<compile_context>
chip_gen: v7x
topology: tpu7x:2x2x1
jax: 0.10.0
libtpu: 0.0.40
codegen_flags: <defaults>
</compile_context>

<pallas_src>
import jax
import jax.numpy as jnp
from jax import lax
from jax.experimental import pallas as pl
from jax.experimental.pallas import tpu as pltpu

EPS = 1e-5

# Order of the packed (12, slab_width) bias/gamma/beta slab rows.
VEC_ORDER = ["b1", "g1", "be1",
             "b2", "g2", "be2",
             "b3", "g3", "be3",
             "gh", "beh", "bh2"]


# ------------------------------ kernel ------------------------------
def _make_kernel(half, h1, h2):
    bf16 = jnp.bfloat16
    f32 = jnp.float32

    def bn_per_half(h, gamma, beta):
        # h: (2*half, N) f32.  Rows [0:half] (clean) and [half:2*half]
        # (corrupted) get independent batch statistics, matching the two
        # separate encoder/head calls in the PyTorch module (train mode,
        # biased variance).  Layout-free reshape since half % 8 == 0.
        n = h.shape[1]
        h3 = h.reshape(2, half, n)
        mu = jnp.mean(h3, axis=1, keepdims=True)                  # (2,1,N)
        d = h3 - mu
        var = jnp.mean(d * d, axis=1, keepdims=True)              # two-pass
        scale = gamma * lax.rsqrt(var + EPS)                      # folded affine
        return (d * scale + beta).reshape(2 * half, n)

    def kernel(x_ref, w1_ref, vec_ref,
               w2_hbm, w3_hbm, wh1_hbm, wh2_hbm,
               out_ref,
               w2_buf, w3_buf, wh1_buf, wh2_buf, sem):
        # Kick off streaming of the 4 big weights (in use order) so their
        # HBM->VMEM DMAs overlap with the preceding layers' compute.
        cp2 = pltpu.make_async_copy(w2_hbm, w2_buf, sem.at[0])
        cp3 = pltpu.make_async_copy(w3_hbm, w3_buf, sem.at[1])
        cp4 = pltpu.make_async_copy(wh1_hbm, wh1_buf, sem.at[2])
        cp5 = pltpu.make_async_copy(wh2_hbm, wh2_buf, sem.at[3])
        cp2.start(); cp3.start(); cp4.start(); cp5.start()

        def vrow(i, w):
            return vec_ref[i:i + 1, :w]       # (1, w) f32

        x = x_ref[...].astype(bf16)

        # ---- encoder layer 1: Linear -> ReLU -> BatchNorm1d ----
        h = jnp.dot(x, w1_ref[...], preferred_element_type=f32) + vrow(0, h1)
        h = bn_per_half(jnp.maximum(h, 0.0), vrow(1, h1), vrow(2, h1))

        # ---- encoder layer 2 ----
        cp2.wait()
        h = jnp.dot(h.astype(bf16), w2_buf[...], preferred_element_type=f32)
        h = h + vrow(3, h2)
        h = bn_per_half(jnp.maximum(h, 0.0), vrow(4, h2), vrow(5, h2))

        # ---- encoder layer 3 ----
        cp3.wait()
        h = jnp.dot(h.astype(bf16), w3_buf[...], preferred_element_type=f32)
        h = h + vrow(6, h2)
        h = bn_per_half(jnp.maximum(h, 0.0), vrow(7, h2), vrow(8, h2))

        # ---- pretraining head (head_depth=2, dropout=0.0):
        #      Linear -> BN -> ReLU -> Linear.
        # First Linear's bias omitted: per-column constant cancelled exactly
        # by the following BatchNorm mean subtraction.
        cp4.wait()
        h = jnp.dot(h.astype(bf16), wh1_buf[...], preferred_element_type=f32)
        h = jnp.maximum(bn_per_half(h, vrow(9, h2), vrow(10, h2)), 0.0)

        cp5.wait()
        h = jnp.dot(h.astype(bf16), wh2_buf[...], preferred_element_type=f32)
        h = h + vrow(11, h2)

        out_ref[...] = h.reshape(2, half, h2).astype(out_ref.dtype)

    return kernel


# ------------------------------ wrapper ------------------------------
def _pack_vectors(params, slab_width):
    rows = []
    for name in VEC_ORDER:
        v = params[name].reshape(-1).astype(jnp.float32)
        row = jnp.zeros((slab_width,), jnp.float32).at[:v.shape[0]].set(v)
        rows.append(row)
    return jnp.stack(rows, axis=0)                 # (12, slab_width) f32


def scarf_subtab_forward(params, x, x_corrupted, emb_real):
    """Returns (embeddings, embeddings_corrupted), each (B, emb_real) float32."""
    B, _ = x.shape
    assert B % 8 == 0, "batch must be a multiple of 8 (f32 sublane tile)"
    h1 = params["w1"].shape[1]           # 1024
    h2 = params["wh2"].shape[1]          # 896 (padded emb/hidden_dim_2)
    slab_w = max(h1, h2)

    x_all = jnp.concatenate([x, x_corrupted], axis=0)      # (2B, D)
    vec_slab = _pack_vectors(params, slab_w)

    vmem = pl.BlockSpec(memory_space=pltpu.MemorySpace.VMEM)
    hbm = pl.BlockSpec(memory_space=pl.ANY)

    out = pl.pallas_call(
        _make_kernel(B, h1, h2),
        out_shape=jax.ShapeDtypeStruct((2, B, h2), jnp.float32),
        in_specs=[vmem, vmem, vmem, hbm, hbm, hbm, hbm],
        out_specs=vmem,
        scratch_shapes=[
            pltpu.VMEM((h1, h2), jnp.bfloat16),   # w2 buffer
            pltpu.VMEM((h2, h2), jnp.bfloat16),   # w3 buffer
            pltpu.VMEM((h2, h2), jnp.bfloat16),   # wh1 buffer
            pltpu.VMEM((h2, h2), jnp.bfloat16),   # wh2 buffer
            pltpu.SemaphoreType.DMA((4,)),
        ],
        compiler_params=pltpu.CompilerParams(
            vmem_limit_bytes=32 * 1024 * 1024,
        ),
    )(x_all, params["w1"], vec_slab,
      params["w2"], params["w3"], params["wh1"], params["wh2"])

    # Drop the 784 -> 896 lane padding; split clean / corrupted halves.
    return out[0, :, :emb_real], out[1, :, :emb_real]


# -------- parameter init (deterministic, PyTorch-style, zero-padded) --------
def _linear_init(key, fan_in_real, fan_out_real, fan_in_pad=None, fan_out_pad=None,
                 with_bias=True):
    fan_in_pad = fan_in_real if fan_in_pad is None else fan_in_pad
    fan_out_pad = fan_out_real if fan_out_pad is None else fan_out_pad
    kw, kb = jax.random.split(key)
    bound = 1.0 / (fan_in_real ** 0.5)
    w = jax.random.uniform(kw, (fan_in_real, fan_out_real),
                           minval=-bound, maxval=bound, dtype=jnp.float32)
    w_full = jnp.zeros((fan_in_pad, fan_out_pad), jnp.float32)
    w_full = w_full.at[:fan_in_real, :fan_out_real].set(w).astype(jnp.bfloat16)
    if not with_bias:
        return w_full, None
    b = jax.random.uniform(kb, (fan_out_real,), minval=-bound, maxval=bound,
                           dtype=jnp.float32)
    b_full = jnp.zeros((fan_out_pad,), jnp.float32).at[:fan_out_real].set(b)
    return w_full, b_full


def _bn_init(n_real, n_pad):
    gamma = jnp.zeros((n_pad,), jnp.float32).at[:n_real].set(1.0)
    beta = jnp.zeros((n_pad,), jnp.float32)
    return gamma, beta


def init_params(key, d_in, h1, h2_real, h2_pad):
    keys = jax.random.split(key, 5)
    p = {}
    p["w1"], p["b1"] = _linear_init(keys[0], d_in, h1)
    p["g1"], p["be1"] = _bn_init(h1, h1)
    p["w2"], p["b2"] = _linear_init(keys[1], h1, h2_real, h1, h2_pad)
    p["g2"], p["be2"] = _bn_init(h2_real, h2_pad)
    p["w3"], p["b3"] = _linear_init(keys[2], h2_real, h2_real, h2_pad, h2_pad)
    p["g3"], p["be3"] = _bn_init(h2_real, h2_pad)
    # head: emb_dim == hidden_dim_2 (encoder output feeds the head directly)
    p["wh1"], _ = _linear_init(keys[3], h2_real, h2_real, h2_pad, h2_pad,
                               with_bias=False)   # bias cancelled by head BN
    p["gh"], p["beh"] = _bn_init(h2_real, h2_pad)
    p["wh2"], p["bh2"] = _linear_init(keys[4], h2_real, h2_real, h2_pad, h2_pad)
    return p


# ---------- corruption glue (SCARF-style, plain JAX RNG, not a kernel) ----------
def make_corrupted(key, x, corruption_len, features_low, features_high):
    B, m = x.shape
    k_perm, k_samp = jax.random.split(key)
    # per-row random permutation -> first `corruption_len` positions corrupted
    r = jax.random.uniform(k_perm, (B, m))
    ranks = jnp.argsort(jnp.argsort(r, axis=1), axis=1)
    corruption_mask = ranks < corruption_len
    # marginals.sample((B,)) : Uniform(low, high) per feature
    u = jax.random.uniform(k_samp, (B, m), dtype=jnp.float32)
    x_random = features_low[None, :] + (features_high - features_low)[None, :] * u
    return jnp.where(corruption_mask, x_random, x)


# ---------------- pure-JAX f32 reference (for validation) ----------------
def _reference_half_forward(params, emb_real):
    f32 = jnp.float32
    h1 = params["w1"].shape[1]
    e = emb_real

    def bn(h, gamma, beta):
        mu = jnp.mean(h, axis=0, keepdims=True)
        var = jnp.mean((h - mu) ** 2, axis=0, keepdims=True)
        return (h - mu) / jnp.sqrt(var + EPS) * gamma + beta

    def forward(xh):
        h = jnp.maximum(xh @ params["w1"].astype(f32) + params["b1"][:h1], 0.0)
        h = bn(h, params["g1"][:h1], params["be1"][:h1])
        h = jnp.maximum(h @ params["w2"].astype(f32)[:, :e] + params["b2"][:e], 0.0)
        h = bn(h, params["g2"][:e], params["be2"][:e])
        h = jnp.maximum(h @ params["w3"].astype(f32)[:e, :e] + params["b3"][:e], 0.0)
        h = bn(h, params["g3"][:e], params["be3"][:e])
        h = h @ params["wh1"].astype(f32)[:e, :e]
        h = jnp.maximum(bn(h, params["gh"][:e], params["beh"][:e]), 0.0)
        return h @ params["wh2"].astype(f32)[:e, :e] + params["bh2"][:e]

    return forward


if __name__ == "__main__":
    key = jax.random.PRNGKey(0)
    B, D_in = 8, 32                  # small batch / feature count (B % 8 == 0)
    HIDDEN1 = 1024                   # SubTab default hidden_dim_1
    H2_REAL = 784                    # SubTab default hidden_dim_2 == emb_dim
    H2_PAD = 896                     # padded to multiple of 128 (lane-dense)
    corruption_rate = 0.6
    corruption_len = int(corruption_rate * D_in)

    k_x, k_corrupt, k_params = jax.random.split(key, 3)
    x = jax.random.normal(k_x, (B, D_in), dtype=jnp.float32)
    features_low = jnp.min(x, axis=0) - 0.5
    features_high = jnp.max(x, axis=0) + 0.5

    params = init_params(k_params, D_in, HIDDEN1, H2_REAL, H2_PAD)
    x_corrupted = make_corrupted(k_corrupt, x, corruption_len,
                                 features_low, features_high)

    embeddings, embeddings_corrupted = scarf_subtab_forward(
        params, x, x_corrupted, emb_real=H2_REAL)
    jax.block_until_ready((embeddings, embeddings_corrupted))

    assert embeddings.shape == (B, H2_REAL)
    assert embeddings_corrupted.shape == (B, H2_REAL)
    assert embeddings.dtype == jnp.float32
    assert bool(jnp.all(jnp.isfinite(embeddings)))
    assert bool(jnp.all(jnp.isfinite(embeddings_corrupted)))

    # Validate against a pure-JAX f32 reference of the same module
    # (bf16 activation/weight policy -> loose relative-Frobenius tolerance).
    ref = _reference_half_forward(params, H2_REAL)
    ref_clean = ref(x)
    ref_corrupt = ref(x_corrupted)

    def rel_err(a, b):
        return float(jnp.linalg.norm(a - b) / (jnp.linalg.norm(b) + 1e-30))

    assert rel_err(embeddings, ref_clean) < 0.1, rel_err(embeddings, ref_clean)
    assert rel_err(embeddings_corrupted, ref_corrupt) < 0.1, \
        rel_err(embeddings_corrupted, ref_corrupt)

    print("KERNEL_OK")
</pallas_src>

<mosaic_0001>
module attributes {stable_mosaic.version = 11 : i64} {
  func.func @kernel(%arg0: memref<16x32xf32, #tpu.memory_space<vmem>>, %arg1: memref<32x1024xbf16, #tpu.memory_space<vmem>>, %arg2: memref<12x1024xf32, #tpu.memory_space<vmem>>, %arg3: memref<1024x896xbf16, #tpu.memory_space<any>>, %arg4: memref<896x896xbf16, #tpu.memory_space<any>>, %arg5: memref<896x896xbf16, #tpu.memory_space<any>>, %arg6: memref<896x896xbf16, #tpu.memory_space<any>>, %arg7: memref<2x8x896xf32, #tpu.memory_space<vmem>>, %arg8: memref<1024x896xbf16, #tpu.memory_space<vmem>>, %arg9: memref<896x896xbf16, #tpu.memory_space<vmem>>, %arg10: memref<896x896xbf16, #tpu.memory_space<vmem>>, %arg11: memref<896x896xbf16, #tpu.memory_space<vmem>>, %arg12: memref<4x!tpu.dma_semaphore, #tpu.memory_space<semaphore_mem>>) attributes {dimension_semantics = [], scalar_prefetch = 0 : i64, scratch_operands = 5 : i64, tpu.core_type = #tpu.core_type<tc>} {
    %c0_i32 = arith.constant 0 : i32
    %0 = tpu.memref_slice %arg12[%c0_i32] : memref<4x!tpu.dma_semaphore, #tpu.memory_space<semaphore_mem>> -> memref<1x!tpu.dma_semaphore, #tpu.memory_space<semaphore_mem>>
    %1 = tpu.memref_squeeze %0 : memref<1x!tpu.dma_semaphore, #tpu.memory_space<semaphore_mem>> -> memref<!tpu.dma_semaphore, #tpu.memory_space<semaphore_mem>>
    tpu.enqueue_dma source(%arg3 : memref<1024x896xbf16, #tpu.memory_space<any>>) target(%arg8 : memref<1024x896xbf16, #tpu.memory_space<vmem>>) target_semaphore(%1 : memref<!tpu.dma_semaphore, #tpu.memory_space<semaphore_mem>>)
    %c1_i32 = arith.constant 1 : i32
    %2 = tpu.memref_slice %arg12[%c1_i32] : memref<4x!tpu.dma_semaphore, #tpu.memory_space<semaphore_mem>> -> memref<1x!tpu.dma_semaphore, #tpu.memory_space<semaphore_mem>>
    %3 = tpu.memref_squeeze %2 : memref<1x!tpu.dma_semaphore, #tpu.memory_space<semaphore_mem>> -> memref<!tpu.dma_semaphore, #tpu.memory_space<semaphore_mem>>
    tpu.enqueue_dma source(%arg4 : memref<896x896xbf16, #tpu.memory_space<any>>) target(%arg9 : memref<896x896xbf16, #tpu.memory_space<vmem>>) target_semaphore(%3 : memref<!tpu.dma_semaphore, #tpu.memory_space<semaphore_mem>>)
    %c2_i32 = arith.constant 2 : i32
    %4 = tpu.memref_slice %arg12[%c2_i32] : memref<4x!tpu.dma_semaphore, #tpu.memory_space<semaphore_mem>> -> memref<1x!tpu.dma_semaphore, #tpu.memory_space<semaphore_mem>>
    %5 = tpu.memref_squeeze %4 : memref<1x!tpu.dma_semaphore, #tpu.memory_space<semaphore_mem>> -> memref<!tpu.dma_semaphore, #tpu.memory_space<semaphore_mem>>
    tpu.enqueue_dma source(%arg5 : memref<896x896xbf16, #tpu.memory_space<any>>) target(%arg10 : memref<896x896xbf16, #tpu.memory_space<vmem>>) target_semaphore(%5 : memref<!tpu.dma_semaphore, #tpu.memory_space<semaphore_mem>>)
    %c3_i32 = arith.constant 3 : i32
    %6 = tpu.memref_slice %arg12[%c3_i32] : memref<4x!tpu.dma_semaphore, #tpu.memory_space<semaphore_mem>> -> memref<1x!tpu.dma_semaphore, #tpu.memory_space<semaphore_mem>>
    %7 = tpu.memref_squeeze %6 : memref<1x!tpu.dma_semaphore, #tpu.memory_space<semaphore_mem>> -> memref<!tpu.dma_semaphore, #tpu.memory_space<semaphore_mem>>
    tpu.enqueue_dma source(%arg6 : memref<896x896xbf16, #tpu.memory_space<any>>) target(%arg11 : memref<896x896xbf16, #tpu.memory_space<vmem>>) target_semaphore(%7 : memref<!tpu.dma_semaphore, #tpu.memory_space<semaphore_mem>>)
    %c0 = arith.constant 0 : index
    %c0_0 = arith.constant 0 : index
    %8 = vector.load %arg0[%c0, %c0_0] : memref<16x32xf32, #tpu.memory_space<vmem>>, vector<16x32xf32>
    %9 = arith.truncf %8 : vector<16x32xf32> to vector<16x32xbf16>
    %c0_1 = arith.constant 0 : index
    %c0_2 = arith.constant 0 : index
    %10 = vector.load %arg1[%c0_1, %c0_2] : memref<32x1024xbf16, #tpu.memory_space<vmem>>, vector<32x1024xbf16>
    %cst = arith.constant dense<0.000000e+00> : vector<16x1024xf32>
    %11 = tpu.matmul %9, %10, %cst {dimension_numbers = #tpu.dot_dimension_numbers<[1], [0], [0], [1], [0, 0, 1, 1], [], []>} : vector<16x32xbf16>, vector<32x1024xbf16>, vector<16x1024xf32> -> vector<16x1024xf32>
    %c0_3 = arith.constant 0 : index
    %c0_4 = arith.constant 0 : index
    %12 = vector.load %arg2[%c0_3, %c0_4] : memref<12x1024xf32, #tpu.memory_space<vmem>>, vector<1x1024xf32>
    %13 = vector.broadcast %12 : vector<1x1024xf32> to vector<16x1024xf32>
    %14 = arith.addf %11, %13 : vector<16x1024xf32>
    %cst_5 = arith.constant 0.000000e+00 : f32
    %15 = vector.broadcast %cst_5 : f32 to vector<16x1024xf32>
    %16 = arith.maximumf %14, %15 : vector<16x1024xf32>
    %c1 = arith.constant 1 : index
    %c0_6 = arith.constant 0 : index
    %17 = vector.load %arg2[%c1, %c0_6] : memref<12x1024xf32, #tpu.memory_space<vmem>>, vector<1x1024xf32>
    %c2 = arith.constant 2 : index
    %c0_7 = arith.constant 0 : index
    %18 = vector.load %arg2[%c2, %c0_7] : memref<12x1024xf32, #tpu.memory_space<vmem>>, vector<1x1024xf32>
    %19 = vector.shape_cast %16 : vector<16x1024xf32> to vector<2x8x1024xf32>
    %cst_8 = arith.constant dense<0.000000e+00> : vector<2x1024xf32>
    %20 = vector.multi_reduction <add>, %19, %cst_8 [1] : vector<2x8x1024xf32> to vector<2x1024xf32>
    %21 = vector.shape_cast %20 : vector<2x1024xf32> to vector<2x1x1024xf32>
    %cst_9 = arith.constant 8.000000e+00 : f32
    %22 = vector.broadcast %cst_9 : f32 to vector<2x1x1024xf32>
    %23 = arith.divf %21, %22 : vector<2x1x1024xf32>
    %24 = vector.broadcast %23 : vector<2x1x1024xf32> to vector<2x8x1024xf32>
    %25 = arith.subf %19, %24 : vector<2x8x1024xf32>
    %26 = arith.mulf %25, %25 : vector<2x8x1024xf32>
    %cst_10 = arith.constant dense<0.000000e+00> : vector<2x1024xf32>
    %27 = vector.multi_reduction <add>, %26, %cst_10 [1] : vector<2x8x1024xf32> to vector<2x1024xf32>
    %28 = vector.shape_cast %27 : vector<2x1024xf32> to vector<2x1x1024xf32>
    %cst_11 = arith.constant 8.000000e+00 : f32
    %29 = vector.broadcast %cst_11 : f32 to vector<2x1x1024xf32>
    %30 = arith.divf %28, %29 : vector<2x1x1024xf32>
    %cst_12 = arith.constant 9.99999974E-6 : f32
    %31 = vector.broadcast %cst_12 : f32 to vector<2x1x1024xf32>
    %32 = arith.addf %30, %31 : vector<2x1x1024xf32>
    %33 = math.rsqrt %32 : vector<2x1x1024xf32>
    %34 = vector.shape_cast %17 : vector<1x1024xf32> to vector<1x1x1024xf32>
    %35 = vector.broadcast %34 : vector<1x1x1024xf32> to vector<2x1x1024xf32>
    %36 = arith.mulf %35, %33 : vector<2x1x1024xf32>
    %37 = vector.broadcast %36 : vector<2x1x1024xf32> to vector<2x8x1024xf32>
    %38 = arith.mulf %25, %37 : vector<2x8x1024xf32>
    %39 = vector.shape_cast %18 : vector<1x1024xf32> to vector<1x1x1024xf32>
    %40 = vector.broadcast %39 : vector<1x1x1024xf32> to vector<2x8x1024xf32>
    %41 = arith.addf %38, %40 : vector<2x8x1024xf32>
    %42 = vector.shape_cast %41 : vector<2x8x1024xf32> to vector<16x1024xf32>
    %c0_i32_13 = arith.constant 0 : i32
    %43 = tpu.memref_slice %arg12[%c0_i32_13] : memref<4x!tpu.dma_semaphore, #tpu.memory_space<semaphore_mem>> -> memref<1x!tpu.dma_semaphore, #tpu.memory_space<semaphore_mem>>
    %44 = tpu.memref_squeeze %43 : memref<1x!tpu.dma_semaphore, #tpu.memory_space<semaphore_mem>> -> memref<!tpu.dma_semaphore, #tpu.memory_space<semaphore_mem>>
    tpu.wait_dma2 semaphore(%44 : memref<!tpu.dma_semaphore, #tpu.memory_space<semaphore_mem>>) src(%arg3 : memref<1024x896xbf16, #tpu.memory_space<any>>) dst(%arg8 : memref<1024x896xbf16, #tpu.memory_space<vmem>>)
    %45 = arith.truncf %42 : vector<16x1024xf32> to vector<16x1024xbf16>
    %c0_14 = arith.constant 0 : index
    %c0_15 = arith.constant 0 : index
    %46 = vector.load %arg8[%c0_14, %c0_15] : memref<1024x896xbf16, #tpu.memory_space<vmem>>, vector<1024x896xbf16>
    %cst_16 = arith.constant dense<0.000000e+00> : vector<16x896xf32>
    %47 = tpu.matmul %45, %46, %cst_16 {dimension_numbers = #tpu.dot_dimension_numbers<[1], [0], [0], [1], [0, 0, 1, 1], [], []>} : vector<16x1024xbf16>, vector<1024x896xbf16>, vector<16x896xf32> -> vector<16x896xf32>
    %c3 = arith.constant 3 : index
    %c0_17 = arith.constant 0 : index
    %48 = vector.load %arg2[%c3, %c0_17] : memref<12x1024xf32, #tpu.memory_space<vmem>>, vector<1x896xf32>
    %49 = vector.broadcast %48 : vector<1x896xf32> to vector<16x896xf32>
    %50 = arith.addf %47, %49 : vector<16x896xf32>
    %cst_18 = arith.constant 0.000000e+00 : f32
    %51 = vector.broadcast %cst_18 : f32 to vector<16x896xf32>
    %52 = arith.maximumf %50, %51 : vector<16x896xf32>
    %c4 = arith.constant 4 : index
    %c0_19 = arith.constant 0 : index
    %53 = vector.load %arg2[%c4, %c0_19] : memref<12x1024xf32, #tpu.memory_space<vmem>>, vector<1x896xf32>
    %c5 = arith.constant 5 : index
    %c0_20 = arith.constant 0 : index
    %54 = vector.load %arg2[%c5, %c0_20] : memref<12x1024xf32, #tpu.memory_space<vmem>>, vector<1x896xf32>
    %55 = vector.shape_cast %52 : vector<16x896xf32> to vector<2x8x896xf32>
    %cst_21 = arith.constant dense<0.000000e+00> : vector<2x896xf32>
    %56 = vector.multi_reduction <add>, %55, %cst_21 [1] : vector<2x8x896xf32> to vector<2x896xf32>
    %57 = vector.shape_cast %56 : vector<2x896xf32> to vector<2x1x896xf32>
    %cst_22 = arith.constant 8.000000e+00 : f32
    %58 = vector.broadcast %cst_22 : f32 to vector<2x1x896xf32>
    %59 = arith.divf %57, %58 : vector<2x1x896xf32>
    %60 = vector.broadcast %59 : vector<2x1x896xf32> to vector<2x8x896xf32>
    %61 = arith.subf %55, %60 : vector<2x8x896xf32>
    %62 = arith.mulf %61, %61 : vector<2x8x896xf32>
    %cst_23 = arith.constant dense<0.000000e+00> : vector<2x896xf32>
    %63 = vector.multi_reduction <add>, %62, %cst_23 [1] : vector<2x8x896xf32> to vector<2x896xf32>
    %64 = vector.shape_cast %63 : vector<2x896xf32> to vector<2x1x896xf32>
    %cst_24 = arith.constant 8.000000e+00 : f32
    %65 = vector.broadcast %cst_24 : f32 to vector<2x1x896xf32>
    %66 = arith.divf %64, %65 : vector<2x1x896xf32>
    %cst_25 = arith.constant 9.99999974E-6 : f32
    %67 = vector.broadcast %cst_25 : f32 to vector<2x1x896xf32>
    %68 = arith.addf %66, %67 : vector<2x1x896xf32>
    %69 = math.rsqrt %68 : vector<2x1x896xf32>
    %70 = vector.shape_cast %53 : vector<1x896xf32> to vector<1x1x896xf32>
    %71 = vector.broadcast %70 : vector<1x1x896xf32> to vector<2x1x896xf32>
    %72 = arith.mulf %71, %69 : vector<2x1x896xf32>
    %73 = vector.broadcast %72 : vector<2x1x896xf32> to vector<2x8x896xf32>
    %74 = arith.mulf %61, %73 : vector<2x8x896xf32>
    %75 = vector.shape_cast %54 : vector<1x896xf32> to vector<1x1x896xf32>
    %76 = vector.broadcast %75 : vector<1x1x896xf32> to vector<2x8x896xf32>
    %77 = arith.addf %74, %76 : vector<2x8x896xf32>
    %78 = vector.shape_cast %77 : vector<2x8x896xf32> to vector<16x896xf32>
    %c1_i32_26 = arith.constant 1 : i32
    %79 = tpu.memref_slice %arg12[%c1_i32_26] : memref<4x!tpu.dma_semaphore, #tpu.memory_space<semaphore_mem>> -> memref<1x!tpu.dma_semaphore, #tpu.memory_space<semaphore_mem>>
    %80 = tpu.memref_squeeze %79 : memref<1x!tpu.dma_semaphore, #tpu.memory_space<semaphore_mem>> -> memref<!tpu.dma_semaphore, #tpu.memory_space<semaphore_mem>>
    tpu.wait_dma2 semaphore(%80 : memref<!tpu.dma_semaphore, #tpu.memory_space<semaphore_mem>>) src(%arg4 : memref<896x896xbf16, #tpu.memory_space<any>>) dst(%arg9 : memref<896x896xbf16, #tpu.memory_space<vmem>>)
    %81 = arith.truncf %78 : vector<16x896xf32> to vector<16x896xbf16>
    %c0_27 = arith.constant 0 : index
    %c0_28 = arith.constant 0 : index
    %82 = vector.load %arg9[%c0_27, %c0_28] : memref<896x896xbf16, #tpu.memory_space<vmem>>, vector<896x896xbf16>
    %cst_29 = arith.constant dense<0.000000e+00> : vector<16x896xf32>
    %83 = tpu.matmul %81, %82, %cst_29 {dimension_numbers = #tpu.dot_dimension_numbers<[1], [0], [0], [1], [0, 0, 1, 1], [], []>} : vector<16x896xbf16>, vector<896x896xbf16>, vector<16x896xf32> -> vector<16x896xf32>
    %c6 = arith.constant 6 : index
    %c0_30 = arith.constant 0 : index
    %84 = vector.load %arg2[%c6, %c0_30] : memref<12x1024xf32, #tpu.memory_space<vmem>>, vector<1x896xf32>
    %85 = vector.broadcast %84 : vector<1x896xf32> to vector<16x896xf32>
    %86 = arith.addf %83, %85 : vector<16x896xf32>
    %cst_31 = arith.constant 0.000000e+00 : f32
    %87 = vector.broadcast %cst_31 : f32 to vector<16x896xf32>
    %88 = arith.maximumf %86, %87 : vector<16x896xf32>
    %c7 = arith.constant 7 : index
    %c0_32 = arith.constant 0 : index
    %89 = vector.load %arg2[%c7, %c0_32] : memref<12x1024xf32, #tpu.memory_space<vmem>>, vector<1x896xf32>
    %c8 = arith.constant 8 : index
    %c0_33 = arith.constant 0 : index
    %90 = vector.load %arg2[%c8, %c0_33] : memref<12x1024xf32, #tpu.memory_space<vmem>>, vector<1x896xf32>
    %91 = vector.shape_cast %88 : vector<16x896xf32> to vector<2x8x896xf32>
    %cst_34 = arith.constant dense<0.000000e+00> : vector<2x896xf32>
    %92 = vector.multi_reduction <add>, %91, %cst_34 [1] : vector<2x8x896xf32> to vector<2x896xf32>
    %93 = vector.shape_cast %92 : vector<2x896xf32> to vector<2x1x896xf32>
    %cst_35 = arith.constant 8.000000e+00 : f32
    %94 = vector.broadcast %cst_35 : f32 to vector<2x1x896xf32>
    %95 = arith.divf %93, %94 : vector<2x1x896xf32>
    %96 = vector.broadcast %95 : vector<2x1x896xf32> to vector<2x8x896xf32>
    %97 = arith.subf %91, %96 : vector<2x8x896xf32>
    %98 = arith.mulf %97, %97 : vector<2x8x896xf32>
    %cst_36 = arith.constant dense<0.000000e+00> : vector<2x896xf32>
    %99 = vector.multi_reduction <add>, %98, %cst_36 [1] : vector<2x8x896xf32> to vector<2x896xf32>
    %100 = vector.shape_cast %99 : vector<2x896xf32> to vector<2x1x896xf32>
    %cst_37 = arith.constant 8.000000e+00 : f32
    %101 = vector.broadcast %cst_37 : f32 to vector<2x1x896xf32>
    %102 = arith.divf %100, %101 : vector<2x1x896xf32>
    %cst_38 = arith.constant 9.99999974E-6 : f32
    %103 = vector.broadcast %cst_38 : f32 to vector<2x1x896xf32>
    %104 = arith.addf %102, %103 : vector<2x1x896xf32>
    %105 = math.rsqrt %104 : vector<2x1x896xf32>
    %106 = vector.shape_cast %89 : vector<1x896xf32> to vector<1x1x896xf32>
    %107 = vector.broadcast %106 : vector<1x1x896xf32> to vector<2x1x896xf32>
    %108 = arith.mulf %107, %105 : vector<2x1x896xf32>
    %109 = vector.broadcast %108 : vector<2x1x896xf32> to vector<2x8x896xf32>
    %110 = arith.mulf %97, %109 : vector<2x8x896xf32>
    %111 = vector.shape_cast %90 : vector<1x896xf32> to vector<1x1x896xf32>
    %112 = vector.broadcast %111 : vector<1x1x896xf32> to vector<2x8x896xf32>
    %113 = arith.addf %110, %112 : vector<2x8x896xf32>
    %114 = vector.shape_cast %113 : vector<2x8x896xf32> to vector<16x896xf32>
    %c2_i32_39 = arith.constant 2 : i32
    %115 = tpu.memref_slice %arg12[%c2_i32_39] : memref<4x!tpu.dma_semaphore, #tpu.memory_space<semaphore_mem>> -> memref<1x!tpu.dma_semaphore, #tpu.memory_space<semaphore_mem>>
    %116 = tpu.memref_squeeze %115 : memref<1x!tpu.dma_semaphore, #tpu.memory_space<semaphore_mem>> -> memref<!tpu.dma_semaphore, #tpu.memory_space<semaphore_mem>>
    tpu.wait_dma2 semaphore(%116 : memref<!tpu.dma_semaphore, #tpu.memory_space<semaphore_mem>>) src(%arg5 : memref<896x896xbf16, #tpu.memory_space<any>>) dst(%arg10 : memref<896x896xbf16, #tpu.memory_space<vmem>>)
    %117 = arith.truncf %114 : vector<16x896xf32> to vector<16x896xbf16>
    %c0_40 = arith.constant 0 : index
    %c0_41 = arith.constant 0 : index
    %118 = vector.load %arg10[%c0_40, %c0_41] : memref<896x896xbf16, #tpu.memory_space<vmem>>, vector<896x896xbf16>
    %cst_42 = arith.constant dense<0.000000e+00> : vector<16x896xf32>
    %119 = tpu.matmul %117, %118, %cst_42 {dimension_numbers = #tpu.dot_dimension_numbers<[1], [0], [0], [1], [0, 0, 1, 1], [], []>} : vector<16x896xbf16>, vector<896x896xbf16>, vector<16x896xf32> -> vector<16x896xf32>
    %c9 = arith.constant 9 : index
    %c0_43 = arith.constant 0 : index
    %120 = vector.load %arg2[%c9, %c0_43] : memref<12x1024xf32, #tpu.memory_space<vmem>>, vector<1x896xf32>
    %c10 = arith.constant 10 : index
    %c0_44 = arith.constant 0 : index
    %121 = vector.load %arg2[%c10, %c0_44] : memref<12x1024xf32, #tpu.memory_space<vmem>>, vector<1x896xf32>
    %122 = vector.shape_cast %119 : vector<16x896xf32> to vector<2x8x896xf32>
    %cst_45 = arith.constant dense<0.000000e+00> : vector<2x896xf32>
    %123 = vector.multi_reduction <add>, %122, %cst_45 [1] : vector<2x8x896xf32> to vector<2x896xf32>
    %124 = vector.shape_cast %123 : vector<2x896xf32> to vector<2x1x896xf32>
    %cst_46 = arith.constant 8.000000e+00 : f32
    %125 = vector.broadcast %cst_46 : f32 to vector<2x1x896xf32>
    %126 = arith.divf %124, %125 : vector<2x1x896xf32>
    %127 = vector.broadcast %126 : vector<2x1x896xf32> to vector<2x8x896xf32>
    %128 = arith.subf %122, %127 : vector<2x8x896xf32>
    %129 = arith.mulf %128, %128 : vector<2x8x896xf32>
    %cst_47 = arith.constant dense<0.000000e+00> : vector<2x896xf32>
    %130 = vector.multi_reduction <add>, %129, %cst_47 [1] : vector<2x8x896xf32> to vector<2x896xf32>
    %131 = vector.shape_cast %130 : vector<2x896xf32> to vector<2x1x896xf32>
    %cst_48 = arith.constant 8.000000e+00 : f32
    %132 = vector.broadcast %cst_48 : f32 to vector<2x1x896xf32>
    %133 = arith.divf %131, %132 : vector<2x1x896xf32>
    %cst_49 = arith.constant 9.99999974E-6 : f32
    %134 = vector.broadcast %cst_49 : f32 to vector<2x1x896xf32>
    %135 = arith.addf %133, %134 : vector<2x1x896xf32>
    %136 = math.rsqrt %135 : vector<2x1x896xf32>
    %137 = vector.shape_cast %120 : vector<1x896xf32> to vector<1x1x896xf32>
    %138 = vector.broadcast %137 : vector<1x1x896xf32> to vector<2x1x896xf32>
    %139 = arith.mulf %138, %136 : vector<2x1x896xf32>
    %140 = vector.broadcast %139 : vector<2x1x896xf32> to vector<2x8x896xf32>
    %141 = arith.mulf %128, %140 : vector<2x8x896xf32>
    %142 = vector.shape_cast %121 : vector<1x896xf32> to vector<1x1x896xf32>
    %143 = vector.broadcast %142 : vector<1x1x896xf32> to vector<2x8x896xf32>
    %144 = arith.addf %141, %143 : vector<2x8x896xf32>
    %145 = vector.shape_cast %144 : vector<2x8x896xf32> to vector<16x896xf32>
    %cst_50 = arith.constant 0.000000e+00 : f32
    %146 = vector.broadcast %cst_50 : f32 to vector<16x896xf32>
    %147 = arith.maximumf %145, %146 : vector<16x896xf32>
    %c3_i32_51 = arith.constant 3 : i32
    %148 = tpu.memref_slice %arg12[%c3_i32_51] : memref<4x!tpu.dma_semaphore, #tpu.memory_space<semaphore_mem>> -> memref<1x!tpu.dma_semaphore, #tpu.memory_space<semaphore_mem>>
    %149 = tpu.memref_squeeze %148 : memref<1x!tpu.dma_semaphore, #tpu.memory_space<semaphore_mem>> -> memref<!tpu.dma_semaphore, #tpu.memory_space<semaphore_mem>>
    tpu.wait_dma2 semaphore(%149 : memref<!tpu.dma_semaphore, #tpu.memory_space<semaphore_mem>>) src(%arg6 : memref<896x896xbf16, #tpu.memory_space<any>>) dst(%arg11 : memref<896x896xbf16, #tpu.memory_space<vmem>>)
    %150 = arith.truncf %147 : vector<16x896xf32> to vector<16x896xbf16>
    %c0_52 = arith.constant 0 : index
    %c0_53 = arith.constant 0 : index
    %151 = vector.load %arg11[%c0_52, %c0_53] : memref<896x896xbf16, #tpu.memory_space<vmem>>, vector<896x896xbf16>
    %cst_54 = arith.constant dense<0.000000e+00> : vector<16x896xf32>
    %152 = tpu.matmul %150, %151, %cst_54 {dimension_numbers = #tpu.dot_dimension_numbers<[1], [0], [0], [1], [0, 0, 1, 1], [], []>} : vector<16x896xbf16>, vector<896x896xbf16>, vector<16x896xf32> -> vector<16x896xf32>
    %c11 = arith.constant 11 : index
    %c0_55 = arith.constant 0 : index
    %153 = vector.load %arg2[%c11, %c0_55] : memref<12x1024xf32, #tpu.memory_space<vmem>>, vector<1x896xf32>
    %154 = vector.broadcast %153 : vector<1x896xf32> to vector<16x896xf32>
    %155 = arith.addf %152, %154 : vector<16x896xf32>
    %156 = vector.shape_cast %155 : vector<16x896xf32> to vector<2x8x896xf32>
    %c0_56 = arith.constant 0 : index
    %c0_57 = arith.constant 0 : index
    %c0_58 = arith.constant 0 : index
    %157 = vector.load %arg7[%c0_56, %c0_57, %c0_58] : memref<2x8x896xf32, #tpu.memory_space<vmem>>, vector<2x8x896xf32>
    tpu.vector_store %arg7[%c0_56, %c0_57, %c0_58], %156 {strides = array<i32>} : memref<2x8x896xf32, #tpu.memory_space<vmem>>, vector<2x8x896xf32>,
    return
  }
}

</mosaic_0001>

<bundles_post_ra>
// kernel: tpu_custom_call.1
= control target key start
LH: loop header
LB: loop body
LE: loop exit
PB: predicated region body
PF: predicated region fallthrough
CT: control target
= control target key end

     0   :  { %12 = vsyncpa [#allocation8], 0  ;;  %s9463_s0 = inlined_call_operand.hbm [shape: f32[16,32], index: 0, kind: input, shape index: {}]   ;;  %s9464_s1 = inlined_call_operand.hbm [shape: bf16[32,1024], index: 1, kind: input, shape index: {}]   ;;  %s9465_s2 = inlined_call_operand.hbm [shape: f32[12,1024], index: 2, kind: input, shape index: {}]   ;;  %s9466_s3 = inlined_call_operand.hbm [shape: bf16[1024,896], index: 3, kind: input, shape index: {}]   ;;  %s9467_s4 = inlined_call_operand.hbm [shape: bf16[896,896], index: 4, kind: input, shape index: {}]   ;;  %s9468_s5 = inlined_call_operand.hbm [shape: bf16[896,896], index: 5, kind: input, shape index: {}]   ;;  %s9469_s6 = inlined_call_operand.hbm [shape: bf16[896,896], index: 6, kind: input, shape index: {}]   ;;  %s9470_s7 = inlined_call_operand.hbm [shape: f32[2,8,896], index: 7, kind: output, shape index: {}]  }
   0x1   :  { %13 = vsyncpa [#allocation11], 0 }
   0x2   :  { %14 = vsyncpa [#allocation9], 0  ;;  %s8077_s24 = smov [#allocation10]   ;;  %s7975_s28 = scalar_lea.hbm %s9464_s1, 2048 }
   0x3   :  { %s32_s25 = sshll.u32 %s8077_s24, 4  ;;  %p7976_p0 = scmp.ne.s32.totalorder %s9464_s1, %s7975_s28  ;;  %s33_s25 = int_to_ptr.vmem [resolvable:$true] %s32_s25 }
   0x4   :  { %p7979_p1 = scmp.lt.u32.totalorder %s7975_s28, %s9464_s1 }
   0x6   :  { %p7981_p2 = pnand %p7979_p1, %p7976_p0 }
   0x8   :  { %7984 = shalt.err (!%p7981_p2)
}
   0x9   :  { %s7985_s10 = scalar_lea.vmem %s33_s25, 2048  ;;  %p7990_p4 = scmp.lt.s32.totalorder %s33_s25, %s33_s25 }
   0xa   :  { %p7986_p3 = scmp.ne.s32.totalorder %s33_s25, %s7985_s10  ;;  %p7991_p5 = scmp.lt.s32.totalorder %s7985_s10, %s7985_s10 }
   0xc   :  { %p7992_p6 = por %p7991_p5, %p7990_p4 }
   0xe   :  { %p7993_p7 = pnand %p7992_p6, %p7986_p3 }
  0x10   :  { %7996 = shalt.err (!%p7993_p7)
}
  0x11   :  { %s8078_s11 = smov 512   ;;  %s8079_s12 = smov 32  }
  0x12   :  { %38 = dma.hbm_to_vmem [thread:$0]  %s9464_s1, 2048, %s33_s25, [#allocation11], %s8078_s11, %s8078_s11, %s8079_s12  }
  0x13   :  { %s8080_s15 = smov [#allocation7]   ;;  %s7997_s19 = scalar_lea.hbm %s9463_s0, 256 }
  0x14   :  { %s20_s16 = sshll.u32 %s8080_s15, 4  ;;  %p7998_p8 = scmp.ne.s32.totalorder %s9463_s0, %s7997_s19  ;;  %s21_s16 = int_to_ptr.vmem [resolvable:$true] %s20_s16 }
  0x15   :  { %p8001_p9 = scmp.lt.u32.totalorder %s7997_s19, %s9463_s0 }
  0x17   :  { %p8003_p10 = pnand %p8001_p9, %p7998_p8 }
  0x19   :  { %8006 = shalt.err (!%p8003_p10)
}
  0x1a   :  { %s8007_s24 = scalar_lea.vmem %s21_s16, 256  ;;  %p8012_p12 = scmp.lt.s32.totalorder %s21_s16, %s21_s16 }
  0x1b   :  { %p8008_p11 = scmp.ne.s32.totalorder %s21_s16, %s8007_s24  ;;  %p8013_p13 = scmp.lt.s32.totalorder %s8007_s24, %s8007_s24 }
  0x1d   :  { %p8014_p0 = por %p8013_p13, %p8012_p12 }
  0x1f   :  { %p8015_p1 = pnand %p8014_p0, %p8008_p11 }
  0x21   :  { %8018 = shalt.err (!%p8015_p1)
}
  0x22   :  { %s8081_s1 = smov 128   ;;  %s8082_s25 = smov 8  }
  0x23   :  { %26 = dma.hbm_to_vmem [thread:$0]  %s9463_s0, 256, %s21_s16, [#allocation8], %s8081_s1, %s8081_s1, %s8082_s25  }
  0x24   :  { %s8083_s28 = smov [#allocation12]   ;;  %s8019_s9 = scalar_lea.hbm %s9465_s2, 2048 }
  0x25   :  { %s44_s29 = sshll.u32 %s8083_s28, 4  ;;  %p8020_p2 = scmp.ne.s32.totalorder %s9465_s2, %s8019_s9  ;;  %s45_s29 = int_to_ptr.vmem [resolvable:$true] %s44_s29 }
  0x26   :  { %p8023_p3 = scmp.lt.u32.totalorder %s8019_s9, %s9465_s2 }
  0x28   :  { %p8025_p4 = pnand %p8023_p3, %p8020_p2 }
  0x2a   :  { %8028 = shalt.err (!%p8025_p4)
}
  0x2b   :  { %s8029_s14 = scalar_lea.vmem %s45_s29, 2048  ;;  %p8034_p6 = scmp.lt.s32.totalorder %s45_s29, %s45_s29 }
  0x2c   :  { %p8030_p5 = scmp.ne.s32.totalorder %s45_s29, %s8029_s14  ;;  %p8035_p7 = scmp.lt.s32.totalorder %s8029_s14, %s8029_s14 }
  0x2e   :  { %p8036_p8 = por %p8035_p7, %p8034_p6 }
  0x30   :  { %p8037_p9 = pnand %p8036_p8, %p8030_p5 }
  0x32   :  { %8040 = shalt.err (!%p8037_p9)
}
  0x33   :  { %s8084_s0 = smov 1024   ;;  %s8085_s15 = smov 64  }
  0x34   :  { %50 = dma.hbm_to_vmem [thread:$0]  %s9465_s2, 2048, %s45_s29, [#allocation11], %s8084_s0, %s8084_s0, %s8085_s15  }
  0x35   :  { %8063 = dma.done.wait [#allocation8], 256  }
  0x36   :  { %8064 = vsyncadd [#allocation8], 4294967040 }
  0x37   :  { %8065 = dma.done.wait [#allocation11], 4096  }
  0x38   :  { %8066 = vsyncadd [#allocation11], 4294963200  ;;  %s65_s18 = sld [smem:[#allocation0]]   ;;  %s8086_s19 = smov 896   ;;  %v8087_v0 = vmov 0   ;;  %vm344_vm0 = vcmask 261120   ;;  %v224_v36 = vlaneseq }
  0x39   :  { %77 = sst [smem:[#allocation15]] %s8086_s19  ;;  %380 = vmatprep.mubr.bf16.mxu1 %v8087_v0  ;;  %s8088_s20 = smov [#allocation2]   ;;  %v8104_v46 = vmov 1966171168  }
  0x3a   :  { %79 = sst [smem:[#allocation15 + $0x1]] %s8086_s19  ;;  %s73_s21 = sshll.u32 %s8088_s20, 4  ;;  %v225_v37 = vshrl.u32 %v224_v36, 7  ;;  %v854_v47 = vunpack.c.l.s4 %v8104_v46  ;;  %s74_s21 = int_to_ptr.vmem [resolvable:$true] %s73_s21 }
  0x3b   :  { %83 = sst [smem:[#allocation15 + $0x3]] %s8085_s15  ;;  %s8089_s2 = smov 7  }
  0x3c   :  { %85 = sst [smem:[#allocation15 + $0x4]] %s8081_s1  ;;  %s8090_s23 = smov 2   ;;  %v8250_v41 = vsub.s32 0, %v225_v37  ;;  %v8252_v42 = vsub.s32 1, %v225_v37  ;;  %v8256_v50 = vsub.s32 2, %v225_v37  ;;  %v8258_v53 = vsub.s32 3, %v225_v37 }
  0x3d   :  { %91 = sst [smem:[#allocation15 + $0x7]] %s8085_s15  ;;  %s8091_s25 = smov 448   ;;  %v8262_v57 = vsub.s32 4, %v225_v37  ;;  %v855_v58 = vunpack.c.0.s8 %v854_v47  ;;  %v8266_v61 = vsub.s32 5, %v225_v37 }
  0x3e   :  { %81 = sst [smem:[#allocation15 + $0x2]] %s8089_s2  ;;  %s7242_s22 = sshll.u32 %s65_s18, 26 }
  0x3f   :  { %87 = sst [smem:[#allocation15 + $0x5]] %s8090_s23  ;;  %s8196_s24 = sadd.s32 134217728, %s7242_s22 }
  0x40   :  { %89 = sst [smem:[#allocation15 + $0x6]] %s8091_s25  ;;  %s8092_s26 = smov 4  }
  0x41   :  { %93 = sst [smem:[#allocation15 + $0x8]] %s8092_s26  ;;  %s8093_s27 = smov [#allocation6]  }
  0x42   :  { %s8094_s28 = smov [#allocation14]   ;;  %s8095_s8 = smov [#allocation3]  }
  0x43   :  { %95 = dma.general %s9466_s3, 57344, %s74_s21, %s8093_s27, %s8094_s28, [#allocation15], %s8196_s24, 0  }
  0x44   :  { %112 = sst [smem:[#allocation17]] %s8086_s19  ;;  %s108_s9 = sshll.u32 %s8095_s8, 4  ;;  %s109_s9 = int_to_ptr.vmem [resolvable:$true] %s108_s9 }
  0x45   :  { %114 = sst [smem:[#allocation17 + $0x1]] %s8086_s19  ;;  %s8096_s3 = smov [#allocation6 + $0x1]  }
  0x46   :  { %116 = sst [smem:[#allocation17 + $0x2]] %s8089_s2  ;;  %s8097_s10 = smov [#allocation16]  }
  0x47   :  { %118 = sst [smem:[#allocation17 + $0x3]] %s8085_s15  ;;  %s8098_s13 = smov [#allocation4]  }
  0x48   :  { %120 = sst [smem:[#allocation17 + $0x4]] %s8081_s1  ;;  %s143_s14 = sshll.u32 %s8098_s13, 4  ;;  %s144_s14 = int_to_ptr.vmem [resolvable:$true] %s143_s14 }
  0x49   :  { %122 = sst [smem:[#allocation17 + $0x5]] %s8090_s23  ;;  %s8100_s0 = smov [#allocation18]  }
  0x4a   :  { %124 = sst [smem:[#allocation17 + $0x6]] %s8091_s25  ;;  %s8101_s18 = smov [#allocation5]  }
  0x4b   :  { %126 = sst [smem:[#allocation17 + $0x7]] %s8085_s15  ;;  %s178_s20 = sshll.u32 %s8101_s18, 4  ;;  %s179_s20 = int_to_ptr.vmem [resolvable:$true] %s178_s20 }
  0x4c   :  { %128 = sst [smem:[#allocation17 + $0x8]] %s8092_s26  ;;  %s8103_s21 = smov [#allocation20]  }
  0x4d   :  { %130 = dma.general %s9467_s4, 50176, %s109_s9, %s8096_s3, %s8097_s10, [#allocation17], %s8196_s24, 0  }
  0x4e   :  { %147 = sst [smem:[#allocation19]] %s8086_s19  ;;  %s8099_s4 = smov [#allocation6 + $0x2]  }
  0x4f   :  { %149 = sst [smem:[#allocation19 + $0x1]] %s8086_s19 }
  0x50   :  { %151 = sst [smem:[#allocation19 + $0x2]] %s8089_s2 }
  0x51   :  { %153 = sst [smem:[#allocation19 + $0x3]] %s8085_s15 }
  0x52   :  { %155 = sst [smem:[#allocation19 + $0x4]] %s8081_s1 }
  0x53   :  { %157 = sst [smem:[#allocation19 + $0x5]] %s8090_s23 }
  0x54   :  { %159 = sst [smem:[#allocation19 + $0x6]] %s8091_s25 }
  0x55   :  { %161 = sst [smem:[#allocation19 + $0x7]] %s8085_s15 }
  0x56   :  { %163 = sst [smem:[#allocation19 + $0x8]] %s8092_s26 }
  0x57   :  { %165 = dma.general %s9468_s5, 50176, %s144_s14, %s8099_s4, %s8100_s0, [#allocation19], %s8196_s24, 0  }
  0x58   :  { %182 = sst [smem:[#allocation21]] %s8086_s19  ;;  %s8102_s5 = smov [#allocation6 + $0x3]  }
  0x59   :  { %184 = sst [smem:[#allocation21 + $0x1]] %s8086_s19 }
  0x5a   :  { %186 = sst [smem:[#allocation21 + $0x2]] %s8089_s2 }
  0x5b   :  { %188 = sst [smem:[#allocation21 + $0x3]] %s8085_s15 }
  0x5c   :  { %190 = sst [smem:[#allocation21 + $0x4]] %s8081_s1 }
  0x5d   :  { %192 = sst [smem:[#allocation21 + $0x5]] %s8090_s23 }
  0x5e   :  { %194 = sst [smem:[#allocation21 + $0x6]] %s8091_s25 }
  0x5f   :  { %196 = sst [smem:[#allocation21 + $0x7]] %s8085_s15 }
  0x60   :  { %198 = sst [smem:[#allocation21 + $0x8]] %s8092_s26 }
  0x61   :  { %200 = dma.general %s9469_s6, 50176, %s179_s20, %s8102_s5, %s8103_s21, [#allocation21], %s8196_s24, 0  }
  0x62   :  { %v204_v1 = vld [vmem:[#allocation10] sm:$0xff]  ;;  %v205_v8 = vld [vmem:[#allocation10 + $0x8] sm:$0xff]  ;;  %v201_v11 = vld [vmem:[#allocation7] sm:$0xff] }
  0x63   :  { %v208_v2 = vld [vmem:[#allocation10 + $0x20] sm:$0xff]  ;;  %v209_v9 = vld [vmem:[#allocation10 + $0x28] sm:$0xff]  ;;  %v202_v12 = vld [vmem:[#allocation7 + $0x8] sm:$0xff] }
  0x64   :  { %v212_v3 = vld [vmem:[#allocation10 + $0x40] sm:$0xff]  ;;  %v7251_v4 = vcombine.high %v204_v1, %v208_v2  ;;  %v7250_v5 = vcombine.low %v204_v1, %v208_v2  ;;  %v7253_v13 = vcombine.high %v205_v8, %v209_v9  ;;  %v213_v14 = vld [vmem:[#allocation10 + $0x48] sm:$0xff]  ;;  %v203_v16 = vpack.c.bf16 %v202_v12, %v201_v11  ;;  %v206_v19 = vld [vmem:[#allocation10 + $0x10] sm:$0xff] }
  0x65   :  { %v216_v6 = vld [vmem:[#allocation10 + $0x60] sm:$0xff]  ;;  %v217_v15 = vld [vmem:[#allocation10 + $0x68] sm:$0xff]  ;;  %v7252_v17 = vcombine.low %v205_v8, %v209_v9  ;;  %v210_v20 = vld [vmem:[#allocation10 + $0x30] sm:$0xff]  ;;  %v8272_v2 = vsub.s32 6, %v225_v37 }
  0x66   :  { %v7259_v7 = vcombine.high %v212_v3, %v216_v6  ;;  %348 = vmatprep.subr.bf16.mxu1 %v7251_v4  ;;  %v7258_v10 = vcombine.low %v212_v3, %v216_v6  ;;  %v7261_v18 = vcombine.high %v213_v14, %v217_v15  ;;  %v7260_v21 = vcombine.low %v213_v14, %v217_v15  ;;  %v214_v23 = vld [vmem:[#allocation10 + $0x50] sm:$0xff]  ;;  %v207_v27 = vld [vmem:[#allocation10 + $0x18] sm:$0xff] }
  0x67   :  { %349 = vmatpush1.bf16.msra.mxu1 %v7250_v5  ;;  %v7255_v22 = vcombine.high %v206_v19, %v210_v20  ;;  %v218_v24 = vld [vmem:[#allocation10 + $0x70] sm:$0xff]  ;;  %v7254_v25 = vcombine.low %v206_v19, %v210_v20  ;;  %v211_v28 = vld [vmem:[#allocation10 + $0x38] sm:$0xff]  ;;  %v8278_v6 = vsub.s32 7, %v225_v37 }
  0x68   :  { %350 = vmatprep.subr.bf16.mxu1 %v7259_v7  ;;  %v7263_v26 = vcombine.high %v214_v23, %v218_v24  ;;  %v7262_v29 = vcombine.low %v214_v23, %v218_v24  ;;  %v7257_v30 = vcombine.high %v207_v27, %v211_v28  ;;  %v215_v31 = vld [vmem:[#allocation10 + $0x58] sm:$0xff]  ;;  %v7256_v33 = vcombine.low %v207_v27, %v211_v28 }
  0x69   :  { %v219_v32 = vld [vmem:[#allocation10 + $0x78] sm:$0xff] }
  0x6a   :  { %v7265_v34 = vcombine.high %v215_v31, %v219_v32  ;;  %v7264_v35 = vcombine.low %v215_v31, %v219_v32  ;;  %v220_v38 = vld [vmem:[#allocation12] ss:$8 sm:$0xf] }
  0x6b   :  { %351 = vmatpush1.bf16.msra.mxu1 %v7258_v10  ;;  %v221_v39 = vld [vmem:[#allocation12] ss:$8 sm:$0xf0]  ;;  %v8285_v10 = vsub.s32 %v855_v58, %v225_v37 }
  0x6c   :  { %391 = vmatprep.subr.bf16.mxu1 %v7253_v13  ;;  %v222_v40 = vor.u32 %v221_v39, %v220_v38 }
  0x6e   :  { %7266 = vmatmul.mubr.msk.bf16.vlgmr.msra.gmra.mrb[0].mxu1 %vm344_vm0, %v203_v16  ;;  %v227_v43 = vrot.slane %v222_v40, %v8250_v41  ;;  %v231_v44 = vrot.slane %v222_v40, %v8252_v42  ;;  %v235_v1 = vrot.slane %v222_v40, %v8256_v50  ;;  %v239_v5 = vrot.slane %v222_v40, %v8258_v53 }
  0x6f   :  { %392 = vmatpush1.bf16.msra.mxu1 %v7252_v17  ;;  %423 = vmatprep.mubr.bf16.mxu1 %v8087_v0  ;;  %v8283_v9 = vrot.slane %v222_v40, %v8262_v57  ;;  %v8290_v14 = vrot.slane %v222_v40, %v8266_v61  ;;  %v8294_v19 = vrot.slane %v222_v40, %v8272_v2 }
  0x70   :  { %393 = vmatprep.subr.bf16.mxu1 %v7261_v18  ;;  %v8298_v24 = vrot.slane %v222_v40, %v8278_v6 }
  0x73   :  { %394 = vmatpush1.bf16.msra.mxu1 %v7260_v21 }
  0x74   :  { %434 = vmatprep.subr.bf16.mxu1 %v7255_v22 }
  0x76   :  { %7267 = vmatmul.mubr.msk.bf16.vlgmr.msra.gmra.mrb[4].mxu1 %vm344_vm0, %v203_v16 }
  0x77   :  { %435 = vmatpush1.bf16.msra.mxu1 %v7254_v25  ;;  %466 = vmatprep.mubr.bf16.mxu1 %v8087_v0 }
  0x78   :  { %436 = vmatprep.subr.bf16.mxu1 %v7263_v26 }
  0x7b   :  { %437 = vmatpush1.bf16.msra.mxu1 %v7262_v29 }
  0x7c   :  { %477 = vmatprep.subr.bf16.mxu1 %v7257_v30 }
  0x7e   :  { %7268 = vmatmul.mubr.msk.bf16.vlgmr.msra.gmra.mrb[8].mxu1 %vm344_vm0, %v203_v16 }
  0x7f   :  { %478 = vmatpush1.bf16.msra.mxu1 %v7256_v33  ;;  %509 = vmatprep.mubr.bf16.mxu1 %v8087_v0 }
  0x80   :  { %479 = vmatprep.subr.bf16.mxu1 %v7265_v34 }
  0x83   :  { %480 = vmatpush1.bf16.msra.mxu1 %v7264_v35 }
  0x86   :  { %7269 = vmatmul.mubr.msk.bf16.vlgmr.msra.gmra.mrb[12].mxu1 %vm344_vm0, %v203_v16 }
 0x141   :  { %v382_v45 = vpop.f32.mrb[0].mxu1 }
 0x142   :  { %v383_v48 = vadd.f32 %v382_v45, %v227_v43  ;;  %v384_v49 = vpop.f32.mrb[1].mxu1 }
 0x143   :  { %v385_v51 = vadd.f32 %v384_v49, %v231_v44  ;;  %v386_v52 = vpop.f32.mrb[2].mxu1 }
 0x144   :  { %v8260_v54 = vmax.f32 %v383_v48, 0.0  ;;  %v387_v55 = vadd.f32 %v386_v52, %v227_v43  ;;  %v388_v56 = vpop.f32.mrb[3].mxu1 }
 0x145   :  { %v8264_v59 = vmax.f32 %v385_v51, 0.0  ;;  %v389_v60 = vadd.f32 %v388_v56, %v231_v44 }
 0x146   :  { %v544_v62 = vrot.slane %v8260_v54, 4  ;;  %v8269_v63 = vmax.f32 %v387_v55, 0.0 }
 0x147   :  { %v550_v3 = vrot.slane %v8264_v59, 4  ;;  %v8275_v4 = vmax.f32 %v389_v60, 0.0 }
 0x148   :  { %v545_v7 = vadd.f32 %v544_v62, %v8260_v54  ;;  %v592_v8 = vrot.slane %v8269_v63, 4 }
 0x149   :  { %v551_v11 = vadd.f32 %v550_v3, %v8264_v59  ;;  %v598_v12 = vrot.slane %v8275_v4, 4  ;;  %v425_v13 = vpop.f32.mrb[4].mxu1 }
 0x14a   :  { %v546_v15 = vrot.slane %v545_v7, 2  ;;  %v593_v16 = vadd.f32 %v592_v8, %v8269_v63  ;;  %v426_v17 = vadd.f32 %v425_v13, %v235_v1  ;;  %v427_v18 = vpop.f32.mrb[5].mxu1 }
 0x14b   :  { %v552_v20 = vrot.slane %v551_v11, 2  ;;  %v599_v21 = vadd.f32 %v598_v12, %v8275_v4  ;;  %v428_v22 = vadd.f32 %v427_v18, %v239_v5  ;;  %v429_v23 = vpop.f32.mrb[6].mxu1 }
 0x14c   :  { %v547_v25 = vadd.f32 %v546_v15, %v545_v7  ;;  %v594_v26 = vrot.slane %v593_v16, 2  ;;  %v8300_v27 = vmax.f32 %v426_v17, 0.0  ;;  %v430_v28 = vadd.f32 %v429_v23, %v235_v1  ;;  %v431_v29 = vpop.f32.mrb[7].mxu1 }
 0x14d   :  { %v553_v30 = vadd.f32 %v552_v20, %v551_v11  ;;  %v600_v31 = vrot.slane %v599_v21, 2  ;;  %v8302_v32 = vmax.f32 %v428_v22, 0.0  ;;  %v432_v33 = vadd.f32 %v431_v29, %v239_v5 }
 0x14e   :  { %v548_v34 = vrot.slane %v547_v25, 1  ;;  %v595_v35 = vadd.f32 %v594_v26, %v593_v16  ;;  %v556_v36 = vrot.slane %v8300_v27, 4  ;;  %v8305_v37 = vmax.f32 %v430_v28, 0.0 }
 0x14f   :  { %v554_v38 = vrot.slane %v553_v30, 1  ;;  %v601_v39 = vadd.f32 %v600_v31, %v599_v21  ;;  %v562_v40 = vrot.slane %v8302_v32, 4  ;;  %v8308_v43 = vmax.f32 %v432_v33, 0.0 }
 0x150   :  { %v549_v44 = vadd.f32 %v548_v34, %v547_v25  ;;  %v596_v45 = vrot.slane %v595_v35, 1  ;;  %v557_v46 = vadd.f32 %v556_v36, %v8300_v27  ;;  %v604_v47 = vrot.slane %v8305_v37, 4 }
 0x151   :  { %v555_v48 = vadd.f32 %v554_v38, %v553_v30  ;;  %v602_v49 = vrot.slane %v601_v39, 1  ;;  %v563_v51 = vadd.f32 %v562_v40, %v8302_v32  ;;  %v610_v52 = vrot.slane %v8308_v43, 4  ;;  %v8314_v55 = vpop.f32.mrb[8].mxu1 }
 0x152   :  { %v641_v56 = vmul.f32 0.125, %v549_v44  ;;  %v597_v58 = vadd.f32 %v596_v45, %v595_v35  ;;  %v558_v60 = vrot.slane %v557_v46, 2  ;;  %v605_v62 = vadd.f32 %v604_v47, %v8305_v37  ;;  %v8317_v1 = vpop.f32.mrb[9].mxu1 }
 0x153   :  { %v642_v3 = vmul.f32 0.125, %v555_v48  ;;  %v603_v5 = vadd.f32 %v602_v49, %v601_v39  ;;  %v564_v7 = vrot.slane %v563_v51, 2  ;;  %v611_v8 = vadd.f32 %v610_v52, %v8308_v43  ;;  %v8320_v11 = vpop.f32.mrb[10].mxu1 }
 0x154   :  { %v8323_v12 = vsub.f32 %v8260_v54, %v641_v56  ;;  %v649_v13 = vmul.f32 0.125, %v597_v58  ;;  %v559_v15 = vadd.f32 %v558_v60, %v557_v46  ;;  %v606_v16 = vrot.slane %v605_v62, 2  ;;  %v8325_v17 = vpop.f32.mrb[11].mxu1 }
 0x155   :  { %v8328_v18 = vsub.f32 %v8264_v59, %v642_v3  ;;  %v650_v20 = vmul.f32 0.125, %v603_v5  ;;  %v565_v21 = vadd.f32 %v564_v7, %v563_v51  ;;  %v612_v22 = vrot.slane %v611_v8, 2 }
 0x156   :  { %v673_v23 = vmul.f32 %v8323_v12, %v8323_v12  ;;  %v8333_v25 = vsub.f32 %v8269_v63, %v649_v13  ;;  %v560_v26 = vrot.slane %v559_v15, 1  ;;  %v607_v54 = vadd.f32 %v606_v16, %v605_v62 }
 0x157   :  { %v674_v28 = vmul.f32 %v8328_v18, %v8328_v18  ;;  %v8338_v29 = vsub.f32 %v8275_v4, %v650_v20  ;;  %v566_v30 = vrot.slane %v565_v21, 1  ;;  %v613_v59 = vadd.f32 %v612_v22, %v611_v8 }
 0x158   :  { %v689_v31 = vrot.slane %v673_v23, 4  ;;  %v681_v33 = vmul.f32 %v8333_v25, %v8333_v25  ;;  %v561_v34 = vadd.f32 %v560_v26, %v559_v15  ;;  %v608_v35 = vrot.slane %v607_v54, 1 }
 0x159   :  { %v695_v36 = vrot.slane %v674_v28, 4  ;;  %v682_v63 = vmul.f32 %v8338_v29, %v8338_v29  ;;  %v567_v38 = vadd.f32 %v566_v30, %v565_v21  ;;  %v614_v39 = vrot.slane %v613_v59, 1  ;;  %v8344_v40 = vpop.f32.mrb[12].mxu1 }
 0x15a   :  { %v690_v44 = vadd.f32 %v689_v31, %v673_v23  ;;  %v737_v45 = vrot.slane %v681_v33, 4  ;;  %v643_v4 = vmul.f32 0.125, %v561_v34  ;;  %v609_v46 = vadd.f32 %v608_v35, %v607_v54  ;;  %v8346_v47 = vpop.f32.mrb[13].mxu1 }
 0x15b   :  { %v696_v48 = vadd.f32 %v695_v36, %v674_v28  ;;  %v743_v49 = vrot.slane %v682_v63, 4  ;;  %v644_v51 = vmul.f32 0.125, %v567_v38  ;;  %v615_v52 = vadd.f32 %v614_v39, %v613_v59  ;;  %v8348_v56 = vpop.f32.mrb[14].mxu1 }
 0x15c   :  { %v691_v58 = vrot.slane %v690_v44, 2  ;;  %v738_v60 = vadd.f32 %v737_v45, %v681_v33  ;;  %v8351_v62 = vsub.f32 %v8300_v27, %v643_v4  ;;  %v651_v3 = vmul.f32 0.125, %v609_v46  ;;  %v8353_v5 = vpop.f32.mrb[15].mxu1 }
 0x15d   :  { %v697_v7 = vrot.slane %v696_v48, 2  ;;  %v744_v8 = vadd.f32 %v743_v49, %v682_v63  ;;  %v8356_v13 = vsub.f32 %v8302_v32, %v644_v51  ;;  %v652_v15 = vmul.f32 0.125, %v615_v52 }
 0x15e   :  { %v692_v16 = vadd.f32 %v691_v58, %v690_v44  ;;  %v739_v20 = vrot.slane %v738_v60, 2  ;;  %v675_v21 = vmul.f32 %v8351_v62, %v8351_v62  ;;  %v8361_v22 = vsub.f32 %v8305_v37, %v651_v3 }
 0x15f   :  { %v698_v23 = vadd.f32 %v697_v7, %v696_v48  ;;  %v745_v27 = vrot.slane %v744_v8, 2  ;;  %v676_v26 = vmul.f32 %v8356_v13, %v8356_v13  ;;  %v8366_v54 = vsub.f32 %v8308_v43, %v652_v15 }
 0x160   :  { %v693_v28 = vrot.slane %v692_v16, 1  ;;  %v740_v32 = vadd.f32 %v739_v20, %v738_v60  ;;  %v701_v30 = vrot.slane %v675_v21, 4  ;;  %v683_v59 = vmul.f32 %v8361_v22, %v8361_v22 }
 0x161   :  { %v699_v31 = vrot.slane %v698_v23, 1  ;;  %v746_v33 = vadd.f32 %v745_v27, %v744_v8  ;;  %v707_v34 = vrot.slane %v676_v26, 4  ;;  %v684_v37 = vmul.f32 %v8366_v54, %v8366_v54 }
 0x162   :  { %v694_v35 = vadd.f32 %v693_v28, %v692_v16  ;;  %v741_v36 = vrot.slane %v740_v32, 1  ;;  %v702_v63 = vadd.f32 %v701_v30, %v675_v21  ;;  %v749_v38 = vrot.slane %v683_v59, 4 }
 0x163   :  { %v700_v39 = vadd.f32 %v699_v31, %v698_v23  ;;  %v747_v44 = vrot.slane %v746_v33, 1  ;;  %v708_v43 = vadd.f32 %v707_v34, %v676_v26  ;;  %v755_v45 = vrot.slane %v684_v37, 4 }
 0x164   :  { %v785_v4 = vmul.f32 0.125, %v694_v35  ;;  %v742_v46 = vadd.f32 %v741_v36, %v740_v32  ;;  %v703_v48 = vrot.slane %v702_v63, 2  ;;  %v750_v49 = vadd.f32 %v749_v38, %v683_v59 }
 0x165   :  { %v786_v51 = vmul.f32 0.125, %v700_v39  ;;  %v748_v52 = vadd.f32 %v747_v44, %v746_v33  ;;  %v709_v58 = vrot.slane %v708_v43, 2  ;;  %v756_v60 = vadd.f32 %v755_v45, %v684_v37 }
 0x166   :  { %v801_v3 = vadd.f32 1e-05, %v785_v4  ;;  %v793_v7 = vmul.f32 0.125, %v742_v46  ;;  %v704_v8 = vadd.f32 %v703_v48, %v702_v63  ;;  %v751_v15 = vrot.slane %v750_v49, 2 }
 0x167   :  { %v802_v16 = vadd.f32 1e-05, %v786_v51  ;;  %v794_v20 = vmul.f32 0.125, %v748_v52  ;;  %v710_v21 = vadd.f32 %v709_v58, %v708_v43  ;;  %v757_v27 = vrot.slane %v756_v60, 2 }
 0x168   :  { %7859 = vrsqrt.f32 %v801_v3  ;;  %v809_v23 = vadd.f32 1e-05, %v793_v7  ;;  %v705_v26 = vrot.slane %v704_v8, 1  ;;  %v752_v28 = vadd.f32 %v751_v15, %v750_v49 }
 0x169   :  { %7861 = vrsqrt.f32 %v802_v16  ;;  %v810_v32 = vadd.f32 1e-05, %v794_v20  ;;  %v711_v30 = vrot.slane %v710_v21, 1  ;;  %v758_v59 = vadd.f32 %v757_v27, %v756_v60 }
 0x16a   :  { %7863 = vrsqrt.f32 %v809_v23  ;;  %v706_v31 = vadd.f32 %v705_v26, %v704_v8  ;;  %v753_v33 = vrot.slane %v752_v28, 1  ;;  %v469_v34 = vadd.f32 %v8314_v55, %v8283_v9 }
 0x16b   :  { %7865 = vrsqrt.f32 %v810_v32  ;;  %v712_v37 = vadd.f32 %v711_v30, %v710_v21  ;;  %v759_v35 = vrot.slane %v758_v59, 1  ;;  %v471_v36 = vadd.f32 %v8317_v1, %v8290_v14 }
 0x16c   :  { %v787_v63 = vmul.f32 0.125, %v706_v31  ;;  %v754_v38 = vadd.f32 %v753_v33, %v752_v28  ;;  %v8376_v39 = vmax.f32 %v469_v34, 0.0  ;;  %v473_v44 = vadd.f32 %v8320_v11, %v8283_v9 }
 0x16d   :  { %v788_v43 = vmul.f32 0.125, %v712_v37  ;;  %v760_v45 = vadd.f32 %v759_v35, %v758_v59  ;;  %v8380_v4 = vmax.f32 %v471_v36, 0.0  ;;  %v475_v55 = vadd.f32 %v8325_v17, %v8290_v14 }
 0x16e   :  { %v803_v46 = vadd.f32 1e-05, %v787_v63  ;;  %v795_v48 = vmul.f32 0.125, %v754_v38  ;;  %v568_v49 = vrot.slane %v8376_v39, 4  ;;  %v8385_v51 = vmax.f32 %v473_v44, 0.0 }
 0x16f   :  { %v804_v1 = vadd.f32 1e-05, %v788_v43  ;;  %v796_v52 = vmul.f32 0.125, %v760_v45  ;;  %v574_v58 = vrot.slane %v8380_v4, 4  ;;  %v8388_v60 = vmax.f32 %v475_v55, 0.0 }
 0x170   :  { %7867 = vrsqrt.f32 %v803_v46  ;;  %v811_v9 = vadd.f32 1e-05, %v795_v48  ;;  %v569_v11 = vadd.f32 %v568_v49, %v8376_v39  ;;  %v616_v3 = vrot.slane %v8385_v51, 4 }
 0x171   :  { %7869 = vrsqrt.f32 %v804_v1  ;;  %v812_v14 = vadd.f32 1e-05, %v796_v52  ;;  %v575_v17 = vadd.f32 %v574_v58, %v8380_v4  ;;  %v622_v7 = vrot.slane %v8388_v60, 4 }
 0x172   :  { %v7860_v8 = vpop.eup %7859  ;;  %7871 = vrsqrt.f32 %v811_v9  ;;  %v570_v15 = vrot.slane %v569_v11, 2  ;;  %v617_v16 = vadd.f32 %v616_v3, %v8385_v51  ;;  %v512_v20 = vadd.f32 %v8344_v40, %v8294_v19 }
 0x173   :  { %v7862_v21 = vpop.eup %7861  ;;  %7873 = vrsqrt.f32 %v812_v14  ;;  %v576_v27 = vrot.slane %v575_v17, 2  ;;  %v623_v23 = vadd.f32 %v622_v7, %v8388_v60  ;;  %v514_v26 = vadd.f32 %v8346_v47, %v8298_v24 }
 0x174   :  { %v7864_v28 = vpop.eup %7863  ;;  %v849_v32 = vcombine.low %v7860_v8, %v7862_v21  ;;  %v571_v30 = vadd.f32 %v570_v15, %v569_v11  ;;  %v618_v59 = vrot.slane %v617_v16, 2  ;;  %v8400_v31 = vmax.f32 %v512_v20, 0.0 }
 0x175   :  { %v7866_v33 = vpop.eup %7865  ;;  %v577_v34 = vadd.f32 %v576_v27, %v575_v17  ;;  %v624_v37 = vrot.slane %v623_v23, 2  ;;  %v8402_v35 = vmax.f32 %v514_v26, 0.0  ;;  %v516_v40 = vadd.f32 %v8348_v56, %v8294_v19 }
 0x176   :  { %v898_v36 = vcombine.low %v7864_v28, %v7866_v33  ;;  %v572_v63 = vrot.slane %v571_v30, 1  ;;  %v619_v38 = vadd.f32 %v618_v59, %v617_v16  ;;  %v580_v47 = vrot.slane %v8400_v31, 4 }
 0x177   :  { %v578_v44 = vrot.slane %v577_v34, 1  ;;  %v625_v43 = vadd.f32 %v624_v37, %v623_v23  ;;  %v586_v45 = vrot.slane %v8402_v35, 4  ;;  %v8409_v55 = vrot.slane %v849_v32, %v8285_v10 }
 0x178   :  { %v573_v46 = vadd.f32 %v572_v63, %v571_v30  ;;  %v620_v48 = vrot.slane %v619_v38, 1  ;;  %v8411_v49 = vmax.f32 %v516_v40, 0.0  ;;  %v581_v19 = vadd.f32 %v580_v47, %v8400_v31 }
 0x179   :  { %v579_v1 = vadd.f32 %v578_v44, %v577_v34  ;;  %v626_v52 = vrot.slane %v625_v43, 1  ;;  %v587_v56 = vadd.f32 %v586_v45, %v8402_v35  ;;  %v8416_v9 = vrot.slane %v898_v36, %v8285_v10 }
 0x17a   :  { %v7868_v58 = vpop.eup %7867  ;;  %v645_v11 = vmul.f32 0.125, %v573_v46  ;;  %v621_v3 = vadd.f32 %v620_v48, %v619_v38  ;;  %v628_v14 = vrot.slane %v8411_v49, 4  ;;  %v582_v15 = vrot.slane %v581_v19, 2 }
 0x17b   :  { %v7870_v17 = vpop.eup %7869  ;;  %v646_v7 = vmul.f32 0.125, %v579_v1  ;;  %v627_v8 = vadd.f32 %v626_v52, %v625_v43  ;;  %v588_v16 = vrot.slane %v587_v56, 2 }
 0x17c   :  { %v7872_v20 = vpop.eup %7871  ;;  %v850_v21 = vcombine.low %v7868_v58, %v7870_v17  ;;  %v8420_v27 = vsub.f32 %v8376_v39, %v645_v11  ;;  %v653_v23 = vmul.f32 0.125, %v621_v3  ;;  %v629_v26 = vadd.f32 %v628_v14, %v8411_v49 }
 0x17d   :  { %v7874_v28 = vpop.eup %7873  ;;  %v8424_v32 = vsub.f32 %v8380_v4, %v646_v7  ;;  %v654_v30 = vmul.f32 0.125, %v627_v8  ;;  %v583_v59 = vadd.f32 %v582_v15, %v581_v19  ;;  %v589_v33 = vadd.f32 %v588_v16, %v587_v56 }
 0x17e   :  { %v8427_v34 = vrot.slane %v850_v21, %v8285_v10  ;;  %v899_v37 = vcombine.low %v7872_v20, %v7874_v28  ;;  %v677_v40 = vmul.f32 %v8420_v27, %v8420_v27  ;;  %v8432_v39 = vsub.f32 %v8385_v51, %v653_v23 }
 0x17f   :  { %v678_v36 = vmul.f32 %v8424_v32, %v8424_v32  ;;  %v8437_v63 = vsub.f32 %v8388_v60, %v654_v30  ;;  %v584_v4 = vrot.slane %v583_v59, 1  ;;  %v590_v38 = vrot.slane %v589_v33, 1 }
 0x180   :  { %v881_v44 = vcombine.low %v8409_v55, %v8427_v34  ;;  %v8442_v43 = vrot.slane %v899_v37, %v8285_v10  ;;  %v713_v47 = vrot.slane %v677_v40, 4  ;;  %v685_v45 = vmul.f32 %v8432_v39, %v8432_v39 }
 0x181   :  { %v719_v51 = vrot.slane %v678_v36, 4  ;;  %v686_v46 = vmul.f32 %v8437_v63, %v8437_v63  ;;  %v585_v48 = vadd.f32 %v584_v4, %v583_v59  ;;  %v591_v1 = vadd.f32 %v590_v38, %v589_v33 }
 0x182   :  { %v930_v60 = vcombine.low %v8416_v9, %v8442_v43  ;;  %v714_v52 = vadd.f32 %v713_v47, %v677_v40  ;;  %v761_v19 = vrot.slane %v685_v45, 4  ;;  %v518_v56 = vadd.f32 %v8353_v5, %v8298_v24 }
 0x183   :  { %v720_v58 = vadd.f32 %v719_v51, %v678_v36  ;;  %v767_v11 = vrot.slane %v686_v46, 4  ;;  %v647_v3 = vmul.f32 0.125, %v585_v48  ;;  %v648_v14 = vmul.f32 0.125, %v591_v1 }
 0x184   :  { %v715_v17 = vrot.slane %v714_v52, 2  ;;  %v762_v7 = vadd.f32 %v761_v19, %v685_v45  ;;  %v630_v8 = vrot.slane %v629_v26, 2  ;;  %v535_v59 = vmax.f32 %v518_v56, 0.0 }
 0x185   :  { %v721_v15 = vrot.slane %v720_v58, 2  ;;  %v768_v16 = vadd.f32 %v767_v11, %v686_v46  ;;  %v8453_v20 = vsub.f32 %v8400_v31, %v647_v3  ;;  %v8456_v21 = vsub.f32 %v8402_v35, %v648_v14 }
 0x186   :  { %v716_v23 = vadd.f32 %v715_v17, %v714_v52  ;;  %v763_v28 = vrot.slane %v762_v7, 2  ;;  %v631_v30 = vadd.f32 %v630_v8, %v629_v26  ;;  %v634_v31 = vrot.slane %v535_v59, 4 }
 0x187   :  { %v722_v24 = vadd.f32 %v721_v15, %v720_v58  ;;  %v769_v5 = vrot.slane %v768_v16, 2  ;;  %v679_v33 = vmul.f32 %v8453_v20, %v8453_v20  ;;  %v680_v37 = vmul.f32 %v8456_v21, %v8456_v21 }
 0x188   :  { %v717_v40 = vrot.slane %v716_v23, 1  ;;  %v764_v36 = vadd.f32 %v763_v28, %v762_v7  ;;  %v632_v4 = vrot.slane %v631_v30, 1  ;;  %v635_v48 = vadd.f32 %v634_v31, %v535_v59 }
 0x189   :  { %v723_v38 = vrot.slane %v722_v24, 1  ;;  %v770_v47 = vadd.f32 %v769_v5, %v768_v16  ;;  %v725_v35 = vrot.slane %v679_v33, 4  ;;  %v731_v45 = vrot.slane %v680_v37, 4 }
 0x18a   :  { %v718_v51 = vadd.f32 %v717_v40, %v716_v23  ;;  %v765_v46 = vrot.slane %v764_v36, 1  ;;  %v633_v26 = vadd.f32 %v632_v4, %v631_v30  ;;  %v636_v14 = vrot.slane %v635_v48, 2 }
 0x18b   :  { %v724_v1 = vadd.f32 %v723_v38, %v722_v24  ;;  %v771_v52 = vrot.slane %v770_v47, 1  ;;  %v726_v19 = vadd.f32 %v725_v35, %v679_v33  ;;  %v732_v56 = vadd.f32 %v731_v45, %v680_v37 }
 0x18c   :  { %v789_v58 = vmul.f32 0.125, %v718_v51  ;;  %v766_v11 = vadd.f32 %v765_v46, %v764_v36  ;;  %v655_v3 = vmul.f32 0.125, %v633_v26  ;;  %v637_v23 = vadd.f32 %v636_v14, %v635_v48 }
 0x18d   :  { %v790_v17 = vmul.f32 0.125, %v724_v1  ;;  %v772_v7 = vadd.f32 %v771_v52, %v770_v47  ;;  %v727_v8 = vrot.slane %v726_v19, 2  ;;  %v733_v15 = vrot.slane %v732_v56, 2 }
 0x18e   :  { %v805_v28 = vadd.f32 1e-05, %v789_v58  ;;  %v797_v16 = vmul.f32 0.125, %v766_v11  ;;  %v8463_v5 = vsub.f32 %v8411_v49, %v655_v3  ;;  %v638_v36 = vrot.slane %v637_v23, 1 }
 0x18f   :  { %v806_v30 = vadd.f32 1e-05, %v790_v17  ;;  %v798_v40 = vmul.f32 0.125, %v772_v7  ;;  %v728_v24 = vadd.f32 %v727_v8, %v726_v19  ;;  %v734_v4 = vadd.f32 %v733_v15, %v732_v56 }
 0x190   :  { %7875 = vrsqrt.f32 %v805_v28  ;;  %v813_v33 = vadd.f32 1e-05, %v797_v16  ;;  %v687_v37 = vmul.f32 %v8463_v5, %v8463_v5  ;;  %v639_v45 = vadd.f32 %v638_v36, %v637_v23 }
 0x191   :  { %7877 = vrsqrt.f32 %v806_v30  ;;  %v814_v31 = vadd.f32 1e-05, %v798_v40  ;;  %v729_v38 = vrot.slane %v728_v24, 1  ;;  %v735_v47 = vrot.slane %v734_v4, 1 }
 0x192   :  { %7879 = vrsqrt.f32 %v813_v33  ;;  %v773_v35 = vrot.slane %v687_v37, 4  ;;  %v656_v26 = vmul.f32 0.125, %v639_v45 }
 0x193   :  { %7881 = vrsqrt.f32 %v814_v31  ;;  %v730_v49 = vadd.f32 %v729_v38, %v728_v24  ;;  %v736_v51 = vadd.f32 %v735_v47, %v734_v4 }
 0x194   :  { %v774_v46 = vadd.f32 %v773_v35, %v687_v37  ;;  %v8467_v19 = vsub.f32 %v535_v59, %v656_v26  ;;  %v541_v35 = vld [vmem:[#allocation12 + $0x2] ss:$8 sm:$0xf] }
 0x195   :  { %v791_v48 = vmul.f32 0.125, %v730_v49  ;;  %v792_v1 = vmul.f32 0.125, %v736_v51  ;;  %v542_v49 = vld [vmem:[#allocation12 + $0x2] ss:$8 sm:$0xf0] }
 0x196   :  { %v775_v52 = vrot.slane %v774_v46, 2  ;;  %v688_v3 = vmul.f32 %v8467_v19, %v8467_v19 }
 0x197   :  { %v807_v56 = vadd.f32 1e-05, %v791_v48  ;;  %v808_v58 = vadd.f32 1e-05, %v792_v1 }
 0x198   :  { %v776_v11 = vadd.f32 %v775_v52, %v774_v46  ;;  %v779_v7 = vrot.slane %v688_v3, 4  ;;  %v537_v46 = vld [vmem:[#allocation12 + $0x1] ss:$8 sm:$0xf] }
 0x199   :  { %7883 = vrsqrt.f32 %v807_v56  ;;  %v538_v48 = vld [vmem:[#allocation12 + $0x1] ss:$8 sm:$0xf0]  ;;  %v543_v56 = vor.u32 %v542_v49, %v541_v35 }
 0x19a   :  { %v7876_v14 = vpop.eup %7875  ;;  %7885 = vrsqrt.f32 %v808_v58  ;;  %v777_v17 = vrot.slane %v776_v11, 1  ;;  %v780_v16 = vadd.f32 %v779_v7, %v688_v3  ;;  %v889_v58 = vrot.slane %v881_v44, %v8285_v10 }
 0x19b   :  { %v7878_v8 = vpop.eup %7877  ;;  %v1057_v7 = vrot.slane %v543_v56, %v8252_v42  ;;  %v1077_v55 = vrot.slane %v543_v56, %v8272_v2  ;;  %v1081_v34 = vrot.slane %v543_v56, %v8278_v6 }
 0x19c   :  { %v8471_v15 = vpop.eup %7879  ;;  %v851_v28 = vcombine.low %v7876_v14, %v7878_v8  ;;  %v778_v59 = vadd.f32 %v777_v17, %v776_v11  ;;  %v781_v40 = vrot.slane %v780_v16, 2  ;;  %v539_v11 = vor.u32 %v538_v48, %v537_v46 }
 0x19d   :  { %v8473_v23 = vpop.eup %7881  ;;  %v1053_v17 = vrot.slane %v543_v56, %v8250_v41  ;;  %v1061_v8 = vrot.slane %v543_v56, %v8256_v50 }
 0x19e   :  { %v900_v30 = vcombine.low %v8471_v15, %v8473_v23  ;;  %v782_v24 = vadd.f32 %v781_v40, %v780_v16  ;;  %v799_v4 = vmul.f32 0.125, %v778_v59  ;;  %v873_v51 = vrot.slane %v851_v28, %v8285_v10 }
 0x19f   :  { %v1065_v15 = vrot.slane %v543_v56, %v8258_v53  ;;  %v1069_v16 = vrot.slane %v543_v56, %v8262_v57  ;;  %v1073_v23 = vrot.slane %v543_v56, %v8266_v61 }
 0x1a0   :  { %v783_v33 = vrot.slane %v782_v24, 1  ;;  %v815_v47 = vadd.f32 1e-05, %v799_v4 }
 0x1a2   :  { %v784_v31 = vadd.f32 %v783_v33, %v782_v24  ;;  %7887 = vrsqrt.f32 %v815_v47 }
 0x1a3   :  { %v7884_v37 = vpop.eup %7883 }
 0x1a4   :  { %v7886_v36 = vpop.eup %7885  ;;  %v800_v45 = vmul.f32 0.125, %v784_v31 }
 0x1a5   :  { %v852_v38 = vcombine.low %v7884_v37, %v7886_v36 }
 0x1a6   :  { %v816_v1 = vadd.f32 1e-05, %v800_v45 }
 0x1a7   :  { %v880_v26 = vrot.slane %v852_v38, %v8285_v10 }
 0x1a8   :  { %7889 = vrsqrt.f32 %v816_v1 }
 0x1a9   :  { %v882_v52 = vcombine.low %v873_v51, %v880_v26 }
 0x1ab   :  { %v896_v3 = vrot.slane %v882_v52, %v8285_v10 }
 0x1ac   :  { %v7888_v31 = vpop.eup %7887 }
 0x1ad   :  { %v897_v14 = vcombine.low %v889_v58, %v896_v3  ;;  %v938_v3 = vrot.slane %v930_v60, %v8285_v10 }
 0x1af   :  { %v949_v28 = vmul.f32 %v897_v14, %v539_v11 }
 0x1b1   :  { %v956_v44 = vrot.slane %v949_v28, %v8250_v41  ;;  %v960_v59 = vrot.slane %v949_v28, %v8252_v42  ;;  %v964_v40 = vrot.slane %v949_v28, %v8256_v50  ;;  %v968_v24 = vrot.slane %v949_v28, %v8258_v53 }
 0x1b2   :  { %v972_v4 = vrot.slane %v949_v28, %v8262_v57  ;;  %v976_v33 = vrot.slane %v949_v28, %v8266_v61  ;;  %v980_v37 = vrot.slane %v949_v28, %v8272_v2  ;;  %v984_v36 = vrot.slane %v949_v28, %v8278_v6  ;;  %v7890_v49 = vpop.eup %7889 }
 0x1b3   :  { %v1033_v38 = vmul.f32 %v956_v44, %v8323_v12  ;;  %v1034_v47 = vmul.f32 %v960_v59, %v8328_v18  ;;  %v1035_v35 = vmul.f32 %v964_v40, %v8351_v62  ;;  %v1036_v45 = vmul.f32 %v968_v24, %v8356_v13 }
 0x1b4   :  { %v1037_v51 = vmul.f32 %v972_v4, %v8420_v27  ;;  %v1038_v46 = vmul.f32 %v976_v33, %v8424_v32  ;;  %v1039_v26 = vmul.f32 %v980_v37, %v8453_v20  ;;  %v1040_v48 = vmul.f32 %v984_v36, %v8456_v21 }
 0x1b5   :  { %v8508_v1 = vadd.f32 %v1053_v17, %v1033_v38  ;;  %v1091_v52 = vadd.f32 %v1057_v7, %v1034_v47  ;;  %v8510_v56 = vadd.f32 %v1061_v8, %v1035_v35  ;;  %v8512_v12 = vadd.f32 %v1065_v15, %v1036_v45 }
 0x1b6   :  { %v8514_v18 = vadd.f32 %v1069_v16, %v1037_v51  ;;  %v8516_v62 = vadd.f32 %v1073_v23, %v1038_v46  ;;  %v8518_v13 = vadd.f32 %v1077_v55, %v1039_v26  ;;  %v8520_v27 = vadd.f32 %v1081_v34, %v1040_v48 }
 0x1b7   :  { %v901_v32 = vcombine.low %v7888_v31, %v7890_v49  ;;  %v922_v20 = vrot.slane %v900_v30, %v8285_v10 }
 0x1b9   :  { %v929_v21 = vrot.slane %v901_v32, %v8285_v10 }
 0x1bb   :  { %v931_v58 = vcombine.low %v922_v20, %v929_v21 }
 0x1bd   :  { %v945_v14 = vrot.slane %v931_v58, %v8285_v10 }
 0x1bf   :  { %v946_v28 = vcombine.low %v938_v3, %v945_v14 }
 0x1c1   :  { %v950_v44 = vmul.f32 %v946_v28, %v539_v11 }
 0x1c3   :  { %v988_v59 = vrot.slane %v950_v44, %v8250_v41  ;;  %v992_v40 = vrot.slane %v950_v44, %v8252_v42  ;;  %v996_v24 = vrot.slane %v950_v44, %v8256_v50  ;;  %v1000_v30 = vrot.slane %v950_v44, %v8258_v53 }
 0x1c4   :  { %v1004_v4 = vrot.slane %v950_v44, %v8262_v57  ;;  %v1008_v33 = vrot.slane %v950_v44, %v8266_v61  ;;  %v1012_v37 = vrot.slane %v950_v44, %v8272_v2  ;;  %v1016_v9 = vrot.slane %v950_v44, %v8278_v6 }
 0x1c5   :  { %v1041_v43 = vmul.f32 %v988_v59, %v8333_v25  ;;  %v1042_v60 = vmul.f32 %v992_v40, %v8338_v29  ;;  %v1043_v11 = vmul.f32 %v996_v24, %v8361_v22  ;;  %v1044_v36 = vmul.f32 %v1000_v30, %v8366_v54 }
 0x1c6   :  { %v1045_v31 = vmul.f32 %v1004_v4, %v8432_v39  ;;  %v1046_v38 = vmul.f32 %v1008_v33, %v8437_v63  ;;  %v1047_v47 = vmul.f32 %v1012_v37, %v8463_v5  ;;  %v1048_v35 = vmul.f32 %v1016_v9, %v8467_v19 }
 0x1c7   :  { %v8545_v45 = vadd.f32 %v1053_v17, %v1041_v43  ;;  %v1099_v49 = vadd.f32 %v1057_v7, %v1042_v60  ;;  %v8547_v6 = vadd.f32 %v1061_v8, %v1043_v11  ;;  %v8549_v25 = vadd.f32 %v1065_v15, %v1044_v36 }
 0x1c8   :  { %v8551_v29 = vadd.f32 %v1069_v16, %v1045_v31  ;;  %v8553_v22 = vadd.f32 %v1073_v23, %v1046_v38  ;;  %v8555_v54 = vadd.f32 %v1077_v55, %v1047_v47  ;;  %v8557_v39 = vadd.f32 %v1081_v34, %v1048_v35 }
 0x1c9   :  { %8067 = dma.done.wait [#allocation6], 57344 }
 0x1ca   :  { %8068 = vsyncadd [#allocation6], 4294909952  ;;  %v8559_v63 = vpack.c.bf16 %v1099_v49, %v1091_v52  ;;  %v1119_v5 = vld [vmem:[#allocation2 + $0x8] sm:$0xff]  ;;  %v1121_v19 = vld [vmem:[#allocation2 + $0x18] sm:$0xff] }
 0x1cb   :  { %v1118_v17 = vld [vmem:[#allocation2] sm:$0xff]  ;;  %1606 = vmatprep.subr.bf16.mxu0 %v1119_v5  ;;  %1778 = vmatprep.subr.bf16.mxu1 %v1121_v19  ;;  %v1120_v7 = vld [vmem:[#allocation2 + $0x10] sm:$0xff]  ;;  %v1125_v16 = vld [vmem:[#allocation2 + $0x38] sm:$0xff] }
 0x1cc   :  { %1638 = vmatprep.mubr.bf16.mxu0 %v8559_v63  ;;  %1810 = vmatprep.mubr.bf16.mxu1 %v8559_v63  ;;  %v1126_v8 = vld [vmem:[#allocation2 + $0x40] sm:$0xff]  ;;  %v1128_v15 = vld [vmem:[#allocation2 + $0x50] sm:$0xff]  ;;  %v1127_v23 = vld [vmem:[#allocation2 + $0x48] sm:$0xff] }
 0x1cd   :  { %1607 = vmatpush1.bf16.msra.mxu0 %v1118_v17  ;;  %1779 = vmatpush1.bf16.msra.mxu1 %v1120_v7  ;;  %v1133_v55 = vld [vmem:[#allocation2 + $0x78] sm:$0xff]  ;;  %v1135_v34 = vld [vmem:[#allocation2 + $0x88] sm:$0xff]  ;;  %v1132_v51 = vld [vmem:[#allocation2 + $0x70] sm:$0xff] }
 0x1ce   :  { %1608 = vmatprep.subr.bf16.mxu0 %v1126_v8  ;;  %1780 = vmatprep.subr.bf16.mxu1 %v1128_v15  ;;  %v1134_v46 = vld [vmem:[#allocation2 + $0x80] sm:$0xff]  ;;  %v1140_v26 = vld [vmem:[#allocation2 + $0xb0] sm:$0xff]  ;;  %v1139_v52 = vld [vmem:[#allocation2 + $0xa8] sm:$0xff] }
 0x1cf   :  { %v1142_v48 = vld [vmem:[#allocation2 + $0xc0] sm:$0xff]  ;;  %v1141_v32 = vld [vmem:[#allocation2 + $0xb8] sm:$0xff]  ;;  %v1147_v20 = vld [vmem:[#allocation2 + $0xe8] sm:$0xff] }
 0x1d0   :  { %v1149_v21 = vld [vmem:[#allocation2 + $0xf8] sm:$0xff]  ;;  %v1146_v58 = vld [vmem:[#allocation2 + $0xe0] sm:$0xff]  ;;  %v1148_v3 = vld [vmem:[#allocation2 + $0xf0] sm:$0xff] }
 0x1d1   :  { %1609 = vmatpush1.bf16.msra.mxu0 %v1125_v16  ;;  %1781 = vmatpush1.bf16.msra.mxu1 %v1127_v23  ;;  %v1154_v14 = vld [vmem:[#allocation2 + $0x120] sm:$0xff]  ;;  %v1156_v28 = vld [vmem:[#allocation2 + $0x130] sm:$0xff]  ;;  %v1153_v44 = vld [vmem:[#allocation2 + $0x118] sm:$0xff] }
 0x1d2   :  { %1610 = vmatprep.subr.bf16.mxu0 %v1133_v55  ;;  %1782 = vmatprep.subr.bf16.mxu1 %v1135_v34  ;;  %v1155_v59 = vld [vmem:[#allocation2 + $0x128] sm:$0xff]  ;;  %v1161_v40 = vld [vmem:[#allocation2 + $0x158] sm:$0xff]  ;;  %v1160_v30 = vld [vmem:[#allocation2 + $0x150] sm:$0xff] }
 0x1d3   :  { %v1163_v24 = vld [vmem:[#allocation2 + $0x168] sm:$0xff]  ;;  %v1162_v4 = vld [vmem:[#allocation2 + $0x160] sm:$0xff]  ;;  %v1168_v33 = vld [vmem:[#allocation2 + $0x190] sm:$0xff] }
 0x1d4   :  { %v1170_v37 = vld [vmem:[#allocation2 + $0x1a0] sm:$0xff]  ;;  %v1167_v9 = vld [vmem:[#allocation2 + $0x188] sm:$0xff]  ;;  %v1169_v43 = vld [vmem:[#allocation2 + $0x198] sm:$0xff] }
 0x1d5   :  { %1611 = vmatpush1.bf16.msra.mxu0 %v1132_v51  ;;  %1783 = vmatpush1.bf16.msra.mxu1 %v1134_v46  ;;  %v1175_v60 = vld [vmem:[#allocation2 + $0x1c8] sm:$0xff]  ;;  %v1177_v11 = vld [vmem:[#allocation2 + $0x1d8] sm:$0xff]  ;;  %v1174_v36 = vld [vmem:[#allocation2 + $0x1c0] sm:$0xff] }
 0x1d6   :  { %1612 = vmatprep.subr.bf16.mxu0 %v1140_v26  ;;  %1784 = vmatprep.subr.bf16.mxu1 %v1142_v48  ;;  %v1176_v31 = vld [vmem:[#allocation2 + $0x1d0] sm:$0xff]  ;;  %v1182_v38 = vld [vmem:[#allocation2 + $0x200] sm:$0xff]  ;;  %v1181_v35 = vld [vmem:[#allocation2 + $0x1f8] sm:$0xff] }
 0x1d7   :  { %v1184_v47 = vld [vmem:[#allocation2 + $0x210] sm:$0xff]  ;;  %v1183_v49 = vld [vmem:[#allocation2 + $0x208] sm:$0xff]  ;;  %v1189_v5 = vld [vmem:[#allocation2 + $0x238] sm:$0xff] }
 0x1d8   :  { %v1191_v19 = vld [vmem:[#allocation2 + $0x248] sm:$0xff]  ;;  %v1188_v17 = vld [vmem:[#allocation2 + $0x230] sm:$0xff]  ;;  %v1190_v7 = vld [vmem:[#allocation2 + $0x240] sm:$0xff] }
 0x1d9   :  { %1613 = vmatpush1.bf16.msra.mxu0 %v1139_v52  ;;  %1785 = vmatpush1.bf16.msra.mxu1 %v1141_v32  ;;  %v1196_v8 = vld [vmem:[#allocation2 + $0x270] sm:$0xff]  ;;  %v1198_v15 = vld [vmem:[#allocation2 + $0x280] sm:$0xff]  ;;  %v1195_v16 = vld [vmem:[#allocation2 + $0x268] sm:$0xff] }
 0x1da   :  { %1614 = vmatprep.subr.bf16.mxu0 %v1147_v20  ;;  %1786 = vmatprep.subr.bf16.mxu1 %v1149_v21  ;;  %v1197_v23 = vld [vmem:[#allocation2 + $0x278] sm:$0xff]  ;;  %v1203_v55 = vld [vmem:[#allocation2 + $0x2a8] sm:$0xff]  ;;  %v1202_v51 = vld [vmem:[#allocation2 + $0x2a0] sm:$0xff] }
 0x1db   :  { %v1205_v34 = vld [vmem:[#allocation2 + $0x2b8] sm:$0xff]  ;;  %v1204_v46 = vld [vmem:[#allocation2 + $0x2b0] sm:$0xff]  ;;  %v1210_v26 = vld [vmem:[#allocation2 + $0x2e0] sm:$0xff] }
 0x1dc   :  { %v1212_v48 = vld [vmem:[#allocation2 + $0x2f0] sm:$0xff]  ;;  %v1209_v52 = vld [vmem:[#allocation2 + $0x2d8] sm:$0xff]  ;;  %v1211_v32 = vld [vmem:[#allocation2 + $0x2e8] sm:$0xff] }
 0x1dd   :  { %1615 = vmatpush1.bf16.msra.mxu0 %v1146_v58  ;;  %1787 = vmatpush1.bf16.msra.mxu1 %v1148_v3  ;;  %v1217_v20 = vld [vmem:[#allocation2 + $0x318] sm:$0xff]  ;;  %v1219_v21 = vld [vmem:[#allocation2 + $0x328] sm:$0xff]  ;;  %v1216_v58 = vld [vmem:[#allocation2 + $0x310] sm:$0xff] }
 0x1de   :  { %1616 = vmatprep.subr.bf16.mxu0 %v1154_v14  ;;  %1788 = vmatprep.subr.bf16.mxu1 %v1156_v28  ;;  %v1218_v3 = vld [vmem:[#allocation2 + $0x320] sm:$0xff]  ;;  %v1224_v14 = vld [vmem:[#allocation2 + $0x350] sm:$0xff] }
 0x1df   :  { %v1226_v28 = vld [vmem:[#allocation2 + $0x360] sm:$0xff] }
 0x1e1   :  { %1617 = vmatpush1.bf16.msra.mxu0 %v1153_v44  ;;  %1789 = vmatpush1.bf16.msra.mxu1 %v1155_v59  ;;  %v1223_v44 = vld [vmem:[#allocation2 + $0x348] sm:$0xff]  ;;  %v1225_v59 = vld [vmem:[#allocation2 + $0x358] sm:$0xff] }
 0x1e2   :  { %1618 = vmatprep.subr.bf16.mxu0 %v1161_v40  ;;  %1790 = vmatprep.subr.bf16.mxu1 %v1163_v24  ;;  %v1231_v40 = vld [vmem:[#allocation2 + $0x388] sm:$0xff]  ;;  %v1233_v24 = vld [vmem:[#allocation2 + $0x398] sm:$0xff] }
 0x1e5   :  { %1619 = vmatpush1.bf16.msra.mxu0 %v1160_v30  ;;  %1791 = vmatpush1.bf16.msra.mxu1 %v1162_v4  ;;  %v8565_v30 = vpack.c.bf16 %v8545_v45, %v8508_v1  ;;  %v1230_v4 = vld [vmem:[#allocation2 + $0x380] sm:$0xff]  ;;  %v1237_v1 = vld [vmem:[#allocation2 + $0x3b8] sm:$0xff]  ;;  %v1239_v45 = vld [vmem:[#allocation2 + $0x3c8] sm:$0xff] }
 0x1e6   :  { %1620 = vmatprep.subr.bf16.mxu0 %v1168_v33  ;;  %1792 = vmatprep.subr.bf16.mxu1 %v1170_v37  ;;  %v1232_v33 = vld [vmem:[#allocation2 + $0x390] sm:$0xff]  ;;  %v1238_v37 = vld [vmem:[#allocation2 + $0x3c0] sm:$0xff] }
 0x1e9   :  { %1621 = vmatpush1.bf16.msra.mxu0 %v1167_v9  ;;  %1793 = vmatpush1.bf16.msra.mxu1 %v1169_v43  ;;  %v1240_v9 = vld [vmem:[#allocation2 + $0x3d0] sm:$0xff]  ;;  %v8569_v43 = vpack.c.bf16 %v8549_v25, %v8512_v12  ;;  %v1246_v25 = vld [vmem:[#allocation2 + $0x400] sm:$0xff] }
 0x1ea   :  { %1622 = vmatprep.subr.bf16.mxu0 %v1175_v60  ;;  %1794 = vmatprep.subr.bf16.mxu1 %v1177_v11  ;;  %v1245_v60 = vld [vmem:[#allocation2 + $0x3f8] sm:$0xff]  ;;  %v1247_v11 = vld [vmem:[#allocation2 + $0x408] sm:$0xff]  ;;  %v1244_v12 = vld [vmem:[#allocation2 + $0x3f0] sm:$0xff] }
 0x1ed   :  { %1623 = vmatpush1.bf16.msra.mxu0 %v1174_v36  ;;  %1795 = vmatpush1.bf16.msra.mxu1 %v1176_v31  ;;  %v1252_v36 = vld [vmem:[#allocation2 + $0x430] sm:$0xff]  ;;  %v1254_v31 = vld [vmem:[#allocation2 + $0x440] sm:$0xff] }
 0x1ee   :  { %1624 = vmatprep.subr.bf16.mxu0 %v1182_v38  ;;  %1796 = vmatprep.subr.bf16.mxu1 %v1184_v47  ;;  %v1251_v38 = vld [vmem:[#allocation2 + $0x428] sm:$0xff]  ;;  %v1253_v47 = vld [vmem:[#allocation2 + $0x438] sm:$0xff] }
 0x1f1   :  { %1625 = vmatpush1.bf16.msra.mxu0 %v1181_v35  ;;  %1797 = vmatpush1.bf16.msra.mxu1 %v1183_v49  ;;  %v1259_v35 = vld [vmem:[#allocation2 + $0x468] sm:$0xff]  ;;  %v1261_v49 = vld [vmem:[#allocation2 + $0x478] sm:$0xff] }
 0x1f2   :  { %1626 = vmatprep.subr.bf16.mxu0 %v1189_v5  ;;  %1798 = vmatprep.subr.bf16.mxu1 %v1191_v19  ;;  %v1258_v5 = vld [vmem:[#allocation2 + $0x460] sm:$0xff]  ;;  %v1260_v19 = vld [vmem:[#allocation2 + $0x470] sm:$0xff] }
 0x1f5   :  { %1627 = vmatpush1.bf16.msra.mxu0 %v1188_v17  ;;  %1799 = vmatpush1.bf16.msra.mxu1 %v1190_v7  ;;  %v1266_v17 = vld [vmem:[#allocation2 + $0x4a0] sm:$0xff]  ;;  %v1268_v7 = vld [vmem:[#allocation2 + $0x4b0] sm:$0xff] }
 0x1f6   :  { %1628 = vmatprep.subr.bf16.mxu0 %v1196_v8  ;;  %1800 = vmatprep.subr.bf16.mxu1 %v1198_v15  ;;  %v1265_v8 = vld [vmem:[#allocation2 + $0x498] sm:$0xff]  ;;  %v1267_v15 = vld [vmem:[#allocation2 + $0x4a8] sm:$0xff] }
 0x1f9   :  { %1629 = vmatpush1.bf16.msra.mxu0 %v1195_v16  ;;  %1801 = vmatpush1.bf16.msra.mxu1 %v1197_v23  ;;  %v1273_v16 = vld [vmem:[#allocation2 + $0x4d8] sm:$0xff]  ;;  %v1275_v23 = vld [vmem:[#allocation2 + $0x4e8] sm:$0xff] }
 0x1fa   :  { %1630 = vmatprep.subr.bf16.mxu0 %v1203_v55  ;;  %1802 = vmatprep.subr.bf16.mxu1 %v1205_v34  ;;  %v1272_v55 = vld [vmem:[#allocation2 + $0x4d0] sm:$0xff]  ;;  %v1274_v34 = vld [vmem:[#allocation2 + $0x4e0] sm:$0xff] }
 0x1fd   :  { %1631 = vmatpush1.bf16.msra.mxu0 %v1202_v51  ;;  %1803 = vmatpush1.bf16.msra.mxu1 %v1204_v46  ;;  %v1280_v51 = vld [vmem:[#allocation2 + $0x510] sm:$0xff]  ;;  %v1282_v46 = vld [vmem:[#allocation2 + $0x520] sm:$0xff] }
 0x1fe   :  { %1632 = vmatprep.subr.bf16.mxu0 %v1210_v26  ;;  %1804 = vmatprep.subr.bf16.mxu1 %v1212_v48  ;;  %v1279_v26 = vld [vmem:[#allocation2 + $0x508] sm:$0xff]  ;;  %v1281_v48 = vld [vmem:[#allocation2 + $0x518] sm:$0xff] }
 0x201   :  { %1633 = vmatpush1.bf16.msra.mxu0 %v1209_v52  ;;  %1805 = vmatpush1.bf16.msra.mxu1 %v1211_v32  ;;  %v1287_v52 = vld [vmem:[#allocation2 + $0x548] sm:$0xff]  ;;  %v1289_v32 = vld [vmem:[#allocation2 + $0x558] sm:$0xff] }
 0x202   :  { %1634 = vmatprep.subr.bf16.mxu0 %v1217_v20  ;;  %1806 = vmatprep.subr.bf16.mxu1 %v1219_v21  ;;  %v1286_v20 = vld [vmem:[#allocation2 + $0x540] sm:$0xff]  ;;  %v1288_v21 = vld [vmem:[#allocation2 + $0x550] sm:$0xff] }
 0x205   :  { %1635 = vmatpush1.bf16.msra.mxu0 %v1216_v58  ;;  %1807 = vmatpush1.bf16.msra.mxu1 %v1218_v3  ;;  %v1294_v58 = vld [vmem:[#allocation2 + $0x580] sm:$0xff]  ;;  %v1296_v3 = vld [vmem:[#allocation2 + $0x590] sm:$0xff] }
 0x206   :  { %1636 = vmatprep.subr.bf16.mxu0 %v1224_v14  ;;  %1808 = vmatprep.subr.bf16.mxu1 %v1226_v28  ;;  %v1293_v14 = vld [vmem:[#allocation2 + $0x578] sm:$0xff]  ;;  %v1295_v28 = vld [vmem:[#allocation2 + $0x588] sm:$0xff] }
 0x209   :  { %1637 = vmatpush1.bf16.msra.mxu0 %v1223_v44  ;;  %1809 = vmatpush1.bf16.msra.mxu1 %v1225_v59  ;;  %v1301_v44 = vld [vmem:[#allocation2 + $0x5b8] sm:$0xff]  ;;  %v1303_v59 = vld [vmem:[#allocation2 + $0x5c8] sm:$0xff] }
 0x20a   :  { %1649 = vmatprep.subr.bf16.mxu0 %v1231_v40  ;;  %1821 = vmatprep.subr.bf16.mxu1 %v1233_v24  ;;  %v1300_v40 = vld [vmem:[#allocation2 + $0x5b0] sm:$0xff]  ;;  %v1302_v24 = vld [vmem:[#allocation2 + $0x5c0] sm:$0xff] }
 0x20c   :  { %1639 = vmatmul.mubr.bf16.vlgmr.msra.gmra.mrb[0].mxu0 %v8565_v30  ;;  %1811 = vmatmul.mubr.bf16.vlgmr.msra.gmra.mrb[16].mxu1 %v8565_v30 }
 0x20d   :  { %1650 = vmatpush1.bf16.msra.mxu0 %v1230_v4  ;;  %1822 = vmatpush1.bf16.msra.mxu1 %v1232_v33  ;;  %v1308_v4 = vld [vmem:[#allocation2 + $0x5f0] sm:$0xff]  ;;  %v1310_v33 = vld [vmem:[#allocation2 + $0x600] sm:$0xff] }
 0x20e   :  { %1651 = vmatprep.subr.bf16.mxu0 %v1238_v37  ;;  %1823 = vmatprep.subr.bf16.mxu1 %v1240_v9  ;;  %v1307_v37 = vld [vmem:[#allocation2 + $0x5e8] sm:$0xff]  ;;  %v1309_v9 = vld [vmem:[#allocation2 + $0x5f8] sm:$0xff] }
 0x20f   :  { %1681 = vmatprep.mubr.bf16.mxu0 %v8569_v43  ;;  %1853 = vmatprep.mubr.bf16.mxu1 %v8569_v43 }
 0x211   :  { %1652 = vmatpush1.bf16.msra.mxu0 %v1237_v1  ;;  %1824 = vmatpush1.bf16.msra.mxu1 %v1239_v45  ;;  %v1315_v1 = vld [vmem:[#allocation2 + $0x628] sm:$0xff]  ;;  %v1317_v45 = vld [vmem:[#allocation2 + $0x638] sm:$0xff] }
 0x212   :  { %1653 = vmatprep.subr.bf16.mxu0 %v1245_v60  ;;  %1825 = vmatprep.subr.bf16.mxu1 %v1247_v11  ;;  %v1314_v60 = vld [vmem:[#allocation2 + $0x620] sm:$0xff]  ;;  %v1316_v11 = vld [vmem:[#allocation2 + $0x630] sm:$0xff] }
 0x215   :  { %1654 = vmatpush1.bf16.msra.mxu0 %v1244_v12  ;;  %1826 = vmatpush1.bf16.msra.mxu1 %v1246_v25  ;;  %v1322_v12 = vld [vmem:[#allocation2 + $0x660] sm:$0xff]  ;;  %v1324_v25 = vld [vmem:[#allocation2 + $0x670] sm:$0xff] }
 0x216   :  { %1655 = vmatprep.subr.bf16.mxu0 %v1252_v36  ;;  %1827 = vmatprep.subr.bf16.mxu1 %v1254_v31  ;;  %v1321_v36 = vld [vmem:[#allocation2 + $0x658] sm:$0xff]  ;;  %v1323_v31 = vld [vmem:[#allocation2 + $0x668] sm:$0xff] }
 0x219   :  { %1656 = vmatpush1.bf16.msra.mxu0 %v1251_v38  ;;  %1828 = vmatpush1.bf16.msra.mxu1 %v1253_v47  ;;  %v1329_v38 = vld [vmem:[#allocation2 + $0x698] sm:$0xff]  ;;  %v1331_v47 = vld [vmem:[#allocation2 + $0x6a8] sm:$0xff] }
 0x21a   :  { %1657 = vmatprep.subr.bf16.mxu0 %v1259_v35  ;;  %1829 = vmatprep.subr.bf16.mxu1 %v1261_v49  ;;  %v1328_v35 = vld [vmem:[#allocation2 + $0x690] sm:$0xff]  ;;  %v1330_v49 = vld [vmem:[#allocation2 + $0x6a0] sm:$0xff] }
 0x21d   :  { %1658 = vmatpush1.bf16.msra.mxu0 %v1258_v5  ;;  %1830 = vmatpush1.bf16.msra.mxu1 %v1260_v19  ;;  %v1336_v5 = vld [vmem:[#allocation2 + $0x6d0] sm:$0xff]  ;;  %v1338_v19 = vld [vmem:[#allocation2 + $0x6e0] sm:$0xff] }
 0x21e   :  { %1659 = vmatprep.subr.bf16.mxu0 %v1266_v17  ;;  %1831 = vmatprep.subr.bf16.mxu1 %v1268_v7  ;;  %v1335_v17 = vld [vmem:[#allocation2 + $0x6c8] sm:$0xff]  ;;  %v1337_v7 = vld [vmem:[#allocation2 + $0x6d8] sm:$0xff] }
 0x221   :  { %1660 = vmatpush1.bf16.msra.mxu0 %v1265_v8  ;;  %1832 = vmatpush1.bf16.msra.mxu1 %v1267_v15  ;;  %v1343_v8 = vld [vmem:[#allocation2 + $0x708] sm:$0xff]  ;;  %v1345_v15 = vld [vmem:[#allocation2 + $0x718] sm:$0xff] }
 0x222   :  { %1661 = vmatprep.subr.bf16.mxu0 %v1273_v16  ;;  %1833 = vmatprep.subr.bf16.mxu1 %v1275_v23  ;;  %v8577_v16 = vpack.c.bf16 %v8547_v6, %v8510_v56  ;;  %v1342_v23 = vld [vmem:[#allocation2 + $0x700] sm:$0xff]  ;;  %v1349_v56 = vld [vmem:[#allocation2 + $0x738] sm:$0xff]  ;;  %v1351_v6 = vld [vmem:[#allocation2 + $0x748] sm:$0xff] }
 0x225   :  { %1662 = vmatpush1.bf16.msra.mxu0 %v1272_v55  ;;  %1834 = vmatpush1.bf16.msra.mxu1 %v1274_v34  ;;  %v1344_v55 = vld [vmem:[#allocation2 + $0x710] sm:$0xff]  ;;  %v1350_v34 = vld [vmem:[#allocation2 + $0x740] sm:$0xff] }
 0x226   :  { %1663 = vmatprep.subr.bf16.mxu0 %v1280_v51  ;;  %1835 = vmatprep.subr.bf16.mxu1 %v1282_v46  ;;  %v1352_v51 = vld [vmem:[#allocation2 + $0x750] sm:$0xff]  ;;  %v8581_v46 = vpack.c.bf16 %v8553_v22, %v8516_v62  ;;  %v1358_v22 = vld [vmem:[#allocation2 + $0x780] sm:$0xff] }
 0x227   :  { %v1356_v62 = vld [vmem:[#allocation2 + $0x770] sm:$0xff] }
 0x229   :  { %1664 = vmatpush1.bf16.msra.mxu0 %v1279_v26  ;;  %1836 = vmatpush1.bf16.msra.mxu1 %v1281_v48  ;;  %v1357_v26 = vld [vmem:[#allocation2 + $0x778] sm:$0xff]  ;;  %v1359_v48 = vld [vmem:[#allocation2 + $0x788] sm:$0xff] }
 0x22a   :  { %1665 = vmatprep.subr.bf16.mxu0 %v1287_v52  ;;  %1837 = vmatprep.subr.bf16.mxu1 %v1289_v32  ;;  %v1364_v52 = vld [vmem:[#allocation2 + $0x7b0] sm:$0xff]  ;;  %v1366_v32 = vld [vmem:[#allocation2 + $0x7c0] sm:$0xff] }
 0x22d   :  { %1666 = vmatpush1.bf16.msra.mxu0 %v1286_v20  ;;  %1838 = vmatpush1.bf16.msra.mxu1 %v1288_v21  ;;  %v1363_v20 = vld [vmem:[#allocation2 + $0x7a8] sm:$0xff]  ;;  %v1365_v21 = vld [vmem:[#allocation2 + $0x7b8] sm:$0xff] }
 0x22e   :  { %1667 = vmatprep.subr.bf16.mxu0 %v1294_v58  ;;  %1839 = vmatprep.subr.bf16.mxu1 %v1296_v3  ;;  %v1371_v58 = vld [vmem:[#allocation2 + $0x7e8] sm:$0xff]  ;;  %v1373_v3 = vld [vmem:[#allocation2 + $0x7f8] sm:$0xff] }
 0x231   :  { %1668 = vmatpush1.bf16.msra.mxu0 %v1293_v14  ;;  %1840 = vmatpush1.bf16.msra.mxu1 %v1295_v28  ;;  %v1370_v14 = vld [vmem:[#allocation2 + $0x7e0] sm:$0xff]  ;;  %v1372_v28 = vld [vmem:[#allocation2 + $0x7f0] sm:$0xff] }
 0x232   :  { %1669 = vmatprep.subr.bf16.mxu0 %v1301_v44  ;;  %1841 = vmatprep.subr.bf16.mxu1 %v1303_v59  ;;  %v1378_v44 = vld [vmem:[#allocation2 + $0x820] sm:$0xff]  ;;  %v1380_v59 = vld [vmem:[#allocation2 + $0x830] sm:$0xff] }
 0x235   :  { %1670 = vmatpush1.bf16.msra.mxu0 %v1300_v40  ;;  %1842 = vmatpush1.bf16.msra.mxu1 %v1302_v24  ;;  %v1377_v40 = vld [vmem:[#allocation2 + $0x818] sm:$0xff]  ;;  %v1379_v24 = vld [vmem:[#allocation2 + $0x828] sm:$0xff] }
 0x236   :  { %1671 = vmatprep.subr.bf16.mxu0 %v1308_v4  ;;  %1843 = vmatprep.subr.bf16.mxu1 %v1310_v33  ;;  %v1385_v4 = vld [vmem:[#allocation2 + $0x858] sm:$0xff]  ;;  %v1387_v33 = vld [vmem:[#allocation2 + $0x868] sm:$0xff] }
 0x239   :  { %1672 = vmatpush1.bf16.msra.mxu0 %v1307_v37  ;;  %1844 = vmatpush1.bf16.msra.mxu1 %v1309_v9  ;;  %v1384_v37 = vld [vmem:[#allocation2 + $0x850] sm:$0xff]  ;;  %v1386_v9 = vld [vmem:[#allocation2 + $0x860] sm:$0xff] }
 0x23a   :  { %1673 = vmatprep.subr.bf16.mxu0 %v1315_v1  ;;  %1845 = vmatprep.subr.bf16.mxu1 %v1317_v45  ;;  %v1392_v1 = vld [vmem:[#allocation2 + $0x890] sm:$0xff]  ;;  %v1394_v45 = vld [vmem:[#allocation2 + $0x8a0] sm:$0xff] }
 0x23d   :  { %1674 = vmatpush1.bf16.msra.mxu0 %v1314_v60  ;;  %1846 = vmatpush1.bf16.msra.mxu1 %v1316_v11  ;;  %v1391_v60 = vld [vmem:[#allocation2 + $0x888] sm:$0xff]  ;;  %v1393_v11 = vld [vmem:[#allocation2 + $0x898] sm:$0xff] }
 0x23e   :  { %1675 = vmatprep.subr.bf16.mxu0 %v1322_v12  ;;  %1847 = vmatprep.subr.bf16.mxu1 %v1324_v25  ;;  %v1399_v12 = vld [vmem:[#allocation2 + $0x8c8] sm:$0xff]  ;;  %v1401_v25 = vld [vmem:[#allocation2 + $0x8d8] sm:$0xff] }
 0x241   :  { %1676 = vmatpush1.bf16.msra.mxu0 %v1321_v36  ;;  %1848 = vmatpush1.bf16.msra.mxu1 %v1323_v31  ;;  %v1398_v36 = vld [vmem:[#allocation2 + $0x8c0] sm:$0xff]  ;;  %v1400_v31 = vld [vmem:[#allocation2 + $0x8d0] sm:$0xff] }
 0x242   :  { %1677 = vmatprep.subr.bf16.mxu0 %v1329_v38  ;;  %1849 = vmatprep.subr.bf16.mxu1 %v1331_v47  ;;  %v1406_v38 = vld [vmem:[#allocation2 + $0x900] sm:$0xff]  ;;  %v1408_v47 = vld [vmem:[#allocation2 + $0x910] sm:$0xff] }
 0x245   :  { %1678 = vmatpush1.bf16.msra.mxu0 %v1328_v35  ;;  %1850 = vmatpush1.bf16.msra.mxu1 %v1330_v49  ;;  %v1405_v35 = vld [vmem:[#allocation2 + $0x8f8] sm:$0xff]  ;;  %v1407_v49 = vld [vmem:[#allocation2 + $0x908] sm:$0xff] }
 0x246   :  { %1679 = vmatprep.subr.bf16.mxu0 %v1336_v5  ;;  %1851 = vmatprep.subr.bf16.mxu1 %v1338_v19  ;;  %v1413_v5 = vld [vmem:[#allocation2 + $0x938] sm:$0xff]  ;;  %v1415_v19 = vld [vmem:[#allocation2 + $0x948] sm:$0xff] }
 0x249   :  { %1680 = vmatpush1.bf16.msra.mxu0 %v1335_v17  ;;  %1852 = vmatpush1.bf16.msra.mxu1 %v1337_v7  ;;  %v1412_v17 = vld [vmem:[#allocation2 + $0x930] sm:$0xff]  ;;  %v1414_v7 = vld [vmem:[#allocation2 + $0x940] sm:$0xff] }
 0x24a   :  { %1692 = vmatprep.subr.bf16.mxu0 %v1343_v8  ;;  %1864 = vmatprep.subr.bf16.mxu1 %v1345_v15  ;;  %v1420_v8 = vld [vmem:[#allocation2 + $0x970] sm:$0xff]  ;;  %v1422_v15 = vld [vmem:[#allocation2 + $0x980] sm:$0xff] }
 0x24c   :  { %1682 = vmatmul.mubr.bf16.vlgmr.msra.gmra.mrb[0].mxu0 %v8577_v16  ;;  %1854 = vmatmul.mubr.bf16.vlgmr.msra.gmra.mrb[16].mxu1 %v8577_v16 }
 0x24d   :  { %1693 = vmatpush1.bf16.msra.mxu0 %v1342_v23  ;;  %1865 = vmatpush1.bf16.msra.mxu1 %v1344_v55  ;;  %v1419_v23 = vld [vmem:[#allocation2 + $0x968] sm:$0xff]  ;;  %v1421_v55 = vld [vmem:[#allocation2 + $0x978] sm:$0xff] }
 0x24e   :  { %1694 = vmatprep.subr.bf16.mxu0 %v1350_v34  ;;  %1866 = vmatprep.subr.bf16.mxu1 %v1352_v51  ;;  %v1427_v34 = vld [vmem:[#allocation2 + $0x9a8] sm:$0xff]  ;;  %v1429_v51 = vld [vmem:[#allocation2 + $0x9b8] sm:$0xff] }
 0x24f   :  { %1724 = vmatprep.mubr.bf16.mxu0 %v8581_v46  ;;  %1896 = vmatprep.mubr.bf16.mxu1 %v8581_v46 }
 0x251   :  { %1695 = vmatpush1.bf16.msra.mxu0 %v1349_v56  ;;  %1867 = vmatpush1.bf16.msra.mxu1 %v1351_v6  ;;  %v1426_v56 = vld [vmem:[#allocation2 + $0x9a0] sm:$0xff]  ;;  %v1428_v6 = vld [vmem:[#allocation2 + $0x9b0] sm:$0xff] }
 0x252   :  { %1696 = vmatprep.subr.bf16.mxu0 %v1357_v26  ;;  %1868 = vmatprep.subr.bf16.mxu1 %v1359_v48  ;;  %v1434_v26 = vld [vmem:[#allocation2 + $0x9e0] sm:$0xff]  ;;  %v1436_v48 = vld [vmem:[#allocation2 + $0x9f0] sm:$0xff] }
 0x255   :  { %1697 = vmatpush1.bf16.msra.mxu0 %v1356_v62  ;;  %1869 = vmatpush1.bf16.msra.mxu1 %v1358_v22  ;;  %v1433_v62 = vld [vmem:[#allocation2 + $0x9d8] sm:$0xff]  ;;  %v1435_v22 = vld [vmem:[#allocation2 + $0x9e8] sm:$0xff] }
 0x256   :  { %1698 = vmatprep.subr.bf16.mxu0 %v1364_v52  ;;  %1870 = vmatprep.subr.bf16.mxu1 %v1366_v32  ;;  %v1441_v52 = vld [vmem:[#allocation2 + $0xa18] sm:$0xff]  ;;  %v1443_v32 = vld [vmem:[#allocation2 + $0xa28] sm:$0xff] }
 0x259   :  { %1699 = vmatpush1.bf16.msra.mxu0 %v1363_v20  ;;  %1871 = vmatpush1.bf16.msra.mxu1 %v1365_v21  ;;  %v1440_v20 = vld [vmem:[#allocation2 + $0xa10] sm:$0xff]  ;;  %v1442_v21 = vld [vmem:[#allocation2 + $0xa20] sm:$0xff] }
 0x25a   :  { %1700 = vmatprep.subr.bf16.mxu0 %v1371_v58  ;;  %1872 = vmatprep.subr.bf16.mxu1 %v1373_v3  ;;  %v1448_v58 = vld [vmem:[#allocation2 + $0xa50] sm:$0xff]  ;;  %v1450_v3 = vld [vmem:[#allocation2 + $0xa60] sm:$0xff] }
 0x25d   :  { %1701 = vmatpush1.bf16.msra.mxu0 %v1370_v14  ;;  %1873 = vmatpush1.bf16.msra.mxu1 %v1372_v28  ;;  %v1447_v14 = vld [vmem:[#allocation2 + $0xa48] sm:$0xff]  ;;  %v1449_v28 = vld [vmem:[#allocation2 + $0xa58] sm:$0xff] }
 0x25e   :  { %1702 = vmatprep.subr.bf16.mxu0 %v1378_v44  ;;  %1874 = vmatprep.subr.bf16.mxu1 %v1380_v59  ;;  %v1455_v44 = vld [vmem:[#allocation2 + $0xa88] sm:$0xff]  ;;  %v1457_v59 = vld [vmem:[#allocation2 + $0xa98] sm:$0xff] }
 0x261   :  { %1703 = vmatpush1.bf16.msra.mxu0 %v1377_v40  ;;  %1875 = vmatpush1.bf16.msra.mxu1 %v1379_v24  ;;  %v8589_v40 = vpack.c.bf16 %v8551_v29, %v8514_v18  ;;  %v1454_v24 = vld [vmem:[#allocation2 + $0xa80] sm:$0xff]  ;;  %v1461_v18 = vld [vmem:[#allocation2 + $0xab8] sm:$0xff]  ;;  %v1463_v29 = vld [vmem:[#allocation2 + $0xac8] sm:$0xff] }
 0x262   :  { %1704 = vmatprep.subr.bf16.mxu0 %v1385_v4  ;;  %1876 = vmatprep.subr.bf16.mxu1 %v1387_v33  ;;  %v1456_v4 = vld [vmem:[#allocation2 + $0xa90] sm:$0xff]  ;;  %v1462_v33 = vld [vmem:[#allocation2 + $0xac0] sm:$0xff] }
 0x265   :  { %1705 = vmatpush1.bf16.msra.mxu0 %v1384_v37  ;;  %1877 = vmatpush1.bf16.msra.mxu1 %v1386_v9  ;;  %v1464_v37 = vld [vmem:[#allocation2 + $0xad0] sm:$0xff]  ;;  %v8593_v9 = vpack.c.bf16 %v8557_v39, %v8520_v27  ;;  %v1470_v39 = vld [vmem:[#allocation2 + $0xb00] sm:$0xff] }
 0x266   :  { %1706 = vmatprep.subr.bf16.mxu0 %v1392_v1  ;;  %1878 = vmatprep.subr.bf16.mxu1 %v1394_v45  ;;  %v1469_v1 = vld [vmem:[#allocation2 + $0xaf8] sm:$0xff]  ;;  %v1471_v45 = vld [vmem:[#allocation2 + $0xb08] sm:$0xff]  ;;  %v1468_v27 = vld [vmem:[#allocation2 + $0xaf0] sm:$0xff] }
 0x269   :  { %1707 = vmatpush1.bf16.msra.mxu0 %v1391_v60  ;;  %1879 = vmatpush1.bf16.msra.mxu1 %v1393_v11  ;;  %v1476_v60 = vld [vmem:[#allocation2 + $0xb30] sm:$0xff]  ;;  %v1478_v11 = vld [vmem:[#allocation2 + $0xb40] sm:$0xff] }
 0x26a   :  { %1708 = vmatprep.subr.bf16.mxu0 %v1399_v12  ;;  %1880 = vmatprep.subr.bf16.mxu1 %v1401_v25  ;;  %v1475_v12 = vld [vmem:[#allocation2 + $0xb28] sm:$0xff]  ;;  %v1477_v25 = vld [vmem:[#allocation2 + $0xb38] sm:$0xff] }
 0x26d   :  { %1709 = vmatpush1.bf16.msra.mxu0 %v1398_v36  ;;  %1881 = vmatpush1.bf16.msra.mxu1 %v1400_v31  ;;  %v1483_v36 = vld [vmem:[#allocation2 + $0xb68] sm:$0xff]  ;;  %v1485_v31 = vld [vmem:[#allocation2 + $0xb78] sm:$0xff] }
 0x26e   :  { %1710 = vmatprep.subr.bf16.mxu0 %v1406_v38  ;;  %1882 = vmatprep.subr.bf16.mxu1 %v1408_v47  ;;  %v1482_v38 = vld [vmem:[#allocation2 + $0xb60] sm:$0xff]  ;;  %v1484_v47 = vld [vmem:[#allocation2 + $0xb70] sm:$0xff] }
 0x271   :  { %1711 = vmatpush1.bf16.msra.mxu0 %v1405_v35  ;;  %1883 = vmatpush1.bf16.msra.mxu1 %v1407_v49  ;;  %v1490_v35 = vld [vmem:[#allocation2 + $0xba0] sm:$0xff]  ;;  %v1492_v49 = vld [vmem:[#allocation2 + $0xbb0] sm:$0xff] }
 0x272   :  { %1712 = vmatprep.subr.bf16.mxu0 %v1413_v5  ;;  %1884 = vmatprep.subr.bf16.mxu1 %v1415_v19  ;;  %v1489_v5 = vld [vmem:[#allocation2 + $0xb98] sm:$0xff]  ;;  %v1491_v19 = vld [vmem:[#allocation2 + $0xba8] sm:$0xff] }
 0x275   :  { %1713 = vmatpush1.bf16.msra.mxu0 %v1412_v17  ;;  %1885 = vmatpush1.bf16.msra.mxu1 %v1414_v7  ;;  %v1497_v17 = vld [vmem:[#allocation2 + $0xbd8] sm:$0xff]  ;;  %v1499_v7 = vld [vmem:[#allocation2 + $0xbe8] sm:$0xff] }
 0x276   :  { %1714 = vmatprep.subr.bf16.mxu0 %v1420_v8  ;;  %1886 = vmatprep.subr.bf16.mxu1 %v1422_v15  ;;  %v1496_v8 = vld [vmem:[#allocation2 + $0xbd0] sm:$0xff]  ;;  %v1498_v15 = vld [vmem:[#allocation2 + $0xbe0] sm:$0xff] }
 0x279   :  { %1715 = vmatpush1.bf16.msra.mxu0 %v1419_v23  ;;  %1887 = vmatpush1.bf16.msra.mxu1 %v1421_v55  ;;  %v1504_v23 = vld [vmem:[#allocation2 + $0xc10] sm:$0xff]  ;;  %v1506_v55 = vld [vmem:[#allocation2 + $0xc20] sm:$0xff] }
 0x27a   :  { %1716 = vmatprep.subr.bf16.mxu0 %v1427_v34  ;;  %1888 = vmatprep.subr.bf16.mxu1 %v1429_v51  ;;  %v1503_v34 = vld [vmem:[#allocation2 + $0xc08] sm:$0xff]  ;;  %v1505_v51 = vld [vmem:[#allocation2 + $0xc18] sm:$0xff] }
 0x27d   :  { %1717 = vmatpush1.bf16.msra.mxu0 %v1426_v56  ;;  %1889 = vmatpush1.bf16.msra.mxu1 %v1428_v6  ;;  %v1511_v56 = vld [vmem:[#allocation2 + $0xc48] sm:$0xff]  ;;  %v1513_v6 = vld [vmem:[#allocation2 + $0xc58] sm:$0xff] }
 0x27e   :  { %1718 = vmatprep.subr.bf16.mxu0 %v1434_v26  ;;  %1890 = vmatprep.subr.bf16.mxu1 %v1436_v48  ;;  %v1510_v26 = vld [vmem:[#allocation2 + $0xc40] sm:$0xff]  ;;  %v1512_v48 = vld [vmem:[#allocation2 + $0xc50] sm:$0xff] }
 0x281   :  { %1719 = vmatpush1.bf16.msra.mxu0 %v1433_v62  ;;  %1891 = vmatpush1.bf16.msra.mxu1 %v1435_v22  ;;  %v1518_v62 = vld [vmem:[#allocation2 + $0xc80] sm:$0xff]  ;;  %v1520_v22 = vld [vmem:[#allocation2 + $0xc90] sm:$0xff] }
 0x282   :  { %1720 = vmatprep.subr.bf16.mxu0 %v1441_v52  ;;  %1892 = vmatprep.subr.bf16.mxu1 %v1443_v32  ;;  %v1517_v52 = vld [vmem:[#allocation2 + $0xc78] sm:$0xff]  ;;  %v1519_v32 = vld [vmem:[#allocation2 + $0xc88] sm:$0xff] }
 0x285   :  { %1721 = vmatpush1.bf16.msra.mxu0 %v1440_v20  ;;  %1893 = vmatpush1.bf16.msra.mxu1 %v1442_v21  ;;  %v1525_v20 = vld [vmem:[#allocation2 + $0xcb8] sm:$0xff]  ;;  %v1527_v21 = vld [vmem:[#allocation2 + $0xcc8] sm:$0xff] }
 0x286   :  { %1722 = vmatprep.subr.bf16.mxu0 %v1448_v58  ;;  %1894 = vmatprep.subr.bf16.mxu1 %v1450_v3  ;;  %v1524_v58 = vld [vmem:[#allocation2 + $0xcb0] sm:$0xff]  ;;  %v1526_v3 = vld [vmem:[#allocation2 + $0xcc0] sm:$0xff] }
 0x289   :  { %1723 = vmatpush1.bf16.msra.mxu0 %v1447_v14  ;;  %1895 = vmatpush1.bf16.msra.mxu1 %v1449_v28  ;;  %v1532_v14 = vld [vmem:[#allocation2 + $0xcf0] sm:$0xff]  ;;  %v1534_v28 = vld [vmem:[#allocation2 + $0xd00] sm:$0xff] }
 0x28a   :  { %1735 = vmatprep.subr.bf16.mxu0 %v1455_v44  ;;  %1907 = vmatprep.subr.bf16.mxu1 %v1457_v59  ;;  %v1531_v44 = vld [vmem:[#allocation2 + $0xce8] sm:$0xff]  ;;  %v1533_v59 = vld [vmem:[#allocation2 + $0xcf8] sm:$0xff] }
 0x28c   :  { %1725 = vmatmul.mubr.bf16.vlgmr.msra.gmra.mrb[0].mxu0 %v8589_v40  ;;  %1897 = vmatmul.mubr.bf16.vlgmr.msra.gmra.mrb[16].mxu1 %v8589_v40 }
 0x28d   :  { %1736 = vmatpush1.bf16.msra.mxu0 %v1454_v24  ;;  %1908 = vmatpush1.bf16.msra.mxu1 %v1456_v4  ;;  %v1539_v24 = vld [vmem:[#allocation2 + $0xd28] sm:$0xff]  ;;  %v1541_v4 = vld [vmem:[#allocation2 + $0xd38] sm:$0xff] }
 0x28e   :  { %1737 = vmatprep.subr.bf16.mxu0 %v1462_v33  ;;  %1909 = vmatprep.subr.bf16.mxu1 %v1464_v37  ;;  %v1538_v33 = vld [vmem:[#allocation2 + $0xd20] sm:$0xff]  ;;  %v1540_v37 = vld [vmem:[#allocation2 + $0xd30] sm:$0xff] }
 0x28f   :  { %1767 = vmatprep.mubr.bf16.mxu0 %v8593_v9  ;;  %1939 = vmatprep.mubr.bf16.mxu1 %v8593_v9 }
 0x291   :  { %1738 = vmatpush1.bf16.msra.mxu0 %v1461_v18  ;;  %1910 = vmatpush1.bf16.msra.mxu1 %v1463_v29  ;;  %v1546_v18 = vld [vmem:[#allocation2 + $0xd60] sm:$0xff]  ;;  %v1548_v29 = vld [vmem:[#allocation2 + $0xd70] sm:$0xff] }
 0x292   :  { %1739 = vmatprep.subr.bf16.mxu0 %v1469_v1  ;;  %1911 = vmatprep.subr.bf16.mxu1 %v1471_v45  ;;  %v1545_v1 = vld [vmem:[#allocation2 + $0xd58] sm:$0xff]  ;;  %v1547_v45 = vld [vmem:[#allocation2 + $0xd68] sm:$0xff] }
 0x295   :  { %1740 = vmatpush1.bf16.msra.mxu0 %v1468_v27  ;;  %1912 = vmatpush1.bf16.msra.mxu1 %v1470_v39  ;;  %v1553_v27 = vld [vmem:[#allocation2 + $0xd98] sm:$0xff]  ;;  %v1555_v39 = vld [vmem:[#allocation2 + $0xda8] sm:$0xff] }
 0x296   :  { %1741 = vmatprep.subr.bf16.mxu0 %v1476_v60  ;;  %1913 = vmatprep.subr.bf16.mxu1 %v1478_v11  ;;  %v1552_v60 = vld [vmem:[#allocation2 + $0xd90] sm:$0xff]  ;;  %v1554_v11 = vld [vmem:[#allocation2 + $0xda0] sm:$0xff] }
 0x299   :  { %1742 = vmatpush1.bf16.msra.mxu0 %v1475_v12  ;;  %1914 = vmatpush1.bf16.msra.mxu1 %v1477_v25  ;;  %v1560_v12 = vld [vmem:[#allocation2 + $0xdd0] sm:$0xff]  ;;  %v1562_v25 = vld [vmem:[#allocation2 + $0xde0] sm:$0xff] }
 0x29a   :  { %1743 = vmatprep.subr.bf16.mxu0 %v1483_v36  ;;  %1915 = vmatprep.subr.bf16.mxu1 %v1485_v31  ;;  %v1559_v36 = vld [vmem:[#allocation2 + $0xdc8] sm:$0xff]  ;;  %v1561_v31 = vld [vmem:[#allocation2 + $0xdd8] sm:$0xff] }
 0x29d   :  { %1744 = vmatpush1.bf16.msra.mxu0 %v1482_v38  ;;  %1916 = vmatpush1.bf16.msra.mxu1 %v1484_v47  ;;  %v1123_v38 = vld [vmem:[#allocation2 + $0x28] sm:$0xff]  ;;  %v1180_v47 = vld [vmem:[#allocation2 + $0x1f0] sm:$0xff] }
 0x29e   :  { %1745 = vmatprep.subr.bf16.mxu0 %v1490_v35  ;;  %1917 = vmatprep.subr.bf16.mxu1 %v1492_v49  ;;  %v8601_v35 = vpack.c.bf16 %v8555_v54, %v8518_v13  ;;  %v1122_v49 = vld [vmem:[#allocation2 + $0x20] sm:$0xff]  ;;  %v1137_v13 = vld [vmem:[#allocation2 + $0x98] sm:$0xff] }
 0x29f   :  { %v1194_v54 = vld [vmem:[#allocation2 + $0x260] sm:$0xff] }
 0x2a1   :  { %1746 = vmatpush1.bf16.msra.mxu0 %v1489_v5  ;;  %1918 = vmatpush1.bf16.msra.mxu1 %v1491_v19  ;;  %v1124_v5 = vld [vmem:[#allocation2 + $0x30] sm:$0xff]  ;;  %v1130_v19 = vld [vmem:[#allocation2 + $0x60] sm:$0xff] }
 0x2a2   :  { %1747 = vmatprep.subr.bf16.mxu0 %v1497_v17  ;;  %1919 = vmatprep.subr.bf16.mxu1 %v1499_v7  ;;  %v1187_v17 = vld [vmem:[#allocation2 + $0x228] sm:$0xff]  ;;  %v1129_v7 = vld [vmem:[#allocation2 + $0x58] sm:$0xff] }
 0x2a5   :  { %1748 = vmatpush1.bf16.msra.mxu0 %v1496_v8  ;;  %1920 = vmatpush1.bf16.msra.mxu1 %v1498_v15  ;;  %v1131_v8 = vld [vmem:[#allocation2 + $0x68] sm:$0xff]  ;;  %v1136_v15 = vld [vmem:[#allocation2 + $0x90] sm:$0xff] }
 0x2a6   :  { %1749 = vmatprep.subr.bf16.mxu0 %v1504_v23  ;;  %1921 = vmatprep.subr.bf16.mxu1 %v1506_v55  ;;  %v1138_v23 = vld [vmem:[#allocation2 + $0xa0] sm:$0xff]  ;;  %v1144_v55 = vld [vmem:[#allocation2 + $0xd0] sm:$0xff] }
 0x2a9   :  { %1750 = vmatpush1.bf16.msra.mxu0 %v1503_v34  ;;  %1922 = vmatpush1.bf16.msra.mxu1 %v1505_v51  ;;  %v1201_v34 = vld [vmem:[#allocation2 + $0x298] sm:$0xff]  ;;  %v1143_v51 = vld [vmem:[#allocation2 + $0xc8] sm:$0xff] }
 0x2aa   :  { %1751 = vmatprep.subr.bf16.mxu0 %v1511_v56  ;;  %1923 = vmatprep.subr.bf16.mxu1 %v1513_v6  ;;  %v1145_v56 = vld [vmem:[#allocation2 + $0xd8] sm:$0xff]  ;;  %v1151_v6 = vld [vmem:[#allocation2 + $0x108] sm:$0xff] }
 0x2ad   :  { %1752 = vmatpush1.bf16.msra.mxu0 %v1510_v26  ;;  %1924 = vmatpush1.bf16.msra.mxu1 %v1512_v48  ;;  %v1208_v26 = vld [vmem:[#allocation2 + $0x2d0] sm:$0xff] }
 0x2ae   :  { %1753 = vmatprep.subr.bf16.mxu0 %v1518_v62  ;;  %1925 = vmatprep.subr.bf16.mxu1 %v1520_v22  ;;  %v1152_v48 = vld [vmem:[#allocation2 + $0x110] sm:$0xff]  ;;  %v1158_v62 = vld [vmem:[#allocation2 + $0x140] sm:$0xff]  ;;  %v1215_v22 = vld [vmem:[#allocation2 + $0x308] sm:$0xff] }
 0x2b1   :  { %1754 = vmatpush1.bf16.msra.mxu0 %v1517_v52  ;;  %1926 = vmatpush1.bf16.msra.mxu1 %v1519_v32  ;;  %v1157_v52 = vld [vmem:[#allocation2 + $0x138] sm:$0xff]  ;;  %v1159_v32 = vld [vmem:[#allocation2 + $0x148] sm:$0xff] }
 0x2b2   :  { %1755 = vmatprep.subr.bf16.mxu0 %v1525_v20  ;;  %1927 = vmatprep.subr.bf16.mxu1 %v1527_v21  ;;  %v1165_v20 = vld [vmem:[#allocation2 + $0x178] sm:$0xff]  ;;  %v1222_v21 = vld [vmem:[#allocation2 + $0x340] sm:$0xff] }
 0x2b5   :  { %1756 = vmatpush1.bf16.msra.mxu0 %v1524_v58  ;;  %1928 = vmatpush1.bf16.msra.mxu1 %v1526_v3  ;;  %v1164_v58 = vld [vmem:[#allocation2 + $0x170] sm:$0xff]  ;;  %v1166_v3 = vld [vmem:[#allocation2 + $0x180] sm:$0xff] }
 0x2b6   :  { %1757 = vmatprep.subr.bf16.mxu0 %v1532_v14  ;;  %1929 = vmatprep.subr.bf16.mxu1 %v1534_v28  ;;  %v1172_v14 = vld [vmem:[#allocation2 + $0x1b0] sm:$0xff]  ;;  %v1229_v28 = vld [vmem:[#allocation2 + $0x378] sm:$0xff] }
 0x2b9   :  { %1758 = vmatpush1.bf16.msra.mxu0 %v1531_v44  ;;  %1930 = vmatpush1.bf16.msra.mxu1 %v1533_v59  ;;  %v1171_v44 = vld [vmem:[#allocation2 + $0x1a8] sm:$0xff]  ;;  %v1173_v59 = vld [vmem:[#allocation2 + $0x1b8] sm:$0xff] }
 0x2ba   :  { %1759 = vmatprep.subr.bf16.mxu0 %v1539_v24  ;;  %1931 = vmatprep.subr.bf16.mxu1 %v1541_v4  ;;  %v1179_v24 = vld [vmem:[#allocation2 + $0x1e8] sm:$0xff]  ;;  %v1292_v4 = vld [vmem:[#allocation2 + $0x570] sm:$0xff] }
 0x2bd   :  { %1760 = vmatpush1.bf16.msra.mxu0 %v1538_v33  ;;  %1932 = vmatpush1.bf16.msra.mxu1 %v1540_v37  ;;  %v1178_v33 = vld [vmem:[#allocation2 + $0x1e0] sm:$0xff]  ;;  %v1236_v37 = vld [vmem:[#allocation2 + $0x3b0] sm:$0xff] }
 0x2be   :  { %1761 = vmatprep.subr.bf16.mxu0 %v1546_v18  ;;  %1933 = vmatprep.subr.bf16.mxu1 %v1548_v29  ;;  %v1186_v18 = vld [vmem:[#allocation2 + $0x220] sm:$0xff]  ;;  %v1299_v29 = vld [vmem:[#allocation2 + $0x5a8] sm:$0xff] }
 0x2c1   :  { %1762 = vmatpush1.bf16.msra.mxu0 %v1545_v1  ;;  %1934 = vmatpush1.bf16.msra.mxu1 %v1547_v45  ;;  %v1185_v1 = vld [vmem:[#allocation2 + $0x218] sm:$0xff]  ;;  %v1243_v45 = vld [vmem:[#allocation2 + $0x3e8] sm:$0xff] }
 0x2c2   :  { %1763 = vmatprep.subr.bf16.mxu0 %v1553_v27  ;;  %1935 = vmatprep.subr.bf16.mxu1 %v1555_v39  ;;  %v1193_v27 = vld [vmem:[#allocation2 + $0x258] sm:$0xff]  ;;  %v1306_v39 = vld [vmem:[#allocation2 + $0x5e0] sm:$0xff] }
 0x2c5   :  { %1764 = vmatpush1.bf16.msra.mxu0 %v1552_v60  ;;  %1936 = vmatpush1.bf16.msra.mxu1 %v1554_v11  ;;  %v1192_v60 = vld [vmem:[#allocation2 + $0x250] sm:$0xff]  ;;  %v1250_v11 = vld [vmem:[#allocation2 + $0x420] sm:$0xff] }
 0x2c6   :  { %1765 = vmatprep.subr.bf16.mxu0 %v1560_v12  ;;  %1937 = vmatprep.subr.bf16.mxu1 %v1562_v25  ;;  %v1200_v12 = vld [vmem:[#allocation2 + $0x290] sm:$0xff]  ;;  %v1313_v25 = vld [vmem:[#allocation2 + $0x618] sm:$0xff] }
 0x2c9   :  { %1766 = vmatpush1.bf16.msra.mxu0 %v1559_v36  ;;  %1938 = vmatpush1.bf16.msra.mxu1 %v1561_v31  ;;  %v1199_v36 = vld [vmem:[#allocation2 + $0x288] sm:$0xff]  ;;  %v1257_v31 = vld [vmem:[#allocation2 + $0x458] sm:$0xff] }
 0x2ca   :  { %1950 = vmatprep.subr.bf16.mxu0 %v1123_v38  ;;  %7274 = vmatprep.subr.bf16.mxu1 %v1180_v47  ;;  %v1207_v38 = vld [vmem:[#allocation2 + $0x2c8] sm:$0xff]  ;;  %v1320_v47 = vld [vmem:[#allocation2 + $0x650] sm:$0xff] }
 0x2cc   :  { %1768 = vmatmul.mubr.bf16.vlgmr.msra.gmra.mrb[0].mxu0 %v8601_v35  ;;  %1940 = vmatmul.mubr.bf16.vlgmr.msra.gmra.mrb[16].mxu1 %v8601_v35 }
 0x2cd   :  { %1951 = vmatpush1.bf16.msra.mxu0 %v1122_v49  ;;  %7275 = vmatpush3.bf16.msra.mxu1 %v1124_v5  ;;  %v1206_v49 = vld [vmem:[#allocation2 + $0x2c0] sm:$0xff]  ;;  %v1264_v5 = vld [vmem:[#allocation2 + $0x490] sm:$0xff] }
 0x2ce   :  { %1952 = vmatprep.subr.bf16.mxu0 %v1130_v19  ;;  %7276 = vmatprep.subr.bf16.mxu1 %v1187_v17  ;;  %v1214_v19 = vld [vmem:[#allocation2 + $0x300] sm:$0xff]  ;;  %v1327_v17 = vld [vmem:[#allocation2 + $0x688] sm:$0xff] }
 0x2cf   :  { %2154 = vmatprep.mubr.bf16.mxu1 %v8559_v63  ;;  %1982 = vmatprep.mubr.bf16.mxu0 %v8559_v63  ;;  %v1150_v63 = vld [vmem:[#allocation2 + $0x100] sm:$0xff] }
 0x2d1   :  { %1953 = vmatpush1.bf16.msra.mxu0 %v1129_v7  ;;  %7277 = vmatpush3.bf16.msra.mxu1 %v1131_v8  ;;  %v1213_v7 = vld [vmem:[#allocation2 + $0x2f8] sm:$0xff]  ;;  %v1271_v8 = vld [vmem:[#allocation2 + $0x4c8] sm:$0xff] }
 0x2d2   :  { %1954 = vmatprep.subr.bf16.mxu0 %v1137_v13  ;;  %7278 = vmatprep.subr.bf16.mxu1 %v1194_v54  ;;  %v1221_v13 = vld [vmem:[#allocation2 + $0x338] sm:$0xff]  ;;  %v1334_v54 = vld [vmem:[#allocation2 + $0x6c0] sm:$0xff] }
 0x2d5   :  { %1955 = vmatpush1.bf16.msra.mxu0 %v1136_v15  ;;  %7279 = vmatpush3.bf16.msra.mxu1 %v1138_v23  ;;  %v1220_v15 = vld [vmem:[#allocation2 + $0x330] sm:$0xff]  ;;  %v1278_v23 = vld [vmem:[#allocation2 + $0x500] sm:$0xff] }
 0x2d6   :  { %1956 = vmatprep.subr.bf16.mxu0 %v1144_v55  ;;  %7280 = vmatprep.subr.bf16.mxu1 %v1201_v34  ;;  %v1228_v55 = vld [vmem:[#allocation2 + $0x370] sm:$0xff]  ;;  %v1341_v34 = vld [vmem:[#allocation2 + $0x6f8] sm:$0xff] }
 0x2d9   :  { %1957 = vmatpush1.bf16.msra.mxu0 %v1143_v51  ;;  %7281 = vmatpush3.bf16.msra.mxu1 %v1145_v56  ;;  %v1227_v51 = vld [vmem:[#allocation2 + $0x368] sm:$0xff]  ;;  %v1285_v56 = vld [vmem:[#allocation2 + $0x538] sm:$0xff] }
 0x2da   :  { %1958 = vmatprep.subr.bf16.mxu0 %v1151_v6  ;;  %7282 = vmatprep.subr.bf16.mxu1 %v1208_v26  ;;  %v1235_v6 = vld [vmem:[#allocation2 + $0x3a8] sm:$0xff]  ;;  %v1404_v26 = vld [vmem:[#allocation2 + $0x8f0] sm:$0xff] }
 0x2dd   :  { %1959 = vmatpush1.bf16.msra.mxu0 %v1150_v63  ;;  %7283 = vmatpush3.bf16.msra.mxu1 %v1152_v48  ;;  %v1234_v63 = vld [vmem:[#allocation2 + $0x3a0] sm:$0xff]  ;;  %v1348_v48 = vld [vmem:[#allocation2 + $0x730] sm:$0xff] }
 0x2de   :  { %1960 = vmatprep.subr.bf16.mxu0 %v1158_v62  ;;  %7284 = vmatprep.subr.bf16.mxu1 %v1215_v22  ;;  %v1242_v62 = vld [vmem:[#allocation2 + $0x3e0] sm:$0xff]  ;;  %v1411_v22 = vld [vmem:[#allocation2 + $0x928] sm:$0xff] }
 0x2e1   :  { %1961 = vmatpush1.bf16.msra.mxu0 %v1157_v52  ;;  %7285 = vmatpush3.bf16.msra.mxu1 %v1159_v32  ;;  %v1241_v52 = vld [vmem:[#allocation2 + $0x3d8] sm:$0xff]  ;;  %v1355_v32 = vld [vmem:[#allocation2 + $0x768] sm:$0xff] }
 0x2e2   :  { %1962 = vmatprep.subr.bf16.mxu0 %v1165_v20  ;;  %7286 = vmatprep.subr.bf16.mxu1 %v1222_v21  ;;  %v1249_v20 = vld [vmem:[#allocation2 + $0x418] sm:$0xff]  ;;  %v1418_v21 = vld [vmem:[#allocation2 + $0x960] sm:$0xff] }
 0x2e5   :  { %1963 = vmatpush1.bf16.msra.mxu0 %v1164_v58  ;;  %7287 = vmatpush3.bf16.msra.mxu1 %v1166_v3  ;;  %v1248_v58 = vld [vmem:[#allocation2 + $0x410] sm:$0xff] }
 0x2e6   :  { %1964 = vmatprep.subr.bf16.mxu0 %v1172_v14  ;;  %7288 = vmatprep.subr.bf16.mxu1 %v1229_v28  ;;  %v1256_v3 = vld [vmem:[#allocation2 + $0x450] sm:$0xff]  ;;  %v1425_v14 = vld [vmem:[#allocation2 + $0x998] sm:$0xff]  ;;  %v1255_v28 = vld [vmem:[#allocation2 + $0x448] sm:$0xff] }
 0x2e9   :  { %1965 = vmatpush1.bf16.msra.mxu0 %v1171_v44  ;;  %7289 = vmatpush3.bf16.msra.mxu1 %v1173_v59  ;;  %v1369_v44 = vld [vmem:[#allocation2 + $0x7d8] sm:$0xff]  ;;  %v1263_v59 = vld [vmem:[#allocation2 + $0x488] sm:$0xff] }
 0x2ea   :  { %1966 = vmatprep.subr.bf16.mxu0 %v1179_v24  ;;  %7296 = vmatprep.subr.bf16.mxu1 %v1292_v4  ;;  %v1432_v24 = vld [vmem:[#allocation2 + $0x9d0] sm:$0xff] }
 0x2eb   :  { %v1376_v4 = vld [vmem:[#allocation2 + $0x810] sm:$0xff] }
 0x2ec   :  { %2155 = vmatmul.mubr.bf16.vlgmr.msra.gmra.mrb[20].mxu1 %v8565_v30 }
 0x2ed   :  { %1967 = vmatpush1.bf16.msra.mxu0 %v1178_v33  ;;  %7297 = vmatpush3.bf16.msra.mxu1 %v1236_v37  ;;  %v1270_v33 = vld [vmem:[#allocation2 + $0x4c0] sm:$0xff]  ;;  %v1439_v37 = vld [vmem:[#allocation2 + $0xa08] sm:$0xff] }
 0x2ee   :  { %1968 = vmatprep.subr.bf16.mxu0 %v1186_v18  ;;  %7298 = vmatprep.subr.bf16.mxu1 %v1299_v29  ;;  %v1269_v18 = vld [vmem:[#allocation2 + $0x4b8] sm:$0xff]  ;;  %v1383_v29 = vld [vmem:[#allocation2 + $0x848] sm:$0xff] }
 0x2ef   :  { %2195 = vmatprep.mubr.bf16.mxu1 %v8569_v43 }
 0x2f1   :  { %1969 = vmatpush1.bf16.msra.mxu0 %v1185_v1  ;;  %7299 = vmatpush3.bf16.msra.mxu1 %v1243_v45  ;;  %v1277_v1 = vld [vmem:[#allocation2 + $0x4f8] sm:$0xff]  ;;  %v1446_v45 = vld [vmem:[#allocation2 + $0xa40] sm:$0xff] }
 0x2f2   :  { %1970 = vmatprep.subr.bf16.mxu0 %v1193_v27  ;;  %7300 = vmatprep.subr.bf16.mxu1 %v1306_v39  ;;  %v1276_v27 = vld [vmem:[#allocation2 + $0x4f0] sm:$0xff]  ;;  %v1390_v39 = vld [vmem:[#allocation2 + $0x880] sm:$0xff] }
 0x2f5   :  { %1971 = vmatpush1.bf16.msra.mxu0 %v1192_v60  ;;  %7301 = vmatpush3.bf16.msra.mxu1 %v1250_v11  ;;  %v1284_v60 = vld [vmem:[#allocation2 + $0x530] sm:$0xff]  ;;  %v1453_v11 = vld [vmem:[#allocation2 + $0xa78] sm:$0xff] }
 0x2f6   :  { %1972 = vmatprep.subr.bf16.mxu0 %v1200_v12  ;;  %7302 = vmatprep.subr.bf16.mxu1 %v1313_v25  ;;  %v1283_v12 = vld [vmem:[#allocation2 + $0x528] sm:$0xff]  ;;  %v1397_v25 = vld [vmem:[#allocation2 + $0x8b8] sm:$0xff] }
 0x2f9   :  { %1973 = vmatpush1.bf16.msra.mxu0 %v1199_v36  ;;  %7303 = vmatpush3.bf16.msra.mxu1 %v1257_v31  ;;  %v1291_v36 = vld [vmem:[#allocation2 + $0x568] sm:$0xff]  ;;  %v1516_v31 = vld [vmem:[#allocation2 + $0xc70] sm:$0xff] }
 0x2fa   :  { %1974 = vmatprep.subr.bf16.mxu0 %v1207_v38  ;;  %7304 = vmatprep.subr.bf16.mxu1 %v1320_v47  ;;  %v1290_v38 = vld [vmem:[#allocation2 + $0x560] sm:$0xff]  ;;  %v1460_v47 = vld [vmem:[#allocation2 + $0xab0] sm:$0xff] }
 0x2fd   :  { %1975 = vmatpush1.bf16.msra.mxu0 %v1206_v49  ;;  %7305 = vmatpush3.bf16.msra.mxu1 %v1264_v5  ;;  %v1298_v49 = vld [vmem:[#allocation2 + $0x5a0] sm:$0xff]  ;;  %v1523_v5 = vld [vmem:[#allocation2 + $0xca8] sm:$0xff] }
 0x2fe   :  { %1976 = vmatprep.subr.bf16.mxu0 %v1214_v19  ;;  %7306 = vmatprep.subr.bf16.mxu1 %v1327_v17  ;;  %v1297_v19 = vld [vmem:[#allocation2 + $0x598] sm:$0xff]  ;;  %v1467_v17 = vld [vmem:[#allocation2 + $0xae8] sm:$0xff] }
 0x301   :  { %1977 = vmatpush1.bf16.msra.mxu0 %v1213_v7  ;;  %7307 = vmatpush3.bf16.msra.mxu1 %v1271_v8  ;;  %v1305_v7 = vld [vmem:[#allocation2 + $0x5d8] sm:$0xff]  ;;  %v1530_v8 = vld [vmem:[#allocation2 + $0xce0] sm:$0xff] }
 0x302   :  { %1978 = vmatprep.subr.bf16.mxu0 %v1221_v13  ;;  %7308 = vmatprep.subr.bf16.mxu1 %v1334_v54  ;;  %v1304_v13 = vld [vmem:[#allocation2 + $0x5d0] sm:$0xff]  ;;  %v1474_v54 = vld [vmem:[#allocation2 + $0xb20] sm:$0xff] }
 0x305   :  { %1979 = vmatpush1.bf16.msra.mxu0 %v1220_v15  ;;  %7309 = vmatpush3.bf16.msra.mxu1 %v1278_v23  ;;  %v1312_v15 = vld [vmem:[#allocation2 + $0x610] sm:$0xff]  ;;  %v1537_v23 = vld [vmem:[#allocation2 + $0xd18] sm:$0xff] }
 0x306   :  { %1980 = vmatprep.subr.bf16.mxu0 %v1228_v55  ;;  %7310 = vmatprep.subr.bf16.mxu1 %v1341_v34  ;;  %v1311_v55 = vld [vmem:[#allocation2 + $0x608] sm:$0xff]  ;;  %v1481_v34 = vld [vmem:[#allocation2 + $0xb58] sm:$0xff] }
 0x309   :  { %1981 = vmatpush1.bf16.msra.mxu0 %v1227_v51  ;;  %7311 = vmatpush3.bf16.msra.mxu1 %v1285_v56  ;;  %v1319_v51 = vld [vmem:[#allocation2 + $0x648] sm:$0xff]  ;;  %v1544_v56 = vld [vmem:[#allocation2 + $0xd50] sm:$0xff] }
 0x30a   :  { %1993 = vmatprep.subr.bf16.mxu0 %v1235_v6  ;;  %7318 = vmatprep.subr.bf16.mxu1 %v1404_v26  ;;  %v1318_v6 = vld [vmem:[#allocation2 + $0x640] sm:$0xff]  ;;  %v1488_v26 = vld [vmem:[#allocation2 + $0xb90] sm:$0xff] }
 0x30c   :  { %1983 = vmatmul.mubr.bf16.vlgmr.msra.gmra.mrb[4].mxu0 %v8565_v30  ;;  %2196 = vmatmul.mubr.bf16.vlgmr.msra.gmra.mrb[24].mxu1 %v8577_v16  ;;  %v1362_v30 = vld [vmem:[#allocation2 + $0x7a0] sm:$0xff] }
 0x30d   :  { %1994 = vmatpush1.bf16.msra.mxu0 %v1234_v63  ;;  %7319 = vmatpush3.bf16.msra.mxu1 %v1348_v48  ;;  %v1326_v63 = vld [vmem:[#allocation2 + $0x680] sm:$0xff]  ;;  %v1551_v48 = vld [vmem:[#allocation2 + $0xd88] sm:$0xff] }
 0x30e   :  { %1995 = vmatprep.subr.bf16.mxu0 %v1242_v62  ;;  %7320 = vmatprep.subr.bf16.mxu1 %v1411_v22  ;;  %v1325_v62 = vld [vmem:[#allocation2 + $0x678] sm:$0xff]  ;;  %v1495_v22 = vld [vmem:[#allocation2 + $0xbc8] sm:$0xff] }
 0x30f   :  { %2236 = vmatprep.mubr.bf16.mxu1 %v8581_v46  ;;  %2025 = vmatprep.mubr.bf16.mxu0 %v8569_v43  ;;  %v1262_v43 = vld [vmem:[#allocation2 + $0x480] sm:$0xff] }
 0x311   :  { %1996 = vmatpush1.bf16.msra.mxu0 %v1241_v52  ;;  %7321 = vmatpush3.bf16.msra.mxu1 %v1355_v32  ;;  %v1333_v52 = vld [vmem:[#allocation2 + $0x6b8] sm:$0xff]  ;;  %v1558_v32 = vld [vmem:[#allocation2 + $0xdc0] sm:$0xff] }
 0x312   :  { %1997 = vmatprep.subr.bf16.mxu0 %v1249_v20  ;;  %7322 = vmatprep.subr.bf16.mxu1 %v1418_v21  ;;  %v1332_v20 = vld [vmem:[#allocation2 + $0x6b0] sm:$0xff]  ;;  %v1502_v21 = vld [vmem:[#allocation2 + $0xc00] sm:$0xff] }
 0x315   :  { %1998 = vmatpush1.bf16.msra.mxu0 %v1248_v58  ;;  %7323 = vmatpush3.bf16.msra.mxu1 %v1362_v30  ;;  %v1340_v58 = vld [vmem:[#allocation2 + $0x6f0] sm:$0xff]  ;;  %v1565_v30 = vld [vmem:[#allocation2 + $0xdf8] sm:$0xff] }
 0x316   :  { %1999 = vmatprep.subr.bf16.mxu0 %v1256_v3  ;;  %7324 = vmatprep.subr.bf16.mxu1 %v1425_v14  ;;  %v1339_v3 = vld [vmem:[#allocation2 + $0x6e8] sm:$0xff]  ;;  %v1509_v14 = vld [vmem:[#allocation2 + $0xc38] sm:$0xff] }
 0x319   :  { %2000 = vmatpush1.bf16.msra.mxu0 %v1255_v28  ;;  %7325 = vmatpush3.bf16.msra.mxu1 %v1369_v44  ;;  %v1347_v28 = vld [vmem:[#allocation2 + $0x728] sm:$0xff]  ;;  %v1346_v44 = vld [vmem:[#allocation2 + $0x720] sm:$0xff] }
 0x31a   :  { %2001 = vmatprep.subr.bf16.mxu0 %v1263_v59  ;;  %7326 = vmatprep.subr.bf16.mxu1 %v1432_v24  ;;  %v1354_v59 = vld [vmem:[#allocation2 + $0x760] sm:$0xff]  ;;  %v1353_v24 = vld [vmem:[#allocation2 + $0x758] sm:$0xff] }
 0x31d   :  { %2002 = vmatpush1.bf16.msra.mxu0 %v1262_v43  ;;  %7327 = vmatpush3.bf16.msra.mxu1 %v1376_v4  ;;  %v1361_v43 = vld [vmem:[#allocation2 + $0x798] sm:$0xff]  ;;  %v1360_v4 = vld [vmem:[#allocation2 + $0x790] sm:$0xff] }
 0x31e   :  { %2003 = vmatprep.subr.bf16.mxu0 %v1270_v33  ;;  %7328 = vmatprep.subr.bf16.mxu1 %v1439_v37  ;;  %v1368_v33 = vld [vmem:[#allocation2 + $0x7d0] sm:$0xff]  ;;  %v1367_v37 = vld [vmem:[#allocation2 + $0x7c8] sm:$0xff] }
 0x321   :  { %2004 = vmatpush1.bf16.msra.mxu0 %v1269_v18  ;;  %7329 = vmatpush3.bf16.msra.mxu1 %v1383_v29  ;;  %v1375_v18 = vld [vmem:[#allocation2 + $0x808] sm:$0xff]  ;;  %v1374_v29 = vld [vmem:[#allocation2 + $0x800] sm:$0xff] }
 0x322   :  { %2005 = vmatprep.subr.bf16.mxu0 %v1277_v1  ;;  %7330 = vmatprep.subr.bf16.mxu1 %v1446_v45  ;;  %v1381_v1 = vld [vmem:[#allocation2 + $0x838] sm:$0xff] }
 0x323   :  { %v1389_v45 = vld [vmem:[#allocation2 + $0x878] sm:$0xff] }
 0x325   :  { %2006 = vmatpush1.bf16.msra.mxu0 %v1276_v27  ;;  %7331 = vmatpush3.bf16.msra.mxu1 %v1390_v39  ;;  %v1396_v27 = vld [vmem:[#allocation2 + $0x8b0] sm:$0xff]  ;;  %v1395_v39 = vld [vmem:[#allocation2 + $0x8a8] sm:$0xff] }
 0x326   :  { %2007 = vmatprep.subr.bf16.mxu0 %v1284_v60  ;;  %7332 = vmatprep.subr.bf16.mxu1 %v1453_v11  ;;  %v1403_v60 = vld [vmem:[#allocation2 + $0x8e8] sm:$0xff]  ;;  %v1402_v11 = vld [vmem:[#allocation2 + $0x8e0] sm:$0xff] }
 0x329   :  { %2008 = vmatpush1.bf16.msra.mxu0 %v1283_v12  ;;  %7333 = vmatpush3.bf16.msra.mxu1 %v1397_v25  ;;  %v1410_v12 = vld [vmem:[#allocation2 + $0x920] sm:$0xff]  ;;  %v1409_v25 = vld [vmem:[#allocation2 + $0x918] sm:$0xff] }
 0x32a   :  { %2009 = vmatprep.subr.bf16.mxu0 %v1291_v36  ;;  %7340 = vmatprep.subr.bf16.mxu1 %v1516_v31  ;;  %v1417_v36 = vld [vmem:[#allocation2 + $0x958] sm:$0xff]  ;;  %v1416_v31 = vld [vmem:[#allocation2 + $0x950] sm:$0xff] }
 0x32c   :  { %2237 = vmatmul.mubr.bf16.vlgmr.msra.gmra.mrb[28].mxu1 %v8589_v40 }
 0x32d   :  { %2010 = vmatpush1.bf16.msra.mxu0 %v1290_v38  ;;  %7341 = vmatpush3.bf16.msra.mxu1 %v1460_v47  ;;  %v1424_v38 = vld [vmem:[#allocation2 + $0x990] sm:$0xff]  ;;  %v1423_v47 = vld [vmem:[#allocation2 + $0x988] sm:$0xff] }
 0x32e   :  { %2011 = vmatprep.subr.bf16.mxu0 %v1298_v49  ;;  %7342 = vmatprep.subr.bf16.mxu1 %v1523_v5  ;;  %v1431_v49 = vld [vmem:[#allocation2 + $0x9c8] sm:$0xff]  ;;  %v1430_v5 = vld [vmem:[#allocation2 + $0x9c0] sm:$0xff] }
 0x32f   :  { %2277 = vmatprep.mubr.bf16.mxu1 %v8593_v9 }
 0x331   :  { %2012 = vmatpush1.bf16.msra.mxu0 %v1297_v19  ;;  %7343 = vmatpush3.bf16.msra.mxu1 %v1467_v17  ;;  %v1438_v19 = vld [vmem:[#allocation2 + $0xa00] sm:$0xff]  ;;  %v1437_v17 = vld [vmem:[#allocation2 + $0x9f8] sm:$0xff] }
 0x332   :  { %2013 = vmatprep.subr.bf16.mxu0 %v1305_v7  ;;  %7344 = vmatprep.subr.bf16.mxu1 %v1530_v8  ;;  %v1445_v7 = vld [vmem:[#allocation2 + $0xa38] sm:$0xff]  ;;  %v1444_v8 = vld [vmem:[#allocation2 + $0xa30] sm:$0xff] }
 0x335   :  { %2014 = vmatpush1.bf16.msra.mxu0 %v1304_v13  ;;  %7345 = vmatpush3.bf16.msra.mxu1 %v1474_v54  ;;  %v1452_v13 = vld [vmem:[#allocation2 + $0xa70] sm:$0xff]  ;;  %v1451_v54 = vld [vmem:[#allocation2 + $0xa68] sm:$0xff] }
 0x336   :  { %2015 = vmatprep.subr.bf16.mxu0 %v1312_v15  ;;  %7346 = vmatprep.subr.bf16.mxu1 %v1537_v23  ;;  %v1459_v15 = vld [vmem:[#allocation2 + $0xaa8] sm:$0xff]  ;;  %v1458_v23 = vld [vmem:[#allocation2 + $0xaa0] sm:$0xff] }
 0x339   :  { %2016 = vmatpush1.bf16.msra.mxu0 %v1311_v55  ;;  %7347 = vmatpush3.bf16.msra.mxu1 %v1481_v34  ;;  %v1466_v55 = vld [vmem:[#allocation2 + $0xae0] sm:$0xff]  ;;  %v1465_v34 = vld [vmem:[#allocation2 + $0xad8] sm:$0xff] }
 0x33a   :  { %2017 = vmatprep.subr.bf16.mxu0 %v1319_v51  ;;  %7348 = vmatprep.subr.bf16.mxu1 %v1544_v56  ;;  %v1473_v51 = vld [vmem:[#allocation2 + $0xb18] sm:$0xff]  ;;  %v1472_v56 = vld [vmem:[#allocation2 + $0xb10] sm:$0xff] }
 0x33d   :  { %2018 = vmatpush1.bf16.msra.mxu0 %v1318_v6  ;;  %7349 = vmatpush3.bf16.msra.mxu1 %v1488_v26  ;;  %v1480_v6 = vld [vmem:[#allocation2 + $0xb50] sm:$0xff] }
 0x33e   :  { %2019 = vmatprep.subr.bf16.mxu0 %v1326_v63  ;;  %7350 = vmatprep.subr.bf16.mxu1 %v1551_v48  ;;  %v1567_v26 = vld [vmem:[#allocation12 + $0x3] ss:$8 sm:$0xf] }
 0x33f   :  { %v1568_v63 = vld [vmem:[#allocation12 + $0x3] ss:$8 sm:$0xf0] }
 0x340   :  { %v1479_v48 = vld [vmem:[#allocation2 + $0xb48] sm:$0xff] }
 0x341   :  { %2020 = vmatpush1.bf16.msra.mxu0 %v1325_v62  ;;  %7351 = vmatpush3.bf16.msra.mxu1 %v1495_v22  ;;  %v1487_v62 = vld [vmem:[#allocation2 + $0xb88] sm:$0xff]  ;;  %v8620_v22 = vor.u32 %v1568_v63, %v1567_v26 }
 0x342   :  { %2021 = vmatprep.subr.bf16.mxu0 %v1333_v52  ;;  %7352 = vmatprep.subr.bf16.mxu1 %v1558_v32  ;;  %v1494_v52 = vld [vmem:[#allocation2 + $0xbc0] sm:$0xff] }
 0x343   :  { %v1582_v32 = vrot.slane %v8620_v22, %v8256_v50 }
 0x345   :  { %2022 = vmatpush1.bf16.msra.mxu0 %v1332_v20  ;;  %7353 = vmatpush3.bf16.msra.mxu1 %v1502_v21  ;;  %v1578_v20 = vrot.slane %v8620_v22, %v8252_v42  ;;  %v1586_v21 = vrot.slane %v8620_v22, %v8258_v53 }
 0x346   :  { %2023 = vmatprep.subr.bf16.mxu0 %v1340_v58  ;;  %7354 = vmatprep.subr.bf16.mxu1 %v1565_v30  ;;  %v1493_v58 = vld [vmem:[#allocation2 + $0xbb8] sm:$0xff] }
 0x349   :  { %2024 = vmatpush1.bf16.msra.mxu0 %v1339_v3  ;;  %7355 = vmatpush3.bf16.msra.mxu1 %v1509_v14  ;;  %v1501_v14 = vld [vmem:[#allocation2 + $0xbf8] sm:$0xff] }
 0x34a   :  { %2036 = vmatprep.subr.bf16.mxu0 %v1347_v28 }
 0x34c   :  { %2026 = vmatmul.mubr.bf16.vlgmr.msra.gmra.mrb[4].mxu0 %v8577_v16  ;;  %2278 = vmatmul.mubr.bf16.vlgmr.msra.gmra.mrb[32].mxu1 %v8601_v35  ;;  %v1382_v16 = vld [vmem:[#allocation2 + $0x840] sm:$0xff] }
 0x34d   :  { %2037 = vmatpush1.bf16.msra.mxu0 %v1346_v44  ;;  %2068 = vmatprep.mubr.bf16.mxu0 %v8581_v46  ;;  %v1388_v46 = vld [vmem:[#allocation2 + $0x870] sm:$0xff] }
 0x34e   :  { %2038 = vmatprep.subr.bf16.mxu0 %v1354_v59 }
 0x351   :  { %2039 = vmatpush1.bf16.msra.mxu0 %v1353_v24 }
 0x352   :  { %2040 = vmatprep.subr.bf16.mxu0 %v1361_v43 }
 0x355   :  { %2041 = vmatpush1.bf16.msra.mxu0 %v1360_v4 }
 0x356   :  { %2042 = vmatprep.subr.bf16.mxu0 %v1368_v33 }
 0x359   :  { %2043 = vmatpush1.bf16.msra.mxu0 %v1367_v37 }
 0x35a   :  { %2044 = vmatprep.subr.bf16.mxu0 %v1375_v18 }
 0x35d   :  { %2045 = vmatpush1.bf16.msra.mxu0 %v1374_v29 }
 0x35e   :  { %2046 = vmatprep.subr.bf16.mxu0 %v1382_v16 }
 0x361   :  { %2047 = vmatpush1.bf16.msra.mxu0 %v1381_v1 }
 0x362   :  { %2048 = vmatprep.subr.bf16.mxu0 %v1389_v45 }
 0x365   :  { %2049 = vmatpush1.bf16.msra.mxu0 %v1388_v46 }
 0x366   :  { %2050 = vmatprep.subr.bf16.mxu0 %v1396_v27  ;;  %v1500_v27 = vld [vmem:[#allocation2 + $0xbf0] sm:$0xff] }
 0x369   :  { %2051 = vmatpush1.bf16.msra.mxu0 %v1395_v39 }
 0x36a   :  { %2052 = vmatprep.subr.bf16.mxu0 %v1403_v60 }
 0x36d   :  { %2053 = vmatpush1.bf16.msra.mxu0 %v1402_v11 }
 0x36e   :  { %2054 = vmatprep.subr.bf16.mxu0 %v1410_v12 }
 0x371   :  { %2055 = vmatpush1.bf16.msra.mxu0 %v1409_v25  ;;  %v1508_v25 = vld [vmem:[#allocation2 + $0xc30] sm:$0xff] }
 0x372   :  { %2056 = vmatprep.subr.bf16.mxu0 %v1417_v36 }
 0x375   :  { %2057 = vmatpush1.bf16.msra.mxu0 %v1416_v31 }
 0x376   :  { %2058 = vmatprep.subr.bf16.mxu0 %v1424_v38 }
 0x379   :  { %2059 = vmatpush1.bf16.msra.mxu0 %v1423_v47 }
 0x37a   :  { %2060 = vmatprep.subr.bf16.mxu0 %v1431_v49 }
 0x37d   :  { %2061 = vmatpush1.bf16.msra.mxu0 %v1430_v5 }
 0x37e   :  { %2062 = vmatprep.subr.bf16.mxu0 %v1438_v19 }
 0x381   :  { %2063 = vmatpush1.bf16.msra.mxu0 %v1437_v17 }
 0x382   :  { %2064 = vmatprep.subr.bf16.mxu0 %v1445_v7 }
 0x385   :  { %2065 = vmatpush1.bf16.msra.mxu0 %v1444_v8 }
 0x386   :  { %2066 = vmatprep.subr.bf16.mxu0 %v1452_v13 }
 0x389   :  { %2067 = vmatpush1.bf16.msra.mxu0 %v1451_v54 }
 0x38a   :  { %2079 = vmatprep.subr.bf16.mxu0 %v1459_v15  ;;  %v1507_v15 = vld [vmem:[#allocation2 + $0xc28] sm:$0xff] }
 0x38c   :  { %2069 = vmatmul.mubr.bf16.vlgmr.msra.gmra.mrb[4].mxu0 %v8589_v40  ;;  %v1486_v40 = vld [vmem:[#allocation2 + $0xb80] sm:$0xff] }
 0x38d   :  { %2080 = vmatpush1.bf16.msra.mxu0 %v1458_v23  ;;  %2111 = vmatprep.mubr.bf16.mxu0 %v8593_v9  ;;  %v1574_v9 = vrot.slane %v8620_v22, %v8250_v41 }
 0x38e   :  { %2081 = vmatprep.subr.bf16.mxu0 %v1466_v55 }
 0x391   :  { %2082 = vmatpush1.bf16.msra.mxu0 %v1465_v34 }
 0x392   :  { %2083 = vmatprep.subr.bf16.mxu0 %v1473_v51 }
 0x395   :  { %2084 = vmatpush1.bf16.msra.mxu0 %v1472_v56  ;;  %v1515_v56 = vld [vmem:[#allocation2 + $0xc68] sm:$0xff] }
 0x396   :  { %2085 = vmatprep.subr.bf16.mxu0 %v1480_v6 }
 0x399   :  { %2086 = vmatpush1.bf16.msra.mxu0 %v1479_v48 }
 0x39a   :  { %2087 = vmatprep.subr.bf16.mxu0 %v1487_v62 }
 0x39d   :  { %2088 = vmatpush1.bf16.msra.mxu0 %v1486_v40 }
 0x39e   :  { %2089 = vmatprep.subr.bf16.mxu0 %v1494_v52 }
 0x39f   :  { %v1769_v30 = vpop.f32.mrb[0].mxu0  ;;  %v1941_v3 = vpop.f32.mrb[16].mxu1 }
 0x3a0   :  { %v7647_v28 = vadd.f32 %v1769_v30, %v1574_v9  ;;  %v7651_v44 = vadd.f32 %v1941_v3, %v1582_v32  ;;  %v1771_v59 = vpop.f32.mrb[1].mxu0  ;;  %v1943_v24 = vpop.f32.mrb[17].mxu1  ;;  %v1514_v30 = vld [vmem:[#allocation2 + $0xc60] sm:$0xff] }
 0x3a1   :  { %v7648_v43 = vadd.f32 %v1771_v59, %v1578_v20  ;;  %v7652_v4 = vadd.f32 %v1943_v24, %v1586_v21  ;;  %v1773_v33 = vpop.f32.mrb[2].mxu0  ;;  %v1945_v37 = vpop.f32.mrb[18].mxu1  ;;  %2090 = vmatpush1.bf16.msra.mxu0 %v1493_v58  ;;  %v1522_v59 = vld [vmem:[#allocation2 + $0xca0] sm:$0xff] }
 0x3a2   :  { %v8630_v18 = vmax.f32 %v7647_v28, 0.0  ;;  %v8632_v29 = vmax.f32 %v7651_v44, 0.0  ;;  %v7649_v16 = vadd.f32 %v1773_v33, %v1574_v9  ;;  %v7653_v1 = vadd.f32 %v1945_v37, %v1582_v32  ;;  %v1775_v45 = vpop.f32.mrb[3].mxu0  ;;  %v1947_v46 = vpop.f32.mrb[19].mxu1  ;;  %2091 = vmatprep.subr.bf16.mxu0 %v1501_v14 }
 0x3a3   :  { %v8634_v39 = vmax.f32 %v7648_v43, 0.0  ;;  %v8636_v60 = vmax.f32 %v7652_v4, 0.0  ;;  %v7650_v11 = vadd.f32 %v1775_v45, %v1578_v20  ;;  %v7654_v12 = vadd.f32 %v1947_v46, %v1586_v21 }
 0x3a4   :  { %v2308_v36 = vrot.slane %v8630_v18, 4  ;;  %v2320_v31 = vrot.slane %v8632_v29, 4  ;;  %v8640_v38 = vmax.f32 %v7649_v16, 0.0  ;;  %v8642_v47 = vmax.f32 %v7653_v1, 0.0 }
 0x3a5   :  { %v2314_v49 = vrot.slane %v8634_v39, 4  ;;  %v2326_v5 = vrot.slane %v8636_v60, 4  ;;  %v8646_v19 = vmax.f32 %v7650_v11, 0.0  ;;  %v8648_v17 = vmax.f32 %v7654_v12, 0.0  ;;  %2092 = vmatpush1.bf16.msra.mxu0 %v1500_v27 }
 0x3a6   :  { %v2309_v7 = vadd.f32 %v2308_v36, %v8630_v18  ;;  %v2321_v8 = vadd.f32 %v2320_v31, %v8632_v29  ;;  %v2350_v13 = vrot.slane %v8640_v38, 4  ;;  %v2362_v54 = vrot.slane %v8642_v47, 4  ;;  %2093 = vmatprep.subr.bf16.mxu0 %v1508_v25  ;;  %v1521_v25 = vld [vmem:[#allocation2 + $0xc98] sm:$0xff] }
 0x3a7   :  { %v2315_v23 = vadd.f32 %v2314_v49, %v8634_v39  ;;  %v2327_v55 = vadd.f32 %v2326_v5, %v8636_v60  ;;  %v2356_v34 = vrot.slane %v8646_v19, 4  ;;  %v2368_v51 = vrot.slane %v8648_v17, 4 }
 0x3a8   :  { %v2310_v6 = vrot.slane %v2309_v7, 2  ;;  %v2322_v26 = vrot.slane %v2321_v8, 2  ;;  %v2351_v63 = vadd.f32 %v2350_v13, %v8640_v38  ;;  %v2363_v48 = vadd.f32 %v2362_v54, %v8642_v47 }
 0x3a9   :  { %v2316_v62 = vrot.slane %v2315_v23, 2  ;;  %v2328_v40 = vrot.slane %v2327_v55, 2  ;;  %v2357_v52 = vadd.f32 %v2356_v34, %v8646_v19  ;;  %v2369_v9 = vadd.f32 %v2368_v51, %v8648_v17  ;;  %2094 = vmatpush1.bf16.msra.mxu0 %v1507_v15 }
 0x3aa   :  { %v2311_v32 = vadd.f32 %v2310_v6, %v2309_v7  ;;  %v2323_v20 = vadd.f32 %v2322_v26, %v2321_v8  ;;  %v2352_v21 = vrot.slane %v2351_v63, 2  ;;  %v2364_v58 = vrot.slane %v2363_v48, 2  ;;  %2095 = vmatprep.subr.bf16.mxu0 %v1515_v56  ;;  %v1529_v7 = vld [vmem:[#allocation2 + $0xcd8] sm:$0xff] }
 0x3ab   :  { %v2317_v3 = vadd.f32 %v2316_v62, %v2315_v23  ;;  %v2329_v14 = vadd.f32 %v2328_v40, %v2327_v55  ;;  %v2358_v28 = vrot.slane %v2357_v52, 2  ;;  %v2370_v44 = vrot.slane %v2369_v9, 2 }
 0x3ac   :  { %v2312_v24 = vrot.slane %v2311_v32, 1  ;;  %v2324_v43 = vrot.slane %v2323_v20, 1  ;;  %v2353_v4 = vadd.f32 %v2352_v21, %v2351_v63  ;;  %v2365_v33 = vadd.f32 %v2364_v58, %v2363_v48  ;;  %v1528_v48 = vld [vmem:[#allocation2 + $0xcd0] sm:$0xff] }
 0x3ad   :  { %v2318_v37 = vrot.slane %v2317_v3, 1  ;;  %v2330_v16 = vrot.slane %v2329_v14, 1  ;;  %v2359_v1 = vadd.f32 %v2358_v28, %v2357_v52  ;;  %v2371_v45 = vadd.f32 %v2370_v44, %v2369_v9  ;;  %2096 = vmatpush1.bf16.msra.mxu0 %v1514_v30  ;;  %v1535_v28 = vld [vmem:[#allocation2 + $0xd08] sm:$0xff] }
 0x3ae   :  { %v2313_v46 = vadd.f32 %v2312_v24, %v2311_v32  ;;  %v2325_v27 = vadd.f32 %v2324_v43, %v2323_v20  ;;  %v2354_v11 = vrot.slane %v2353_v4, 1  ;;  %v2366_v12 = vrot.slane %v2365_v33, 1  ;;  %2097 = vmatprep.subr.bf16.mxu0 %v1522_v59  ;;  %v1536_v32 = vld [vmem:[#allocation2 + $0xd10] sm:$0xff]  ;;  %v1543_v24 = vld [vmem:[#allocation2 + $0xd48] sm:$0xff] }
 0x3af   :  { %v2319_v36 = vadd.f32 %v2318_v37, %v2317_v3  ;;  %v2331_v31 = vadd.f32 %v2330_v16, %v2329_v14  ;;  %v2360_v49 = vrot.slane %v2359_v1, 1  ;;  %v2372_v5 = vrot.slane %v2371_v45, 1 }
 0x3b0   :  { %v2392_v8 = vmul.f32 0.125, %v2313_v46  ;;  %v2394_v13 = vmul.f32 0.125, %v2325_v27  ;;  %v2355_v54 = vadd.f32 %v2354_v11, %v2353_v4  ;;  %v2367_v15 = vadd.f32 %v2366_v12, %v2365_v33 }
 0x3b1   :  { %v2393_v23 = vmul.f32 0.125, %v2319_v36  ;;  %v2395_v55 = vmul.f32 0.125, %v2331_v31  ;;  %v2361_v34 = vadd.f32 %v2360_v49, %v2359_v1  ;;  %v2373_v51 = vadd.f32 %v2372_v5, %v2371_v45  ;;  %2098 = vmatpush1.bf16.msra.mxu0 %v1521_v25  ;;  %v1542_v36 = vld [vmem:[#allocation2 + $0xd40] sm:$0xff] }
 0x3b2   :  { %v8663_v56 = vsub.f32 %v8630_v18, %v2392_v8  ;;  %v8666_v6 = vsub.f32 %v8632_v29, %v2394_v13  ;;  %v2399_v26 = vmul.f32 0.125, %v2355_v54  ;;  %v2401_v63 = vmul.f32 0.125, %v2367_v15  ;;  %2099 = vmatprep.subr.bf16.mxu0 %v1529_v7  ;;  %v1550_v8 = vld [vmem:[#allocation2 + $0xd80] sm:$0xff] }
 0x3b3   :  { %v8669_v62 = vsub.f32 %v8634_v39, %v2393_v23  ;;  %v8672_v40 = vsub.f32 %v8636_v60, %v2395_v55  ;;  %v2400_v52 = vmul.f32 0.125, %v2361_v34  ;;  %v2402_v9 = vmul.f32 0.125, %v2373_v51 }
 0x3b4   :  { %v2420_v18 = vmul.f32 %v8663_v56, %v8663_v56  ;;  %v2422_v29 = vmul.f32 %v8666_v6, %v8666_v6  ;;  %v8679_v20 = vsub.f32 %v8640_v38, %v2399_v26  ;;  %v8682_v21 = vsub.f32 %v8642_v47, %v2401_v63 }
 0x3b5   :  { %v2421_v39 = vmul.f32 %v8669_v62, %v8669_v62  ;;  %v2423_v60 = vmul.f32 %v8672_v40, %v8672_v40  ;;  %v8689_v58 = vsub.f32 %v8646_v19, %v2400_v52  ;;  %v8692_v30 = vsub.f32 %v8648_v17, %v2402_v9  ;;  %2100 = vmatpush1.bf16.msra.mxu0 %v1528_v48 }
 0x3b6   :  { %v2434_v3 = vrot.slane %v2420_v18, 4  ;;  %v2446_v14 = vrot.slane %v2422_v29, 4  ;;  %v2427_v38 = vmul.f32 %v8679_v20, %v8679_v20  ;;  %v2429_v47 = vmul.f32 %v8682_v21, %v8682_v21  ;;  %2101 = vmatprep.subr.bf16.mxu0 %v1536_v32  ;;  %v1549_v32 = vld [vmem:[#allocation2 + $0xd78] sm:$0xff] }
 0x3b7   :  { %v2440_v44 = vrot.slane %v2421_v39, 4  ;;  %v2452_v59 = vrot.slane %v2423_v60, 4  ;;  %v2428_v19 = vmul.f32 %v8689_v58, %v8689_v58  ;;  %v2430_v17 = vmul.f32 %v8692_v30, %v8692_v30 }
 0x3b8   :  { %v2435_v43 = vadd.f32 %v2434_v3, %v2420_v18  ;;  %v2447_v4 = vadd.f32 %v2446_v14, %v2422_v29  ;;  %v2476_v33 = vrot.slane %v2427_v38, 4  ;;  %v2488_v37 = vrot.slane %v2429_v47, 4  ;;  %v1557_v3 = vld [vmem:[#allocation2 + $0xdb8] sm:$0xff] }
 0x3b9   :  { %v2441_v16 = vadd.f32 %v2440_v44, %v2421_v39  ;;  %v2453_v1 = vadd.f32 %v2452_v59, %v2423_v60  ;;  %v2482_v45 = vrot.slane %v2428_v19, 4  ;;  %v2494_v46 = vrot.slane %v2430_v17, 4  ;;  %2102 = vmatpush1.bf16.msra.mxu0 %v1535_v28 }
 0x3ba   :  { %v2436_v27 = vrot.slane %v2435_v43, 2  ;;  %v2448_v11 = vrot.slane %v2447_v4, 2  ;;  %v2477_v12 = vadd.f32 %v2476_v33, %v2427_v38  ;;  %v2489_v25 = vadd.f32 %v2488_v37, %v2429_v47  ;;  %2103 = vmatprep.subr.bf16.mxu0 %v1543_v24 }
 0x3bb   :  { %v2442_v31 = vrot.slane %v2441_v16, 2  ;;  %v2454_v49 = vrot.slane %v2453_v1, 2  ;;  %v2483_v5 = vadd.f32 %v2482_v45, %v2428_v19  ;;  %v2495_v7 = vadd.f32 %v2494_v46, %v2430_v17  ;;  %v1556_v45 = vld [vmem:[#allocation2 + $0xdb0] sm:$0xff] }
 0x3bc   :  { %v2437_v13 = vadd.f32 %v2436_v27, %v2435_v43  ;;  %v2449_v54 = vadd.f32 %v2448_v11, %v2447_v4  ;;  %v2478_v15 = vrot.slane %v2477_v12, 2  ;;  %v2490_v23 = vrot.slane %v2489_v25, 2 }
 0x3bd   :  { %v2443_v55 = vadd.f32 %v2442_v31, %v2441_v16  ;;  %v2455_v34 = vadd.f32 %v2454_v49, %v2453_v1  ;;  %v2484_v51 = vrot.slane %v2483_v5, 2  ;;  %v2496_v26 = vrot.slane %v2495_v7, 2  ;;  %2104 = vmatpush1.bf16.msra.mxu0 %v1542_v36  ;;  %v1564_v36 = vld [vmem:[#allocation2 + $0xdf0] sm:$0xff] }
 0x3be   :  { %v2438_v63 = vrot.slane %v2437_v13, 1  ;;  %v2450_v48 = vrot.slane %v2449_v54, 1  ;;  %v2479_v52 = vadd.f32 %v2478_v15, %v2477_v12  ;;  %v2491_v9 = vadd.f32 %v2490_v23, %v2489_v25  ;;  %2105 = vmatprep.subr.bf16.mxu0 %v1550_v8 }
 0x3bf   :  { %v2444_v18 = vrot.slane %v2443_v55, 1  ;;  %v2456_v29 = vrot.slane %v2455_v34, 1  ;;  %v2485_v39 = vadd.f32 %v2484_v51, %v2483_v5  ;;  %v2497_v60 = vadd.f32 %v2496_v26, %v2495_v7  ;;  %v7290_v14 = vpop.f32.mrb[20].mxu1 }
 0x3c0   :  { %v2439_v38 = vadd.f32 %v2438_v63, %v2437_v13  ;;  %v2451_v47 = vadd.f32 %v2450_v48, %v2449_v54  ;;  %v2480_v28 = vrot.slane %v2479_v52, 1  ;;  %v2492_v44 = vrot.slane %v2491_v9, 1  ;;  %v7291_v59 = vpop.f32.mrb[21].mxu1 }
 0x3c1   :  { %v2445_v19 = vadd.f32 %v2444_v18, %v2443_v55  ;;  %v2457_v17 = vadd.f32 %v2456_v29, %v2455_v34  ;;  %v2486_v24 = vrot.slane %v2485_v39, 1  ;;  %v2498_v43 = vrot.slane %v2497_v60, 1  ;;  %2106 = vmatpush1.bf16.msra.mxu0 %v1549_v32  ;;  %v7293_v4 = vpop.f32.mrb[22].mxu1  ;;  %v1563_v55 = vld [vmem:[#allocation2 + $0xde8] sm:$0xff] }
 0x3c2   :  { %v2518_v33 = vmul.f32 0.125, %v2439_v38  ;;  %v2520_v37 = vmul.f32 0.125, %v2451_v47  ;;  %v2481_v16 = vadd.f32 %v2480_v28, %v2479_v52  ;;  %v2493_v1 = vadd.f32 %v2492_v44, %v2491_v9  ;;  %2107 = vmatprep.subr.bf16.mxu0 %v1557_v3  ;;  %v7294_v46 = vpop.f32.mrb[23].mxu1 }
 0x3c3   :  { %v2519_v27 = vmul.f32 0.125, %v2445_v19  ;;  %v2521_v11 = vmul.f32 0.125, %v2457_v17  ;;  %v2487_v12 = vadd.f32 %v2486_v24, %v2485_v39  ;;  %v2499_v25 = vadd.f32 %v2498_v43, %v2497_v60 }
 0x3c4   :  { %v2532_v31 = vadd.f32 1e-05, %v2518_v33  ;;  %v2534_v49 = vadd.f32 1e-05, %v2520_v37  ;;  %v2525_v5 = vmul.f32 0.125, %v2481_v16  ;;  %v2527_v7 = vmul.f32 0.125, %v2493_v1 }
 0x3c5   :  { %v2533_v8 = vadd.f32 1e-05, %v2519_v27  ;;  %v2535_v13 = vadd.f32 1e-05, %v2521_v11  ;;  %v2526_v54 = vmul.f32 0.125, %v2487_v12  ;;  %v2528_v15 = vmul.f32 0.125, %v2499_v25  ;;  %2108 = vmatpush1.bf16.msra.mxu0 %v1556_v45 }
 0x3c6   :  { %7891 = vrsqrt.f32 %v2532_v31  ;;  %v2539_v23 = vadd.f32 1e-05, %v2525_v5  ;;  %2109 = vmatprep.subr.bf16.mxu0 %v1564_v36  ;;  %v7292_v34 = vadd.f32 %v7291_v59, %v7290_v14  ;;  %v2541_v51 = vadd.f32 1e-05, %v2527_v7 }
 0x3c7   :  { %7893 = vrsqrt.f32 %v2534_v49  ;;  %v7295_v26 = vadd.f32 %v7294_v46, %v7293_v4  ;;  %v2540_v63 = vadd.f32 1e-05, %v2526_v54  ;;  %v2542_v48 = vadd.f32 1e-05, %v2528_v15 }
 0x3c8   :  { %7895 = vrsqrt.f32 %v2533_v8  ;;  %v1598_v24 = vrot.slane %v8620_v22, %v8272_v2 }
 0x3c9   :  { %7897 = vrsqrt.f32 %v2535_v13  ;;  %2110 = vmatpush1.bf16.msra.mxu0 %v1563_v55 }
 0x3ca   :  { %7899 = vrsqrt.f32 %v2539_v23  ;;  %v2157_v4 = vadd.f32 %v7292_v34, %v1598_v24  ;;  %v2160_v16 = vadd.f32 %v7295_v26, %v1598_v24 }
 0x3cb   :  { %7901 = vrsqrt.f32 %v2541_v51 }
 0x3cc   :  { %7903 = vrsqrt.f32 %v2540_v63  ;;  %2112 = vmatmul.mubr.bf16.vlgmr.msra.gmra.mrb[4].mxu0 %v8601_v35 }
 0x3cd   :  { %7905 = vrsqrt.f32 %v2542_v48 }
 0x3d0   :  { %v7892_v52 = vpop.eup %7891 }
 0x3d1   :  { %v7894_v9 = vpop.eup %7893 }
 0x3d2   :  { %v7896_v32 = vpop.eup %7895 }
 0x3d3   :  { %v7898_v18 = vpop.eup %7897  ;;  %v2574_v29 = vcombine.low %v7892_v52, %v7896_v32 }
 0x3d4   :  { %v7900_v39 = vpop.eup %7899  ;;  %v2575_v60 = vcombine.low %v7894_v9, %v7898_v18 }
 0x3d5   :  { %v7902_v3 = vpop.eup %7901  ;;  %v8704_v14 = vrot.slane %v2574_v29, %v8285_v10 }
 0x3d6   :  { %v7904_v38 = vpop.eup %7903  ;;  %v8707_v47 = vrot.slane %v2575_v60, %v8285_v10 }
 0x3d7   :  { %v7906_v28 = vpop.eup %7905  ;;  %v2622_v44 = vcombine.low %v7900_v39, %v7904_v38 }
 0x3d8   :  { %v2605_v35 = vcombine.low %v8704_v14, %v8707_v47  ;;  %v2623_v59 = vcombine.low %v7902_v3, %v7906_v28 }
 0x3d9   :  { %v8712_v19 = vrot.slane %v2622_v44, %v8285_v10 }
 0x3da   :  { %v8715_v17 = vrot.slane %v2623_v59, %v8285_v10 }
 0x3dc   :  { %v2653_v43 = vcombine.low %v8712_v19, %v8715_v17 }
 0x3df   :  { %v7312_v33 = vpop.f32.mrb[24].mxu1 }
 0x3e0   :  { %v7313_v37 = vpop.f32.mrb[25].mxu1 }
 0x3e1   :  { %v7314_v1 = vadd.f32 %v7313_v37, %v7312_v33  ;;  %v7315_v45 = vpop.f32.mrb[26].mxu1 }
 0x3e2   :  { %v7316_v46 = vpop.f32.mrb[27].mxu1 }
 0x3e3   :  { %v2198_v27 = vadd.f32 %v7314_v1, %v2157_v4  ;;  %v7317_v11 = vadd.f32 %v7316_v46, %v7315_v45  ;;  %v1594_v45 = vrot.slane %v8620_v22, %v8266_v61 }
 0x3e5   :  { %v2201_v12 = vadd.f32 %v7317_v11, %v2160_v16  ;;  %v1590_v16 = vrot.slane %v8620_v22, %v8262_v57 }
 0x3ff   :  { %v7334_v25 = vpop.f32.mrb[28].mxu1 }
 0x400   :  { %v7335_v36 = vpop.f32.mrb[29].mxu1 }
 0x401   :  { %v7336_v31 = vadd.f32 %v7335_v36, %v7334_v25  ;;  %v7337_v49 = vpop.f32.mrb[30].mxu1 }
 0x402   :  { %v7338_v5 = vpop.f32.mrb[31].mxu1 }
 0x403   :  { %v2239_v7 = vadd.f32 %v7336_v31, %v2198_v27  ;;  %v7339_v8 = vadd.f32 %v7338_v5, %v7337_v49 }
 0x405   :  { %v2242_v13 = vadd.f32 %v7339_v8, %v2201_v12 }
 0x41f   :  { %v7356_v54 = vpop.f32.mrb[32].mxu1 }
 0x420   :  { %v7357_v15 = vpop.f32.mrb[33].mxu1 }
 0x421   :  { %v7358_v23 = vadd.f32 %v7357_v15, %v7356_v54  ;;  %v7359_v55 = vpop.f32.mrb[34].mxu1 }
 0x422   :  { %v7360_v34 = vpop.f32.mrb[35].mxu1 }
 0x423   :  { %v2280_v51 = vadd.f32 %v7358_v23, %v2239_v7  ;;  %v7361_v26 = vadd.f32 %v7360_v34, %v7359_v55 }
 0x425   :  { %v2283_v63 = vadd.f32 %v7361_v26, %v2242_v13  ;;  %v2292_v48 = vmax.f32 %v2280_v51, 0.0 }
 0x427   :  { %v2299_v52 = vmax.f32 %v2283_v63, 0.0  ;;  %v2344_v9 = vrot.slane %v2292_v48, 4 }
 0x429   :  { %v2386_v32 = vrot.slane %v2299_v52, 4  ;;  %v2345_v18 = vadd.f32 %v2344_v9, %v2292_v48 }
 0x42b   :  { %v2387_v29 = vadd.f32 %v2386_v32, %v2299_v52  ;;  %v2346_v39 = vrot.slane %v2345_v18, 2 }
 0x42d   :  { %v2388_v60 = vrot.slane %v2387_v29, 2  ;;  %v2347_v3 = vadd.f32 %v2346_v39, %v2345_v18 }
 0x42f   :  { %v2389_v38 = vadd.f32 %v2388_v60, %v2387_v29  ;;  %v2348_v28 = vrot.slane %v2347_v3, 1 }
 0x431   :  { %v2390_v44 = vrot.slane %v2389_v38, 1  ;;  %v2349_v59 = vadd.f32 %v2348_v28, %v2347_v3 }
 0x433   :  { %v2391_v24 = vadd.f32 %v2390_v44, %v2389_v38  ;;  %v2398_v4 = vmul.f32 0.125, %v2349_v59 }
 0x435   :  { %v2405_v33 = vmul.f32 0.125, %v2391_v24  ;;  %v8721_v37 = vsub.f32 %v2292_v48, %v2398_v4 }
 0x437   :  { %v8725_v1 = vsub.f32 %v2299_v52, %v2405_v33  ;;  %v2426_v27 = vmul.f32 %v8721_v37, %v8721_v37 }
 0x439   :  { %v2433_v25 = vmul.f32 %v8725_v1, %v8725_v1  ;;  %v2470_v54 = vrot.slane %v2426_v27, 4 }
 0x43b   :  { %v2512_v22 = vrot.slane %v2433_v25, 4  ;;  %v2471_v52 = vadd.f32 %v2470_v54, %v2426_v27 }
 0x43d   :  { %v2513_v18 = vadd.f32 %v2512_v22, %v2433_v25  ;;  %v2472_v44 = vrot.slane %v2471_v52, 2 }
 0x43f   :  { %v2514_v4 = vrot.slane %v2513_v18, 2  ;;  %v2473_v27 = vadd.f32 %v2472_v44, %v2471_v52 }
 0x441   :  { %v2515_v25 = vadd.f32 %v2514_v4, %v2513_v18 }
 0x49f   :  { %v2113_v46 = vpop.f32.mrb[4].mxu0 }
 0x4a0   :  { %v7655_v11 = vadd.f32 %v2113_v46, %v1590_v16  ;;  %v2115_v12 = vpop.f32.mrb[5].mxu0 }
 0x4a1   :  { %v7656_v36 = vadd.f32 %v2115_v12, %v1594_v45  ;;  %v2117_v31 = vpop.f32.mrb[6].mxu0 }
 0x4a2   :  { %v2290_v49 = vmax.f32 %v7655_v11, 0.0  ;;  %v7657_v5 = vadd.f32 %v2117_v31, %v1590_v16  ;;  %v2119_v7 = vpop.f32.mrb[7].mxu0 }
 0x4a3   :  { %v2291_v8 = vmax.f32 %v7656_v36, 0.0  ;;  %v7658_v13 = vadd.f32 %v2119_v7, %v1594_v45 }
 0x4a4   :  { %v2332_v15 = vrot.slane %v2290_v49, 4  ;;  %v2297_v23 = vmax.f32 %v7657_v5, 0.0 }
 0x4a5   :  { %v2338_v55 = vrot.slane %v2291_v8, 4  ;;  %v2298_v34 = vmax.f32 %v7658_v13, 0.0 }
 0x4a6   :  { %v2333_v51 = vadd.f32 %v2332_v15, %v2290_v49  ;;  %v2374_v26 = vrot.slane %v2297_v23, 4 }
 0x4a7   :  { %v2339_v63 = vadd.f32 %v2338_v55, %v2291_v8  ;;  %v2380_v48 = vrot.slane %v2298_v34, 4  ;;  %v2474_v55 = vrot.slane %v2473_v27, 1 }
 0x4a8   :  { %v2334_v9 = vrot.slane %v2333_v51, 2  ;;  %v2375_v32 = vadd.f32 %v2374_v26, %v2297_v23 }
 0x4a9   :  { %v2340_v29 = vrot.slane %v2339_v63, 2  ;;  %v2381_v39 = vadd.f32 %v2380_v48, %v2298_v34  ;;  %v2475_v18 = vadd.f32 %v2474_v55, %v2473_v27 }
 0x4aa   :  { %v2335_v60 = vadd.f32 %v2334_v9, %v2333_v51  ;;  %v2376_v3 = vrot.slane %v2375_v32, 2 }
 0x4ab   :  { %v2341_v38 = vadd.f32 %v2340_v29, %v2339_v63  ;;  %v2382_v28 = vrot.slane %v2381_v39, 2  ;;  %v2516_v63 = vrot.slane %v2515_v25, 1 }
 0x4ac   :  { %v2336_v59 = vrot.slane %v2335_v60, 1  ;;  %v2377_v24 = vadd.f32 %v2376_v3, %v2375_v32 }
 0x4ad   :  { %v2342_v33 = vrot.slane %v2341_v38, 1  ;;  %v2383_v16 = vadd.f32 %v2382_v28, %v2381_v39 }
 0x4ae   :  { %v2337_v45 = vadd.f32 %v2336_v59, %v2335_v60  ;;  %v2378_v46 = vrot.slane %v2377_v24, 1  ;;  %v2517_v60 = vadd.f32 %v2516_v63, %v2515_v25 }
 0x4af   :  { %v2343_v11 = vadd.f32 %v2342_v33, %v2341_v38  ;;  %v2384_v12 = vrot.slane %v2383_v16, 1 }
 0x4b0   :  { %v2396_v36 = vmul.f32 0.125, %v2337_v45  ;;  %v2379_v31 = vadd.f32 %v2378_v46, %v2377_v24  ;;  %v2531_v33 = vmul.f32 0.125, %v2517_v60 }
 0x4b1   :  { %v2397_v5 = vmul.f32 0.125, %v2343_v11  ;;  %v2385_v7 = vadd.f32 %v2384_v12, %v2383_v16 }
 0x4b2   :  { %v8733_v13 = vsub.f32 %v2290_v49, %v2396_v36  ;;  %v2403_v54 = vmul.f32 0.125, %v2379_v31  ;;  %v2545_v25 = vadd.f32 1e-05, %v2531_v33  ;;  %v2301_v33 = vld [vmem:[#allocation12 + $0x4] ss:$8 sm:$0xf] }
 0x4b3   :  { %v8735_v15 = vsub.f32 %v2291_v8, %v2397_v5  ;;  %v2404_v22 = vmul.f32 0.125, %v2385_v7 }
 0x4b4   :  { %v2424_v51 = vmul.f32 %v8733_v13, %v8733_v13  ;;  %v8739_v26 = vsub.f32 %v2297_v23, %v2403_v54 }
 0x4b5   :  { %v2425_v48 = vmul.f32 %v8735_v15, %v8735_v15  ;;  %v8743_v52 = vsub.f32 %v2298_v34, %v2404_v22  ;;  %v2524_v34 = vmul.f32 0.125, %v2475_v18 }
 0x4b6   :  { %v2458_v9 = vrot.slane %v2424_v51, 4  ;;  %v2431_v49 = vmul.f32 %v8739_v26, %v8739_v26 }
 0x4b7   :  { %v2464_v32 = vrot.slane %v2425_v48, 4  ;;  %v2432_v8 = vmul.f32 %v8743_v52, %v8743_v52  ;;  %v2538_v27 = vadd.f32 1e-05, %v2524_v34  ;;  %v2306_v34 = vld [vmem:[#allocation12 + $0x5] ss:$8 sm:$0xf0] }
 0x4b8   :  { %v2459_v29 = vadd.f32 %v2458_v9, %v2424_v51  ;;  %v2500_v39 = vrot.slane %v2431_v49, 4 }
 0x4b9   :  { %v2465_v23 = vadd.f32 %v2464_v32, %v2425_v48  ;;  %v2506_v3 = vrot.slane %v2432_v8, 4  ;;  %7907 = vrsqrt.f32 %v2538_v27 }
 0x4ba   :  { %v2460_v38 = vrot.slane %v2459_v29, 2  ;;  %v2501_v28 = vadd.f32 %v2500_v39, %v2431_v49  ;;  %7909 = vrsqrt.f32 %v2545_v25  ;;  %v2661_v25 = vrot.slane %v2653_v43, %v8285_v10 }
 0x4bb   :  { %v2466_v44 = vrot.slane %v2465_v23, 2  ;;  %v2507_v59 = vadd.f32 %v2506_v3, %v2432_v8 }
 0x4bc   :  { %v2461_v24 = vadd.f32 %v2460_v38, %v2459_v29  ;;  %v2502_v4 = vrot.slane %v2501_v28, 2 }
 0x4bd   :  { %v2467_v16 = vadd.f32 %v2466_v44, %v2465_v23  ;;  %v2508_v45 = vrot.slane %v2507_v59, 2 }
 0x4be   :  { %v2462_v46 = vrot.slane %v2461_v24, 1  ;;  %v2503_v11 = vadd.f32 %v2502_v4, %v2501_v28 }
 0x4bf   :  { %v2468_v12 = vrot.slane %v2467_v16, 1  ;;  %v2509_v36 = vadd.f32 %v2508_v45, %v2507_v59  ;;  %v2305_v59 = vld [vmem:[#allocation12 + $0x5] ss:$8 sm:$0xf] }
 0x4c0   :  { %v2463_v31 = vadd.f32 %v2462_v46, %v2461_v24  ;;  %v2504_v5 = vrot.slane %v2503_v11, 1 }
 0x4c1   :  { %v2469_v7 = vadd.f32 %v2468_v12, %v2467_v16  ;;  %v2510_v54 = vrot.slane %v2509_v36, 1  ;;  %v2302_v16 = vld [vmem:[#allocation12 + $0x4] ss:$8 sm:$0xf0]  ;;  %v2307_v12 = vor.u32 %v2306_v34, %v2305_v59 }
 0x4c2   :  { %v2522_v22 = vmul.f32 0.125, %v2463_v31  ;;  %v2505_v55 = vadd.f32 %v2504_v5, %v2503_v11  ;;  %v2303_v27 = vor.u32 %v2302_v16, %v2301_v33 }
 0x4c3   :  { %v2523_v51 = vmul.f32 0.125, %v2469_v7  ;;  %v2511_v63 = vadd.f32 %v2510_v54, %v2509_v36  ;;  %v7908_v29 = vpop.eup %7907  ;;  %v2613_v36 = vrot.slane %v2605_v35, %v8285_v10  ;;  %v2772_v14 = vrot.slane %v2307_v12, %v8256_v50 }
 0x4c4   :  { %v2536_v48 = vadd.f32 1e-05, %v2522_v22  ;;  %v2529_v9 = vmul.f32 0.125, %v2505_v55  ;;  %v7910_v39 = vpop.eup %7909  ;;  %v2604_v44 = vrot.slane %v7908_v29, %v8285_v10  ;;  %v2764_v22 = vrot.slane %v2307_v12, %v8250_v41 }
 0x4c5   :  { %v2537_v49 = vadd.f32 1e-05, %v2523_v51  ;;  %v2530_v32 = vmul.f32 0.125, %v2511_v63  ;;  %v2652_v45 = vrot.slane %v7910_v39, %v8285_v10  ;;  %v2768_v51 = vrot.slane %v2307_v12, %v8252_v42 }
 0x4c6   :  { %7911 = vrsqrt.f32 %v2536_v48  ;;  %v2543_v8 = vadd.f32 1e-05, %v2529_v9  ;;  %v2776_v35 = vrot.slane %v2307_v12, %v8258_v53  ;;  %v2780_v63 = vrot.slane %v2307_v12, %v8262_v57 }
 0x4c7   :  { %7913 = vrsqrt.f32 %v2537_v49  ;;  %v2544_v18 = vadd.f32 1e-05, %v2530_v32  ;;  %v2784_v48 = vrot.slane %v2307_v12, %v8266_v61  ;;  %v2788_v19 = vrot.slane %v2307_v12, %v8272_v2 }
 0x4c8   :  { %7915 = vrsqrt.f32 %v2543_v8 }
 0x4c9   :  { %7917 = vrsqrt.f32 %v2544_v18 }
 0x4d0   :  { %v7912_v60 = vpop.eup %7911 }
 0x4d1   :  { %v7914_v23 = vpop.eup %7913 }
 0x4d2   :  { %v7916_v3 = vpop.eup %7915  ;;  %v2576_v38 = vcombine.low %v7912_v60, %v7914_v23 }
 0x4d3   :  { %v7918_v28 = vpop.eup %7917 }
 0x4d4   :  { %v2597_v24 = vrot.slane %v2576_v38, %v8285_v10  ;;  %v2624_v4 = vcombine.low %v7916_v3, %v7918_v28 }
 0x4d6   :  { %v2606_v46 = vcombine.low %v2597_v24, %v2604_v44  ;;  %v2645_v11 = vrot.slane %v2624_v4, %v8285_v10 }
 0x4d8   :  { %v2620_v31 = vrot.slane %v2606_v46, %v8285_v10  ;;  %v2654_v5 = vcombine.low %v2645_v11, %v2652_v45 }
 0x4da   :  { %v2621_v7 = vcombine.low %v2613_v36, %v2620_v31  ;;  %v2668_v54 = vrot.slane %v2654_v5, %v8285_v10 }
 0x4dc   :  { %v2672_v55 = vmul.f32 %v2621_v7, %v2303_v27  ;;  %v2669_v47 = vcombine.low %v2661_v25, %v2668_v54 }
 0x4de   :  { %v2679_v17 = vrot.slane %v2672_v55, %v8250_v41  ;;  %v2683_v43 = vrot.slane %v2672_v55, %v8252_v42  ;;  %v2687_v9 = vrot.slane %v2672_v55, %v8256_v50  ;;  %v2691_v49 = vrot.slane %v2672_v55, %v8258_v53 }
 0x4df   :  { %v2695_v32 = vrot.slane %v2672_v55, %v8262_v57  ;;  %v2699_v8 = vrot.slane %v2672_v55, %v8266_v61  ;;  %v2703_v18 = vrot.slane %v2672_v55, %v8272_v2  ;;  %v2673_v29 = vmul.f32 %v2669_v47, %v2303_v27 }
 0x4e0   :  { %v2746_v39 = vmul.f32 %v2679_v17, %v8663_v56  ;;  %v2747_v60 = vmul.f32 %v2683_v43, %v8669_v62  ;;  %v2748_v23 = vmul.f32 %v2687_v9, %v8666_v6  ;;  %v2749_v3 = vmul.f32 %v2691_v49, %v8672_v40 }
 0x4e1   :  { %v2750_v38 = vmul.f32 %v2695_v32, %v8733_v13  ;;  %v2751_v28 = vmul.f32 %v2699_v8, %v8735_v15  ;;  %v2752_v44 = vmul.f32 %v2703_v18, %v8721_v37  ;;  %v2707_v59 = vrot.slane %v2673_v29, %v8250_v41 }
 0x4e2   :  { %v8785_v34 = vadd.f32 %v2764_v22, %v2746_v39  ;;  %v2797_v24 = vadd.f32 %v2768_v51, %v2747_v60  ;;  %v8787_v4 = vadd.f32 %v2772_v14, %v2748_v23  ;;  %v8789_v56 = vadd.f32 %v2776_v35, %v2749_v3 }
 0x4e3   :  { %v8791_v62 = vadd.f32 %v2780_v63, %v2750_v38  ;;  %v8793_v6 = vadd.f32 %v2784_v48, %v2751_v28  ;;  %v8795_v40 = vadd.f32 %v2788_v19, %v2752_v44  ;;  %v2711_v13 = vrot.slane %v2673_v29, %v8252_v42 }
 0x4e4   :  { %v2715_v15 = vrot.slane %v2673_v29, %v8256_v50  ;;  %v2719_v37 = vrot.slane %v2673_v29, %v8258_v53  ;;  %v2723_v33 = vrot.slane %v2673_v29, %v8262_v57  ;;  %v2727_v16 = vrot.slane %v2673_v29, %v8266_v61 }
 0x4e5   :  { %v2731_v45 = vrot.slane %v2673_v29, %v8272_v2  ;;  %v2753_v46 = vmul.f32 %v2707_v59, %v8679_v20  ;;  %v2754_v11 = vmul.f32 %v2711_v13, %v8689_v58 }
 0x4e6   :  { %v2755_v12 = vmul.f32 %v2715_v15, %v8682_v21  ;;  %v2756_v36 = vmul.f32 %v2719_v37, %v8692_v30  ;;  %v2757_v27 = vmul.f32 %v2723_v33, %v8739_v26  ;;  %v2758_v31 = vmul.f32 %v2727_v16, %v8743_v52 }
 0x4e7   :  { %v2759_v5 = vmul.f32 %v2731_v45, %v8725_v1  ;;  %v8810_v25 = vadd.f32 %v2764_v22, %v2753_v46  ;;  %v2804_v7 = vadd.f32 %v2768_v51, %v2754_v11 }
 0x4e8   :  { %v8812_v54 = vadd.f32 %v2772_v14, %v2755_v12  ;;  %v8814_v55 = vadd.f32 %v2776_v35, %v2756_v36  ;;  %v8816_v20 = vadd.f32 %v2780_v63, %v2757_v27  ;;  %v8818_v58 = vadd.f32 %v2784_v48, %v2758_v31 }
 0x4e9   :  { %v8820_v21 = vadd.f32 %v2788_v19, %v2759_v5 }
 0x4ea   :  { %8069 = dma.done.wait [#allocation6 + $0x1], 50176 }
 0x4eb   :  { %8070 = vsyncadd [#allocation6 + $0x1], 4294917120  ;;  %v8822_v30 = vpack.c.bf16 %v2804_v7, %v2797_v24  ;;  %v2822_v1 = vld [vmem:[#allocation3 + $0x8] sm:$0xff]  ;;  %v2824_v26 = vld [vmem:[#allocation3 + $0x18] sm:$0xff]  ;;  %vm8106_vm1 = vmmov 0  }
 0x4ec   :  { %v2821_v52 = vld [vmem:[#allocation3] sm:$0xff]  ;;  %3253 = vmatprep.subr.bf16.mxu1 %v2822_v1  ;;  %3425 = vmatprep.subr.bf16.mxu0 %v2824_v26  ;;  %v2823_v22 = vld [vmem:[#allocation3 + $0x10] sm:$0xff]  ;;  %v2828_v47 = vld [vmem:[#allocation3 + $0x38] sm:$0xff] }
 0x4ed   :  { %3285 = vmatprep.mubr.bf16.mxu1 %v8822_v30  ;;  %3457 = vmatprep.mubr.bf16.mxu0 %v8822_v30  ;;  %v2829_v51 = vld [vmem:[#allocation3 + $0x40] sm:$0xff]  ;;  %v2831_v14 = vld [vmem:[#allocation3 + $0x50] sm:$0xff]  ;;  %v2830_v35 = vld [vmem:[#allocation3 + $0x48] sm:$0xff] }
 0x4ee   :  { %3254 = vmatpush1.bf16.msra.mxu1 %v2821_v52  ;;  %3426 = vmatpush1.bf16.msra.mxu0 %v2823_v22  ;;  %v2836_v63 = vld [vmem:[#allocation3 + $0x78] sm:$0xff]  ;;  %v2838_v48 = vld [vmem:[#allocation3 + $0x88] sm:$0xff]  ;;  %v2835_v19 = vld [vmem:[#allocation3 + $0x70] sm:$0xff] }
 0x4ef   :  { %3255 = vmatprep.subr.bf16.mxu1 %v2829_v51  ;;  %3427 = vmatprep.subr.bf16.mxu0 %v2831_v14  ;;  %v2837_v17 = vld [vmem:[#allocation3 + $0x80] sm:$0xff]  ;;  %v2843_v43 = vld [vmem:[#allocation3 + $0xb0] sm:$0xff]  ;;  %v2842_v49 = vld [vmem:[#allocation3 + $0xa8] sm:$0xff] }
 0x4f0   :  { %v2845_v9 = vld [vmem:[#allocation3 + $0xc0] sm:$0xff]  ;;  %v2844_v32 = vld [vmem:[#allocation3 + $0xb8] sm:$0xff]  ;;  %v2850_v8 = vld [vmem:[#allocation3 + $0xe8] sm:$0xff] }
 0x4f1   :  { %v2852_v18 = vld [vmem:[#allocation3 + $0xf8] sm:$0xff]  ;;  %v2849_v29 = vld [vmem:[#allocation3 + $0xe0] sm:$0xff]  ;;  %v2851_v39 = vld [vmem:[#allocation3 + $0xf0] sm:$0xff] }
 0x4f2   :  { %3256 = vmatpush1.bf16.msra.mxu1 %v2828_v47  ;;  %3428 = vmatpush1.bf16.msra.mxu0 %v2830_v35  ;;  %v2857_v60 = vld [vmem:[#allocation3 + $0x120] sm:$0xff]  ;;  %v2859_v23 = vld [vmem:[#allocation3 + $0x130] sm:$0xff]  ;;  %v2856_v3 = vld [vmem:[#allocation3 + $0x118] sm:$0xff] }
 0x4f3   :  { %3257 = vmatprep.subr.bf16.mxu1 %v2836_v63  ;;  %3429 = vmatprep.subr.bf16.mxu0 %v2838_v48  ;;  %v2858_v38 = vld [vmem:[#allocation3 + $0x128] sm:$0xff]  ;;  %v2864_v28 = vld [vmem:[#allocation3 + $0x158] sm:$0xff]  ;;  %v2863_v59 = vld [vmem:[#allocation3 + $0x150] sm:$0xff] }
 0x4f4   :  { %v2866_v44 = vld [vmem:[#allocation3 + $0x168] sm:$0xff]  ;;  %v2865_v24 = vld [vmem:[#allocation3 + $0x160] sm:$0xff]  ;;  %v2871_v13 = vld [vmem:[#allocation3 + $0x190] sm:$0xff] }
 0x4f5   :  { %v2873_v15 = vld [vmem:[#allocation3 + $0x1a0] sm:$0xff]  ;;  %v2870_v37 = vld [vmem:[#allocation3 + $0x188] sm:$0xff]  ;;  %v2872_v33 = vld [vmem:[#allocation3 + $0x198] sm:$0xff] }
 0x4f6   :  { %3258 = vmatpush1.bf16.msra.mxu1 %v2835_v19  ;;  %3430 = vmatpush1.bf16.msra.mxu0 %v2837_v17  ;;  %v2878_v16 = vld [vmem:[#allocation3 + $0x1c8] sm:$0xff]  ;;  %v2880_v45 = vld [vmem:[#allocation3 + $0x1d8] sm:$0xff]  ;;  %v2877_v46 = vld [vmem:[#allocation3 + $0x1c0] sm:$0xff] }
 0x4f7   :  { %3259 = vmatprep.subr.bf16.mxu1 %v2843_v43  ;;  %3431 = vmatprep.subr.bf16.mxu0 %v2845_v9  ;;  %v2879_v11 = vld [vmem:[#allocation3 + $0x1d0] sm:$0xff]  ;;  %v2885_v12 = vld [vmem:[#allocation3 + $0x200] sm:$0xff]  ;;  %v2884_v27 = vld [vmem:[#allocation3 + $0x1f8] sm:$0xff] }
 0x4f8   :  { %v2887_v36 = vld [vmem:[#allocation3 + $0x210] sm:$0xff]  ;;  %v2886_v31 = vld [vmem:[#allocation3 + $0x208] sm:$0xff]  ;;  %v2892_v5 = vld [vmem:[#allocation3 + $0x238] sm:$0xff] }
 0x4f9   :  { %v2894_v7 = vld [vmem:[#allocation3 + $0x248] sm:$0xff]  ;;  %v2891_v1 = vld [vmem:[#allocation3 + $0x230] sm:$0xff]  ;;  %v2893_v26 = vld [vmem:[#allocation3 + $0x240] sm:$0xff] }
 0x4fa   :  { %3260 = vmatpush1.bf16.msra.mxu1 %v2842_v49  ;;  %3432 = vmatpush1.bf16.msra.mxu0 %v2844_v32  ;;  %v2899_v52 = vld [vmem:[#allocation3 + $0x270] sm:$0xff]  ;;  %v2901_v22 = vld [vmem:[#allocation3 + $0x280] sm:$0xff]  ;;  %v2898_v51 = vld [vmem:[#allocation3 + $0x268] sm:$0xff] }
 0x4fb   :  { %3261 = vmatprep.subr.bf16.mxu1 %v2850_v8  ;;  %3433 = vmatprep.subr.bf16.mxu0 %v2852_v18  ;;  %v2900_v14 = vld [vmem:[#allocation3 + $0x278] sm:$0xff]  ;;  %v2906_v47 = vld [vmem:[#allocation3 + $0x2a8] sm:$0xff]  ;;  %v2905_v63 = vld [vmem:[#allocation3 + $0x2a0] sm:$0xff] }
 0x4fc   :  { %v2908_v35 = vld [vmem:[#allocation3 + $0x2b8] sm:$0xff]  ;;  %v2907_v48 = vld [vmem:[#allocation3 + $0x2b0] sm:$0xff]  ;;  %v2913_v19 = vld [vmem:[#allocation3 + $0x2e0] sm:$0xff] }
 0x4fd   :  { %v2915_v17 = vld [vmem:[#allocation3 + $0x2f0] sm:$0xff]  ;;  %v2912_v43 = vld [vmem:[#allocation3 + $0x2d8] sm:$0xff]  ;;  %v2914_v9 = vld [vmem:[#allocation3 + $0x2e8] sm:$0xff] }
 0x4fe   :  { %3262 = vmatpush1.bf16.msra.mxu1 %v2849_v29  ;;  %3434 = vmatpush1.bf16.msra.mxu0 %v2851_v39  ;;  %v2920_v49 = vld [vmem:[#allocation3 + $0x318] sm:$0xff]  ;;  %v2922_v32 = vld [vmem:[#allocation3 + $0x328] sm:$0xff]  ;;  %v2919_v8 = vld [vmem:[#allocation3 + $0x310] sm:$0xff] }
 0x4ff   :  { %3263 = vmatprep.subr.bf16.mxu1 %v2857_v60  ;;  %3435 = vmatprep.subr.bf16.mxu0 %v2859_v23  ;;  %v2921_v18 = vld [vmem:[#allocation3 + $0x320] sm:$0xff]  ;;  %v2927_v29 = vld [vmem:[#allocation3 + $0x350] sm:$0xff]  ;;  %v2926_v60 = vld [vmem:[#allocation3 + $0x348] sm:$0xff] }
 0x500   :  { %v2929_v39 = vld [vmem:[#allocation3 + $0x360] sm:$0xff]  ;;  %v2928_v23 = vld [vmem:[#allocation3 + $0x358] sm:$0xff] }
 0x502   :  { %3264 = vmatpush1.bf16.msra.mxu1 %v2856_v3  ;;  %3436 = vmatpush1.bf16.msra.mxu0 %v2858_v38  ;;  %v2934_v3 = vld [vmem:[#allocation3 + $0x388] sm:$0xff]  ;;  %v2936_v38 = vld [vmem:[#allocation3 + $0x398] sm:$0xff] }
 0x503   :  { %3265 = vmatprep.subr.bf16.mxu1 %v2864_v28  ;;  %3437 = vmatprep.subr.bf16.mxu0 %v2866_v44  ;;  %v8828_v28 = vpack.c.bf16 %v8810_v25, %v8785_v34  ;;  %v2933_v44 = vld [vmem:[#allocation3 + $0x380] sm:$0xff]  ;;  %v2940_v34 = vld [vmem:[#allocation3 + $0x3b8] sm:$0xff]  ;;  %v2942_v25 = vld [vmem:[#allocation3 + $0x3c8] sm:$0xff] }
 0x506   :  { %3266 = vmatpush1.bf16.msra.mxu1 %v2863_v59  ;;  %3438 = vmatpush1.bf16.msra.mxu0 %v2865_v24  ;;  %v2935_v59 = vld [vmem:[#allocation3 + $0x390] sm:$0xff]  ;;  %v2941_v24 = vld [vmem:[#allocation3 + $0x3c0] sm:$0xff] }
 0x507   :  { %3267 = vmatprep.subr.bf16.mxu1 %v2871_v13  ;;  %3439 = vmatprep.subr.bf16.mxu0 %v2873_v15  ;;  %v2943_v13 = vld [vmem:[#allocation3 + $0x3d0] sm:$0xff]  ;;  %v8832_v15 = vpack.c.bf16 %v8814_v55, %v8789_v56  ;;  %v2949_v55 = vld [vmem:[#allocation3 + $0x400] sm:$0xff] }
 0x508   :  { %v2947_v56 = vld [vmem:[#allocation3 + $0x3f0] sm:$0xff] }
 0x50a   :  { %3268 = vmatpush1.bf16.msra.mxu1 %v2870_v37  ;;  %3440 = vmatpush1.bf16.msra.mxu0 %v2872_v33  ;;  %v2948_v37 = vld [vmem:[#allocation3 + $0x3f8] sm:$0xff]  ;;  %v2950_v33 = vld [vmem:[#allocation3 + $0x408] sm:$0xff] }
 0x50b   :  { %3269 = vmatprep.subr.bf16.mxu1 %v2878_v16  ;;  %3441 = vmatprep.subr.bf16.mxu0 %v2880_v45  ;;  %v2955_v16 = vld [vmem:[#allocation3 + $0x430] sm:$0xff]  ;;  %v2957_v45 = vld [vmem:[#allocation3 + $0x440] sm:$0xff] }
 0x50e   :  { %3270 = vmatpush1.bf16.msra.mxu1 %v2877_v46  ;;  %3442 = vmatpush1.bf16.msra.mxu0 %v2879_v11  ;;  %v2954_v46 = vld [vmem:[#allocation3 + $0x428] sm:$0xff]  ;;  %v2956_v11 = vld [vmem:[#allocation3 + $0x438] sm:$0xff] }
 0x50f   :  { %3271 = vmatprep.subr.bf16.mxu1 %v2885_v12  ;;  %3443 = vmatprep.subr.bf16.mxu0 %v2887_v36  ;;  %v2962_v12 = vld [vmem:[#allocation3 + $0x468] sm:$0xff]  ;;  %v2964_v36 = vld [vmem:[#allocation3 + $0x478] sm:$0xff] }
 0x512   :  { %3272 = vmatpush1.bf16.msra.mxu1 %v2884_v27  ;;  %3444 = vmatpush1.bf16.msra.mxu0 %v2886_v31  ;;  %v2961_v27 = vld [vmem:[#allocation3 + $0x460] sm:$0xff]  ;;  %v2963_v31 = vld [vmem:[#allocation3 + $0x470] sm:$0xff] }
 0x513   :  { %3273 = vmatprep.subr.bf16.mxu1 %v2892_v5  ;;  %3445 = vmatprep.subr.bf16.mxu0 %v2894_v7  ;;  %v2969_v5 = vld [vmem:[#allocation3 + $0x4a0] sm:$0xff]  ;;  %v2971_v7 = vld [vmem:[#allocation3 + $0x4b0] sm:$0xff] }
 0x516   :  { %3274 = vmatpush1.bf16.msra.mxu1 %v2891_v1  ;;  %3446 = vmatpush1.bf16.msra.mxu0 %v2893_v26  ;;  %v2968_v1 = vld [vmem:[#allocation3 + $0x498] sm:$0xff]  ;;  %v2970_v26 = vld [vmem:[#allocation3 + $0x4a8] sm:$0xff] }
 0x517   :  { %3275 = vmatprep.subr.bf16.mxu1 %v2899_v52  ;;  %3447 = vmatprep.subr.bf16.mxu0 %v2901_v22  ;;  %v2976_v52 = vld [vmem:[#allocation3 + $0x4d8] sm:$0xff]  ;;  %v2978_v22 = vld [vmem:[#allocation3 + $0x4e8] sm:$0xff] }
 0x51a   :  { %3276 = vmatpush1.bf16.msra.mxu1 %v2898_v51  ;;  %3448 = vmatpush1.bf16.msra.mxu0 %v2900_v14  ;;  %v2975_v51 = vld [vmem:[#allocation3 + $0x4d0] sm:$0xff]  ;;  %v2977_v14 = vld [vmem:[#allocation3 + $0x4e0] sm:$0xff] }
 0x51b   :  { %3277 = vmatprep.subr.bf16.mxu1 %v2906_v47  ;;  %3449 = vmatprep.subr.bf16.mxu0 %v2908_v35  ;;  %v2983_v47 = vld [vmem:[#allocation3 + $0x510] sm:$0xff]  ;;  %v2985_v35 = vld [vmem:[#allocation3 + $0x520] sm:$0xff] }
 0x51e   :  { %3278 = vmatpush1.bf16.msra.mxu1 %v2905_v63  ;;  %3450 = vmatpush1.bf16.msra.mxu0 %v2907_v48  ;;  %v2982_v63 = vld [vmem:[#allocation3 + $0x508] sm:$0xff]  ;;  %v2984_v48 = vld [vmem:[#allocation3 + $0x518] sm:$0xff] }
 0x51f   :  { %3279 = vmatprep.subr.bf16.mxu1 %v2913_v19  ;;  %3451 = vmatprep.subr.bf16.mxu0 %v2915_v17  ;;  %v2990_v19 = vld [vmem:[#allocation3 + $0x548] sm:$0xff]  ;;  %v2992_v17 = vld [vmem:[#allocation3 + $0x558] sm:$0xff] }
 0x522   :  { %3280 = vmatpush1.bf16.msra.mxu1 %v2912_v43  ;;  %3452 = vmatpush1.bf16.msra.mxu0 %v2914_v9  ;;  %v2989_v43 = vld [vmem:[#allocation3 + $0x540] sm:$0xff]  ;;  %v2991_v9 = vld [vmem:[#allocation3 + $0x550] sm:$0xff] }
 0x523   :  { %3281 = vmatprep.subr.bf16.mxu1 %v2920_v49  ;;  %3453 = vmatprep.subr.bf16.mxu0 %v2922_v32  ;;  %v2997_v49 = vld [vmem:[#allocation3 + $0x580] sm:$0xff]  ;;  %v2999_v32 = vld [vmem:[#allocation3 + $0x590] sm:$0xff] }
 0x526   :  { %3282 = vmatpush1.bf16.msra.mxu1 %v2919_v8  ;;  %3454 = vmatpush1.bf16.msra.mxu0 %v2921_v18  ;;  %v2996_v8 = vld [vmem:[#allocation3 + $0x578] sm:$0xff]  ;;  %v2998_v18 = vld [vmem:[#allocation3 + $0x588] sm:$0xff] }
 0x527   :  { %3283 = vmatprep.subr.bf16.mxu1 %v2927_v29  ;;  %3455 = vmatprep.subr.bf16.mxu0 %v2929_v39  ;;  %v3004_v29 = vld [vmem:[#allocation3 + $0x5b8] sm:$0xff]  ;;  %v3006_v39 = vld [vmem:[#allocation3 + $0x5c8] sm:$0xff] }
 0x52a   :  { %3284 = vmatpush1.bf16.msra.mxu1 %v2926_v60  ;;  %3456 = vmatpush1.bf16.msra.mxu0 %v2928_v23  ;;  %v3003_v60 = vld [vmem:[#allocation3 + $0x5b0] sm:$0xff]  ;;  %v3005_v23 = vld [vmem:[#allocation3 + $0x5c0] sm:$0xff] }
 0x52b   :  { %3296 = vmatprep.subr.bf16.mxu1 %v2934_v3  ;;  %3468 = vmatprep.subr.bf16.mxu0 %v2936_v38  ;;  %v3011_v3 = vld [vmem:[#allocation3 + $0x5f0] sm:$0xff]  ;;  %v3013_v38 = vld [vmem:[#allocation3 + $0x600] sm:$0xff] }
 0x52d   :  { %3286 = vmatmul.mubr.bf16.vlgmr.msra.gmra.mrb[36].mxu1 %v8828_v28  ;;  %3458 = vmatmul.mubr.bf16.vlgmr.msra.gmra.mrb[8].mxu0 %v8828_v28 }
 0x52e   :  { %3297 = vmatpush1.bf16.msra.mxu1 %v2933_v44  ;;  %3469 = vmatpush1.bf16.msra.mxu0 %v2935_v59  ;;  %v3010_v44 = vld [vmem:[#allocation3 + $0x5e8] sm:$0xff]  ;;  %v3012_v59 = vld [vmem:[#allocation3 + $0x5f8] sm:$0xff] }
 0x52f   :  { %3298 = vmatprep.subr.bf16.mxu1 %v2941_v24  ;;  %3470 = vmatprep.subr.bf16.mxu0 %v2943_v13  ;;  %v3018_v24 = vld [vmem:[#allocation3 + $0x628] sm:$0xff]  ;;  %v3020_v13 = vld [vmem:[#allocation3 + $0x638] sm:$0xff] }
 0x530   :  { %3328 = vmatprep.mubr.bf16.mxu1 %v8832_v15  ;;  %3500 = vmatprep.mubr.bf16.mxu0 %v8832_v15 }
 0x532   :  { %3299 = vmatpush1.bf16.msra.mxu1 %v2940_v34  ;;  %3471 = vmatpush1.bf16.msra.mxu0 %v2942_v25  ;;  %v3017_v34 = vld [vmem:[#allocation3 + $0x620] sm:$0xff]  ;;  %v3019_v25 = vld [vmem:[#allocation3 + $0x630] sm:$0xff] }
 0x533   :  { %3300 = vmatprep.subr.bf16.mxu1 %v2948_v37  ;;  %3472 = vmatprep.subr.bf16.mxu0 %v2950_v33  ;;  %v3025_v37 = vld [vmem:[#allocation3 + $0x660] sm:$0xff]  ;;  %v3027_v33 = vld [vmem:[#allocation3 + $0x670] sm:$0xff] }
 0x536   :  { %3301 = vmatpush1.bf16.msra.mxu1 %v2947_v56  ;;  %3473 = vmatpush1.bf16.msra.mxu0 %v2949_v55  ;;  %v3024_v56 = vld [vmem:[#allocation3 + $0x658] sm:$0xff]  ;;  %v3026_v55 = vld [vmem:[#allocation3 + $0x668] sm:$0xff] }
 0x537   :  { %3302 = vmatprep.subr.bf16.mxu1 %v2955_v16  ;;  %3474 = vmatprep.subr.bf16.mxu0 %v2957_v45  ;;  %v3032_v16 = vld [vmem:[#allocation3 + $0x698] sm:$0xff]  ;;  %v3034_v45 = vld [vmem:[#allocation3 + $0x6a8] sm:$0xff] }
 0x53a   :  { %3303 = vmatpush1.bf16.msra.mxu1 %v2954_v46  ;;  %3475 = vmatpush1.bf16.msra.mxu0 %v2956_v11  ;;  %v3031_v46 = vld [vmem:[#allocation3 + $0x690] sm:$0xff]  ;;  %v3033_v11 = vld [vmem:[#allocation3 + $0x6a0] sm:$0xff] }
 0x53b   :  { %3304 = vmatprep.subr.bf16.mxu1 %v2962_v12  ;;  %3476 = vmatprep.subr.bf16.mxu0 %v2964_v36  ;;  %v3039_v12 = vld [vmem:[#allocation3 + $0x6d0] sm:$0xff]  ;;  %v3041_v36 = vld [vmem:[#allocation3 + $0x6e0] sm:$0xff] }
 0x53e   :  { %3305 = vmatpush1.bf16.msra.mxu1 %v2961_v27  ;;  %3477 = vmatpush1.bf16.msra.mxu0 %v2963_v31  ;;  %v3038_v27 = vld [vmem:[#allocation3 + $0x6c8] sm:$0xff]  ;;  %v3040_v31 = vld [vmem:[#allocation3 + $0x6d8] sm:$0xff] }
 0x53f   :  { %3306 = vmatprep.subr.bf16.mxu1 %v2969_v5  ;;  %3478 = vmatprep.subr.bf16.mxu0 %v2971_v7  ;;  %v3046_v5 = vld [vmem:[#allocation3 + $0x708] sm:$0xff]  ;;  %v3048_v7 = vld [vmem:[#allocation3 + $0x718] sm:$0xff] }
 0x542   :  { %3307 = vmatpush1.bf16.msra.mxu1 %v2968_v1  ;;  %3479 = vmatpush1.bf16.msra.mxu0 %v2970_v26  ;;  %v8840_v1 = vpack.c.bf16 %v8812_v54, %v8787_v4  ;;  %v3045_v26 = vld [vmem:[#allocation3 + $0x700] sm:$0xff]  ;;  %v3052_v4 = vld [vmem:[#allocation3 + $0x738] sm:$0xff]  ;;  %v3054_v54 = vld [vmem:[#allocation3 + $0x748] sm:$0xff] }
 0x543   :  { %3308 = vmatprep.subr.bf16.mxu1 %v2976_v52  ;;  %3480 = vmatprep.subr.bf16.mxu0 %v2978_v22  ;;  %v3047_v52 = vld [vmem:[#allocation3 + $0x710] sm:$0xff]  ;;  %v3053_v22 = vld [vmem:[#allocation3 + $0x740] sm:$0xff] }
 0x546   :  { %3309 = vmatpush1.bf16.msra.mxu1 %v2975_v51  ;;  %3481 = vmatpush1.bf16.msra.mxu0 %v2977_v14  ;;  %v3055_v51 = vld [vmem:[#allocation3 + $0x750] sm:$0xff]  ;;  %v8844_v14 = vpack.c.bf16 %v8818_v58, %v8793_v6  ;;  %v3061_v58 = vld [vmem:[#allocation3 + $0x780] sm:$0xff] }
 0x547   :  { %3310 = vmatprep.subr.bf16.mxu1 %v2983_v47  ;;  %3482 = vmatprep.subr.bf16.mxu0 %v2985_v35  ;;  %v3060_v47 = vld [vmem:[#allocation3 + $0x778] sm:$0xff]  ;;  %v3062_v35 = vld [vmem:[#allocation3 + $0x788] sm:$0xff]  ;;  %v3059_v6 = vld [vmem:[#allocation3 + $0x770] sm:$0xff] }
 0x54a   :  { %3311 = vmatpush1.bf16.msra.mxu1 %v2982_v63  ;;  %3483 = vmatpush1.bf16.msra.mxu0 %v2984_v48  ;;  %v3067_v63 = vld [vmem:[#allocation3 + $0x7b0] sm:$0xff]  ;;  %v3069_v48 = vld [vmem:[#allocation3 + $0x7c0] sm:$0xff] }
 0x54b   :  { %3312 = vmatprep.subr.bf16.mxu1 %v2990_v19  ;;  %3484 = vmatprep.subr.bf16.mxu0 %v2992_v17  ;;  %v3066_v19 = vld [vmem:[#allocation3 + $0x7a8] sm:$0xff]  ;;  %v3068_v17 = vld [vmem:[#allocation3 + $0x7b8] sm:$0xff] }
 0x54e   :  { %3313 = vmatpush1.bf16.msra.mxu1 %v2989_v43  ;;  %3485 = vmatpush1.bf16.msra.mxu0 %v2991_v9  ;;  %v3074_v43 = vld [vmem:[#allocation3 + $0x7e8] sm:$0xff]  ;;  %v3076_v9 = vld [vmem:[#allocation3 + $0x7f8] sm:$0xff] }
 0x54f   :  { %3314 = vmatprep.subr.bf16.mxu1 %v2997_v49  ;;  %3486 = vmatprep.subr.bf16.mxu0 %v2999_v32  ;;  %v3073_v49 = vld [vmem:[#allocation3 + $0x7e0] sm:$0xff]  ;;  %v3075_v32 = vld [vmem:[#allocation3 + $0x7f0] sm:$0xff] }
 0x552   :  { %3315 = vmatpush1.bf16.msra.mxu1 %v2996_v8  ;;  %3487 = vmatpush1.bf16.msra.mxu0 %v2998_v18  ;;  %v3081_v8 = vld [vmem:[#allocation3 + $0x820] sm:$0xff]  ;;  %v3083_v18 = vld [vmem:[#allocation3 + $0x830] sm:$0xff] }
 0x553   :  { %3316 = vmatprep.subr.bf16.mxu1 %v3004_v29  ;;  %3488 = vmatprep.subr.bf16.mxu0 %v3006_v39  ;;  %v3080_v29 = vld [vmem:[#allocation3 + $0x818] sm:$0xff]  ;;  %v3082_v39 = vld [vmem:[#allocation3 + $0x828] sm:$0xff] }
 0x556   :  { %3317 = vmatpush1.bf16.msra.mxu1 %v3003_v60  ;;  %3489 = vmatpush1.bf16.msra.mxu0 %v3005_v23  ;;  %v3088_v60 = vld [vmem:[#allocation3 + $0x858] sm:$0xff]  ;;  %v3090_v23 = vld [vmem:[#allocation3 + $0x868] sm:$0xff] }
 0x557   :  { %3318 = vmatprep.subr.bf16.mxu1 %v3011_v3  ;;  %3490 = vmatprep.subr.bf16.mxu0 %v3013_v38  ;;  %v3087_v3 = vld [vmem:[#allocation3 + $0x850] sm:$0xff]  ;;  %v3089_v38 = vld [vmem:[#allocation3 + $0x860] sm:$0xff] }
 0x55a   :  { %3319 = vmatpush1.bf16.msra.mxu1 %v3010_v44  ;;  %3491 = vmatpush1.bf16.msra.mxu0 %v3012_v59  ;;  %v3095_v44 = vld [vmem:[#allocation3 + $0x890] sm:$0xff]  ;;  %v3097_v59 = vld [vmem:[#allocation3 + $0x8a0] sm:$0xff] }
 0x55b   :  { %3320 = vmatprep.subr.bf16.mxu1 %v3018_v24  ;;  %3492 = vmatprep.subr.bf16.mxu0 %v3020_v13  ;;  %v3094_v24 = vld [vmem:[#allocation3 + $0x888] sm:$0xff]  ;;  %v3096_v13 = vld [vmem:[#allocation3 + $0x898] sm:$0xff] }
 0x55e   :  { %3321 = vmatpush1.bf16.msra.mxu1 %v3017_v34  ;;  %3493 = vmatpush1.bf16.msra.mxu0 %v3019_v25  ;;  %v3102_v34 = vld [vmem:[#allocation3 + $0x8c8] sm:$0xff]  ;;  %v3104_v25 = vld [vmem:[#allocation3 + $0x8d8] sm:$0xff] }
 0x55f   :  { %3322 = vmatprep.subr.bf16.mxu1 %v3025_v37  ;;  %3494 = vmatprep.subr.bf16.mxu0 %v3027_v33  ;;  %v3101_v37 = vld [vmem:[#allocation3 + $0x8c0] sm:$0xff]  ;;  %v3103_v33 = vld [vmem:[#allocation3 + $0x8d0] sm:$0xff] }
 0x562   :  { %3323 = vmatpush1.bf16.msra.mxu1 %v3024_v56  ;;  %3495 = vmatpush1.bf16.msra.mxu0 %v3026_v55  ;;  %v3109_v56 = vld [vmem:[#allocation3 + $0x900] sm:$0xff]  ;;  %v3111_v55 = vld [vmem:[#allocation3 + $0x910] sm:$0xff] }
 0x563   :  { %3324 = vmatprep.subr.bf16.mxu1 %v3032_v16  ;;  %3496 = vmatprep.subr.bf16.mxu0 %v3034_v45  ;;  %v3108_v16 = vld [vmem:[#allocation3 + $0x8f8] sm:$0xff]  ;;  %v3110_v45 = vld [vmem:[#allocation3 + $0x908] sm:$0xff] }
 0x566   :  { %3325 = vmatpush1.bf16.msra.mxu1 %v3031_v46  ;;  %3497 = vmatpush1.bf16.msra.mxu0 %v3033_v11  ;;  %v3116_v46 = vld [vmem:[#allocation3 + $0x938] sm:$0xff]  ;;  %v3118_v11 = vld [vmem:[#allocation3 + $0x948] sm:$0xff] }
 0x567   :  { %3326 = vmatprep.subr.bf16.mxu1 %v3039_v12  ;;  %3498 = vmatprep.subr.bf16.mxu0 %v3041_v36  ;;  %v3115_v12 = vld [vmem:[#allocation3 + $0x930] sm:$0xff]  ;;  %v3117_v36 = vld [vmem:[#allocation3 + $0x940] sm:$0xff] }
 0x56a   :  { %3327 = vmatpush1.bf16.msra.mxu1 %v3038_v27  ;;  %3499 = vmatpush1.bf16.msra.mxu0 %v3040_v31  ;;  %v3123_v27 = vld [vmem:[#allocation3 + $0x970] sm:$0xff]  ;;  %v3125_v31 = vld [vmem:[#allocation3 + $0x980] sm:$0xff] }
 0x56b   :  { %3339 = vmatprep.subr.bf16.mxu1 %v3046_v5  ;;  %3511 = vmatprep.subr.bf16.mxu0 %v3048_v7  ;;  %v3122_v5 = vld [vmem:[#allocation3 + $0x968] sm:$0xff]  ;;  %v3124_v7 = vld [vmem:[#allocation3 + $0x978] sm:$0xff] }
 0x56d   :  { %3329 = vmatmul.mubr.bf16.vlgmr.msra.gmra.mrb[36].mxu1 %v8840_v1  ;;  %3501 = vmatmul.mubr.bf16.vlgmr.msra.gmra.mrb[8].mxu0 %v8840_v1 }
 0x56e   :  { %3340 = vmatpush1.bf16.msra.mxu1 %v3045_v26  ;;  %3512 = vmatpush1.bf16.msra.mxu0 %v3047_v52  ;;  %v3130_v26 = vld [vmem:[#allocation3 + $0x9a8] sm:$0xff]  ;;  %v3132_v52 = vld [vmem:[#allocation3 + $0x9b8] sm:$0xff] }
 0x56f   :  { %3341 = vmatprep.subr.bf16.mxu1 %v3053_v22  ;;  %3513 = vmatprep.subr.bf16.mxu0 %v3055_v51  ;;  %v3129_v22 = vld [vmem:[#allocation3 + $0x9a0] sm:$0xff]  ;;  %v3131_v51 = vld [vmem:[#allocation3 + $0x9b0] sm:$0xff] }
 0x570   :  { %3371 = vmatprep.mubr.bf16.mxu1 %v8844_v14  ;;  %3543 = vmatprep.mubr.bf16.mxu0 %v8844_v14 }
 0x572   :  { %3342 = vmatpush1.bf16.msra.mxu1 %v3052_v4  ;;  %3514 = vmatpush1.bf16.msra.mxu0 %v3054_v54  ;;  %v3137_v4 = vld [vmem:[#allocation3 + $0x9e0] sm:$0xff]  ;;  %v3139_v54 = vld [vmem:[#allocation3 + $0x9f0] sm:$0xff] }
 0x573   :  { %3343 = vmatprep.subr.bf16.mxu1 %v3060_v47  ;;  %3515 = vmatprep.subr.bf16.mxu0 %v3062_v35  ;;  %v3136_v47 = vld [vmem:[#allocation3 + $0x9d8] sm:$0xff]  ;;  %v3138_v35 = vld [vmem:[#allocation3 + $0x9e8] sm:$0xff] }
 0x576   :  { %3344 = vmatpush1.bf16.msra.mxu1 %v3059_v6  ;;  %3516 = vmatpush1.bf16.msra.mxu0 %v3061_v58  ;;  %v3144_v6 = vld [vmem:[#allocation3 + $0xa18] sm:$0xff]  ;;  %v3146_v58 = vld [vmem:[#allocation3 + $0xa28] sm:$0xff] }
 0x577   :  { %3345 = vmatprep.subr.bf16.mxu1 %v3067_v63  ;;  %3517 = vmatprep.subr.bf16.mxu0 %v3069_v48  ;;  %v3143_v63 = vld [vmem:[#allocation3 + $0xa10] sm:$0xff]  ;;  %v3145_v48 = vld [vmem:[#allocation3 + $0xa20] sm:$0xff] }
 0x57a   :  { %3346 = vmatpush1.bf16.msra.mxu1 %v3066_v19  ;;  %3518 = vmatpush1.bf16.msra.mxu0 %v3068_v17  ;;  %v3151_v19 = vld [vmem:[#allocation3 + $0xa50] sm:$0xff]  ;;  %v3153_v17 = vld [vmem:[#allocation3 + $0xa60] sm:$0xff] }
 0x57b   :  { %3347 = vmatprep.subr.bf16.mxu1 %v3074_v43  ;;  %3519 = vmatprep.subr.bf16.mxu0 %v3076_v9  ;;  %v3150_v43 = vld [vmem:[#allocation3 + $0xa48] sm:$0xff]  ;;  %v3152_v9 = vld [vmem:[#allocation3 + $0xa58] sm:$0xff] }
 0x57e   :  { %3348 = vmatpush1.bf16.msra.mxu1 %v3073_v49  ;;  %3520 = vmatpush1.bf16.msra.mxu0 %v3075_v32  ;;  %v3158_v49 = vld [vmem:[#allocation3 + $0xa88] sm:$0xff]  ;;  %v3160_v32 = vld [vmem:[#allocation3 + $0xa98] sm:$0xff] }
 0x57f   :  { %3349 = vmatprep.subr.bf16.mxu1 %v3081_v8  ;;  %3521 = vmatprep.subr.bf16.mxu0 %v3083_v18  ;;  %v8852_v8 = vpack.c.bf16 %v8816_v20, %v8791_v62  ;;  %v3157_v18 = vld [vmem:[#allocation3 + $0xa80] sm:$0xff]  ;;  %v3172_v62 = vld [vmem:[#allocation3 + $0xaf8] sm:$0xff]  ;;  %v3174_v20 = vld [vmem:[#allocation3 + $0xb08] sm:$0xff] }
 0x582   :  { %3350 = vmatpush1.bf16.msra.mxu1 %v3080_v29  ;;  %3522 = vmatpush1.bf16.msra.mxu0 %v3082_v39  ;;  %v3159_v29 = vld [vmem:[#allocation3 + $0xa90] sm:$0xff]  ;;  %v3165_v39 = vld [vmem:[#allocation3 + $0xac0] sm:$0xff] }
 0x583   :  { %3351 = vmatprep.subr.bf16.mxu1 %v3088_v60  ;;  %3523 = vmatprep.subr.bf16.mxu0 %v3090_v23  ;;  %v3167_v60 = vld [vmem:[#allocation3 + $0xad0] sm:$0xff]  ;;  %v3164_v23 = vld [vmem:[#allocation3 + $0xab8] sm:$0xff] }
 0x586   :  { %3352 = vmatpush1.bf16.msra.mxu1 %v3087_v3  ;;  %3524 = vmatpush1.bf16.msra.mxu0 %v3089_v38  ;;  %v3166_v3 = vld [vmem:[#allocation3 + $0xac8] sm:$0xff]  ;;  %v3171_v38 = vld [vmem:[#allocation3 + $0xaf0] sm:$0xff] }
 0x587   :  { %3353 = vmatprep.subr.bf16.mxu1 %v3095_v44  ;;  %3525 = vmatprep.subr.bf16.mxu0 %v3097_v59  ;;  %v3173_v44 = vld [vmem:[#allocation3 + $0xb00] sm:$0xff]  ;;  %v3179_v59 = vld [vmem:[#allocation3 + $0xb30] sm:$0xff] }
 0x58a   :  { %3354 = vmatpush1.bf16.msra.mxu1 %v3094_v24  ;;  %3526 = vmatpush1.bf16.msra.mxu0 %v3096_v13  ;;  %v3181_v24 = vld [vmem:[#allocation3 + $0xb40] sm:$0xff]  ;;  %v3178_v13 = vld [vmem:[#allocation3 + $0xb28] sm:$0xff] }
 0x58b   :  { %3355 = vmatprep.subr.bf16.mxu1 %v3102_v34  ;;  %3527 = vmatprep.subr.bf16.mxu0 %v3104_v25  ;;  %v3180_v34 = vld [vmem:[#allocation3 + $0xb38] sm:$0xff]  ;;  %v3186_v25 = vld [vmem:[#allocation3 + $0xb68] sm:$0xff] }
 0x58e   :  { %3356 = vmatpush1.bf16.msra.mxu1 %v3101_v37  ;;  %3528 = vmatpush1.bf16.msra.mxu0 %v3103_v33  ;;  %v3188_v37 = vld [vmem:[#allocation3 + $0xb78] sm:$0xff]  ;;  %v3185_v33 = vld [vmem:[#allocation3 + $0xb60] sm:$0xff] }
 0x58f   :  { %3357 = vmatprep.subr.bf16.mxu1 %v3109_v56  ;;  %3529 = vmatprep.subr.bf16.mxu0 %v3111_v55  ;;  %v3187_v56 = vld [vmem:[#allocation3 + $0xb70] sm:$0xff]  ;;  %v3193_v55 = vld [vmem:[#allocation3 + $0xba0] sm:$0xff] }
 0x592   :  { %3358 = vmatpush1.bf16.msra.mxu1 %v3108_v16  ;;  %3530 = vmatpush1.bf16.msra.mxu0 %v3110_v45  ;;  %v3195_v16 = vld [vmem:[#allocation3 + $0xbb0] sm:$0xff]  ;;  %v3192_v45 = vld [vmem:[#allocation3 + $0xb98] sm:$0xff] }
 0x593   :  { %3359 = vmatprep.subr.bf16.mxu1 %v3116_v46  ;;  %3531 = vmatprep.subr.bf16.mxu0 %v3118_v11  ;;  %v3194_v46 = vld [vmem:[#allocation3 + $0xba8] sm:$0xff]  ;;  %v3200_v11 = vld [vmem:[#allocation3 + $0xbd8] sm:$0xff] }
 0x596   :  { %3360 = vmatpush1.bf16.msra.mxu1 %v3115_v12  ;;  %3532 = vmatpush1.bf16.msra.mxu0 %v3117_v36  ;;  %v3202_v12 = vld [vmem:[#allocation3 + $0xbe8] sm:$0xff]  ;;  %v3199_v36 = vld [vmem:[#allocation3 + $0xbd0] sm:$0xff] }
 0x597   :  { %3361 = vmatprep.subr.bf16.mxu1 %v3123_v27  ;;  %3533 = vmatprep.subr.bf16.mxu0 %v3125_v31  ;;  %v3201_v27 = vld [vmem:[#allocation3 + $0xbe0] sm:$0xff]  ;;  %v3207_v31 = vld [vmem:[#allocation3 + $0xc10] sm:$0xff] }
 0x59a   :  { %3362 = vmatpush1.bf16.msra.mxu1 %v3122_v5  ;;  %3534 = vmatpush1.bf16.msra.mxu0 %v3124_v7  ;;  %v3209_v5 = vld [vmem:[#allocation3 + $0xc20] sm:$0xff]  ;;  %v3206_v7 = vld [vmem:[#allocation3 + $0xc08] sm:$0xff] }
 0x59b   :  { %3363 = vmatprep.subr.bf16.mxu1 %v3130_v26  ;;  %3535 = vmatprep.subr.bf16.mxu0 %v3132_v52  ;;  %v3208_v26 = vld [vmem:[#allocation3 + $0xc18] sm:$0xff]  ;;  %v2826_v52 = vld [vmem:[#allocation3 + $0x28] sm:$0xff] }
 0x59e   :  { %3364 = vmatpush1.bf16.msra.mxu1 %v3129_v22  ;;  %3536 = vmatpush1.bf16.msra.mxu0 %v3131_v51  ;;  %v2883_v22 = vld [vmem:[#allocation3 + $0x1f0] sm:$0xff]  ;;  %v8860_v51 = vpack.c.bf16 %v8820_v21, %v8795_v40  ;;  %v2840_v40 = vld [vmem:[#allocation3 + $0x98] sm:$0xff]  ;;  %v2897_v21 = vld [vmem:[#allocation3 + $0x260] sm:$0xff] }
 0x59f   :  { %3365 = vmatprep.subr.bf16.mxu1 %v3137_v4  ;;  %3537 = vmatprep.subr.bf16.mxu0 %v3139_v54  ;;  %v2825_v4 = vld [vmem:[#allocation3 + $0x20] sm:$0xff]  ;;  %v2827_v54 = vld [vmem:[#allocation3 + $0x30] sm:$0xff] }
 0x5a2   :  { %3366 = vmatpush1.bf16.msra.mxu1 %v3136_v47  ;;  %3538 = vmatpush1.bf16.msra.mxu0 %v3138_v35  ;;  %v2833_v47 = vld [vmem:[#allocation3 + $0x60] sm:$0xff]  ;;  %v2890_v35 = vld [vmem:[#allocation3 + $0x228] sm:$0xff] }
 0x5a3   :  { %3367 = vmatprep.subr.bf16.mxu1 %v3144_v6  ;;  %3539 = vmatprep.subr.bf16.mxu0 %v3146_v58  ;;  %v2832_v6 = vld [vmem:[#allocation3 + $0x58] sm:$0xff]  ;;  %v2834_v58 = vld [vmem:[#allocation3 + $0x68] sm:$0xff] }
 0x5a6   :  { %3368 = vmatpush1.bf16.msra.mxu1 %v3143_v63  ;;  %3540 = vmatpush1.bf16.msra.mxu0 %v3145_v48  ;;  %v2839_v63 = vld [vmem:[#allocation3 + $0x90] sm:$0xff]  ;;  %v2841_v48 = vld [vmem:[#allocation3 + $0xa0] sm:$0xff] }
 0x5a7   :  { %3369 = vmatprep.subr.bf16.mxu1 %v3151_v19  ;;  %3541 = vmatprep.subr.bf16.mxu0 %v3153_v17  ;;  %v2847_v19 = vld [vmem:[#allocation3 + $0xd0] sm:$0xff]  ;;  %v2904_v17 = vld [vmem:[#allocation3 + $0x298] sm:$0xff] }
 0x5aa   :  { %3370 = vmatpush1.bf16.msra.mxu1 %v3150_v43  ;;  %3542 = vmatpush1.bf16.msra.mxu0 %v3152_v9  ;;  %v2846_v43 = vld [vmem:[#allocation3 + $0xc8] sm:$0xff]  ;;  %v2848_v9 = vld [vmem:[#allocation3 + $0xd8] sm:$0xff] }
 0x5ab   :  { %3382 = vmatprep.subr.bf16.mxu1 %v3158_v49  ;;  %3554 = vmatprep.subr.bf16.mxu0 %v3160_v32  ;;  %v2854_v49 = vld [vmem:[#allocation3 + $0x108] sm:$0xff]  ;;  %v2911_v32 = vld [vmem:[#allocation3 + $0x2d0] sm:$0xff] }
 0x5ad   :  { %3372 = vmatmul.mubr.bf16.vlgmr.msra.gmra.mrb[36].mxu1 %v8852_v8  ;;  %3544 = vmatmul.mubr.bf16.vlgmr.msra.gmra.mrb[8].mxu0 %v8852_v8 }
 0x5ae   :  { %3383 = vmatpush1.bf16.msra.mxu1 %v3157_v18  ;;  %3555 = vmatpush1.bf16.msra.mxu0 %v3159_v29  ;;  %v2855_v18 = vld [vmem:[#allocation3 + $0x110] sm:$0xff]  ;;  %v2861_v29 = vld [vmem:[#allocation3 + $0x140] sm:$0xff] }
 0x5af   :  { %3384 = vmatprep.subr.bf16.mxu1 %v3165_v39  ;;  %3556 = vmatprep.subr.bf16.mxu0 %v3167_v60  ;;  %v2918_v39 = vld [vmem:[#allocation3 + $0x308] sm:$0xff]  ;;  %v2860_v60 = vld [vmem:[#allocation3 + $0x138] sm:$0xff] }
 0x5b0   :  { %3414 = vmatprep.mubr.bf16.mxu1 %v8087_v0  ;;  %3586 = vmatprep.mubr.bf16.mxu0 %v8087_v0 }
 0x5b2   :  { %3385 = vmatpush1.bf16.msra.mxu1 %v3164_v23  ;;  %3557 = vmatpush1.bf16.msra.mxu0 %v3166_v3  ;;  %v2862_v23 = vld [vmem:[#allocation3 + $0x148] sm:$0xff]  ;;  %v2868_v3 = vld [vmem:[#allocation3 + $0x178] sm:$0xff] }
 0x5b3   :  { %3386 = vmatprep.subr.bf16.mxu1 %v3172_v62  ;;  %3558 = vmatprep.subr.bf16.mxu0 %v3174_v20  ;;  %v2925_v62 = vld [vmem:[#allocation3 + $0x340] sm:$0xff]  ;;  %v2867_v20 = vld [vmem:[#allocation3 + $0x170] sm:$0xff] }
 0x5b6   :  { %3387 = vmatpush1.bf16.msra.mxu1 %v3171_v38  ;;  %3559 = vmatpush1.bf16.msra.mxu0 %v3173_v44  ;;  %v2869_v38 = vld [vmem:[#allocation3 + $0x180] sm:$0xff]  ;;  %v2875_v44 = vld [vmem:[#allocation3 + $0x1b0] sm:$0xff] }
 0x5b7   :  { %3388 = vmatprep.subr.bf16.mxu1 %v3179_v59  ;;  %3560 = vmatprep.subr.bf16.mxu0 %v3181_v24  ;;  %v2932_v59 = vld [vmem:[#allocation3 + $0x378] sm:$0xff]  ;;  %v2874_v24 = vld [vmem:[#allocation3 + $0x1a8] sm:$0xff] }
 0x5ba   :  { %3389 = vmatpush1.bf16.msra.mxu1 %v3178_v13  ;;  %3561 = vmatpush1.bf16.msra.mxu0 %v3180_v34  ;;  %v2876_v13 = vld [vmem:[#allocation3 + $0x1b8] sm:$0xff]  ;;  %v2882_v34 = vld [vmem:[#allocation3 + $0x1e8] sm:$0xff] }
 0x5bb   :  { %3390 = vmatprep.subr.bf16.mxu1 %v3186_v25  ;;  %3562 = vmatprep.subr.bf16.mxu0 %v3188_v37  ;;  %v2995_v25 = vld [vmem:[#allocation3 + $0x570] sm:$0xff]  ;;  %v2881_v37 = vld [vmem:[#allocation3 + $0x1e0] sm:$0xff] }
 0x5be   :  { %3391 = vmatpush1.bf16.msra.mxu1 %v3185_v33  ;;  %3563 = vmatpush1.bf16.msra.mxu0 %v3187_v56  ;;  %v2939_v33 = vld [vmem:[#allocation3 + $0x3b0] sm:$0xff]  ;;  %v2889_v56 = vld [vmem:[#allocation3 + $0x220] sm:$0xff] }
 0x5bf   :  { %3392 = vmatprep.subr.bf16.mxu1 %v3193_v55  ;;  %3564 = vmatprep.subr.bf16.mxu0 %v3195_v16  ;;  %v3002_v55 = vld [vmem:[#allocation3 + $0x5a8] sm:$0xff]  ;;  %v2888_v16 = vld [vmem:[#allocation3 + $0x218] sm:$0xff] }
 0x5c2   :  { %3393 = vmatpush1.bf16.msra.mxu1 %v3192_v45  ;;  %3565 = vmatpush1.bf16.msra.mxu0 %v3194_v46  ;;  %v2946_v45 = vld [vmem:[#allocation3 + $0x3e8] sm:$0xff]  ;;  %v2896_v46 = vld [vmem:[#allocation3 + $0x258] sm:$0xff] }
 0x5c3   :  { %3394 = vmatprep.subr.bf16.mxu1 %v3200_v11  ;;  %3566 = vmatprep.subr.bf16.mxu0 %v3202_v12  ;;  %v3009_v11 = vld [vmem:[#allocation3 + $0x5e0] sm:$0xff]  ;;  %v2895_v12 = vld [vmem:[#allocation3 + $0x250] sm:$0xff] }
 0x5c6   :  { %3395 = vmatpush1.bf16.msra.mxu1 %v3199_v36  ;;  %3567 = vmatpush1.bf16.msra.mxu0 %v3201_v27  ;;  %v2953_v36 = vld [vmem:[#allocation3 + $0x420] sm:$0xff]  ;;  %v2903_v27 = vld [vmem:[#allocation3 + $0x290] sm:$0xff] }
 0x5c7   :  { %3396 = vmatprep.subr.bf16.mxu1 %v3207_v31  ;;  %3568 = vmatprep.subr.bf16.mxu0 %v3209_v5  ;;  %v3016_v31 = vld [vmem:[#allocation3 + $0x618] sm:$0xff]  ;;  %v2902_v5 = vld [vmem:[#allocation3 + $0x288] sm:$0xff] }
 0x5ca   :  { %3397 = vmatpush1.bf16.msra.mxu1 %v3206_v7  ;;  %3569 = vmatpush1.bf16.msra.mxu0 %v3208_v26  ;;  %v2960_v7 = vld [vmem:[#allocation3 + $0x458] sm:$0xff]  ;;  %v2910_v26 = vld [vmem:[#allocation3 + $0x2c8] sm:$0xff] }
 0x5cb   :  { %3597 = vmatprep.subr.bf16.mxu1 %v2826_v52  ;;  %7362 = vmatprep.subr.bf16.mxu0 %v2883_v22  ;;  %v3023_v52 = vld [vmem:[#allocation3 + $0x650] sm:$0xff]  ;;  %v2909_v22 = vld [vmem:[#allocation3 + $0x2c0] sm:$0xff] }
 0x5cd   :  { %3415 = vmatmul.mubr.bf16.vlgmr.msra.gmra.mrb[36].mxu1 %v8860_v51  ;;  %3587 = vmatmul.mubr.bf16.vlgmr.msra.gmra.mrb[8].mxu0 %v8860_v51 }
 0x5ce   :  { %3598 = vmatpush1.bf16.msra.mxu1 %v2825_v4  ;;  %7363 = vmatpush3.bf16.msra.mxu0 %v2827_v54  ;;  %v2967_v4 = vld [vmem:[#allocation3 + $0x490] sm:$0xff]  ;;  %v2917_v54 = vld [vmem:[#allocation3 + $0x300] sm:$0xff] }
 0x5cf   :  { %3599 = vmatprep.subr.bf16.mxu1 %v2833_v47  ;;  %7364 = vmatprep.subr.bf16.mxu0 %v2890_v35  ;;  %v3030_v47 = vld [vmem:[#allocation3 + $0x688] sm:$0xff]  ;;  %v2916_v35 = vld [vmem:[#allocation3 + $0x2f8] sm:$0xff] }
 0x5d0   :  { %3801 = vmatprep.mubr.bf16.mxu0 %v8822_v30  ;;  %3629 = vmatprep.mubr.bf16.mxu1 %v8822_v30  ;;  %v2853_v30 = vld [vmem:[#allocation3 + $0x100] sm:$0xff] }
 0x5d2   :  { %3600 = vmatpush1.bf16.msra.mxu1 %v2832_v6  ;;  %7365 = vmatpush3.bf16.msra.mxu0 %v2834_v58  ;;  %v2974_v6 = vld [vmem:[#allocation3 + $0x4c8] sm:$0xff]  ;;  %v2924_v58 = vld [vmem:[#allocation3 + $0x338] sm:$0xff] }
 0x5d3   :  { %3601 = vmatprep.subr.bf16.mxu1 %v2840_v40  ;;  %7366 = vmatprep.subr.bf16.mxu0 %v2897_v21  ;;  %v3037_v40 = vld [vmem:[#allocation3 + $0x6c0] sm:$0xff]  ;;  %v2923_v21 = vld [vmem:[#allocation3 + $0x330] sm:$0xff] }
 0x5d6   :  { %3602 = vmatpush1.bf16.msra.mxu1 %v2839_v63  ;;  %7367 = vmatpush3.bf16.msra.mxu0 %v2841_v48  ;;  %v2981_v63 = vld [vmem:[#allocation3 + $0x500] sm:$0xff]  ;;  %v2931_v48 = vld [vmem:[#allocation3 + $0x370] sm:$0xff] }
 0x5d7   :  { %3603 = vmatprep.subr.bf16.mxu1 %v2847_v19  ;;  %7368 = vmatprep.subr.bf16.mxu0 %v2904_v17  ;;  %v3044_v19 = vld [vmem:[#allocation3 + $0x6f8] sm:$0xff]  ;;  %v2930_v17 = vld [vmem:[#allocation3 + $0x368] sm:$0xff] }
 0x5da   :  { %3604 = vmatpush1.bf16.msra.mxu1 %v2846_v43  ;;  %7369 = vmatpush3.bf16.msra.mxu0 %v2848_v9  ;;  %v2988_v43 = vld [vmem:[#allocation3 + $0x538] sm:$0xff]  ;;  %v2938_v9 = vld [vmem:[#allocation3 + $0x3a8] sm:$0xff] }
 0x5db   :  { %3605 = vmatprep.subr.bf16.mxu1 %v2854_v49  ;;  %7370 = vmatprep.subr.bf16.mxu0 %v2911_v32  ;;  %v3107_v49 = vld [vmem:[#allocation3 + $0x8f0] sm:$0xff]  ;;  %v2937_v32 = vld [vmem:[#allocation3 + $0x3a0] sm:$0xff] }
 0x5de   :  { %3606 = vmatpush1.bf16.msra.mxu1 %v2853_v30  ;;  %7371 = vmatpush3.bf16.msra.mxu0 %v2855_v18  ;;  %v3051_v30 = vld [vmem:[#allocation3 + $0x730] sm:$0xff]  ;;  %v2945_v18 = vld [vmem:[#allocation3 + $0x3e0] sm:$0xff] }
 0x5df   :  { %3607 = vmatprep.subr.bf16.mxu1 %v2861_v29  ;;  %7372 = vmatprep.subr.bf16.mxu0 %v2918_v39  ;;  %v3114_v29 = vld [vmem:[#allocation3 + $0x928] sm:$0xff]  ;;  %v2944_v39 = vld [vmem:[#allocation3 + $0x3d8] sm:$0xff] }
 0x5e2   :  { %3608 = vmatpush1.bf16.msra.mxu1 %v2860_v60  ;;  %7373 = vmatpush3.bf16.msra.mxu0 %v2862_v23  ;;  %v3058_v60 = vld [vmem:[#allocation3 + $0x768] sm:$0xff]  ;;  %v2952_v23 = vld [vmem:[#allocation3 + $0x418] sm:$0xff] }
 0x5e3   :  { %3609 = vmatprep.subr.bf16.mxu1 %v2868_v3  ;;  %7374 = vmatprep.subr.bf16.mxu0 %v2925_v62  ;;  %v3121_v3 = vld [vmem:[#allocation3 + $0x960] sm:$0xff]  ;;  %v2951_v62 = vld [vmem:[#allocation3 + $0x410] sm:$0xff] }
 0x5e6   :  { %3610 = vmatpush1.bf16.msra.mxu1 %v2867_v20  ;;  %7375 = vmatpush3.bf16.msra.mxu0 %v2869_v38  ;;  %v2959_v20 = vld [vmem:[#allocation3 + $0x450] sm:$0xff]  ;;  %v3128_v38 = vld [vmem:[#allocation3 + $0x998] sm:$0xff] }
 0x5e7   :  { %3611 = vmatprep.subr.bf16.mxu1 %v2875_v44  ;;  %7376 = vmatprep.subr.bf16.mxu0 %v2932_v59  ;;  %v2958_v44 = vld [vmem:[#allocation3 + $0x448] sm:$0xff]  ;;  %v3072_v59 = vld [vmem:[#allocation3 + $0x7d8] sm:$0xff] }
 0x5ea   :  { %3612 = vmatpush1.bf16.msra.mxu1 %v2874_v24  ;;  %7377 = vmatpush3.bf16.msra.mxu0 %v2876_v13  ;;  %v2966_v24 = vld [vmem:[#allocation3 + $0x488] sm:$0xff]  ;;  %v3135_v13 = vld [vmem:[#allocation3 + $0x9d0] sm:$0xff] }
 0x5eb   :  { %3613 = vmatprep.subr.bf16.mxu1 %v2882_v34  ;;  %7384 = vmatprep.subr.bf16.mxu0 %v2995_v25  ;;  %v3079_v34 = vld [vmem:[#allocation3 + $0x810] sm:$0xff]  ;;  %v2973_v25 = vld [vmem:[#allocation3 + $0x4c0] sm:$0xff] }
 0x5ed   :  { %3802 = vmatmul.mubr.bf16.vlgmr.msra.gmra.mrb[12].mxu0 %v8828_v28 }
 0x5ee   :  { %3614 = vmatpush1.bf16.msra.mxu1 %v2881_v37  ;;  %7385 = vmatpush3.bf16.msra.mxu0 %v2939_v33  ;;  %v3142_v37 = vld [vmem:[#allocation3 + $0xa08] sm:$0xff]  ;;  %v2972_v33 = vld [vmem:[#allocation3 + $0x4b8] sm:$0xff] }
 0x5ef   :  { %3615 = vmatprep.subr.bf16.mxu1 %v2889_v56  ;;  %7386 = vmatprep.subr.bf16.mxu0 %v3002_v55  ;;  %v3086_v56 = vld [vmem:[#allocation3 + $0x848] sm:$0xff]  ;;  %v2980_v55 = vld [vmem:[#allocation3 + $0x4f8] sm:$0xff] }
 0x5f0   :  { %3842 = vmatprep.mubr.bf16.mxu0 %v8832_v15 }
 0x5f2   :  { %3616 = vmatpush1.bf16.msra.mxu1 %v2888_v16  ;;  %7387 = vmatpush3.bf16.msra.mxu0 %v2946_v45  ;;  %v3149_v16 = vld [vmem:[#allocation3 + $0xa40] sm:$0xff]  ;;  %v2979_v45 = vld [vmem:[#allocation3 + $0x4f0] sm:$0xff] }
 0x5f3   :  { %3617 = vmatprep.subr.bf16.mxu1 %v2896_v46  ;;  %7388 = vmatprep.subr.bf16.mxu0 %v3009_v11  ;;  %v3093_v46 = vld [vmem:[#allocation3 + $0x880] sm:$0xff]  ;;  %v2987_v11 = vld [vmem:[#allocation3 + $0x530] sm:$0xff] }
 0x5f6   :  { %3618 = vmatpush1.bf16.msra.mxu1 %v2895_v12  ;;  %7389 = vmatpush3.bf16.msra.mxu0 %v2953_v36  ;;  %v3156_v12 = vld [vmem:[#allocation3 + $0xa78] sm:$0xff]  ;;  %v2986_v36 = vld [vmem:[#allocation3 + $0x528] sm:$0xff] }
 0x5f7   :  { %3619 = vmatprep.subr.bf16.mxu1 %v2903_v27  ;;  %7390 = vmatprep.subr.bf16.mxu0 %v3016_v31  ;;  %v3100_v27 = vld [vmem:[#allocation3 + $0x8b8] sm:$0xff]  ;;  %v2994_v31 = vld [vmem:[#allocation3 + $0x568] sm:$0xff] }
 0x5fa   :  { %3620 = vmatpush1.bf16.msra.mxu1 %v2902_v5  ;;  %7391 = vmatpush3.bf16.msra.mxu0 %v2960_v7  ;;  %v8105_v5 = vmov 0.0   ;;  %v2993_v7 = vld [vmem:[#allocation3 + $0x560] sm:$0xff] }
 0x5fb   :  { %3621 = vmatprep.subr.bf16.mxu1 %v2910_v26  ;;  %7392 = vmatprep.subr.bf16.mxu0 %v3023_v52  ;;  %v3163_v26 = vld [vmem:[#allocation3 + $0xab0] sm:$0xff]  ;;  %v3001_v52 = vld [vmem:[#allocation3 + $0x5a0] sm:$0xff] }
 0x5fe   :  { %3622 = vmatpush1.bf16.msra.mxu1 %v2909_v22  ;;  %7393 = vmatpush3.bf16.msra.mxu0 %v2967_v4  ;;  %v3000_v22 = vld [vmem:[#allocation3 + $0x598] sm:$0xff]  ;;  %v3170_v4 = vld [vmem:[#allocation3 + $0xae8] sm:$0xff] }
 0x5ff   :  { %3623 = vmatprep.subr.bf16.mxu1 %v2917_v54  ;;  %7394 = vmatprep.subr.bf16.mxu0 %v3030_v47  ;;  %v3008_v54 = vld [vmem:[#allocation3 + $0x5d8] sm:$0xff]  ;;  %v3007_v47 = vld [vmem:[#allocation3 + $0x5d0] sm:$0xff] }
 0x602   :  { %3624 = vmatpush1.bf16.msra.mxu1 %v2916_v35  ;;  %7395 = vmatpush3.bf16.msra.mxu0 %v2974_v6  ;;  %v3177_v35 = vld [vmem:[#allocation3 + $0xb20] sm:$0xff]  ;;  %v3015_v6 = vld [vmem:[#allocation3 + $0x610] sm:$0xff] }
 0x603   :  { %3625 = vmatprep.subr.bf16.mxu1 %v2924_v58  ;;  %7396 = vmatprep.subr.bf16.mxu0 %v3037_v40  ;;  %v3014_v58 = vld [vmem:[#allocation3 + $0x608] sm:$0xff]  ;;  %v3184_v40 = vld [vmem:[#allocation3 + $0xb58] sm:$0xff] }
 0x606   :  { %3626 = vmatpush1.bf16.msra.mxu1 %v2923_v21  ;;  %7397 = vmatpush3.bf16.msra.mxu0 %v2981_v63  ;;  %v3022_v21 = vld [vmem:[#allocation3 + $0x648] sm:$0xff]  ;;  %v3021_v63 = vld [vmem:[#allocation3 + $0x640] sm:$0xff] }
 0x607   :  { %3627 = vmatprep.subr.bf16.mxu1 %v2931_v48  ;;  %7398 = vmatprep.subr.bf16.mxu0 %v3044_v19  ;;  %v3191_v48 = vld [vmem:[#allocation3 + $0xb90] sm:$0xff]  ;;  %v3029_v19 = vld [vmem:[#allocation3 + $0x680] sm:$0xff] }
 0x60a   :  { %3628 = vmatpush1.bf16.msra.mxu1 %v2930_v17  ;;  %7399 = vmatpush3.bf16.msra.mxu0 %v2988_v43  ;;  %v3028_v17 = vld [vmem:[#allocation3 + $0x678] sm:$0xff]  ;;  %v3198_v43 = vld [vmem:[#allocation3 + $0xbc8] sm:$0xff] }
 0x60b   :  { %3640 = vmatprep.subr.bf16.mxu1 %v2938_v9  ;;  %7406 = vmatprep.subr.bf16.mxu0 %v3107_v49  ;;  %v3036_v9 = vld [vmem:[#allocation3 + $0x6b8] sm:$0xff]  ;;  %v3035_v49 = vld [vmem:[#allocation3 + $0x6b0] sm:$0xff] }
 0x60d   :  { %3630 = vmatmul.mubr.bf16.vlgmr.msra.gmra.mrb[40].mxu1 %v8828_v28  ;;  %3843 = vmatmul.mubr.bf16.vlgmr.msra.gmra.mrb[16].mxu0 %v8840_v1  ;;  %v3065_v28 = vld [vmem:[#allocation3 + $0x7a0] sm:$0xff] }
 0x60e   :  { %3641 = vmatpush1.bf16.msra.mxu1 %v2937_v32  ;;  %7407 = vmatpush3.bf16.msra.mxu0 %v3051_v30  ;;  %v3205_v32 = vld [vmem:[#allocation3 + $0xc00] sm:$0xff]  ;;  %v3043_v30 = vld [vmem:[#allocation3 + $0x6f0] sm:$0xff] }
 0x60f   :  { %3642 = vmatprep.subr.bf16.mxu1 %v2945_v18  ;;  %7408 = vmatprep.subr.bf16.mxu0 %v3114_v29  ;;  %v3042_v18 = vld [vmem:[#allocation3 + $0x6e8] sm:$0xff]  ;;  %v3212_v29 = vld [vmem:[#allocation3 + $0xc38] sm:$0xff] }
 0x610   :  { %3883 = vmatprep.mubr.bf16.mxu0 %v8844_v14  ;;  %3672 = vmatprep.mubr.bf16.mxu1 %v8832_v15  ;;  %v2965_v15 = vld [vmem:[#allocation3 + $0x480] sm:$0xff] }
 0x612   :  { %3643 = vmatpush1.bf16.msra.mxu1 %v2944_v39  ;;  %7409 = vmatpush3.bf16.msra.mxu0 %v3058_v60  ;;  %v3050_v39 = vld [vmem:[#allocation3 + $0x728] sm:$0xff]  ;;  %v3049_v60 = vld [vmem:[#allocation3 + $0x720] sm:$0xff] }
 0x613   :  { %3644 = vmatprep.subr.bf16.mxu1 %v2952_v23  ;;  %7410 = vmatprep.subr.bf16.mxu0 %v3121_v3  ;;  %v3057_v23 = vld [vmem:[#allocation3 + $0x760] sm:$0xff]  ;;  %v3056_v3 = vld [vmem:[#allocation3 + $0x758] sm:$0xff] }
 0x616   :  { %3645 = vmatpush1.bf16.msra.mxu1 %v2951_v62  ;;  %7411 = vmatpush3.bf16.msra.mxu0 %v3065_v28  ;;  %v3064_v62 = vld [vmem:[#allocation3 + $0x798] sm:$0xff]  ;;  %v3063_v28 = vld [vmem:[#allocation3 + $0x790] sm:$0xff] }
 0x617   :  { %3646 = vmatprep.subr.bf16.mxu1 %v2959_v20  ;;  %7412 = vmatprep.subr.bf16.mxu0 %v3128_v38  ;;  %v3071_v20 = vld [vmem:[#allocation3 + $0x7d0] sm:$0xff]  ;;  %v3070_v38 = vld [vmem:[#allocation3 + $0x7c8] sm:$0xff] }
 0x61a   :  { %3647 = vmatpush1.bf16.msra.mxu1 %v2958_v44  ;;  %7413 = vmatpush3.bf16.msra.mxu0 %v3072_v59  ;;  %v3078_v44 = vld [vmem:[#allocation3 + $0x808] sm:$0xff]  ;;  %v3077_v59 = vld [vmem:[#allocation3 + $0x800] sm:$0xff] }
 0x61b   :  { %3648 = vmatprep.subr.bf16.mxu1 %v2966_v24  ;;  %7414 = vmatprep.subr.bf16.mxu0 %v3135_v13  ;;  %v3085_v24 = vld [vmem:[#allocation3 + $0x840] sm:$0xff]  ;;  %v3092_v13 = vld [vmem:[#allocation3 + $0x878] sm:$0xff] }
 0x61e   :  { %3649 = vmatpush1.bf16.msra.mxu1 %v2965_v15  ;;  %7415 = vmatpush3.bf16.msra.mxu0 %v3079_v34  ;;  %v3099_v15 = vld [vmem:[#allocation3 + $0x8b0] sm:$0xff]  ;;  %v3098_v34 = vld [vmem:[#allocation3 + $0x8a8] sm:$0xff] }
 0x61f   :  { %3650 = vmatprep.subr.bf16.mxu1 %v2973_v25  ;;  %7416 = vmatprep.subr.bf16.mxu0 %v3142_v37  ;;  %v3106_v25 = vld [vmem:[#allocation3 + $0x8e8] sm:$0xff]  ;;  %v3105_v37 = vld [vmem:[#allocation3 + $0x8e0] sm:$0xff] }
 0x622   :  { %3651 = vmatpush1.bf16.msra.mxu1 %v2972_v33  ;;  %7417 = vmatpush3.bf16.msra.mxu0 %v3086_v56  ;;  %v3113_v33 = vld [vmem:[#allocation3 + $0x920] sm:$0xff]  ;;  %v3112_v56 = vld [vmem:[#allocation3 + $0x918] sm:$0xff] }
 0x623   :  { %3652 = vmatprep.subr.bf16.mxu1 %v2980_v55  ;;  %7418 = vmatprep.subr.bf16.mxu0 %v3149_v16  ;;  %v3120_v55 = vld [vmem:[#allocation3 + $0x958] sm:$0xff]  ;;  %v3119_v16 = vld [vmem:[#allocation3 + $0x950] sm:$0xff] }
 0x626   :  { %3653 = vmatpush1.bf16.msra.mxu1 %v2979_v45  ;;  %7419 = vmatpush3.bf16.msra.mxu0 %v3093_v46  ;;  %v3127_v45 = vld [vmem:[#allocation3 + $0x990] sm:$0xff]  ;;  %v3126_v46 = vld [vmem:[#allocation3 + $0x988] sm:$0xff] }
 0x627   :  { %3654 = vmatprep.subr.bf16.mxu1 %v2987_v11  ;;  %7420 = vmatprep.subr.bf16.mxu0 %v3156_v12  ;;  %v3134_v11 = vld [vmem:[#allocation3 + $0x9c8] sm:$0xff]  ;;  %v3133_v12 = vld [vmem:[#allocation3 + $0x9c0] sm:$0xff] }
 0x62a   :  { %3655 = vmatpush1.bf16.msra.mxu1 %v2986_v36  ;;  %7421 = vmatpush3.bf16.msra.mxu0 %v3100_v27  ;;  %v3141_v36 = vld [vmem:[#allocation3 + $0xa00] sm:$0xff]  ;;  %v3140_v27 = vld [vmem:[#allocation3 + $0x9f8] sm:$0xff] }
 0x62b   :  { %3656 = vmatprep.subr.bf16.mxu1 %v2994_v31  ;;  %7587 = vmatprep.subr.bf16.mxu0 %v8105_v5  ;;  %v3148_v31 = vld [vmem:[#allocation3 + $0xa38] sm:$0xff] }
 0x62d   :  { %3884 = vmatmul.mubr.bf16.vlgmr.msra.gmra.mrb[20].mxu0 %v8852_v8 }
 0x62e   :  { %3657 = vmatpush1.bf16.msra.mxu1 %v2993_v7  ;;  %7588 = vmatpush3.bf16.msra.mxu0 %v3163_v26  ;;  %v3147_v7 = vld [vmem:[#allocation3 + $0xa30] sm:$0xff] }
 0x62f   :  { %3658 = vmatprep.subr.bf16.mxu1 %v3001_v52  ;;  %7589 = vmatprep.subr.bf16.mxu0 %v8105_v5  ;;  %v3155_v26 = vld [vmem:[#allocation3 + $0xa70] sm:$0xff]  ;;  %v3154_v52 = vld [vmem:[#allocation3 + $0xa68] sm:$0xff] }
 0x630   :  { %7603 = vmatprep.mubr.msk.bf16.mxu0 %vm8106_vm1, %v8105_v5 }
 0x632   :  { %3659 = vmatpush1.bf16.msra.mxu1 %v3000_v22  ;;  %7590 = vmatpush3.bf16.msra.mxu0 %v3170_v4  ;;  %v3162_v22 = vld [vmem:[#allocation3 + $0xaa8] sm:$0xff]  ;;  %v3161_v4 = vld [vmem:[#allocation3 + $0xaa0] sm:$0xff] }
 0x633   :  { %3660 = vmatprep.subr.bf16.mxu1 %v3008_v54  ;;  %7591 = vmatprep.subr.bf16.mxu0 %v8105_v5  ;;  %v3169_v54 = vld [vmem:[#allocation3 + $0xae0] sm:$0xff] }
 0x636   :  { %3661 = vmatpush1.bf16.msra.mxu1 %v3007_v47  ;;  %7592 = vmatpush3.bf16.msra.mxu0 %v3177_v35  ;;  %v3168_v47 = vld [vmem:[#allocation3 + $0xad8] sm:$0xff] }
 0x637   :  { %3662 = vmatprep.subr.bf16.mxu1 %v3015_v6  ;;  %7593 = vmatprep.subr.bf16.mxu0 %v8105_v5  ;;  %v3176_v35 = vld [vmem:[#allocation3 + $0xb18] sm:$0xff]  ;;  %v3175_v6 = vld [vmem:[#allocation3 + $0xb10] sm:$0xff] }
 0x63a   :  { %3663 = vmatpush1.bf16.msra.mxu1 %v3014_v58  ;;  %7594 = vmatpush3.bf16.msra.mxu0 %v3184_v40  ;;  %v3183_v58 = vld [vmem:[#allocation3 + $0xb50] sm:$0xff] }
 0x63b   :  { %3664 = vmatprep.subr.bf16.mxu1 %v3022_v21  ;;  %7595 = vmatprep.subr.bf16.mxu0 %v8105_v5  ;;  %v3214_v40 = vld [vmem:[#allocation12 + $0x6] ss:$8 sm:$0xf] }
 0x63c   :  { %v3215_v21 = vld [vmem:[#allocation12 + $0x6] ss:$8 sm:$0xf0] }
 0x63e   :  { %3665 = vmatpush1.bf16.msra.mxu1 %v3021_v63  ;;  %7596 = vmatpush3.bf16.msra.mxu0 %v3191_v48  ;;  %v3182_v63 = vld [vmem:[#allocation3 + $0xb48] sm:$0xff] }
 0x63f   :  { %3666 = vmatprep.subr.bf16.mxu1 %v3029_v19  ;;  %7597 = vmatprep.subr.bf16.mxu0 %v8105_v5  ;;  %v3190_v48 = vld [vmem:[#allocation3 + $0xb88] sm:$0xff]  ;;  %v8888_v19 = vor.u32 %v3215_v21, %v3214_v40 }
 0x642   :  { %3667 = vmatpush1.bf16.msra.mxu1 %v3028_v17  ;;  %7598 = vmatpush3.bf16.msra.mxu0 %v3198_v43  ;;  %v3197_v17 = vld [vmem:[#allocation3 + $0xbc0] sm:$0xff]  ;;  %v3221_v43 = vrot.slane %v8888_v19, %v8250_v41 }
 0x643   :  { %3668 = vmatprep.subr.bf16.mxu1 %v3036_v9  ;;  %7599 = vmatprep.subr.bf16.mxu0 %v8105_v5  ;;  %v3229_v9 = vrot.slane %v8888_v19, %v8256_v50 }
 0x646   :  { %3669 = vmatpush1.bf16.msra.mxu1 %v3035_v49  ;;  %7600 = vmatpush3.bf16.msra.mxu0 %v3205_v32  ;;  %v3225_v49 = vrot.slane %v8888_v19, %v8252_v42  ;;  %v3233_v32 = vrot.slane %v8888_v19, %v8258_v53 }
 0x647   :  { %3670 = vmatprep.subr.bf16.mxu1 %v3043_v30  ;;  %7601 = vmatprep.subr.bf16.mxu0 %v8105_v5  ;;  %v3196_v30 = vld [vmem:[#allocation3 + $0xbb8] sm:$0xff] }
 0x64a   :  { %3671 = vmatpush1.bf16.msra.mxu1 %v3042_v18  ;;  %7602 = vmatpush3.bf16.msra.mxu0 %v3212_v29 }
 0x64b   :  { %3683 = vmatprep.subr.bf16.mxu1 %v3050_v39  ;;  %v3204_v39 = vld [vmem:[#allocation3 + $0xbf8] sm:$0xff] }
 0x64d   :  { %7604 = vmatmul.mubr.bf16.vlgmr.msra.gmra.mrb[24].mxu0 %v8860_v51  ;;  %3673 = vmatmul.mubr.bf16.vlgmr.msra.gmra.mrb[40].mxu1 %v8840_v1  ;;  %v3084_v1 = vld [vmem:[#allocation3 + $0x838] sm:$0xff] }
 0x64e   :  { %3684 = vmatpush1.bf16.msra.mxu1 %v3049_v60  ;;  %3715 = vmatprep.mubr.bf16.mxu1 %v8844_v14  ;;  %v3091_v14 = vld [vmem:[#allocation3 + $0x870] sm:$0xff] }
 0x64f   :  { %3685 = vmatprep.subr.bf16.mxu1 %v3057_v23 }
 0x652   :  { %3686 = vmatpush1.bf16.msra.mxu1 %v3056_v3 }
 0x653   :  { %3687 = vmatprep.subr.bf16.mxu1 %v3064_v62 }
 0x656   :  { %3688 = vmatpush1.bf16.msra.mxu1 %v3063_v28 }
 0x657   :  { %3689 = vmatprep.subr.bf16.mxu1 %v3071_v20 }
 0x65a   :  { %3690 = vmatpush1.bf16.msra.mxu1 %v3070_v38 }
 0x65b   :  { %3691 = vmatprep.subr.bf16.mxu1 %v3078_v44 }
 0x65e   :  { %3692 = vmatpush1.bf16.msra.mxu1 %v3077_v59 }
 0x65f   :  { %3693 = vmatprep.subr.bf16.mxu1 %v3085_v24 }
 0x662   :  { %3694 = vmatpush1.bf16.msra.mxu1 %v3084_v1 }
 0x663   :  { %3695 = vmatprep.subr.bf16.mxu1 %v3092_v13 }
 0x666   :  { %3696 = vmatpush1.bf16.msra.mxu1 %v3091_v14 }
 0x667   :  { %3697 = vmatprep.subr.bf16.mxu1 %v3099_v15 }
 0x66a   :  { %3698 = vmatpush1.bf16.msra.mxu1 %v3098_v34  ;;  %v3203_v34 = vld [vmem:[#allocation3 + $0xbf0] sm:$0xff] }
 0x66b   :  { %3699 = vmatprep.subr.bf16.mxu1 %v3106_v25 }
 0x66e   :  { %3700 = vmatpush1.bf16.msra.mxu1 %v3105_v37 }
 0x66f   :  { %3701 = vmatprep.subr.bf16.mxu1 %v3113_v33 }
 0x672   :  { %3702 = vmatpush1.bf16.msra.mxu1 %v3112_v56 }
 0x673   :  { %3703 = vmatprep.subr.bf16.mxu1 %v3120_v55  ;;  %v3211_v55 = vld [vmem:[#allocation3 + $0xc30] sm:$0xff] }
 0x676   :  { %3704 = vmatpush1.bf16.msra.mxu1 %v3119_v16 }
 0x677   :  { %3705 = vmatprep.subr.bf16.mxu1 %v3127_v45 }
 0x67a   :  { %3706 = vmatpush1.bf16.msra.mxu1 %v3126_v46 }
 0x67b   :  { %3707 = vmatprep.subr.bf16.mxu1 %v3134_v11 }
 0x67e   :  { %3708 = vmatpush1.bf16.msra.mxu1 %v3133_v12 }
 0x67f   :  { %3709 = vmatprep.subr.bf16.mxu1 %v3141_v36 }
 0x682   :  { %3710 = vmatpush1.bf16.msra.mxu1 %v3140_v27 }
 0x683   :  { %3711 = vmatprep.subr.bf16.mxu1 %v3148_v31 }
 0x686   :  { %3712 = vmatpush1.bf16.msra.mxu1 %v3147_v7 }
 0x687   :  { %3713 = vmatprep.subr.bf16.mxu1 %v3155_v26 }
 0x68a   :  { %3714 = vmatpush1.bf16.msra.mxu1 %v3154_v52 }
 0x68b   :  { %3726 = vmatprep.subr.bf16.mxu1 %v3162_v22 }
 0x68d   :  { %3716 = vmatmul.mubr.bf16.vlgmr.msra.gmra.mrb[40].mxu1 %v8852_v8  ;;  %v3189_v8 = vld [vmem:[#allocation3 + $0xb80] sm:$0xff] }
 0x68e   :  { %3727 = vmatpush1.bf16.msra.mxu1 %v3161_v4  ;;  %3758 = vmatprep.mubr.bf16.mxu1 %v8087_v0  ;;  %v3210_v4 = vld [vmem:[#allocation3 + $0xc28] sm:$0xff] }
 0x68f   :  { %3728 = vmatprep.subr.bf16.mxu1 %v3169_v54 }
 0x692   :  { %3729 = vmatpush1.bf16.msra.mxu1 %v3168_v47 }
 0x693   :  { %3730 = vmatprep.subr.bf16.mxu1 %v3176_v35 }
 0x696   :  { %3731 = vmatpush1.bf16.msra.mxu1 %v3175_v6 }
 0x697   :  { %3732 = vmatprep.subr.bf16.mxu1 %v3183_v58 }
 0x69a   :  { %3733 = vmatpush1.bf16.msra.mxu1 %v3182_v63 }
 0x69b   :  { %3734 = vmatprep.subr.bf16.mxu1 %v3190_v48 }
 0x69e   :  { %3735 = vmatpush1.bf16.msra.mxu1 %v3189_v8 }
 0x69f   :  { %3736 = vmatprep.subr.bf16.mxu1 %v3197_v17 }
 0x6a0   :  { %v3416_v18 = vpop.f32.mrb[36].mxu1  ;;  %v3588_v29 = vpop.f32.mrb[8].mxu0 }
 0x6a1   :  { %v7659_v60 = vadd.f32 %v3416_v18, %v3221_v43  ;;  %v7663_v23 = vadd.f32 %v3588_v29, %v3229_v9  ;;  %v3418_v3 = vpop.f32.mrb[37].mxu1  ;;  %v3590_v62 = vpop.f32.mrb[9].mxu0 }
 0x6a2   :  { %v7660_v28 = vadd.f32 %v3418_v3, %v3225_v49  ;;  %v7664_v20 = vadd.f32 %v3590_v62, %v3233_v32  ;;  %v3420_v38 = vpop.f32.mrb[38].mxu1  ;;  %v3592_v44 = vpop.f32.mrb[10].mxu0  ;;  %3737 = vmatpush1.bf16.msra.mxu1 %v3196_v30 }
 0x6a3   :  { %v8898_v59 = vmax.f32 %v7659_v60, 0.0  ;;  %v8900_v24 = vmax.f32 %v7663_v23, 0.0  ;;  %v7661_v1 = vadd.f32 %v3420_v38, %v3221_v43  ;;  %v7665_v13 = vadd.f32 %v3592_v44, %v3229_v9  ;;  %v3422_v14 = vpop.f32.mrb[39].mxu1  ;;  %v3594_v15 = vpop.f32.mrb[11].mxu0  ;;  %3738 = vmatprep.subr.bf16.mxu1 %v3204_v39 }
 0x6a4   :  { %v8902_v25 = vmax.f32 %v7660_v28, 0.0  ;;  %v8904_v37 = vmax.f32 %v7664_v20, 0.0  ;;  %v7662_v33 = vadd.f32 %v3422_v14, %v3225_v49  ;;  %v7666_v56 = vadd.f32 %v3594_v15, %v3233_v32 }
 0x6a5   :  { %v3955_v16 = vrot.slane %v8898_v59, 4  ;;  %v3967_v45 = vrot.slane %v8900_v24, 4  ;;  %v8908_v46 = vmax.f32 %v7661_v1, 0.0  ;;  %v8910_v11 = vmax.f32 %v7665_v13, 0.0 }
 0x6a6   :  { %v3961_v12 = vrot.slane %v8902_v25, 4  ;;  %v3973_v36 = vrot.slane %v8904_v37, 4  ;;  %v8914_v27 = vmax.f32 %v7662_v33, 0.0  ;;  %v8916_v31 = vmax.f32 %v7666_v56, 0.0  ;;  %3739 = vmatpush1.bf16.msra.mxu1 %v3203_v34 }
 0x6a7   :  { %v3956_v7 = vadd.f32 %v3955_v16, %v8898_v59  ;;  %v3968_v26 = vadd.f32 %v3967_v45, %v8900_v24  ;;  %v3997_v52 = vrot.slane %v8908_v46, 4  ;;  %v4009_v22 = vrot.slane %v8910_v11, 4  ;;  %3740 = vmatprep.subr.bf16.mxu1 %v3211_v55 }
 0x6a8   :  { %v3962_v54 = vadd.f32 %v3961_v12, %v8902_v25  ;;  %v3974_v47 = vadd.f32 %v3973_v36, %v8904_v37  ;;  %v4003_v35 = vrot.slane %v8914_v27, 4  ;;  %v4015_v6 = vrot.slane %v8916_v31, 4 }
 0x6a9   :  { %v3957_v58 = vrot.slane %v3956_v7, 2  ;;  %v3969_v40 = vrot.slane %v3968_v26, 2  ;;  %v3998_v21 = vadd.f32 %v3997_v52, %v8908_v46  ;;  %v4010_v63 = vadd.f32 %v4009_v22, %v8910_v11 }
 0x6aa   :  { %v3963_v48 = vrot.slane %v3962_v54, 2  ;;  %v3975_v8 = vrot.slane %v3974_v47, 2  ;;  %v4004_v17 = vadd.f32 %v4003_v35, %v8914_v27  ;;  %v4016_v43 = vadd.f32 %v4015_v6, %v8916_v31  ;;  %3741 = vmatpush1.bf16.msra.mxu1 %v3210_v4 }
 0x6ab   :  { %v3958_v9 = vadd.f32 %v3957_v58, %v3956_v7  ;;  %v3970_v49 = vadd.f32 %v3969_v40, %v3968_v26  ;;  %v3999_v32 = vrot.slane %v3998_v21, 2  ;;  %v4011_v30 = vrot.slane %v4010_v63, 2 }
 0x6ac   :  { %v3964_v18 = vadd.f32 %v3963_v48, %v3962_v54  ;;  %v3976_v29 = vadd.f32 %v3975_v8, %v3974_v47  ;;  %v4005_v39 = vrot.slane %v4004_v17, 2  ;;  %v4017_v60 = vrot.slane %v4016_v43, 2 }
 0x6ad   :  { %v3959_v23 = vrot.slane %v3958_v9, 1  ;;  %v3971_v3 = vrot.slane %v3970_v49, 1  ;;  %v4000_v62 = vadd.f32 %v3999_v32, %v3998_v21  ;;  %v4012_v28 = vadd.f32 %v4011_v30, %v4010_v63  ;;  %3759 = vmatmul.mubr.bf16.vlgmr.msra.gmra.mrb[40].mxu1 %v8860_v51 }
 0x6ae   :  { %v3965_v20 = vrot.slane %v3964_v18, 1  ;;  %v3977_v38 = vrot.slane %v3976_v29, 1  ;;  %v4006_v44 = vadd.f32 %v4005_v39, %v4004_v17  ;;  %v4018_v1 = vadd.f32 %v4017_v60, %v4016_v43 }
 0x6af   :  { %v3960_v13 = vadd.f32 %v3959_v23, %v3958_v9  ;;  %v3972_v14 = vadd.f32 %v3971_v3, %v3970_v49  ;;  %v4001_v15 = vrot.slane %v4000_v62, 1  ;;  %v4013_v34 = vrot.slane %v4012_v28, 1 }
 0x6b0   :  { %v3966_v33 = vadd.f32 %v3965_v20, %v3964_v18  ;;  %v3978_v56 = vadd.f32 %v3977_v38, %v3976_v29  ;;  %v4007_v55 = vrot.slane %v4006_v44, 1  ;;  %v4019_v16 = vrot.slane %v4018_v1, 1 }
 0x6b1   :  { %v4039_v45 = vmul.f32 0.125, %v3960_v13  ;;  %v4041_v12 = vmul.f32 0.125, %v3972_v14  ;;  %v4002_v36 = vadd.f32 %v4001_v15, %v4000_v62  ;;  %v4014_v7 = vadd.f32 %v4013_v34, %v4012_v28 }
 0x6b2   :  { %v4040_v26 = vmul.f32 0.125, %v3966_v33  ;;  %v4042_v52 = vmul.f32 0.125, %v3978_v56  ;;  %v4008_v22 = vadd.f32 %v4007_v55, %v4006_v44  ;;  %v4020_v51 = vadd.f32 %v4019_v16, %v4018_v1 }
 0x6b3   :  { %v8932_v4 = vsub.f32 %v8898_v59, %v4039_v45  ;;  %v8935_v54 = vsub.f32 %v8900_v24, %v4041_v12  ;;  %v4046_v47 = vmul.f32 0.125, %v4002_v36  ;;  %v4048_v35 = vmul.f32 0.125, %v4014_v7 }
 0x6b4   :  { %v8938_v6 = vsub.f32 %v8902_v25, %v4040_v26  ;;  %v8941_v58 = vsub.f32 %v8904_v37, %v4042_v52  ;;  %v4047_v40 = vmul.f32 0.125, %v4008_v22  ;;  %v4049_v21 = vmul.f32 0.125, %v4020_v51 }
 0x6b5   :  { %v4067_v63 = vmul.f32 %v8932_v4, %v8932_v4  ;;  %v4069_v59 = vmul.f32 %v8935_v54, %v8935_v54  ;;  %v8948_v48 = vsub.f32 %v8908_v46, %v4046_v47  ;;  %v8951_v24 = vsub.f32 %v8910_v11, %v4048_v35 }
 0x6b6   :  { %v4068_v25 = vmul.f32 %v8938_v6, %v8938_v6  ;;  %v4070_v37 = vmul.f32 %v8941_v58, %v8941_v58  ;;  %v8958_v8 = vsub.f32 %v8914_v27, %v4047_v40  ;;  %v8961_v17 = vsub.f32 %v8916_v31, %v4049_v21 }
 0x6b7   :  { %v4081_v43 = vrot.slane %v4067_v63, 4  ;;  %v4093_v9 = vrot.slane %v4069_v59, 4  ;;  %v4074_v46 = vmul.f32 %v8948_v48, %v8948_v48  ;;  %v4076_v11 = vmul.f32 %v8951_v24, %v8951_v24 }
 0x6b8   :  { %v4087_v49 = vrot.slane %v4068_v25, 4  ;;  %v4099_v32 = vrot.slane %v4070_v37, 4  ;;  %v4075_v30 = vmul.f32 %v8958_v8, %v8958_v8  ;;  %v4077_v27 = vmul.f32 %v8961_v17, %v8961_v17 }
 0x6b9   :  { %v4082_v18 = vadd.f32 %v4081_v43, %v4067_v63  ;;  %v4094_v29 = vadd.f32 %v4093_v9, %v4069_v59  ;;  %v4123_v31 = vrot.slane %v4074_v46, 4  ;;  %v4135_v39 = vrot.slane %v4076_v11, 4 }
 0x6ba   :  { %v4088_v60 = vadd.f32 %v4087_v49, %v4068_v25  ;;  %v4100_v23 = vadd.f32 %v4099_v32, %v4070_v37  ;;  %v4129_v3 = vrot.slane %v4075_v30, 4  ;;  %v4141_v62 = vrot.slane %v4077_v27, 4 }
 0x6bb   :  { %v4083_v28 = vrot.slane %v4082_v18, 2  ;;  %v4095_v20 = vrot.slane %v4094_v29, 2  ;;  %v4124_v38 = vadd.f32 %v4123_v31, %v4074_v46  ;;  %v4136_v44 = vadd.f32 %v4135_v39, %v4076_v11 }
 0x6bc   :  { %v4089_v1 = vrot.slane %v4088_v60, 2  ;;  %v4101_v13 = vrot.slane %v4100_v23, 2  ;;  %v4130_v14 = vadd.f32 %v4129_v3, %v4075_v30  ;;  %v4142_v15 = vadd.f32 %v4141_v62, %v4077_v27 }
 0x6bd   :  { %v4084_v34 = vadd.f32 %v4083_v28, %v4082_v18  ;;  %v4096_v33 = vadd.f32 %v4095_v20, %v4094_v29  ;;  %v4125_v56 = vrot.slane %v4124_v38, 2  ;;  %v4137_v55 = vrot.slane %v4136_v44, 2 }
 0x6be   :  { %v4090_v16 = vadd.f32 %v4089_v1, %v4088_v60  ;;  %v4102_v45 = vadd.f32 %v4101_v13, %v4100_v23  ;;  %v4131_v12 = vrot.slane %v4130_v14, 2  ;;  %v4143_v36 = vrot.slane %v4142_v15, 2 }
 0x6bf   :  { %v4085_v7 = vrot.slane %v4084_v34, 1  ;;  %v4097_v26 = vrot.slane %v4096_v33, 1  ;;  %v4126_v52 = vadd.f32 %v4125_v56, %v4124_v38  ;;  %v4138_v22 = vadd.f32 %v4137_v55, %v4136_v44 }
 0x6c0   :  { %v4091_v51 = vrot.slane %v4090_v16, 1  ;;  %v4103_v47 = vrot.slane %v4102_v45, 1  ;;  %v4132_v35 = vadd.f32 %v4131_v12, %v4130_v14  ;;  %v4144_v40 = vadd.f32 %v4143_v36, %v4142_v15  ;;  %v7378_v21 = vpop.f32.mrb[12].mxu0 }
 0x6c1   :  { %v4086_v63 = vadd.f32 %v4085_v7, %v4084_v34  ;;  %v4098_v59 = vadd.f32 %v4097_v26, %v4096_v33  ;;  %v4127_v25 = vrot.slane %v4126_v52, 1  ;;  %v4139_v37 = vrot.slane %v4138_v22, 1  ;;  %v7379_v43 = vpop.f32.mrb[13].mxu0 }
 0x6c2   :  { %v4092_v9 = vadd.f32 %v4091_v51, %v4090_v16  ;;  %v4104_v46 = vadd.f32 %v4103_v47, %v4102_v45  ;;  %v4133_v11 = vrot.slane %v4132_v35, 1  ;;  %v4145_v49 = vrot.slane %v4144_v40, 1  ;;  %v7381_v32 = vpop.f32.mrb[14].mxu0 }
 0x6c3   :  { %v4165_v30 = vmul.f32 0.125, %v4086_v63  ;;  %v4167_v27 = vmul.f32 0.125, %v4098_v59  ;;  %v4128_v18 = vadd.f32 %v4127_v25, %v4126_v52  ;;  %v4140_v29 = vadd.f32 %v4139_v37, %v4138_v22  ;;  %v7382_v31 = vpop.f32.mrb[15].mxu0 }
 0x6c4   :  { %v4166_v39 = vmul.f32 0.125, %v4092_v9  ;;  %v4168_v60 = vmul.f32 0.125, %v4104_v46  ;;  %v4134_v23 = vadd.f32 %v4133_v11, %v4132_v35  ;;  %v4146_v3 = vadd.f32 %v4145_v49, %v4144_v40 }
 0x6c5   :  { %v4179_v62 = vadd.f32 1e-05, %v4165_v30  ;;  %v4181_v28 = vadd.f32 1e-05, %v4167_v27  ;;  %v4172_v20 = vmul.f32 0.125, %v4128_v18  ;;  %v4174_v38 = vmul.f32 0.125, %v4140_v29 }
 0x6c6   :  { %v4180_v44 = vadd.f32 1e-05, %v4166_v39  ;;  %v4182_v1 = vadd.f32 1e-05, %v4168_v60  ;;  %v4173_v13 = vmul.f32 0.125, %v4134_v23  ;;  %v4175_v14 = vmul.f32 0.125, %v4146_v3 }
 0x6c7   :  { %7919 = vrsqrt.f32 %v4179_v62  ;;  %v4186_v15 = vadd.f32 1e-05, %v4172_v20  ;;  %v7380_v34 = vadd.f32 %v7379_v43, %v7378_v21  ;;  %v4188_v33 = vadd.f32 1e-05, %v4174_v38 }
 0x6c8   :  { %7921 = vrsqrt.f32 %v4181_v28  ;;  %v7383_v56 = vadd.f32 %v7382_v31, %v7381_v32  ;;  %v4187_v55 = vadd.f32 1e-05, %v4173_v13  ;;  %v4189_v16 = vadd.f32 1e-05, %v4175_v14 }
 0x6c9   :  { %7923 = vrsqrt.f32 %v4180_v44  ;;  %v3245_v9 = vrot.slane %v8888_v19, %v8272_v2 }
 0x6ca   :  { %7925 = vrsqrt.f32 %v4182_v1 }
 0x6cb   :  { %7927 = vrsqrt.f32 %v4186_v15  ;;  %v3804_v11 = vadd.f32 %v7380_v34, %v3245_v9  ;;  %v3807_v30 = vadd.f32 %v7383_v56, %v3245_v9 }
 0x6cc   :  { %7929 = vrsqrt.f32 %v4188_v33 }
 0x6cd   :  { %7931 = vrsqrt.f32 %v4187_v55 }
 0x6ce   :  { %7933 = vrsqrt.f32 %v4189_v16 }
 0x6d1   :  { %v7920_v45 = vpop.eup %7919 }
 0x6d2   :  { %v7922_v12 = vpop.eup %7921 }
 0x6d3   :  { %v7924_v36 = vpop.eup %7923 }
 0x6d4   :  { %v7926_v7 = vpop.eup %7925  ;;  %v4221_v26 = vcombine.low %v7920_v45, %v7924_v36 }
 0x6d5   :  { %v7928_v52 = vpop.eup %7927  ;;  %v4222_v22 = vcombine.low %v7922_v12, %v7926_v7 }
 0x6d6   :  { %v7930_v51 = vpop.eup %7929  ;;  %v8972_v47 = vrot.slane %v4221_v26, %v8285_v10 }
 0x6d7   :  { %v7932_v35 = vpop.eup %7931  ;;  %v8975_v40 = vrot.slane %v4222_v22, %v8285_v10 }
 0x6d8   :  { %v7934_v21 = vpop.eup %7933  ;;  %v4269_v63 = vcombine.low %v7928_v52, %v7932_v35 }
 0x6d9   :  { %v4252_v59 = vcombine.low %v8972_v47, %v8975_v40  ;;  %v4270_v25 = vcombine.low %v7930_v51, %v7934_v21 }
 0x6da   :  { %v8980_v37 = vrot.slane %v4269_v63, %v8285_v10 }
 0x6db   :  { %v8983_v43 = vrot.slane %v4270_v25, %v8285_v10 }
 0x6dd   :  { %v4300_v46 = vcombine.low %v8980_v37, %v8983_v43 }
 0x6e0   :  { %v7400_v49 = vpop.f32.mrb[16].mxu0 }
 0x6e1   :  { %v7401_v32 = vpop.f32.mrb[17].mxu0 }
 0x6e2   :  { %v7402_v27 = vadd.f32 %v7401_v32, %v7400_v49  ;;  %v7403_v18 = vpop.f32.mrb[18].mxu0  ;;  %v3237_v32 = vrot.slane %v8888_v19, %v8262_v57 }
 0x6e3   :  { %v7404_v29 = vpop.f32.mrb[19].mxu0 }
 0x6e4   :  { %v3845_v31 = vadd.f32 %v7402_v27, %v3804_v11  ;;  %v7405_v39 = vadd.f32 %v7404_v29, %v7403_v18  ;;  %v3241_v27 = vrot.slane %v8888_v19, %v8266_v61 }
 0x6e6   :  { %v3848_v60 = vadd.f32 %v7405_v39, %v3807_v30 }
 0x700   :  { %v7422_v23 = vpop.f32.mrb[20].mxu0 }
 0x701   :  { %v7423_v3 = vpop.f32.mrb[21].mxu0 }
 0x702   :  { %v7424_v62 = vadd.f32 %v7423_v3, %v7422_v23  ;;  %v7425_v28 = vpop.f32.mrb[22].mxu0 }
 0x703   :  { %v7426_v20 = vpop.f32.mrb[23].mxu0 }
 0x704   :  { %v7427_v38 = vadd.f32 %v7426_v20, %v7425_v28  ;;  %v3886_v44 = vadd.f32 %v7424_v62, %v3845_v31 }
 0x706   :  { %v3889_v1 = vadd.f32 %v7427_v38, %v3848_v60 }
 0x720   :  { %v3926_v13 = vpop.f32.mrb[24].mxu0 }
 0x721   :  { %v3927_v14 = vadd.f32 %v3926_v13, %v3886_v44  ;;  %v7605_v15 = vpop.f32.mrb[25].mxu0 }
 0x722   :  { %v3929_v34 = vpop.f32.mrb[26].mxu0 }
 0x723   :  { %v3930_v33 = vadd.f32 %v3929_v34, %v3889_v1  ;;  %v7606_v56 = vpop.f32.mrb[27].mxu0  ;;  %v3939_v55 = vmax.f32 %v3927_v14, 0.0 }
 0x725   :  { %v3946_v16 = vmax.f32 %v3930_v33, 0.0  ;;  %v3991_v45 = vrot.slane %v3939_v55, 4 }
 0x727   :  { %v4033_v12 = vrot.slane %v3946_v16, 4  ;;  %v3992_v36 = vadd.f32 %v3991_v45, %v3939_v55 }
 0x729   :  { %v4034_v7 = vadd.f32 %v4033_v12, %v3946_v16  ;;  %v3993_v26 = vrot.slane %v3992_v36, 2 }
 0x72b   :  { %v4035_v52 = vrot.slane %v4034_v7, 2  ;;  %v3994_v22 = vadd.f32 %v3993_v26, %v3992_v36 }
 0x72d   :  { %v4036_v51 = vadd.f32 %v4035_v52, %v4034_v7  ;;  %v3995_v35 = vrot.slane %v3994_v22, 1 }
 0x72f   :  { %v4037_v21 = vrot.slane %v4036_v51, 1  ;;  %v3996_v63 = vadd.f32 %v3995_v35, %v3994_v22 }
 0x731   :  { %v4038_v25 = vadd.f32 %v4037_v21, %v4036_v51  ;;  %v4045_v9 = vmul.f32 0.125, %v3996_v63 }
 0x733   :  { %v4052_v11 = vmul.f32 0.125, %v4038_v25  ;;  %v8989_v49 = vsub.f32 %v3939_v55, %v4045_v9 }
 0x735   :  { %v8993_v30 = vsub.f32 %v3946_v16, %v4052_v11  ;;  %v4073_v29 = vmul.f32 %v8989_v49, %v8989_v49 }
 0x737   :  { %v4080_v60 = vmul.f32 %v8993_v30, %v8993_v30  ;;  %v4117_v1 = vrot.slane %v4073_v29, 4 }
 0x739   :  { %v4159_v19 = vrot.slane %v4080_v60, 4  ;;  %v4118_v45 = vadd.f32 %v4117_v1, %v4073_v29 }
 0x73b   :  { %v4160_v7 = vadd.f32 %v4159_v19, %v4080_v60  ;;  %v4119_v63 = vrot.slane %v4118_v45, 2 }
 0x73d   :  { %v4161_v11 = vrot.slane %v4160_v7, 2  ;;  %v4120_v29 = vadd.f32 %v4119_v63, %v4118_v45 }
 0x73f   :  { %v4162_v60 = vadd.f32 %v4161_v11, %v4160_v7 }
 0x780   :  { %v3760_v18 = vpop.f32.mrb[40].mxu1 }
 0x781   :  { %v7667_v31 = vadd.f32 %v3760_v18, %v3237_v32  ;;  %v3762_v39 = vpop.f32.mrb[41].mxu1 }
 0x782   :  { %v7668_v23 = vadd.f32 %v3762_v39, %v3241_v27  ;;  %v3764_v3 = vpop.f32.mrb[42].mxu1 }
 0x783   :  { %v3937_v62 = vmax.f32 %v7667_v31, 0.0  ;;  %v7669_v28 = vadd.f32 %v3764_v3, %v3237_v32  ;;  %v3766_v20 = vpop.f32.mrb[43].mxu1 }
 0x784   :  { %v3938_v38 = vmax.f32 %v7668_v23, 0.0  ;;  %v7670_v44 = vadd.f32 %v3766_v20, %v3241_v27 }
 0x785   :  { %v3979_v13 = vrot.slane %v3937_v62, 4  ;;  %v3944_v14 = vmax.f32 %v7669_v28, 0.0 }
 0x786   :  { %v3985_v15 = vrot.slane %v3938_v38, 4  ;;  %v3945_v34 = vmax.f32 %v7670_v44, 0.0 }
 0x787   :  { %v3980_v33 = vadd.f32 %v3979_v13, %v3937_v62  ;;  %v4021_v56 = vrot.slane %v3944_v14, 4 }
 0x788   :  { %v3986_v55 = vadd.f32 %v3985_v15, %v3938_v38  ;;  %v4027_v16 = vrot.slane %v3945_v34, 4 }
 0x789   :  { %v3981_v12 = vrot.slane %v3980_v33, 2  ;;  %v4022_v36 = vadd.f32 %v4021_v56, %v3944_v14 }
 0x78a   :  { %v3987_v26 = vrot.slane %v3986_v55, 2  ;;  %v4028_v52 = vadd.f32 %v4027_v16, %v3945_v34  ;;  %v4163_v16 = vrot.slane %v4162_v60, 1 }
 0x78b   :  { %v3982_v22 = vadd.f32 %v3981_v12, %v3980_v33  ;;  %v4023_v51 = vrot.slane %v4022_v36, 2  ;;  %v4121_v33 = vrot.slane %v4120_v29, 1 }
 0x78c   :  { %v3988_v35 = vadd.f32 %v3987_v26, %v3986_v55  ;;  %v4029_v21 = vrot.slane %v4028_v52, 2 }
 0x78d   :  { %v3983_v25 = vrot.slane %v3982_v22, 1  ;;  %v4024_v9 = vadd.f32 %v4023_v51, %v4022_v36  ;;  %v4122_v26 = vadd.f32 %v4121_v33, %v4120_v29  ;;  %v4164_v51 = vadd.f32 %v4163_v16, %v4162_v60 }
 0x78e   :  { %v3989_v32 = vrot.slane %v3988_v35, 1  ;;  %v4030_v27 = vadd.f32 %v4029_v21, %v4028_v52 }
 0x78f   :  { %v3984_v18 = vadd.f32 %v3983_v25, %v3982_v22  ;;  %v4025_v31 = vrot.slane %v4024_v9, 1 }
 0x790   :  { %v3990_v39 = vadd.f32 %v3989_v32, %v3988_v35  ;;  %v4031_v23 = vrot.slane %v4030_v27, 1 }
 0x791   :  { %v4043_v3 = vmul.f32 0.125, %v3984_v18  ;;  %v4026_v28 = vadd.f32 %v4025_v31, %v4024_v9 }
 0x792   :  { %v4044_v20 = vmul.f32 0.125, %v3990_v39  ;;  %v4032_v44 = vadd.f32 %v4031_v23, %v4030_v27  ;;  %v4178_v27 = vmul.f32 0.125, %v4164_v51 }
 0x793   :  { %v9001_v1 = vsub.f32 %v3937_v62, %v4043_v3  ;;  %v4050_v13 = vmul.f32 0.125, %v4026_v28 }
 0x794   :  { %v9003_v19 = vsub.f32 %v3938_v38, %v4044_v20  ;;  %v4051_v15 = vmul.f32 0.125, %v4032_v44  ;;  %v4192_v60 = vadd.f32 1e-05, %v4178_v27 }
 0x795   :  { %v4071_v56 = vmul.f32 %v9001_v1, %v9001_v1  ;;  %v9007_v55 = vsub.f32 %v3944_v14, %v4050_v13 }
 0x796   :  { %v4072_v45 = vmul.f32 %v9003_v19, %v9003_v19  ;;  %v9011_v12 = vsub.f32 %v3945_v34, %v4051_v15  ;;  %v4171_v34 = vmul.f32 0.125, %v4122_v26 }
 0x797   :  { %v4105_v36 = vrot.slane %v4071_v56, 4  ;;  %v4078_v62 = vmul.f32 %v9007_v55, %v9007_v55 }
 0x798   :  { %v4111_v7 = vrot.slane %v4072_v45, 4  ;;  %v4079_v38 = vmul.f32 %v9011_v12, %v9011_v12  ;;  %v4185_v29 = vadd.f32 1e-05, %v4171_v34  ;;  %v3952_v34 = vld [vmem:[#allocation12 + $0x40] ss:$8 sm:$0xf] }
 0x799   :  { %v4106_v52 = vadd.f32 %v4105_v36, %v4071_v56  ;;  %v4147_v22 = vrot.slane %v4078_v62, 4 }
 0x79a   :  { %v4112_v14 = vadd.f32 %v4111_v7, %v4072_v45  ;;  %v4153_v35 = vrot.slane %v4079_v38, 4  ;;  %7935 = vrsqrt.f32 %v4185_v29  ;;  %v4260_v29 = vrot.slane %v4252_v59, %v8285_v10 }
 0x79b   :  { %v4107_v21 = vrot.slane %v4106_v52, 2  ;;  %v4148_v63 = vadd.f32 %v4147_v22, %v4078_v62  ;;  %7937 = vrsqrt.f32 %v4192_v60 }
 0x79c   :  { %v4113_v25 = vrot.slane %v4112_v14, 2  ;;  %v4154_v9 = vadd.f32 %v4153_v35, %v4079_v38 }
 0x79d   :  { %v4108_v11 = vadd.f32 %v4107_v21, %v4106_v52  ;;  %v4149_v32 = vrot.slane %v4148_v63, 2 }
 0x79e   :  { %v4114_v18 = vadd.f32 %v4113_v25, %v4112_v14  ;;  %v4155_v31 = vrot.slane %v4154_v9, 2 }
 0x79f   :  { %v4109_v39 = vrot.slane %v4108_v11, 1  ;;  %v4150_v23 = vadd.f32 %v4149_v32, %v4148_v63 }
 0x7a0   :  { %v4115_v3 = vrot.slane %v4114_v18, 1  ;;  %v4156_v28 = vadd.f32 %v4155_v31, %v4154_v9  ;;  %v3949_v31 = vld [vmem:[#allocation12 + $0x7] ss:$8 sm:$0xf0] }
 0x7a1   :  { %v4110_v20 = vadd.f32 %v4109_v39, %v4108_v11  ;;  %v4151_v44 = vrot.slane %v4150_v23, 1  ;;  %v3953_v11 = vld [vmem:[#allocation12 + $0x40] ss:$8 sm:$0xf0] }
 0x7a2   :  { %v4116_v13 = vadd.f32 %v4115_v3, %v4114_v18  ;;  %v4157_v15 = vrot.slane %v4156_v28, 1  ;;  %v3948_v18 = vld [vmem:[#allocation12 + $0x7] ss:$8 sm:$0xf] }
 0x7a3   :  { %v4169_v33 = vmul.f32 0.125, %v4110_v20  ;;  %v4152_v56 = vadd.f32 %v4151_v44, %v4150_v23  ;;  %v3950_v20 = vor.u32 %v3949_v31, %v3948_v18 }
 0x7a4   :  { %v4170_v16 = vmul.f32 0.125, %v4116_v13  ;;  %v4158_v45 = vadd.f32 %v4157_v15, %v4156_v28  ;;  %v7936_v22 = vpop.eup %7935  ;;  %v3954_v28 = vor.u32 %v3953_v11, %v3952_v34  ;;  %v4308_v13 = vrot.slane %v4300_v46, %v8285_v10 }
 0x7a5   :  { %v4183_v36 = vadd.f32 1e-05, %v4169_v33  ;;  %v4176_v62 = vmul.f32 0.125, %v4152_v56  ;;  %v7938_v51 = vpop.eup %7937  ;;  %v4251_v9 = vrot.slane %v7936_v22, %v8285_v10 }
 0x7a6   :  { %v4184_v7 = vadd.f32 1e-05, %v4170_v16  ;;  %v4177_v38 = vmul.f32 0.125, %v4158_v45  ;;  %v4299_v39 = vrot.slane %v7938_v51, %v8285_v10  ;;  %v4411_v56 = vrot.slane %v3954_v28, %v8250_v41 }
 0x7a7   :  { %7939 = vrsqrt.f32 %v4183_v36  ;;  %v4190_v26 = vadd.f32 1e-05, %v4176_v62  ;;  %v4415_v45 = vrot.slane %v3954_v28, %v8252_v42  ;;  %v4419_v47 = vrot.slane %v3954_v28, %v8256_v50 }
 0x7a8   :  { %7941 = vrsqrt.f32 %v4184_v7  ;;  %v4191_v52 = vadd.f32 1e-05, %v4177_v38  ;;  %v4423_v59 = vrot.slane %v3954_v28, %v8258_v53  ;;  %v4427_v36 = vrot.slane %v3954_v28, %v8262_v57 }
 0x7a9   :  { %7943 = vrsqrt.f32 %v4190_v26  ;;  %v4431_v62 = vrot.slane %v3954_v28, %v8266_v61  ;;  %v4435_v37 = vrot.slane %v3954_v28, %v8272_v2 }
 0x7aa   :  { %7945 = vrsqrt.f32 %v4191_v52 }
 0x7b1   :  { %v7940_v14 = vpop.eup %7939 }
 0x7b2   :  { %v7942_v35 = vpop.eup %7941 }
 0x7b3   :  { %v7944_v21 = vpop.eup %7943  ;;  %v4223_v63 = vcombine.low %v7940_v14, %v7942_v35 }
 0x7b4   :  { %v7946_v25 = vpop.eup %7945 }
 0x7b5   :  { %v4244_v32 = vrot.slane %v4223_v63, %v8285_v10  ;;  %v4271_v27 = vcombine.low %v7944_v21, %v7946_v25 }
 0x7b7   :  { %v4253_v23 = vcombine.low %v4244_v32, %v4251_v9  ;;  %v4292_v3 = vrot.slane %v4271_v27, %v8285_v10 }
 0x7b9   :  { %v4267_v44 = vrot.slane %v4253_v23, %v8285_v10  ;;  %v4301_v60 = vcombine.low %v4292_v3, %v4299_v39 }
 0x7bb   :  { %v4268_v15 = vcombine.low %v4260_v29, %v4267_v44  ;;  %v4315_v33 = vrot.slane %v4301_v60, %v8285_v10 }
 0x7bd   :  { %v4319_v16 = vmul.f32 %v4268_v15, %v3950_v20  ;;  %v4316_v40 = vcombine.low %v4308_v13, %v4315_v33 }
 0x7bf   :  { %v4326_v43 = vrot.slane %v4319_v16, %v8250_v41  ;;  %v4330_v46 = vrot.slane %v4319_v16, %v8252_v42  ;;  %v4334_v7 = vrot.slane %v4319_v16, %v8256_v50  ;;  %v4338_v38 = vrot.slane %v4319_v16, %v8258_v53 }
 0x7c0   :  { %v4342_v26 = vrot.slane %v4319_v16, %v8262_v57  ;;  %v4346_v52 = vrot.slane %v4319_v16, %v8266_v61  ;;  %v4350_v22 = vrot.slane %v4319_v16, %v8272_v2  ;;  %v4320_v51 = vmul.f32 %v4316_v40, %v3950_v20 }
 0x7c1   :  { %v4393_v14 = vmul.f32 %v4326_v43, %v8932_v4  ;;  %v4394_v35 = vmul.f32 %v4330_v46, %v8938_v6  ;;  %v4395_v21 = vmul.f32 %v4334_v7, %v8935_v54  ;;  %v4396_v63 = vmul.f32 %v4338_v38, %v8941_v58 }
 0x7c2   :  { %v4397_v25 = vmul.f32 %v4342_v26, %v9001_v1  ;;  %v4398_v9 = vmul.f32 %v4346_v52, %v9003_v19  ;;  %v4399_v34 = vmul.f32 %v4350_v22, %v8989_v49  ;;  %v4354_v11 = vrot.slane %v4320_v51, %v8250_v41 }
 0x7c3   :  { %v9053_v32 = vadd.f32 %v4411_v56, %v4393_v14  ;;  %v4444_v27 = vadd.f32 %v4415_v45, %v4394_v35  ;;  %v9055_v18 = vadd.f32 %v4419_v47, %v4395_v21  ;;  %v9057_v4 = vadd.f32 %v4423_v59, %v4396_v63 }
 0x7c4   :  { %v9059_v6 = vadd.f32 %v4427_v36, %v4397_v25  ;;  %v9061_v54 = vadd.f32 %v4431_v62, %v4398_v9  ;;  %v9063_v58 = vadd.f32 %v4435_v37, %v4399_v34  ;;  %v4358_v1 = vrot.slane %v4320_v51, %v8252_v42 }
 0x7c5   :  { %v4362_v19 = vrot.slane %v4320_v51, %v8256_v50  ;;  %v4366_v49 = vrot.slane %v4320_v51, %v8258_v53  ;;  %v4370_v31 = vrot.slane %v4320_v51, %v8262_v57  ;;  %v4374_v39 = vrot.slane %v4320_v51, %v8266_v61 }
 0x7c6   :  { %v4378_v23 = vrot.slane %v4320_v51, %v8272_v2  ;;  %v4400_v3 = vmul.f32 %v4354_v11, %v8948_v48  ;;  %v4401_v28 = vmul.f32 %v4358_v1, %v8958_v8 }
 0x7c7   :  { %v4402_v29 = vmul.f32 %v4362_v19, %v8951_v24  ;;  %v4403_v20 = vmul.f32 %v4366_v49, %v8961_v17  ;;  %v4404_v44 = vmul.f32 %v4370_v31, %v9007_v55  ;;  %v4405_v60 = vmul.f32 %v4374_v39, %v9011_v12 }
 0x7c8   :  { %v4406_v13 = vmul.f32 %v4378_v23, %v8993_v30  ;;  %v9078_v15 = vadd.f32 %v4411_v56, %v4400_v3  ;;  %v4451_v33 = vadd.f32 %v4415_v45, %v4401_v28 }
 0x7c9   :  { %v9080_v16 = vadd.f32 %v4419_v47, %v4402_v29  ;;  %v9082_v40 = vadd.f32 %v4423_v59, %v4403_v20  ;;  %v9084_v48 = vadd.f32 %v4427_v36, %v4404_v44  ;;  %v9086_v8 = vadd.f32 %v4431_v62, %v4405_v60 }
 0x7ca   :  { %v9088_v24 = vadd.f32 %v4435_v37, %v4406_v13 }
 0x7cb   :  { %8071 = dma.done.wait [#allocation6 + $0x2], 50176 }
 0x7cc   :  { %8072 = vsyncadd [#allocation6 + $0x2], 4294917120  ;;  %v9090_v17 = vpack.c.bf16 %v4451_v33, %v4444_v27  ;;  %v4467_v30 = vld [vmem:[#allocation4 + $0x8] sm:$0xff]  ;;  %v4469_v55 = vld [vmem:[#allocation4 + $0x18] sm:$0xff] }
 0x7cd   :  { %v4466_v12 = vld [vmem:[#allocation4] sm:$0xff]  ;;  %4858 = vmatprep.subr.bf16.mxu1 %v4467_v30  ;;  %5030 = vmatprep.subr.bf16.mxu0 %v4469_v55  ;;  %v4468_v56 = vld [vmem:[#allocation4 + $0x10] sm:$0xff]  ;;  %v4473_v59 = vld [vmem:[#allocation4 + $0x38] sm:$0xff] }
 0x7ce   :  { %4890 = vmatprep.mubr.bf16.mxu1 %v9090_v17  ;;  %5062 = vmatprep.mubr.bf16.mxu0 %v9090_v17  ;;  %v4474_v45 = vld [vmem:[#allocation4 + $0x40] sm:$0xff]  ;;  %v4476_v47 = vld [vmem:[#allocation4 + $0x50] sm:$0xff]  ;;  %v4475_v36 = vld [vmem:[#allocation4 + $0x48] sm:$0xff] }
 0x7cf   :  { %4859 = vmatpush1.bf16.msra.mxu1 %v4466_v12  ;;  %5031 = vmatpush1.bf16.msra.mxu0 %v4468_v56  ;;  %v4481_v62 = vld [vmem:[#allocation4 + $0x78] sm:$0xff]  ;;  %v4483_v37 = vld [vmem:[#allocation4 + $0x88] sm:$0xff]  ;;  %v4480_v43 = vld [vmem:[#allocation4 + $0x70] sm:$0xff] }
 0x7d0   :  { %4860 = vmatprep.subr.bf16.mxu1 %v4474_v45  ;;  %5032 = vmatprep.subr.bf16.mxu0 %v4476_v47  ;;  %v4482_v46 = vld [vmem:[#allocation4 + $0x80] sm:$0xff]  ;;  %v4488_v7 = vld [vmem:[#allocation4 + $0xb0] sm:$0xff]  ;;  %v4487_v26 = vld [vmem:[#allocation4 + $0xa8] sm:$0xff] }
 0x7d1   :  { %v4490_v38 = vld [vmem:[#allocation4 + $0xc0] sm:$0xff]  ;;  %v4489_v52 = vld [vmem:[#allocation4 + $0xb8] sm:$0xff]  ;;  %v4495_v22 = vld [vmem:[#allocation4 + $0xe8] sm:$0xff] }
 0x7d2   :  { %v4497_v51 = vld [vmem:[#allocation4 + $0xf8] sm:$0xff]  ;;  %v4494_v14 = vld [vmem:[#allocation4 + $0xe0] sm:$0xff]  ;;  %v4496_v35 = vld [vmem:[#allocation4 + $0xf0] sm:$0xff] }
 0x7d3   :  { %4861 = vmatpush1.bf16.msra.mxu1 %v4473_v59  ;;  %5033 = vmatpush1.bf16.msra.mxu0 %v4475_v36  ;;  %v4502_v21 = vld [vmem:[#allocation4 + $0x120] sm:$0xff]  ;;  %v4504_v63 = vld [vmem:[#allocation4 + $0x130] sm:$0xff]  ;;  %v4501_v25 = vld [vmem:[#allocation4 + $0x118] sm:$0xff] }
 0x7d4   :  { %4862 = vmatprep.subr.bf16.mxu1 %v4481_v62  ;;  %5034 = vmatprep.subr.bf16.mxu0 %v4483_v37  ;;  %v4503_v9 = vld [vmem:[#allocation4 + $0x128] sm:$0xff]  ;;  %v4509_v34 = vld [vmem:[#allocation4 + $0x158] sm:$0xff]  ;;  %v4508_v27 = vld [vmem:[#allocation4 + $0x150] sm:$0xff] }
 0x7d5   :  { %v4511_v11 = vld [vmem:[#allocation4 + $0x168] sm:$0xff]  ;;  %v4510_v1 = vld [vmem:[#allocation4 + $0x160] sm:$0xff]  ;;  %v4516_v19 = vld [vmem:[#allocation4 + $0x190] sm:$0xff] }
 0x7d6   :  { %v4518_v49 = vld [vmem:[#allocation4 + $0x1a0] sm:$0xff]  ;;  %v4515_v31 = vld [vmem:[#allocation4 + $0x188] sm:$0xff]  ;;  %v4517_v39 = vld [vmem:[#allocation4 + $0x198] sm:$0xff] }
 0x7d7   :  { %4863 = vmatpush1.bf16.msra.mxu1 %v4480_v43  ;;  %5035 = vmatpush1.bf16.msra.mxu0 %v4482_v46  ;;  %v4523_v23 = vld [vmem:[#allocation4 + $0x1c8] sm:$0xff]  ;;  %v4525_v3 = vld [vmem:[#allocation4 + $0x1d8] sm:$0xff]  ;;  %v4522_v28 = vld [vmem:[#allocation4 + $0x1c0] sm:$0xff] }
 0x7d8   :  { %4864 = vmatprep.subr.bf16.mxu1 %v4488_v7  ;;  %5036 = vmatprep.subr.bf16.mxu0 %v4490_v38  ;;  %v4524_v29 = vld [vmem:[#allocation4 + $0x1d0] sm:$0xff]  ;;  %v4530_v20 = vld [vmem:[#allocation4 + $0x200] sm:$0xff]  ;;  %v4529_v60 = vld [vmem:[#allocation4 + $0x1f8] sm:$0xff] }
 0x7d9   :  { %v4532_v44 = vld [vmem:[#allocation4 + $0x210] sm:$0xff]  ;;  %v4531_v13 = vld [vmem:[#allocation4 + $0x208] sm:$0xff]  ;;  %v4537_v33 = vld [vmem:[#allocation4 + $0x238] sm:$0xff] }
 0x7da   :  { %v4539_v30 = vld [vmem:[#allocation4 + $0x248] sm:$0xff]  ;;  %v4536_v55 = vld [vmem:[#allocation4 + $0x230] sm:$0xff]  ;;  %v4538_v12 = vld [vmem:[#allocation4 + $0x240] sm:$0xff] }
 0x7db   :  { %4865 = vmatpush1.bf16.msra.mxu1 %v4487_v26  ;;  %5037 = vmatpush1.bf16.msra.mxu0 %v4489_v52  ;;  %v4544_v56 = vld [vmem:[#allocation4 + $0x270] sm:$0xff]  ;;  %v4546_v45 = vld [vmem:[#allocation4 + $0x280] sm:$0xff]  ;;  %v4543_v47 = vld [vmem:[#allocation4 + $0x268] sm:$0xff] }
 0x7dc   :  { %4866 = vmatprep.subr.bf16.mxu1 %v4495_v22  ;;  %5038 = vmatprep.subr.bf16.mxu0 %v4497_v51  ;;  %v4545_v59 = vld [vmem:[#allocation4 + $0x278] sm:$0xff]  ;;  %v4551_v36 = vld [vmem:[#allocation4 + $0x2a8] sm:$0xff]  ;;  %v4550_v37 = vld [vmem:[#allocation4 + $0x2a0] sm:$0xff] }
 0x7dd   :  { %v4553_v62 = vld [vmem:[#allocation4 + $0x2b8] sm:$0xff]  ;;  %v4552_v43 = vld [vmem:[#allocation4 + $0x2b0] sm:$0xff]  ;;  %v4558_v46 = vld [vmem:[#allocation4 + $0x2e0] sm:$0xff] }
 0x7de   :  { %v4560_v7 = vld [vmem:[#allocation4 + $0x2f0] sm:$0xff]  ;;  %v4557_v38 = vld [vmem:[#allocation4 + $0x2d8] sm:$0xff]  ;;  %v4559_v26 = vld [vmem:[#allocation4 + $0x2e8] sm:$0xff] }
 0x7df   :  { %4867 = vmatpush1.bf16.msra.mxu1 %v4494_v14  ;;  %5039 = vmatpush1.bf16.msra.mxu0 %v4496_v35  ;;  %v4565_v52 = vld [vmem:[#allocation4 + $0x318] sm:$0xff]  ;;  %v4567_v22 = vld [vmem:[#allocation4 + $0x328] sm:$0xff]  ;;  %v4564_v51 = vld [vmem:[#allocation4 + $0x310] sm:$0xff] }
 0x7e0   :  { %4868 = vmatprep.subr.bf16.mxu1 %v4502_v21  ;;  %5040 = vmatprep.subr.bf16.mxu0 %v4504_v63  ;;  %v4566_v14 = vld [vmem:[#allocation4 + $0x320] sm:$0xff]  ;;  %v4572_v35 = vld [vmem:[#allocation4 + $0x350] sm:$0xff]  ;;  %v4571_v63 = vld [vmem:[#allocation4 + $0x348] sm:$0xff] }
 0x7e1   :  { %v4574_v21 = vld [vmem:[#allocation4 + $0x360] sm:$0xff] }
 0x7e3   :  { %4869 = vmatpush1.bf16.msra.mxu1 %v4501_v25  ;;  %5041 = vmatpush1.bf16.msra.mxu0 %v4503_v9  ;;  %v4573_v25 = vld [vmem:[#allocation4 + $0x358] sm:$0xff]  ;;  %v4579_v9 = vld [vmem:[#allocation4 + $0x388] sm:$0xff] }
 0x7e4   :  { %4870 = vmatprep.subr.bf16.mxu1 %v4509_v34  ;;  %5042 = vmatprep.subr.bf16.mxu0 %v4511_v11  ;;  %v4581_v34 = vld [vmem:[#allocation4 + $0x398] sm:$0xff]  ;;  %v9096_v11 = vpack.c.bf16 %v9078_v15, %v9053_v32  ;;  %v4587_v15 = vld [vmem:[#allocation4 + $0x3c8] sm:$0xff] }
 0x7e5   :  { %v4585_v32 = vld [vmem:[#allocation4 + $0x3b8] sm:$0xff] }
 0x7e7   :  { %4871 = vmatpush1.bf16.msra.mxu1 %v4508_v27  ;;  %5043 = vmatpush1.bf16.msra.mxu0 %v4510_v1  ;;  %v4578_v27 = vld [vmem:[#allocation4 + $0x380] sm:$0xff]  ;;  %v4580_v1 = vld [vmem:[#allocation4 + $0x390] sm:$0xff] }
 0x7e8   :  { %4872 = vmatprep.subr.bf16.mxu1 %v4516_v19  ;;  %5044 = vmatprep.subr.bf16.mxu0 %v4518_v49  ;;  %v4586_v19 = vld [vmem:[#allocation4 + $0x3c0] sm:$0xff]  ;;  %v4588_v49 = vld [vmem:[#allocation4 + $0x3d0] sm:$0xff] }
 0x7eb   :  { %4873 = vmatpush1.bf16.msra.mxu1 %v4515_v31  ;;  %5045 = vmatpush1.bf16.msra.mxu0 %v4517_v39  ;;  %v9100_v31 = vpack.c.bf16 %v9082_v40, %v9057_v4  ;;  %v4593_v39 = vld [vmem:[#allocation4 + $0x3f8] sm:$0xff]  ;;  %v4592_v4 = vld [vmem:[#allocation4 + $0x3f0] sm:$0xff]  ;;  %v4594_v40 = vld [vmem:[#allocation4 + $0x400] sm:$0xff] }
 0x7ec   :  { %4874 = vmatprep.subr.bf16.mxu1 %v4523_v23  ;;  %5046 = vmatprep.subr.bf16.mxu0 %v4525_v3  ;;  %v4595_v23 = vld [vmem:[#allocation4 + $0x408] sm:$0xff]  ;;  %v4600_v3 = vld [vmem:[#allocation4 + $0x430] sm:$0xff] }
 0x7ef   :  { %4875 = vmatpush1.bf16.msra.mxu1 %v4522_v28  ;;  %5047 = vmatpush1.bf16.msra.mxu0 %v4524_v29  ;;  %v4602_v28 = vld [vmem:[#allocation4 + $0x440] sm:$0xff]  ;;  %v4599_v29 = vld [vmem:[#allocation4 + $0x428] sm:$0xff] }
 0x7f0   :  { %4876 = vmatprep.subr.bf16.mxu1 %v4530_v20  ;;  %5048 = vmatprep.subr.bf16.mxu0 %v4532_v44  ;;  %v4601_v20 = vld [vmem:[#allocation4 + $0x438] sm:$0xff]  ;;  %v4607_v44 = vld [vmem:[#allocation4 + $0x468] sm:$0xff] }
 0x7f3   :  { %4877 = vmatpush1.bf16.msra.mxu1 %v4529_v60  ;;  %5049 = vmatpush1.bf16.msra.mxu0 %v4531_v13  ;;  %v4609_v60 = vld [vmem:[#allocation4 + $0x478] sm:$0xff]  ;;  %v4606_v13 = vld [vmem:[#allocation4 + $0x460] sm:$0xff] }
 0x7f4   :  { %4878 = vmatprep.subr.bf16.mxu1 %v4537_v33  ;;  %5050 = vmatprep.subr.bf16.mxu0 %v4539_v30  ;;  %v4608_v33 = vld [vmem:[#allocation4 + $0x470] sm:$0xff]  ;;  %v4614_v30 = vld [vmem:[#allocation4 + $0x4a0] sm:$0xff] }
 0x7f7   :  { %4879 = vmatpush1.bf16.msra.mxu1 %v4536_v55  ;;  %5051 = vmatpush1.bf16.msra.mxu0 %v4538_v12  ;;  %v4616_v55 = vld [vmem:[#allocation4 + $0x4b0] sm:$0xff]  ;;  %v4613_v12 = vld [vmem:[#allocation4 + $0x498] sm:$0xff] }
 0x7f8   :  { %4880 = vmatprep.subr.bf16.mxu1 %v4544_v56  ;;  %5052 = vmatprep.subr.bf16.mxu0 %v4546_v45  ;;  %v4615_v56 = vld [vmem:[#allocation4 + $0x4a8] sm:$0xff]  ;;  %v4621_v45 = vld [vmem:[#allocation4 + $0x4d8] sm:$0xff] }
 0x7fb   :  { %4881 = vmatpush1.bf16.msra.mxu1 %v4543_v47  ;;  %5053 = vmatpush1.bf16.msra.mxu0 %v4545_v59  ;;  %v4623_v47 = vld [vmem:[#allocation4 + $0x4e8] sm:$0xff]  ;;  %v4620_v59 = vld [vmem:[#allocation4 + $0x4d0] sm:$0xff] }
 0x7fc   :  { %4882 = vmatprep.subr.bf16.mxu1 %v4551_v36  ;;  %5054 = vmatprep.subr.bf16.mxu0 %v4553_v62  ;;  %v4622_v36 = vld [vmem:[#allocation4 + $0x4e0] sm:$0xff]  ;;  %v4628_v62 = vld [vmem:[#allocation4 + $0x510] sm:$0xff] }
 0x7ff   :  { %4883 = vmatpush1.bf16.msra.mxu1 %v4550_v37  ;;  %5055 = vmatpush1.bf16.msra.mxu0 %v4552_v43  ;;  %v4630_v37 = vld [vmem:[#allocation4 + $0x520] sm:$0xff]  ;;  %v4627_v43 = vld [vmem:[#allocation4 + $0x508] sm:$0xff] }
 0x800   :  { %4884 = vmatprep.subr.bf16.mxu1 %v4558_v46  ;;  %5056 = vmatprep.subr.bf16.mxu0 %v4560_v7  ;;  %v4629_v46 = vld [vmem:[#allocation4 + $0x518] sm:$0xff]  ;;  %v4635_v7 = vld [vmem:[#allocation4 + $0x548] sm:$0xff] }
 0x803   :  { %4885 = vmatpush1.bf16.msra.mxu1 %v4557_v38  ;;  %5057 = vmatpush1.bf16.msra.mxu0 %v4559_v26  ;;  %v4637_v38 = vld [vmem:[#allocation4 + $0x558] sm:$0xff]  ;;  %v4634_v26 = vld [vmem:[#allocation4 + $0x540] sm:$0xff] }
 0x804   :  { %4886 = vmatprep.subr.bf16.mxu1 %v4565_v52  ;;  %5058 = vmatprep.subr.bf16.mxu0 %v4567_v22  ;;  %v4636_v52 = vld [vmem:[#allocation4 + $0x550] sm:$0xff]  ;;  %v4642_v22 = vld [vmem:[#allocation4 + $0x580] sm:$0xff] }
 0x807   :  { %4887 = vmatpush1.bf16.msra.mxu1 %v4564_v51  ;;  %5059 = vmatpush1.bf16.msra.mxu0 %v4566_v14  ;;  %v4644_v51 = vld [vmem:[#allocation4 + $0x590] sm:$0xff]  ;;  %v4641_v14 = vld [vmem:[#allocation4 + $0x578] sm:$0xff] }
 0x808   :  { %4888 = vmatprep.subr.bf16.mxu1 %v4572_v35  ;;  %5060 = vmatprep.subr.bf16.mxu0 %v4574_v21  ;;  %v4643_v35 = vld [vmem:[#allocation4 + $0x588] sm:$0xff]  ;;  %v4649_v21 = vld [vmem:[#allocation4 + $0x5b8] sm:$0xff] }
 0x80b   :  { %4889 = vmatpush1.bf16.msra.mxu1 %v4571_v63  ;;  %5061 = vmatpush1.bf16.msra.mxu0 %v4573_v25  ;;  %v4651_v63 = vld [vmem:[#allocation4 + $0x5c8] sm:$0xff]  ;;  %v4648_v25 = vld [vmem:[#allocation4 + $0x5b0] sm:$0xff] }
 0x80c   :  { %4901 = vmatprep.subr.bf16.mxu1 %v4579_v9  ;;  %5073 = vmatprep.subr.bf16.mxu0 %v4581_v34  ;;  %v4650_v9 = vld [vmem:[#allocation4 + $0x5c0] sm:$0xff]  ;;  %v4656_v34 = vld [vmem:[#allocation4 + $0x5f0] sm:$0xff] }
 0x80e   :  { %4891 = vmatmul.mubr.bf16.vlgmr.msra.gmra.mrb[44].mxu1 %v9096_v11  ;;  %5063 = vmatmul.mubr.bf16.vlgmr.msra.gmra.mrb[28].mxu0 %v9096_v11 }
 0x80f   :  { %4902 = vmatpush1.bf16.msra.mxu1 %v4578_v27  ;;  %5074 = vmatpush1.bf16.msra.mxu0 %v4580_v1  ;;  %v4658_v27 = vld [vmem:[#allocation4 + $0x600] sm:$0xff]  ;;  %v4655_v1 = vld [vmem:[#allocation4 + $0x5e8] sm:$0xff] }
 0x810   :  { %4903 = vmatprep.subr.bf16.mxu1 %v4586_v19  ;;  %5075 = vmatprep.subr.bf16.mxu0 %v4588_v49  ;;  %v4657_v19 = vld [vmem:[#allocation4 + $0x5f8] sm:$0xff]  ;;  %v4663_v49 = vld [vmem:[#allocation4 + $0x628] sm:$0xff] }
 0x811   :  { %4933 = vmatprep.mubr.bf16.mxu1 %v9100_v31  ;;  %5105 = vmatprep.mubr.bf16.mxu0 %v9100_v31 }
 0x813   :  { %4904 = vmatpush1.bf16.msra.mxu1 %v4585_v32  ;;  %5076 = vmatpush1.bf16.msra.mxu0 %v4587_v15  ;;  %v4665_v32 = vld [vmem:[#allocation4 + $0x638] sm:$0xff]  ;;  %v4662_v15 = vld [vmem:[#allocation4 + $0x620] sm:$0xff] }
 0x814   :  { %4905 = vmatprep.subr.bf16.mxu1 %v4593_v39  ;;  %5077 = vmatprep.subr.bf16.mxu0 %v4595_v23  ;;  %v4664_v39 = vld [vmem:[#allocation4 + $0x630] sm:$0xff]  ;;  %v4670_v23 = vld [vmem:[#allocation4 + $0x660] sm:$0xff] }
 0x817   :  { %4906 = vmatpush1.bf16.msra.mxu1 %v4592_v4  ;;  %5078 = vmatpush1.bf16.msra.mxu0 %v4594_v40  ;;  %v4672_v4 = vld [vmem:[#allocation4 + $0x670] sm:$0xff]  ;;  %v4669_v40 = vld [vmem:[#allocation4 + $0x658] sm:$0xff] }
 0x818   :  { %4907 = vmatprep.subr.bf16.mxu1 %v4600_v3  ;;  %5079 = vmatprep.subr.bf16.mxu0 %v4602_v28  ;;  %v4671_v3 = vld [vmem:[#allocation4 + $0x668] sm:$0xff]  ;;  %v4677_v28 = vld [vmem:[#allocation4 + $0x698] sm:$0xff] }
 0x81b   :  { %4908 = vmatpush1.bf16.msra.mxu1 %v4599_v29  ;;  %5080 = vmatpush1.bf16.msra.mxu0 %v4601_v20  ;;  %v4679_v29 = vld [vmem:[#allocation4 + $0x6a8] sm:$0xff]  ;;  %v4676_v20 = vld [vmem:[#allocation4 + $0x690] sm:$0xff] }
 0x81c   :  { %4909 = vmatprep.subr.bf16.mxu1 %v4607_v44  ;;  %5081 = vmatprep.subr.bf16.mxu0 %v4609_v60  ;;  %v4678_v44 = vld [vmem:[#allocation4 + $0x6a0] sm:$0xff]  ;;  %v4684_v60 = vld [vmem:[#allocation4 + $0x6d0] sm:$0xff] }
 0x81f   :  { %4910 = vmatpush1.bf16.msra.mxu1 %v4606_v13  ;;  %5082 = vmatpush1.bf16.msra.mxu0 %v4608_v33  ;;  %v4686_v13 = vld [vmem:[#allocation4 + $0x6e0] sm:$0xff]  ;;  %v4683_v33 = vld [vmem:[#allocation4 + $0x6c8] sm:$0xff] }
 0x820   :  { %4911 = vmatprep.subr.bf16.mxu1 %v4614_v30  ;;  %5083 = vmatprep.subr.bf16.mxu0 %v4616_v55  ;;  %v4685_v30 = vld [vmem:[#allocation4 + $0x6d8] sm:$0xff]  ;;  %v4691_v55 = vld [vmem:[#allocation4 + $0x708] sm:$0xff] }
 0x823   :  { %4912 = vmatpush1.bf16.msra.mxu1 %v4613_v12  ;;  %5084 = vmatpush1.bf16.msra.mxu0 %v4615_v56  ;;  %v4693_v12 = vld [vmem:[#allocation4 + $0x718] sm:$0xff]  ;;  %v9108_v56 = vpack.c.bf16 %v9080_v16, %v9055_v18  ;;  %v4699_v16 = vld [vmem:[#allocation4 + $0x748] sm:$0xff] }
 0x824   :  { %4913 = vmatprep.subr.bf16.mxu1 %v4621_v45  ;;  %5085 = vmatprep.subr.bf16.mxu0 %v4623_v47  ;;  %v4690_v45 = vld [vmem:[#allocation4 + $0x700] sm:$0xff]  ;;  %v4692_v47 = vld [vmem:[#allocation4 + $0x710] sm:$0xff]  ;;  %v4697_v18 = vld [vmem:[#allocation4 + $0x738] sm:$0xff] }
 0x827   :  { %4914 = vmatpush1.bf16.msra.mxu1 %v4620_v59  ;;  %5086 = vmatpush1.bf16.msra.mxu0 %v4622_v36  ;;  %v4698_v59 = vld [vmem:[#allocation4 + $0x740] sm:$0xff]  ;;  %v4700_v36 = vld [vmem:[#allocation4 + $0x750] sm:$0xff] }
 0x828   :  { %4915 = vmatprep.subr.bf16.mxu1 %v4628_v62  ;;  %5087 = vmatprep.subr.bf16.mxu0 %v4630_v37  ;;  %v9112_v62 = vpack.c.bf16 %v9086_v8, %v9061_v54  ;;  %v4705_v37 = vld [vmem:[#allocation4 + $0x778] sm:$0xff]  ;;  %v4704_v54 = vld [vmem:[#allocation4 + $0x770] sm:$0xff]  ;;  %v4706_v8 = vld [vmem:[#allocation4 + $0x780] sm:$0xff] }
 0x82b   :  { %4916 = vmatpush1.bf16.msra.mxu1 %v4627_v43  ;;  %5088 = vmatpush1.bf16.msra.mxu0 %v4629_v46  ;;  %v4707_v43 = vld [vmem:[#allocation4 + $0x788] sm:$0xff]  ;;  %v4712_v46 = vld [vmem:[#allocation4 + $0x7b0] sm:$0xff] }
 0x82c   :  { %4917 = vmatprep.subr.bf16.mxu1 %v4635_v7  ;;  %5089 = vmatprep.subr.bf16.mxu0 %v4637_v38  ;;  %v4714_v7 = vld [vmem:[#allocation4 + $0x7c0] sm:$0xff]  ;;  %v4711_v38 = vld [vmem:[#allocation4 + $0x7a8] sm:$0xff] }
 0x82f   :  { %4918 = vmatpush1.bf16.msra.mxu1 %v4634_v26  ;;  %5090 = vmatpush1.bf16.msra.mxu0 %v4636_v52  ;;  %v4713_v26 = vld [vmem:[#allocation4 + $0x7b8] sm:$0xff]  ;;  %v4719_v52 = vld [vmem:[#allocation4 + $0x7e8] sm:$0xff] }
 0x830   :  { %4919 = vmatprep.subr.bf16.mxu1 %v4642_v22  ;;  %5091 = vmatprep.subr.bf16.mxu0 %v4644_v51  ;;  %v4721_v22 = vld [vmem:[#allocation4 + $0x7f8] sm:$0xff]  ;;  %v4718_v51 = vld [vmem:[#allocation4 + $0x7e0] sm:$0xff] }
 0x833   :  { %4920 = vmatpush1.bf16.msra.mxu1 %v4641_v14  ;;  %5092 = vmatpush1.bf16.msra.mxu0 %v4643_v35  ;;  %v4720_v14 = vld [vmem:[#allocation4 + $0x7f0] sm:$0xff]  ;;  %v4726_v35 = vld [vmem:[#allocation4 + $0x820] sm:$0xff] }
 0x834   :  { %4921 = vmatprep.subr.bf16.mxu1 %v4649_v21  ;;  %5093 = vmatprep.subr.bf16.mxu0 %v4651_v63  ;;  %v4728_v21 = vld [vmem:[#allocation4 + $0x830] sm:$0xff]  ;;  %v4725_v63 = vld [vmem:[#allocation4 + $0x818] sm:$0xff] }
 0x837   :  { %4922 = vmatpush1.bf16.msra.mxu1 %v4648_v25  ;;  %5094 = vmatpush1.bf16.msra.mxu0 %v4650_v9  ;;  %v4727_v25 = vld [vmem:[#allocation4 + $0x828] sm:$0xff]  ;;  %v4733_v9 = vld [vmem:[#allocation4 + $0x858] sm:$0xff] }
 0x838   :  { %4923 = vmatprep.subr.bf16.mxu1 %v4656_v34  ;;  %5095 = vmatprep.subr.bf16.mxu0 %v4658_v27  ;;  %v4735_v34 = vld [vmem:[#allocation4 + $0x868] sm:$0xff]  ;;  %v4732_v27 = vld [vmem:[#allocation4 + $0x850] sm:$0xff] }
 0x83b   :  { %4924 = vmatpush1.bf16.msra.mxu1 %v4655_v1  ;;  %5096 = vmatpush1.bf16.msra.mxu0 %v4657_v19  ;;  %v4734_v1 = vld [vmem:[#allocation4 + $0x860] sm:$0xff]  ;;  %v4740_v19 = vld [vmem:[#allocation4 + $0x890] sm:$0xff] }
 0x83c   :  { %4925 = vmatprep.subr.bf16.mxu1 %v4663_v49  ;;  %5097 = vmatprep.subr.bf16.mxu0 %v4665_v32  ;;  %v4742_v49 = vld [vmem:[#allocation4 + $0x8a0] sm:$0xff]  ;;  %v4739_v32 = vld [vmem:[#allocation4 + $0x888] sm:$0xff] }
 0x83f   :  { %4926 = vmatpush1.bf16.msra.mxu1 %v4662_v15  ;;  %5098 = vmatpush1.bf16.msra.mxu0 %v4664_v39  ;;  %v4741_v15 = vld [vmem:[#allocation4 + $0x898] sm:$0xff]  ;;  %v4747_v39 = vld [vmem:[#allocation4 + $0x8c8] sm:$0xff] }
 0x840   :  { %4927 = vmatprep.subr.bf16.mxu1 %v4670_v23  ;;  %5099 = vmatprep.subr.bf16.mxu0 %v4672_v4  ;;  %v4749_v23 = vld [vmem:[#allocation4 + $0x8d8] sm:$0xff]  ;;  %v4746_v4 = vld [vmem:[#allocation4 + $0x8c0] sm:$0xff] }
 0x843   :  { %4928 = vmatpush1.bf16.msra.mxu1 %v4669_v40  ;;  %5100 = vmatpush1.bf16.msra.mxu0 %v4671_v3  ;;  %v4748_v40 = vld [vmem:[#allocation4 + $0x8d0] sm:$0xff]  ;;  %v4754_v3 = vld [vmem:[#allocation4 + $0x900] sm:$0xff] }
 0x844   :  { %4929 = vmatprep.subr.bf16.mxu1 %v4677_v28  ;;  %5101 = vmatprep.subr.bf16.mxu0 %v4679_v29  ;;  %v4756_v28 = vld [vmem:[#allocation4 + $0x910] sm:$0xff]  ;;  %v4753_v29 = vld [vmem:[#allocation4 + $0x8f8] sm:$0xff] }
 0x847   :  { %4930 = vmatpush1.bf16.msra.mxu1 %v4676_v20  ;;  %5102 = vmatpush1.bf16.msra.mxu0 %v4678_v44  ;;  %v4755_v20 = vld [vmem:[#allocation4 + $0x908] sm:$0xff]  ;;  %v4761_v44 = vld [vmem:[#allocation4 + $0x938] sm:$0xff] }
 0x848   :  { %4931 = vmatprep.subr.bf16.mxu1 %v4684_v60  ;;  %5103 = vmatprep.subr.bf16.mxu0 %v4686_v13  ;;  %v4763_v60 = vld [vmem:[#allocation4 + $0x948] sm:$0xff]  ;;  %v4760_v13 = vld [vmem:[#allocation4 + $0x930] sm:$0xff] }
 0x84b   :  { %4932 = vmatpush1.bf16.msra.mxu1 %v4683_v33  ;;  %5104 = vmatpush1.bf16.msra.mxu0 %v4685_v30  ;;  %v4762_v33 = vld [vmem:[#allocation4 + $0x940] sm:$0xff]  ;;  %v4768_v30 = vld [vmem:[#allocation4 + $0x970] sm:$0xff] }
 0x84c   :  { %4944 = vmatprep.subr.bf16.mxu1 %v4691_v55  ;;  %5116 = vmatprep.subr.bf16.mxu0 %v4693_v12  ;;  %v4770_v55 = vld [vmem:[#allocation4 + $0x980] sm:$0xff]  ;;  %v4767_v12 = vld [vmem:[#allocation4 + $0x968] sm:$0xff] }
 0x84e   :  { %4934 = vmatmul.mubr.bf16.vlgmr.msra.gmra.mrb[44].mxu1 %v9108_v56  ;;  %5106 = vmatmul.mubr.bf16.vlgmr.msra.gmra.mrb[28].mxu0 %v9108_v56 }
 0x84f   :  { %4945 = vmatpush1.bf16.msra.mxu1 %v4690_v45  ;;  %5117 = vmatpush1.bf16.msra.mxu0 %v4692_v47  ;;  %v4769_v45 = vld [vmem:[#allocation4 + $0x978] sm:$0xff]  ;;  %v4775_v47 = vld [vmem:[#allocation4 + $0x9a8] sm:$0xff] }
 0x850   :  { %4946 = vmatprep.subr.bf16.mxu1 %v4698_v59  ;;  %5118 = vmatprep.subr.bf16.mxu0 %v4700_v36  ;;  %v4777_v59 = vld [vmem:[#allocation4 + $0x9b8] sm:$0xff]  ;;  %v4774_v36 = vld [vmem:[#allocation4 + $0x9a0] sm:$0xff] }
 0x851   :  { %4976 = vmatprep.mubr.bf16.mxu1 %v9112_v62  ;;  %5148 = vmatprep.mubr.bf16.mxu0 %v9112_v62 }
 0x853   :  { %4947 = vmatpush1.bf16.msra.mxu1 %v4697_v18  ;;  %5119 = vmatpush1.bf16.msra.mxu0 %v4699_v16  ;;  %v4776_v18 = vld [vmem:[#allocation4 + $0x9b0] sm:$0xff]  ;;  %v4782_v16 = vld [vmem:[#allocation4 + $0x9e0] sm:$0xff] }
 0x854   :  { %4948 = vmatprep.subr.bf16.mxu1 %v4705_v37  ;;  %5120 = vmatprep.subr.bf16.mxu0 %v4707_v43  ;;  %v4784_v37 = vld [vmem:[#allocation4 + $0x9f0] sm:$0xff]  ;;  %v4781_v43 = vld [vmem:[#allocation4 + $0x9d8] sm:$0xff] }
 0x857   :  { %4949 = vmatpush1.bf16.msra.mxu1 %v4704_v54  ;;  %5121 = vmatpush1.bf16.msra.mxu0 %v4706_v8  ;;  %v4783_v54 = vld [vmem:[#allocation4 + $0x9e8] sm:$0xff]  ;;  %v4789_v8 = vld [vmem:[#allocation4 + $0xa18] sm:$0xff] }
 0x858   :  { %4950 = vmatprep.subr.bf16.mxu1 %v4712_v46  ;;  %5122 = vmatprep.subr.bf16.mxu0 %v4714_v7  ;;  %v4791_v46 = vld [vmem:[#allocation4 + $0xa28] sm:$0xff]  ;;  %v4788_v7 = vld [vmem:[#allocation4 + $0xa10] sm:$0xff] }
 0x85b   :  { %4951 = vmatpush1.bf16.msra.mxu1 %v4711_v38  ;;  %5123 = vmatpush1.bf16.msra.mxu0 %v4713_v26  ;;  %v4790_v38 = vld [vmem:[#allocation4 + $0xa20] sm:$0xff]  ;;  %v4796_v26 = vld [vmem:[#allocation4 + $0xa50] sm:$0xff] }
 0x85c   :  { %4952 = vmatprep.subr.bf16.mxu1 %v4719_v52  ;;  %5124 = vmatprep.subr.bf16.mxu0 %v4721_v22  ;;  %v4798_v52 = vld [vmem:[#allocation4 + $0xa60] sm:$0xff]  ;;  %v4795_v22 = vld [vmem:[#allocation4 + $0xa48] sm:$0xff] }
 0x85f   :  { %4953 = vmatpush1.bf16.msra.mxu1 %v4718_v51  ;;  %5125 = vmatpush1.bf16.msra.mxu0 %v4720_v14  ;;  %v4797_v51 = vld [vmem:[#allocation4 + $0xa58] sm:$0xff]  ;;  %v4803_v14 = vld [vmem:[#allocation4 + $0xa88] sm:$0xff] }
 0x860   :  { %4954 = vmatprep.subr.bf16.mxu1 %v4726_v35  ;;  %5126 = vmatprep.subr.bf16.mxu0 %v4728_v21  ;;  %v4805_v35 = vld [vmem:[#allocation4 + $0xa98] sm:$0xff]  ;;  %v9120_v21 = vpack.c.bf16 %v9084_v48, %v9059_v6  ;;  %v4819_v48 = vld [vmem:[#allocation4 + $0xb08] sm:$0xff] }
 0x861   :  { %v4817_v6 = vld [vmem:[#allocation4 + $0xaf8] sm:$0xff] }
 0x863   :  { %4955 = vmatpush1.bf16.msra.mxu1 %v4725_v63  ;;  %5127 = vmatpush1.bf16.msra.mxu0 %v4727_v25  ;;  %v4802_v63 = vld [vmem:[#allocation4 + $0xa80] sm:$0xff]  ;;  %v4804_v25 = vld [vmem:[#allocation4 + $0xa90] sm:$0xff] }
 0x864   :  { %4956 = vmatprep.subr.bf16.mxu1 %v4733_v9  ;;  %5128 = vmatprep.subr.bf16.mxu0 %v4735_v34  ;;  %v4810_v9 = vld [vmem:[#allocation4 + $0xac0] sm:$0xff]  ;;  %v4812_v34 = vld [vmem:[#allocation4 + $0xad0] sm:$0xff] }
 0x867   :  { %4957 = vmatpush1.bf16.msra.mxu1 %v4732_v27  ;;  %5129 = vmatpush1.bf16.msra.mxu0 %v4734_v1  ;;  %v4809_v27 = vld [vmem:[#allocation4 + $0xab8] sm:$0xff]  ;;  %v4811_v1 = vld [vmem:[#allocation4 + $0xac8] sm:$0xff] }
 0x868   :  { %4958 = vmatprep.subr.bf16.mxu1 %v4740_v19  ;;  %5130 = vmatprep.subr.bf16.mxu0 %v4742_v49  ;;  %v4816_v19 = vld [vmem:[#allocation4 + $0xaf0] sm:$0xff]  ;;  %v4818_v49 = vld [vmem:[#allocation4 + $0xb00] sm:$0xff] }
 0x86b   :  { %4959 = vmatpush1.bf16.msra.mxu1 %v4739_v32  ;;  %5131 = vmatpush1.bf16.msra.mxu0 %v4741_v15  ;;  %v4824_v32 = vld [vmem:[#allocation4 + $0xb30] sm:$0xff]  ;;  %v4826_v15 = vld [vmem:[#allocation4 + $0xb40] sm:$0xff] }
 0x86c   :  { %4960 = vmatprep.subr.bf16.mxu1 %v4747_v39  ;;  %5132 = vmatprep.subr.bf16.mxu0 %v4749_v23  ;;  %v4823_v39 = vld [vmem:[#allocation4 + $0xb28] sm:$0xff]  ;;  %v4825_v23 = vld [vmem:[#allocation4 + $0xb38] sm:$0xff] }
 0x86f   :  { %4961 = vmatpush1.bf16.msra.mxu1 %v4746_v4  ;;  %5133 = vmatpush1.bf16.msra.mxu0 %v4748_v40  ;;  %v4831_v4 = vld [vmem:[#allocation4 + $0xb68] sm:$0xff]  ;;  %v4833_v40 = vld [vmem:[#allocation4 + $0xb78] sm:$0xff] }
 0x870   :  { %4962 = vmatprep.subr.bf16.mxu1 %v4754_v3  ;;  %5134 = vmatprep.subr.bf16.mxu0 %v4756_v28  ;;  %v4830_v3 = vld [vmem:[#allocation4 + $0xb60] sm:$0xff]  ;;  %v4832_v28 = vld [vmem:[#allocation4 + $0xb70] sm:$0xff] }
 0x873   :  { %4963 = vmatpush1.bf16.msra.mxu1 %v4753_v29  ;;  %5135 = vmatpush1.bf16.msra.mxu0 %v4755_v20  ;;  %v4838_v29 = vld [vmem:[#allocation4 + $0xba0] sm:$0xff]  ;;  %v4840_v20 = vld [vmem:[#allocation4 + $0xbb0] sm:$0xff] }
 0x874   :  { %4964 = vmatprep.subr.bf16.mxu1 %v4761_v44  ;;  %5136 = vmatprep.subr.bf16.mxu0 %v4763_v60  ;;  %v4837_v44 = vld [vmem:[#allocation4 + $0xb98] sm:$0xff]  ;;  %v4839_v60 = vld [vmem:[#allocation4 + $0xba8] sm:$0xff] }
 0x877   :  { %4965 = vmatpush1.bf16.msra.mxu1 %v4760_v13  ;;  %5137 = vmatpush1.bf16.msra.mxu0 %v4762_v33  ;;  %v4845_v13 = vld [vmem:[#allocation4 + $0xbd8] sm:$0xff]  ;;  %v4847_v33 = vld [vmem:[#allocation4 + $0xbe8] sm:$0xff] }
 0x878   :  { %4966 = vmatprep.subr.bf16.mxu1 %v4768_v30  ;;  %5138 = vmatprep.subr.bf16.mxu0 %v4770_v55  ;;  %v4844_v30 = vld [vmem:[#allocation4 + $0xbd0] sm:$0xff]  ;;  %v4846_v55 = vld [vmem:[#allocation4 + $0xbe0] sm:$0xff] }
 0x87b   :  { %4967 = vmatpush1.bf16.msra.mxu1 %v4767_v12  ;;  %5139 = vmatpush1.bf16.msra.mxu0 %v4769_v45  ;;  %v4852_v12 = vld [vmem:[#allocation4 + $0xc10] sm:$0xff]  ;;  %v4854_v45 = vld [vmem:[#allocation4 + $0xc20] sm:$0xff] }
 0x87c   :  { %4968 = vmatprep.subr.bf16.mxu1 %v4775_v47  ;;  %5140 = vmatprep.subr.bf16.mxu0 %v4777_v59  ;;  %v4851_v47 = vld [vmem:[#allocation4 + $0xc08] sm:$0xff]  ;;  %v4853_v59 = vld [vmem:[#allocation4 + $0xc18] sm:$0xff] }
 0x87f   :  { %4969 = vmatpush1.bf16.msra.mxu1 %v4774_v36  ;;  %5141 = vmatpush1.bf16.msra.mxu0 %v4776_v18  ;;  %v4471_v36 = vld [vmem:[#allocation4 + $0x28] sm:$0xff]  ;;  %v4528_v18 = vld [vmem:[#allocation4 + $0x1f0] sm:$0xff] }
 0x880   :  { %4970 = vmatprep.subr.bf16.mxu1 %v4782_v16  ;;  %5142 = vmatprep.subr.bf16.mxu0 %v4784_v37  ;;  %v9128_v16 = vpack.c.bf16 %v9088_v24, %v9063_v58  ;;  %v4470_v37 = vld [vmem:[#allocation4 + $0x20] sm:$0xff]  ;;  %v4485_v58 = vld [vmem:[#allocation4 + $0x98] sm:$0xff] }
 0x881   :  { %v4542_v24 = vld [vmem:[#allocation4 + $0x260] sm:$0xff] }
 0x883   :  { %4971 = vmatpush1.bf16.msra.mxu1 %v4781_v43  ;;  %5143 = vmatpush1.bf16.msra.mxu0 %v4783_v54  ;;  %v4472_v43 = vld [vmem:[#allocation4 + $0x30] sm:$0xff]  ;;  %v4478_v54 = vld [vmem:[#allocation4 + $0x60] sm:$0xff] }
 0x884   :  { %4972 = vmatprep.subr.bf16.mxu1 %v4789_v8  ;;  %5144 = vmatprep.subr.bf16.mxu0 %v4791_v46  ;;  %v4535_v8 = vld [vmem:[#allocation4 + $0x228] sm:$0xff]  ;;  %v4477_v46 = vld [vmem:[#allocation4 + $0x58] sm:$0xff] }
 0x887   :  { %4973 = vmatpush1.bf16.msra.mxu1 %v4788_v7  ;;  %5145 = vmatpush1.bf16.msra.mxu0 %v4790_v38  ;;  %v4479_v7 = vld [vmem:[#allocation4 + $0x68] sm:$0xff]  ;;  %v4484_v38 = vld [vmem:[#allocation4 + $0x90] sm:$0xff] }
 0x888   :  { %4974 = vmatprep.subr.bf16.mxu1 %v4796_v26  ;;  %5146 = vmatprep.subr.bf16.mxu0 %v4798_v52  ;;  %v4486_v26 = vld [vmem:[#allocation4 + $0xa0] sm:$0xff]  ;;  %v4492_v52 = vld [vmem:[#allocation4 + $0xd0] sm:$0xff] }
 0x88b   :  { %4975 = vmatpush1.bf16.msra.mxu1 %v4795_v22  ;;  %5147 = vmatpush1.bf16.msra.mxu0 %v4797_v51  ;;  %v4549_v22 = vld [vmem:[#allocation4 + $0x298] sm:$0xff]  ;;  %v4491_v51 = vld [vmem:[#allocation4 + $0xc8] sm:$0xff] }
 0x88c   :  { %4987 = vmatprep.subr.bf16.mxu1 %v4803_v14  ;;  %5159 = vmatprep.subr.bf16.mxu0 %v4805_v35  ;;  %v4493_v14 = vld [vmem:[#allocation4 + $0xd8] sm:$0xff]  ;;  %v4499_v35 = vld [vmem:[#allocation4 + $0x108] sm:$0xff] }
 0x88e   :  { %4977 = vmatmul.mubr.bf16.vlgmr.msra.gmra.mrb[44].mxu1 %v9120_v21  ;;  %5149 = vmatmul.mubr.bf16.vlgmr.msra.gmra.mrb[28].mxu0 %v9120_v21 }
 0x88f   :  { %4988 = vmatpush1.bf16.msra.mxu1 %v4802_v63  ;;  %5160 = vmatpush1.bf16.msra.mxu0 %v4804_v25  ;;  %v4556_v63 = vld [vmem:[#allocation4 + $0x2d0] sm:$0xff] }
 0x890   :  { %4989 = vmatprep.subr.bf16.mxu1 %v4810_v9  ;;  %5161 = vmatprep.subr.bf16.mxu0 %v4812_v34  ;;  %v4500_v25 = vld [vmem:[#allocation4 + $0x110] sm:$0xff]  ;;  %v4506_v9 = vld [vmem:[#allocation4 + $0x140] sm:$0xff]  ;;  %v4563_v34 = vld [vmem:[#allocation4 + $0x308] sm:$0xff] }
 0x891   :  { %5019 = vmatprep.mubr.bf16.mxu1 %v8087_v0  ;;  %5191 = vmatprep.mubr.bf16.mxu0 %v8087_v0 }
 0x893   :  { %4990 = vmatpush1.bf16.msra.mxu1 %v4809_v27  ;;  %5162 = vmatpush1.bf16.msra.mxu0 %v4811_v1  ;;  %v4505_v27 = vld [vmem:[#allocation4 + $0x138] sm:$0xff]  ;;  %v4507_v1 = vld [vmem:[#allocation4 + $0x148] sm:$0xff] }
 0x894   :  { %4991 = vmatprep.subr.bf16.mxu1 %v4817_v6  ;;  %5163 = vmatprep.subr.bf16.mxu0 %v4819_v48  ;;  %v4513_v6 = vld [vmem:[#allocation4 + $0x178] sm:$0xff]  ;;  %v4570_v48 = vld [vmem:[#allocation4 + $0x340] sm:$0xff] }
 0x897   :  { %4992 = vmatpush1.bf16.msra.mxu1 %v4816_v19  ;;  %5164 = vmatpush1.bf16.msra.mxu0 %v4818_v49  ;;  %v4512_v19 = vld [vmem:[#allocation4 + $0x170] sm:$0xff]  ;;  %v4514_v49 = vld [vmem:[#allocation4 + $0x180] sm:$0xff] }
 0x898   :  { %4993 = vmatprep.subr.bf16.mxu1 %v4824_v32  ;;  %5165 = vmatprep.subr.bf16.mxu0 %v4826_v15  ;;  %v4520_v32 = vld [vmem:[#allocation4 + $0x1b0] sm:$0xff]  ;;  %v4577_v15 = vld [vmem:[#allocation4 + $0x378] sm:$0xff] }
 0x89b   :  { %4994 = vmatpush1.bf16.msra.mxu1 %v4823_v39  ;;  %5166 = vmatpush1.bf16.msra.mxu0 %v4825_v23  ;;  %v4519_v39 = vld [vmem:[#allocation4 + $0x1a8] sm:$0xff]  ;;  %v4521_v23 = vld [vmem:[#allocation4 + $0x1b8] sm:$0xff] }
 0x89c   :  { %4995 = vmatprep.subr.bf16.mxu1 %v4831_v4  ;;  %5167 = vmatprep.subr.bf16.mxu0 %v4833_v40  ;;  %v4527_v4 = vld [vmem:[#allocation4 + $0x1e8] sm:$0xff]  ;;  %v4640_v40 = vld [vmem:[#allocation4 + $0x570] sm:$0xff] }
 0x89f   :  { %4996 = vmatpush1.bf16.msra.mxu1 %v4830_v3  ;;  %5168 = vmatpush1.bf16.msra.mxu0 %v4832_v28  ;;  %v4526_v3 = vld [vmem:[#allocation4 + $0x1e0] sm:$0xff]  ;;  %v4584_v28 = vld [vmem:[#allocation4 + $0x3b0] sm:$0xff] }
 0x8a0   :  { %4997 = vmatprep.subr.bf16.mxu1 %v4838_v29  ;;  %5169 = vmatprep.subr.bf16.mxu0 %v4840_v20  ;;  %v4534_v29 = vld [vmem:[#allocation4 + $0x220] sm:$0xff]  ;;  %v4647_v20 = vld [vmem:[#allocation4 + $0x5a8] sm:$0xff] }
 0x8a3   :  { %4998 = vmatpush1.bf16.msra.mxu1 %v4837_v44  ;;  %5170 = vmatpush1.bf16.msra.mxu0 %v4839_v60  ;;  %v4533_v44 = vld [vmem:[#allocation4 + $0x218] sm:$0xff]  ;;  %v4591_v60 = vld [vmem:[#allocation4 + $0x3e8] sm:$0xff] }
 0x8a4   :  { %4999 = vmatprep.subr.bf16.mxu1 %v4845_v13  ;;  %5171 = vmatprep.subr.bf16.mxu0 %v4847_v33  ;;  %v4541_v13 = vld [vmem:[#allocation4 + $0x258] sm:$0xff]  ;;  %v4654_v33 = vld [vmem:[#allocation4 + $0x5e0] sm:$0xff] }
 0x8a7   :  { %5000 = vmatpush1.bf16.msra.mxu1 %v4844_v30  ;;  %5172 = vmatpush1.bf16.msra.mxu0 %v4846_v55  ;;  %v4540_v30 = vld [vmem:[#allocation4 + $0x250] sm:$0xff]  ;;  %v4598_v55 = vld [vmem:[#allocation4 + $0x420] sm:$0xff] }
 0x8a8   :  { %5001 = vmatprep.subr.bf16.mxu1 %v4852_v12  ;;  %5173 = vmatprep.subr.bf16.mxu0 %v4854_v45  ;;  %v4548_v12 = vld [vmem:[#allocation4 + $0x290] sm:$0xff]  ;;  %v4661_v45 = vld [vmem:[#allocation4 + $0x618] sm:$0xff] }
 0x8ab   :  { %5002 = vmatpush1.bf16.msra.mxu1 %v4851_v47  ;;  %5174 = vmatpush1.bf16.msra.mxu0 %v4853_v59  ;;  %v4547_v47 = vld [vmem:[#allocation4 + $0x288] sm:$0xff]  ;;  %v4605_v59 = vld [vmem:[#allocation4 + $0x458] sm:$0xff] }
 0x8ac   :  { %5202 = vmatprep.subr.bf16.mxu1 %v4471_v36  ;;  %7437 = vmatprep.subr.bf16.mxu0 %v4528_v18  ;;  %v4555_v36 = vld [vmem:[#allocation4 + $0x2c8] sm:$0xff]  ;;  %v4668_v18 = vld [vmem:[#allocation4 + $0x650] sm:$0xff] }
 0x8ae   :  { %5020 = vmatmul.mubr.bf16.vlgmr.msra.gmra.mrb[44].mxu1 %v9128_v16  ;;  %5192 = vmatmul.mubr.bf16.vlgmr.msra.gmra.mrb[28].mxu0 %v9128_v16 }
 0x8af   :  { %5203 = vmatpush1.bf16.msra.mxu1 %v4470_v37  ;;  %7438 = vmatpush3.bf16.msra.mxu0 %v4472_v43  ;;  %v4554_v37 = vld [vmem:[#allocation4 + $0x2c0] sm:$0xff]  ;;  %v4612_v43 = vld [vmem:[#allocation4 + $0x490] sm:$0xff] }
 0x8b0   :  { %5204 = vmatprep.subr.bf16.mxu1 %v4478_v54  ;;  %7439 = vmatprep.subr.bf16.mxu0 %v4535_v8  ;;  %v4562_v54 = vld [vmem:[#allocation4 + $0x300] sm:$0xff]  ;;  %v4675_v8 = vld [vmem:[#allocation4 + $0x688] sm:$0xff] }
 0x8b1   :  { %5406 = vmatprep.mubr.bf16.mxu0 %v9090_v17  ;;  %5234 = vmatprep.mubr.bf16.mxu1 %v9090_v17  ;;  %v4498_v17 = vld [vmem:[#allocation4 + $0x100] sm:$0xff] }
 0x8b3   :  { %5205 = vmatpush1.bf16.msra.mxu1 %v4477_v46  ;;  %7440 = vmatpush3.bf16.msra.mxu0 %v4479_v7  ;;  %v4561_v46 = vld [vmem:[#allocation4 + $0x2f8] sm:$0xff]  ;;  %v4619_v7 = vld [vmem:[#allocation4 + $0x4c8] sm:$0xff] }
 0x8b4   :  { %5206 = vmatprep.subr.bf16.mxu1 %v4485_v58  ;;  %7441 = vmatprep.subr.bf16.mxu0 %v4542_v24  ;;  %v4569_v58 = vld [vmem:[#allocation4 + $0x338] sm:$0xff]  ;;  %v4682_v24 = vld [vmem:[#allocation4 + $0x6c0] sm:$0xff] }
 0x8b7   :  { %5207 = vmatpush1.bf16.msra.mxu1 %v4484_v38  ;;  %7442 = vmatpush3.bf16.msra.mxu0 %v4486_v26  ;;  %v4568_v38 = vld [vmem:[#allocation4 + $0x330] sm:$0xff]  ;;  %v4626_v26 = vld [vmem:[#allocation4 + $0x500] sm:$0xff] }
 0x8b8   :  { %5208 = vmatprep.subr.bf16.mxu1 %v4492_v52  ;;  %7443 = vmatprep.subr.bf16.mxu0 %v4549_v22  ;;  %v4576_v52 = vld [vmem:[#allocation4 + $0x370] sm:$0xff]  ;;  %v4689_v22 = vld [vmem:[#allocation4 + $0x6f8] sm:$0xff] }
 0x8bb   :  { %5209 = vmatpush1.bf16.msra.mxu1 %v4491_v51  ;;  %7444 = vmatpush3.bf16.msra.mxu0 %v4493_v14  ;;  %v4575_v51 = vld [vmem:[#allocation4 + $0x368] sm:$0xff]  ;;  %v4633_v14 = vld [vmem:[#allocation4 + $0x538] sm:$0xff] }
 0x8bc   :  { %5210 = vmatprep.subr.bf16.mxu1 %v4499_v35  ;;  %7445 = vmatprep.subr.bf16.mxu0 %v4556_v63  ;;  %v4583_v35 = vld [vmem:[#allocation4 + $0x3a8] sm:$0xff]  ;;  %v4752_v63 = vld [vmem:[#allocation4 + $0x8f0] sm:$0xff] }
 0x8bf   :  { %5211 = vmatpush1.bf16.msra.mxu1 %v4498_v17  ;;  %7446 = vmatpush3.bf16.msra.mxu0 %v4500_v25  ;;  %v4582_v17 = vld [vmem:[#allocation4 + $0x3a0] sm:$0xff]  ;;  %v4696_v25 = vld [vmem:[#allocation4 + $0x730] sm:$0xff] }
 0x8c0   :  { %5212 = vmatprep.subr.bf16.mxu1 %v4506_v9  ;;  %7447 = vmatprep.subr.bf16.mxu0 %v4563_v34  ;;  %v4590_v9 = vld [vmem:[#allocation4 + $0x3e0] sm:$0xff]  ;;  %v4759_v34 = vld [vmem:[#allocation4 + $0x928] sm:$0xff] }
 0x8c3   :  { %5213 = vmatpush1.bf16.msra.mxu1 %v4505_v27  ;;  %7448 = vmatpush3.bf16.msra.mxu0 %v4507_v1  ;;  %v4589_v27 = vld [vmem:[#allocation4 + $0x3d8] sm:$0xff]  ;;  %v4703_v1 = vld [vmem:[#allocation4 + $0x768] sm:$0xff] }
 0x8c4   :  { %5214 = vmatprep.subr.bf16.mxu1 %v4513_v6  ;;  %7449 = vmatprep.subr.bf16.mxu0 %v4570_v48  ;;  %v4597_v6 = vld [vmem:[#allocation4 + $0x418] sm:$0xff]  ;;  %v4766_v48 = vld [vmem:[#allocation4 + $0x960] sm:$0xff] }
 0x8c7   :  { %5215 = vmatpush1.bf16.msra.mxu1 %v4512_v19  ;;  %7450 = vmatpush3.bf16.msra.mxu0 %v4514_v49  ;;  %v4596_v19 = vld [vmem:[#allocation4 + $0x410] sm:$0xff] }
 0x8c8   :  { %5216 = vmatprep.subr.bf16.mxu1 %v4520_v32  ;;  %7451 = vmatprep.subr.bf16.mxu0 %v4577_v15  ;;  %v4604_v49 = vld [vmem:[#allocation4 + $0x450] sm:$0xff]  ;;  %v4773_v32 = vld [vmem:[#allocation4 + $0x998] sm:$0xff]  ;;  %v4603_v15 = vld [vmem:[#allocation4 + $0x448] sm:$0xff] }
 0x8cb   :  { %5217 = vmatpush1.bf16.msra.mxu1 %v4519_v39  ;;  %7452 = vmatpush3.bf16.msra.mxu0 %v4521_v23  ;;  %v4717_v39 = vld [vmem:[#allocation4 + $0x7d8] sm:$0xff]  ;;  %v4611_v23 = vld [vmem:[#allocation4 + $0x488] sm:$0xff] }
 0x8cc   :  { %5218 = vmatprep.subr.bf16.mxu1 %v4527_v4  ;;  %7459 = vmatprep.subr.bf16.mxu0 %v4640_v40  ;;  %v4780_v4 = vld [vmem:[#allocation4 + $0x9d0] sm:$0xff] }
 0x8cd   :  { %v4724_v40 = vld [vmem:[#allocation4 + $0x810] sm:$0xff] }
 0x8ce   :  { %5407 = vmatmul.mubr.bf16.vlgmr.msra.gmra.mrb[32].mxu0 %v9096_v11 }
 0x8cf   :  { %5219 = vmatpush1.bf16.msra.mxu1 %v4526_v3  ;;  %7460 = vmatpush3.bf16.msra.mxu0 %v4584_v28  ;;  %v4618_v3 = vld [vmem:[#allocation4 + $0x4c0] sm:$0xff]  ;;  %v4787_v28 = vld [vmem:[#allocation4 + $0xa08] sm:$0xff] }
 0x8d0   :  { %5220 = vmatprep.subr.bf16.mxu1 %v4534_v29  ;;  %7461 = vmatprep.subr.bf16.mxu0 %v4647_v20  ;;  %v4617_v29 = vld [vmem:[#allocation4 + $0x4b8] sm:$0xff]  ;;  %v4731_v20 = vld [vmem:[#allocation4 + $0x848] sm:$0xff] }
 0x8d1   :  { %5447 = vmatprep.mubr.bf16.mxu0 %v9100_v31 }
 0x8d3   :  { %5221 = vmatpush1.bf16.msra.mxu1 %v4533_v44  ;;  %7462 = vmatpush3.bf16.msra.mxu0 %v4591_v60  ;;  %v4625_v44 = vld [vmem:[#allocation4 + $0x4f8] sm:$0xff]  ;;  %v4794_v60 = vld [vmem:[#allocation4 + $0xa40] sm:$0xff] }
 0x8d4   :  { %5222 = vmatprep.subr.bf16.mxu1 %v4541_v13  ;;  %7463 = vmatprep.subr.bf16.mxu0 %v4654_v33  ;;  %v4624_v13 = vld [vmem:[#allocation4 + $0x4f0] sm:$0xff]  ;;  %v4738_v33 = vld [vmem:[#allocation4 + $0x880] sm:$0xff] }
 0x8d7   :  { %5223 = vmatpush1.bf16.msra.mxu1 %v4540_v30  ;;  %7464 = vmatpush3.bf16.msra.mxu0 %v4598_v55  ;;  %v4632_v30 = vld [vmem:[#allocation4 + $0x530] sm:$0xff]  ;;  %v4801_v55 = vld [vmem:[#allocation4 + $0xa78] sm:$0xff] }
 0x8d8   :  { %5224 = vmatprep.subr.bf16.mxu1 %v4548_v12  ;;  %7465 = vmatprep.subr.bf16.mxu0 %v4661_v45  ;;  %v4631_v12 = vld [vmem:[#allocation4 + $0x528] sm:$0xff]  ;;  %v4745_v45 = vld [vmem:[#allocation4 + $0x8b8] sm:$0xff] }
 0x8db   :  { %5225 = vmatpush1.bf16.msra.mxu1 %v4547_v47  ;;  %7466 = vmatpush3.bf16.msra.mxu0 %v4605_v59  ;;  %v4639_v47 = vld [vmem:[#allocation4 + $0x568] sm:$0xff]  ;;  %v4638_v59 = vld [vmem:[#allocation4 + $0x560] sm:$0xff] }
 0x8dc   :  { %5226 = vmatprep.subr.bf16.mxu1 %v4555_v36  ;;  %7467 = vmatprep.subr.bf16.mxu0 %v4668_v18  ;;  %v4808_v36 = vld [vmem:[#allocation4 + $0xab0] sm:$0xff]  ;;  %v4646_v18 = vld [vmem:[#allocation4 + $0x5a0] sm:$0xff] }
 0x8df   :  { %5227 = vmatpush1.bf16.msra.mxu1 %v4554_v37  ;;  %7468 = vmatpush3.bf16.msra.mxu0 %v4612_v43  ;;  %v4645_v37 = vld [vmem:[#allocation4 + $0x598] sm:$0xff]  ;;  %v4815_v43 = vld [vmem:[#allocation4 + $0xae8] sm:$0xff] }
 0x8e0   :  { %5228 = vmatprep.subr.bf16.mxu1 %v4562_v54  ;;  %7469 = vmatprep.subr.bf16.mxu0 %v4675_v8  ;;  %v4653_v54 = vld [vmem:[#allocation4 + $0x5d8] sm:$0xff]  ;;  %v4652_v8 = vld [vmem:[#allocation4 + $0x5d0] sm:$0xff] }
 0x8e3   :  { %5229 = vmatpush1.bf16.msra.mxu1 %v4561_v46  ;;  %7470 = vmatpush3.bf16.msra.mxu0 %v4619_v7  ;;  %v4822_v46 = vld [vmem:[#allocation4 + $0xb20] sm:$0xff]  ;;  %v4660_v7 = vld [vmem:[#allocation4 + $0x610] sm:$0xff] }
 0x8e4   :  { %5230 = vmatprep.subr.bf16.mxu1 %v4569_v58  ;;  %7471 = vmatprep.subr.bf16.mxu0 %v4682_v24  ;;  %v4659_v58 = vld [vmem:[#allocation4 + $0x608] sm:$0xff]  ;;  %v4829_v24 = vld [vmem:[#allocation4 + $0xb58] sm:$0xff] }
 0x8e7   :  { %5231 = vmatpush1.bf16.msra.mxu1 %v4568_v38  ;;  %7472 = vmatpush3.bf16.msra.mxu0 %v4626_v26  ;;  %v4667_v38 = vld [vmem:[#allocation4 + $0x648] sm:$0xff]  ;;  %v4666_v26 = vld [vmem:[#allocation4 + $0x640] sm:$0xff] }
 0x8e8   :  { %5232 = vmatprep.subr.bf16.mxu1 %v4576_v52  ;;  %7473 = vmatprep.subr.bf16.mxu0 %v4689_v22  ;;  %v4836_v52 = vld [vmem:[#allocation4 + $0xb90] sm:$0xff]  ;;  %v4674_v22 = vld [vmem:[#allocation4 + $0x680] sm:$0xff] }
 0x8eb   :  { %5233 = vmatpush1.bf16.msra.mxu1 %v4575_v51  ;;  %7474 = vmatpush3.bf16.msra.mxu0 %v4633_v14  ;;  %v4673_v51 = vld [vmem:[#allocation4 + $0x678] sm:$0xff]  ;;  %v4843_v14 = vld [vmem:[#allocation4 + $0xbc8] sm:$0xff] }
 0x8ec   :  { %5245 = vmatprep.subr.bf16.mxu1 %v4583_v35  ;;  %7481 = vmatprep.subr.bf16.mxu0 %v4752_v63  ;;  %v4681_v35 = vld [vmem:[#allocation4 + $0x6b8] sm:$0xff]  ;;  %v4680_v63 = vld [vmem:[#allocation4 + $0x6b0] sm:$0xff] }
 0x8ee   :  { %5235 = vmatmul.mubr.bf16.vlgmr.msra.gmra.mrb[48].mxu1 %v9096_v11  ;;  %5448 = vmatmul.mubr.bf16.vlgmr.msra.gmra.mrb[36].mxu0 %v9108_v56  ;;  %v4710_v11 = vld [vmem:[#allocation4 + $0x7a0] sm:$0xff] }
 0x8ef   :  { %5246 = vmatpush1.bf16.msra.mxu1 %v4582_v17  ;;  %7482 = vmatpush3.bf16.msra.mxu0 %v4696_v25  ;;  %v4850_v17 = vld [vmem:[#allocation4 + $0xc00] sm:$0xff]  ;;  %v4688_v25 = vld [vmem:[#allocation4 + $0x6f0] sm:$0xff] }
 0x8f0   :  { %5247 = vmatprep.subr.bf16.mxu1 %v4590_v9  ;;  %7483 = vmatprep.subr.bf16.mxu0 %v4759_v34  ;;  %v4687_v9 = vld [vmem:[#allocation4 + $0x6e8] sm:$0xff]  ;;  %v4857_v34 = vld [vmem:[#allocation4 + $0xc38] sm:$0xff] }
 0x8f1   :  { %5488 = vmatprep.mubr.bf16.mxu0 %v9112_v62  ;;  %5277 = vmatprep.mubr.bf16.mxu1 %v9100_v31  ;;  %v4610_v31 = vld [vmem:[#allocation4 + $0x480] sm:$0xff] }
 0x8f3   :  { %5248 = vmatpush1.bf16.msra.mxu1 %v4589_v27  ;;  %7484 = vmatpush3.bf16.msra.mxu0 %v4703_v1  ;;  %v4695_v27 = vld [vmem:[#allocation4 + $0x728] sm:$0xff]  ;;  %v4694_v1 = vld [vmem:[#allocation4 + $0x720] sm:$0xff] }
 0x8f4   :  { %5249 = vmatprep.subr.bf16.mxu1 %v4597_v6  ;;  %7485 = vmatprep.subr.bf16.mxu0 %v4766_v48  ;;  %v4702_v6 = vld [vmem:[#allocation4 + $0x760] sm:$0xff]  ;;  %v4701_v48 = vld [vmem:[#allocation4 + $0x758] sm:$0xff] }
 0x8f7   :  { %5250 = vmatpush1.bf16.msra.mxu1 %v4596_v19  ;;  %7486 = vmatpush3.bf16.msra.mxu0 %v4710_v11  ;;  %v4709_v19 = vld [vmem:[#allocation4 + $0x798] sm:$0xff]  ;;  %v4708_v11 = vld [vmem:[#allocation4 + $0x790] sm:$0xff] }
 0x8f8   :  { %5251 = vmatprep.subr.bf16.mxu1 %v4604_v49  ;;  %7487 = vmatprep.subr.bf16.mxu0 %v4773_v32  ;;  %v4716_v49 = vld [vmem:[#allocation4 + $0x7d0] sm:$0xff]  ;;  %v4715_v32 = vld [vmem:[#allocation4 + $0x7c8] sm:$0xff] }
 0x8fb   :  { %5252 = vmatpush1.bf16.msra.mxu1 %v4603_v15  ;;  %7488 = vmatpush3.bf16.msra.mxu0 %v4717_v39  ;;  %v4723_v15 = vld [vmem:[#allocation4 + $0x808] sm:$0xff]  ;;  %v4722_v39 = vld [vmem:[#allocation4 + $0x800] sm:$0xff] }
 0x8fc   :  { %5253 = vmatprep.subr.bf16.mxu1 %v4611_v23  ;;  %7489 = vmatprep.subr.bf16.mxu0 %v4780_v4  ;;  %v4730_v23 = vld [vmem:[#allocation4 + $0x840] sm:$0xff]  ;;  %v4737_v4 = vld [vmem:[#allocation4 + $0x878] sm:$0xff] }
 0x8ff   :  { %5254 = vmatpush1.bf16.msra.mxu1 %v4610_v31  ;;  %7490 = vmatpush3.bf16.msra.mxu0 %v4724_v40  ;;  %v4744_v31 = vld [vmem:[#allocation4 + $0x8b0] sm:$0xff]  ;;  %v4743_v40 = vld [vmem:[#allocation4 + $0x8a8] sm:$0xff] }
 0x900   :  { %5255 = vmatprep.subr.bf16.mxu1 %v4618_v3  ;;  %7491 = vmatprep.subr.bf16.mxu0 %v4787_v28  ;;  %v4751_v3 = vld [vmem:[#allocation4 + $0x8e8] sm:$0xff]  ;;  %v4750_v28 = vld [vmem:[#allocation4 + $0x8e0] sm:$0xff] }
 0x903   :  { %5256 = vmatpush1.bf16.msra.mxu1 %v4617_v29  ;;  %7492 = vmatpush3.bf16.msra.mxu0 %v4731_v20  ;;  %v4758_v29 = vld [vmem:[#allocation4 + $0x920] sm:$0xff]  ;;  %v4757_v20 = vld [vmem:[#allocation4 + $0x918] sm:$0xff] }
 0x904   :  { %5257 = vmatprep.subr.bf16.mxu1 %v4625_v44  ;;  %7493 = vmatprep.subr.bf16.mxu0 %v4794_v60  ;;  %v4765_v44 = vld [vmem:[#allocation4 + $0x958] sm:$0xff]  ;;  %v4764_v60 = vld [vmem:[#allocation4 + $0x950] sm:$0xff] }
 0x907   :  { %5258 = vmatpush1.bf16.msra.mxu1 %v4624_v13  ;;  %7494 = vmatpush3.bf16.msra.mxu0 %v4738_v33  ;;  %v4772_v13 = vld [vmem:[#allocation4 + $0x990] sm:$0xff]  ;;  %v4771_v33 = vld [vmem:[#allocation4 + $0x988] sm:$0xff] }
 0x908   :  { %5259 = vmatprep.subr.bf16.mxu1 %v4632_v30  ;;  %7495 = vmatprep.subr.bf16.mxu0 %v4801_v55  ;;  %v4779_v30 = vld [vmem:[#allocation4 + $0x9c8] sm:$0xff]  ;;  %v4778_v55 = vld [vmem:[#allocation4 + $0x9c0] sm:$0xff] }
 0x90b   :  { %5260 = vmatpush1.bf16.msra.mxu1 %v4631_v12  ;;  %7496 = vmatpush3.bf16.msra.mxu0 %v4745_v45  ;;  %v4786_v12 = vld [vmem:[#allocation4 + $0xa00] sm:$0xff]  ;;  %v4785_v45 = vld [vmem:[#allocation4 + $0x9f8] sm:$0xff] }
 0x90c   :  { %5261 = vmatprep.subr.bf16.mxu1 %v4639_v47  ;;  %7607 = vmatprep.subr.bf16.mxu0 %v8105_v5  ;;  %v4793_v47 = vld [vmem:[#allocation4 + $0xa38] sm:$0xff] }
 0x90e   :  { %5489 = vmatmul.mubr.bf16.vlgmr.msra.gmra.mrb[40].mxu0 %v9120_v21 }
 0x90f   :  { %5262 = vmatpush1.bf16.msra.mxu1 %v4638_v59  ;;  %7608 = vmatpush3.bf16.msra.mxu0 %v4808_v36  ;;  %v4792_v59 = vld [vmem:[#allocation4 + $0xa30] sm:$0xff] }
 0x910   :  { %5263 = vmatprep.subr.bf16.mxu1 %v4646_v18  ;;  %7609 = vmatprep.subr.bf16.mxu0 %v8105_v5  ;;  %v4800_v36 = vld [vmem:[#allocation4 + $0xa70] sm:$0xff]  ;;  %v4799_v18 = vld [vmem:[#allocation4 + $0xa68] sm:$0xff] }
 0x911   :  { %7623 = vmatprep.mubr.msk.bf16.mxu0 %vm8106_vm1, %v8105_v5 }
 0x913   :  { %5264 = vmatpush1.bf16.msra.mxu1 %v4645_v37  ;;  %7610 = vmatpush3.bf16.msra.mxu0 %v4815_v43  ;;  %v4807_v37 = vld [vmem:[#allocation4 + $0xaa8] sm:$0xff]  ;;  %v4806_v43 = vld [vmem:[#allocation4 + $0xaa0] sm:$0xff] }
 0x914   :  { %5265 = vmatprep.subr.bf16.mxu1 %v4653_v54  ;;  %7611 = vmatprep.subr.bf16.mxu0 %v8105_v5  ;;  %v4814_v54 = vld [vmem:[#allocation4 + $0xae0] sm:$0xff] }
 0x917   :  { %5266 = vmatpush1.bf16.msra.mxu1 %v4652_v8  ;;  %7612 = vmatpush3.bf16.msra.mxu0 %v4822_v46  ;;  %v4813_v8 = vld [vmem:[#allocation4 + $0xad8] sm:$0xff] }
 0x918   :  { %5267 = vmatprep.subr.bf16.mxu1 %v4660_v7  ;;  %7613 = vmatprep.subr.bf16.mxu0 %v8105_v5  ;;  %v4821_v46 = vld [vmem:[#allocation4 + $0xb18] sm:$0xff]  ;;  %v4820_v7 = vld [vmem:[#allocation4 + $0xb10] sm:$0xff] }
 0x91b   :  { %5268 = vmatpush1.bf16.msra.mxu1 %v4659_v58  ;;  %7614 = vmatpush3.bf16.msra.mxu0 %v4829_v24  ;;  %v4828_v58 = vld [vmem:[#allocation4 + $0xb50] sm:$0xff]  ;;  %v4827_v24 = vld [vmem:[#allocation4 + $0xb48] sm:$0xff] }
 0x91c   :  { %5269 = vmatprep.subr.bf16.mxu1 %v4667_v38  ;;  %7615 = vmatprep.subr.bf16.mxu0 %v8105_v5  ;;  %v4835_v38 = vld [vmem:[#allocation4 + $0xb88] sm:$0xff] }
 0x91f   :  { %5270 = vmatpush1.bf16.msra.mxu1 %v4666_v26  ;;  %7616 = vmatpush3.bf16.msra.mxu0 %v4836_v52  ;;  %v4834_v26 = vld [vmem:[#allocation4 + $0xb80] sm:$0xff] }
 0x920   :  { %5271 = vmatprep.subr.bf16.mxu1 %v4674_v22  ;;  %7617 = vmatprep.subr.bf16.mxu0 %v8105_v5  ;;  %v4842_v52 = vld [vmem:[#allocation4 + $0xbc0] sm:$0xff] }
 0x923   :  { %5272 = vmatpush1.bf16.msra.mxu1 %v4673_v51  ;;  %7618 = vmatpush3.bf16.msra.mxu0 %v4843_v14  ;;  %v4849_v14 = vld [vmem:[#allocation4 + $0xbf8] sm:$0xff] }
 0x924   :  { %5273 = vmatprep.subr.bf16.mxu1 %v4681_v35  ;;  %7619 = vmatprep.subr.bf16.mxu0 %v8105_v5 }
 0x927   :  { %5274 = vmatpush1.bf16.msra.mxu1 %v4680_v63  ;;  %7620 = vmatpush3.bf16.msra.mxu0 %v4850_v17 }
 0x928   :  { %5275 = vmatprep.subr.bf16.mxu1 %v4688_v25  ;;  %7621 = vmatprep.subr.bf16.mxu0 %v8105_v5 }
 0x92b   :  { %5276 = vmatpush1.bf16.msra.mxu1 %v4687_v9  ;;  %7622 = vmatpush3.bf16.msra.mxu0 %v4857_v34 }
 0x92c   :  { %5288 = vmatprep.subr.bf16.mxu1 %v4695_v27 }
 0x92e   :  { %7624 = vmatmul.mubr.bf16.vlgmr.msra.gmra.mrb[44].mxu0 %v9128_v16  ;;  %5278 = vmatmul.mubr.bf16.vlgmr.msra.gmra.mrb[48].mxu1 %v9108_v56  ;;  %v4729_v56 = vld [vmem:[#allocation4 + $0x838] sm:$0xff] }
 0x92f   :  { %5289 = vmatpush1.bf16.msra.mxu1 %v4694_v1  ;;  %5320 = vmatprep.mubr.bf16.mxu1 %v9112_v62  ;;  %v4736_v62 = vld [vmem:[#allocation4 + $0x870] sm:$0xff] }
 0x930   :  { %5290 = vmatprep.subr.bf16.mxu1 %v4702_v6 }
 0x933   :  { %5291 = vmatpush1.bf16.msra.mxu1 %v4701_v48 }
 0x934   :  { %5292 = vmatprep.subr.bf16.mxu1 %v4709_v19 }
 0x937   :  { %5293 = vmatpush1.bf16.msra.mxu1 %v4708_v11 }
 0x938   :  { %5294 = vmatprep.subr.bf16.mxu1 %v4716_v49 }
 0x93b   :  { %5295 = vmatpush1.bf16.msra.mxu1 %v4715_v32 }
 0x93c   :  { %5296 = vmatprep.subr.bf16.mxu1 %v4723_v15  ;;  %v4848_v15 = vld [vmem:[#allocation4 + $0xbf0] sm:$0xff] }
 0x93f   :  { %5297 = vmatpush1.bf16.msra.mxu1 %v4722_v39 }
 0x940   :  { %5298 = vmatprep.subr.bf16.mxu1 %v4730_v23 }
 0x943   :  { %5299 = vmatpush1.bf16.msra.mxu1 %v4729_v56 }
 0x944   :  { %5300 = vmatprep.subr.bf16.mxu1 %v4737_v4 }
 0x947   :  { %5301 = vmatpush1.bf16.msra.mxu1 %v4736_v62  ;;  %v4856_v62 = vld [vmem:[#allocation4 + $0xc30] sm:$0xff] }
 0x948   :  { %5302 = vmatprep.subr.bf16.mxu1 %v4744_v31 }
 0x94b   :  { %5303 = vmatpush1.bf16.msra.mxu1 %v4743_v40 }
 0x94c   :  { %5304 = vmatprep.subr.bf16.mxu1 %v4751_v3 }
 0x94f   :  { %5305 = vmatpush1.bf16.msra.mxu1 %v4750_v28 }
 0x950   :  { %5306 = vmatprep.subr.bf16.mxu1 %v4758_v29 }
 0x953   :  { %5307 = vmatpush1.bf16.msra.mxu1 %v4757_v20 }
 0x954   :  { %5308 = vmatprep.subr.bf16.mxu1 %v4765_v44 }
 0x957   :  { %5309 = vmatpush1.bf16.msra.mxu1 %v4764_v60 }
 0x958   :  { %5310 = vmatprep.subr.bf16.mxu1 %v4772_v13 }
 0x95b   :  { %5311 = vmatpush1.bf16.msra.mxu1 %v4771_v33 }
 0x95c   :  { %5312 = vmatprep.subr.bf16.mxu1 %v4779_v30 }
 0x95f   :  { %5313 = vmatpush1.bf16.msra.mxu1 %v4778_v55 }
 0x960   :  { %5314 = vmatprep.subr.bf16.mxu1 %v4786_v12  ;;  %v4855_v12 = vld [vmem:[#allocation4 + $0xc28] sm:$0xff] }
 0x963   :  { %5315 = vmatpush1.bf16.msra.mxu1 %v4785_v45 }
 0x964   :  { %5316 = vmatprep.subr.bf16.mxu1 %v4793_v47 }
 0x967   :  { %5317 = vmatpush1.bf16.msra.mxu1 %v4792_v59 }
 0x968   :  { %5318 = vmatprep.subr.bf16.mxu1 %v4800_v36 }
 0x96b   :  { %5319 = vmatpush1.bf16.msra.mxu1 %v4799_v18 }
 0x96c   :  { %5331 = vmatprep.subr.bf16.mxu1 %v4807_v37 }
 0x96e   :  { %5321 = vmatmul.mubr.bf16.vlgmr.msra.gmra.mrb[48].mxu1 %v9120_v21  ;;  %v4841_v21 = vld [vmem:[#allocation4 + $0xbb8] sm:$0xff] }
 0x96f   :  { %5332 = vmatpush1.bf16.msra.mxu1 %v4806_v43  ;;  %5363 = vmatprep.mubr.bf16.mxu1 %v8087_v0 }
 0x970   :  { %5333 = vmatprep.subr.bf16.mxu1 %v4814_v54 }
 0x973   :  { %5334 = vmatpush1.bf16.msra.mxu1 %v4813_v8 }
 0x974   :  { %5335 = vmatprep.subr.bf16.mxu1 %v4821_v46 }
 0x977   :  { %5336 = vmatpush1.bf16.msra.mxu1 %v4820_v7 }
 0x978   :  { %5337 = vmatprep.subr.bf16.mxu1 %v4828_v58 }
 0x97b   :  { %5338 = vmatpush1.bf16.msra.mxu1 %v4827_v24 }
 0x97c   :  { %5339 = vmatprep.subr.bf16.mxu1 %v4835_v38 }
 0x97f   :  { %5340 = vmatpush1.bf16.msra.mxu1 %v4834_v26 }
 0x980   :  { %5341 = vmatprep.subr.bf16.mxu1 %v4842_v52 }
 0x981   :  { %v9156_v22 = vpop.f32.mrb[44].mxu1  ;;  %v9158_v51 = vpop.f32.mrb[28].mxu0 }
 0x982   :  { %v5546_v35 = vrot.slane %v9156_v22, 4  ;;  %v5558_v63 = vrot.slane %v9158_v51, 4  ;;  %v9162_v17 = vpop.f32.mrb[45].mxu1  ;;  %v9164_v25 = vpop.f32.mrb[29].mxu0 }
 0x983   :  { %v5552_v9 = vrot.slane %v9162_v17, 4  ;;  %v5564_v34 = vrot.slane %v9164_v25, 4  ;;  %v9168_v27 = vpop.f32.mrb[46].mxu1  ;;  %v9170_v1 = vpop.f32.mrb[30].mxu0  ;;  %5342 = vmatpush1.bf16.msra.mxu1 %v4841_v21 }
 0x984   :  { %v5547_v6 = vadd.f32 %v5546_v35, %v9156_v22  ;;  %v5559_v48 = vadd.f32 %v5558_v63, %v9158_v51  ;;  %v5588_v19 = vrot.slane %v9168_v27, 4  ;;  %v5600_v11 = vrot.slane %v9170_v1, 4  ;;  %v9176_v49 = vpop.f32.mrb[47].mxu1  ;;  %v9178_v32 = vpop.f32.mrb[31].mxu0  ;;  %5343 = vmatprep.subr.bf16.mxu1 %v4849_v14 }
 0x985   :  { %v5553_v39 = vadd.f32 %v5552_v9, %v9162_v17  ;;  %v5565_v23 = vadd.f32 %v5564_v34, %v9164_v25  ;;  %v5594_v56 = vrot.slane %v9176_v49, 4  ;;  %v5606_v4 = vrot.slane %v9178_v32, 4 }
 0x986   :  { %v5548_v31 = vrot.slane %v5547_v6, 2  ;;  %v5560_v40 = vrot.slane %v5559_v48, 2  ;;  %v5589_v3 = vadd.f32 %v5588_v19, %v9168_v27  ;;  %v5601_v28 = vadd.f32 %v5600_v11, %v9170_v1 }
 0x987   :  { %v5554_v29 = vrot.slane %v5553_v39, 2  ;;  %v5566_v20 = vrot.slane %v5565_v23, 2  ;;  %v5595_v44 = vadd.f32 %v5594_v56, %v9176_v49  ;;  %v5607_v60 = vadd.f32 %v5606_v4, %v9178_v32  ;;  %5344 = vmatpush1.bf16.msra.mxu1 %v4848_v15 }
 0x988   :  { %v5549_v13 = vadd.f32 %v5548_v31, %v5547_v6  ;;  %v5561_v33 = vadd.f32 %v5560_v40, %v5559_v48  ;;  %v5590_v30 = vrot.slane %v5589_v3, 2  ;;  %v5602_v55 = vrot.slane %v5601_v28, 2  ;;  %5345 = vmatprep.subr.bf16.mxu1 %v4856_v62 }
 0x989   :  { %v5555_v45 = vadd.f32 %v5554_v29, %v5553_v39  ;;  %v5567_v47 = vadd.f32 %v5566_v20, %v5565_v23  ;;  %v5596_v59 = vrot.slane %v5595_v44, 2  ;;  %v5608_v36 = vrot.slane %v5607_v60, 2 }
 0x98a   :  { %v5550_v18 = vrot.slane %v5549_v13, 1  ;;  %v5562_v37 = vrot.slane %v5561_v33, 1  ;;  %v5591_v43 = vadd.f32 %v5590_v30, %v5589_v3  ;;  %v5603_v54 = vadd.f32 %v5602_v55, %v5601_v28 }
 0x98b   :  { %v5556_v8 = vrot.slane %v5555_v45, 1  ;;  %v5568_v46 = vrot.slane %v5567_v47, 1  ;;  %v5597_v7 = vadd.f32 %v5596_v59, %v5595_v44  ;;  %v5609_v58 = vadd.f32 %v5608_v36, %v5607_v60  ;;  %5346 = vmatpush1.bf16.msra.mxu1 %v4855_v12 }
 0x98c   :  { %v5551_v24 = vadd.f32 %v5550_v18, %v5549_v13  ;;  %v5563_v38 = vadd.f32 %v5562_v37, %v5561_v33  ;;  %v5592_v26 = vrot.slane %v5591_v43, 1  ;;  %v5604_v52 = vrot.slane %v5603_v54, 1 }
 0x98d   :  { %v5557_v21 = vadd.f32 %v5556_v8, %v5555_v45  ;;  %v5569_v14 = vadd.f32 %v5568_v46, %v5567_v47  ;;  %v5598_v35 = vrot.slane %v5597_v7, 1  ;;  %v5610_v63 = vrot.slane %v5609_v58, 1 }
 0x98e   :  { %v5630_v9 = vmul.f32 0.125, %v5551_v24  ;;  %v5632_v34 = vmul.f32 0.125, %v5563_v38  ;;  %v5593_v6 = vadd.f32 %v5592_v26, %v5591_v43  ;;  %v5605_v48 = vadd.f32 %v5604_v52, %v5603_v54  ;;  %5364 = vmatmul.mubr.bf16.vlgmr.msra.gmra.mrb[48].mxu1 %v9128_v16 }
 0x98f   :  { %v5631_v19 = vmul.f32 0.125, %v5557_v21  ;;  %v5633_v11 = vmul.f32 0.125, %v5569_v14  ;;  %v5599_v15 = vadd.f32 %v5598_v35, %v5597_v7  ;;  %v5611_v39 = vadd.f32 %v5610_v63, %v5609_v58 }
 0x990   :  { %v9190_v23 = vsub.f32 %v9156_v22, %v5630_v9  ;;  %v9193_v56 = vsub.f32 %v9158_v51, %v5632_v34  ;;  %v5637_v4 = vmul.f32 0.125, %v5593_v6  ;;  %v5639_v62 = vmul.f32 0.125, %v5605_v48 }
 0x991   :  { %v9196_v31 = vsub.f32 %v9162_v17, %v5631_v19  ;;  %v9199_v40 = vsub.f32 %v9164_v25, %v5633_v11  ;;  %v5638_v3 = vmul.f32 0.125, %v5599_v15  ;;  %v5640_v16 = vmul.f32 0.125, %v5611_v39 }
 0x992   :  { %v5658_v28 = vmul.f32 %v9190_v23, %v9190_v23  ;;  %v5660_v22 = vmul.f32 %v9193_v56, %v9193_v56  ;;  %v9206_v29 = vsub.f32 %v9168_v27, %v5637_v4  ;;  %v9209_v51 = vsub.f32 %v9170_v1, %v5639_v62 }
 0x993   :  { %v5659_v17 = vmul.f32 %v9196_v31, %v9196_v31  ;;  %v5661_v25 = vmul.f32 %v9199_v40, %v9199_v40  ;;  %v9216_v20 = vsub.f32 %v9176_v49, %v5638_v3  ;;  %v9219_v44 = vsub.f32 %v9178_v32, %v5640_v16 }
 0x994   :  { %v5672_v60 = vrot.slane %v5658_v28, 4  ;;  %v5684_v13 = vrot.slane %v5660_v22, 4  ;;  %v5665_v27 = vmul.f32 %v9206_v29, %v9206_v29  ;;  %v5667_v1 = vmul.f32 %v9209_v51, %v9209_v51 }
 0x995   :  { %v5678_v33 = vrot.slane %v5659_v17, 4  ;;  %v5690_v30 = vrot.slane %v5661_v25, 4  ;;  %v5666_v55 = vmul.f32 %v9216_v20, %v9216_v20  ;;  %v5668_v49 = vmul.f32 %v9219_v44, %v9219_v44 }
 0x996   :  { %v5673_v12 = vadd.f32 %v5672_v60, %v5658_v28  ;;  %v5685_v45 = vadd.f32 %v5684_v13, %v5660_v22  ;;  %v5714_v32 = vrot.slane %v5665_v27, 4  ;;  %v5726_v47 = vrot.slane %v5667_v1, 4 }
 0x997   :  { %v5679_v59 = vadd.f32 %v5678_v33, %v5659_v17  ;;  %v5691_v36 = vadd.f32 %v5690_v30, %v5661_v25  ;;  %v5720_v18 = vrot.slane %v5666_v55, 4  ;;  %v5732_v37 = vrot.slane %v5668_v49, 4 }
 0x998   :  { %v5674_v43 = vrot.slane %v5673_v12, 2  ;;  %v5686_v54 = vrot.slane %v5685_v45, 2  ;;  %v5715_v8 = vadd.f32 %v5714_v32, %v5665_v27  ;;  %v5727_v46 = vadd.f32 %v5726_v47, %v5667_v1 }
 0x999   :  { %v5680_v7 = vrot.slane %v5679_v59, 2  ;;  %v5692_v58 = vrot.slane %v5691_v36, 2  ;;  %v5721_v24 = vadd.f32 %v5720_v18, %v5666_v55  ;;  %v5733_v38 = vadd.f32 %v5732_v37, %v5668_v49 }
 0x99a   :  { %v5675_v26 = vadd.f32 %v5674_v43, %v5673_v12  ;;  %v5687_v52 = vadd.f32 %v5686_v54, %v5685_v45  ;;  %v5716_v21 = vrot.slane %v5715_v8, 2  ;;  %v5728_v14 = vrot.slane %v5727_v46, 2 }
 0x99b   :  { %v5681_v35 = vadd.f32 %v5680_v7, %v5679_v59  ;;  %v5693_v63 = vadd.f32 %v5692_v58, %v5691_v36  ;;  %v5722_v9 = vrot.slane %v5721_v24, 2  ;;  %v5734_v34 = vrot.slane %v5733_v38, 2 }
 0x99c   :  { %v5676_v6 = vrot.slane %v5675_v26, 1  ;;  %v5688_v48 = vrot.slane %v5687_v52, 1  ;;  %v5717_v19 = vadd.f32 %v5716_v21, %v5715_v8  ;;  %v5729_v11 = vadd.f32 %v5728_v14, %v5727_v46 }
 0x99d   :  { %v5682_v15 = vrot.slane %v5681_v35, 1  ;;  %v5694_v39 = vrot.slane %v5693_v63, 1  ;;  %v5723_v4 = vadd.f32 %v5722_v9, %v5721_v24  ;;  %v5735_v62 = vadd.f32 %v5734_v34, %v5733_v38 }
 0x99e   :  { %v5677_v3 = vadd.f32 %v5676_v6, %v5675_v26  ;;  %v5689_v16 = vadd.f32 %v5688_v48, %v5687_v52  ;;  %v5718_v28 = vrot.slane %v5717_v19, 1  ;;  %v5730_v22 = vrot.slane %v5729_v11, 1 }
 0x99f   :  { %v5683_v17 = vadd.f32 %v5682_v15, %v5681_v35  ;;  %v5695_v25 = vadd.f32 %v5694_v39, %v5693_v63  ;;  %v5724_v60 = vrot.slane %v5723_v4, 1  ;;  %v5736_v13 = vrot.slane %v5735_v62, 1 }
 0x9a0   :  { %v5756_v27 = vmul.f32 0.125, %v5677_v3  ;;  %v5758_v1 = vmul.f32 0.125, %v5689_v16  ;;  %v5719_v33 = vadd.f32 %v5718_v28, %v5717_v19  ;;  %v5731_v30 = vadd.f32 %v5730_v22, %v5729_v11 }
 0x9a1   :  { %v5757_v55 = vmul.f32 0.125, %v5683_v17  ;;  %v5759_v49 = vmul.f32 0.125, %v5695_v25  ;;  %v5725_v12 = vadd.f32 %v5724_v60, %v5723_v4  ;;  %v5737_v45 = vadd.f32 %v5736_v13, %v5735_v62  ;;  %v7453_v32 = vpop.f32.mrb[32].mxu0 }
 0x9a2   :  { %v5770_v47 = vadd.f32 1e-05, %v5756_v27  ;;  %v5772_v59 = vadd.f32 1e-05, %v5758_v1  ;;  %v5763_v36 = vmul.f32 0.125, %v5719_v33  ;;  %v5765_v18 = vmul.f32 0.125, %v5731_v30 }
 0x9a3   :  { %v5771_v37 = vadd.f32 1e-05, %v5757_v55  ;;  %v5773_v43 = vadd.f32 1e-05, %v5759_v49  ;;  %v5764_v54 = vmul.f32 0.125, %v5725_v12  ;;  %v5766_v8 = vmul.f32 0.125, %v5737_v45 }
 0x9a4   :  { %7947 = vrsqrt.f32 %v5770_v47  ;;  %v5777_v46 = vadd.f32 1e-05, %v5763_v36  ;;  %v7454_v7 = vpop.f32.mrb[33].mxu0  ;;  %v5779_v58 = vadd.f32 1e-05, %v5765_v18 }
 0x9a5   :  { %7949 = vrsqrt.f32 %v5772_v59  ;;  %v7455_v24 = vadd.f32 %v7454_v7, %v7453_v32  ;;  %v7456_v38 = vpop.f32.mrb[34].mxu0  ;;  %v5778_v26 = vadd.f32 1e-05, %v5764_v54  ;;  %v5780_v21 = vadd.f32 1e-05, %v5766_v8 }
 0x9a6   :  { %7951 = vrsqrt.f32 %v5771_v37  ;;  %v7457_v52 = vpop.f32.mrb[35].mxu0 }
 0x9a7   :  { %7953 = vrsqrt.f32 %v5773_v43  ;;  %v7458_v14 = vadd.f32 %v7457_v52, %v7456_v38 }
 0x9a8   :  { %7955 = vrsqrt.f32 %v5777_v46 }
 0x9a9   :  { %7957 = vrsqrt.f32 %v5779_v58 }
 0x9aa   :  { %7959 = vrsqrt.f32 %v5778_v26 }
 0x9ab   :  { %7961 = vrsqrt.f32 %v5780_v21 }
 0x9ae   :  { %v7948_v35 = vpop.eup %7947 }
 0x9af   :  { %v7950_v63 = vpop.eup %7949 }
 0x9b0   :  { %v7952_v9 = vpop.eup %7951 }
 0x9b1   :  { %v7954_v34 = vpop.eup %7953  ;;  %v5812_v6 = vcombine.low %v7948_v35, %v7952_v9 }
 0x9b2   :  { %v7956_v48 = vpop.eup %7955  ;;  %v5813_v19 = vcombine.low %v7950_v63, %v7954_v34 }
 0x9b3   :  { %v7958_v11 = vpop.eup %7957  ;;  %v9230_v15 = vrot.slane %v5812_v6, %v8285_v10 }
 0x9b4   :  { %v7960_v39 = vpop.eup %7959  ;;  %v9233_v4 = vrot.slane %v5813_v19, %v8285_v10 }
 0x9b5   :  { %v7962_v62 = vpop.eup %7961  ;;  %v5860_v3 = vcombine.low %v7956_v48, %v7960_v39 }
 0x9b6   :  { %v5843_v16 = vcombine.low %v9230_v15, %v9233_v4  ;;  %v5861_v28 = vcombine.low %v7958_v11, %v7962_v62 }
 0x9b7   :  { %v9238_v22 = vrot.slane %v5860_v3, %v8285_v10 }
 0x9b8   :  { %v9241_v17 = vrot.slane %v5861_v28, %v8285_v10 }
 0x9ba   :  { %v5891_v25 = vcombine.low %v9238_v22, %v9241_v17 }
 0x9c1   :  { %v7475_v60 = vpop.f32.mrb[36].mxu0 }
 0x9c2   :  { %v7476_v13 = vpop.f32.mrb[37].mxu0 }
 0x9c3   :  { %v7477_v27 = vadd.f32 %v7476_v13, %v7475_v60  ;;  %v7478_v1 = vpop.f32.mrb[38].mxu0 }
 0x9c4   :  { %v7479_v33 = vpop.f32.mrb[39].mxu0 }
 0x9c5   :  { %v5450_v30 = vadd.f32 %v7477_v27, %v7455_v24  ;;  %v7480_v55 = vadd.f32 %v7479_v33, %v7478_v1 }
 0x9c7   :  { %v5453_v49 = vadd.f32 %v7480_v55, %v7458_v14 }
 0x9e1   :  { %v7497_v12 = vpop.f32.mrb[40].mxu0 }
 0x9e2   :  { %v7498_v45 = vpop.f32.mrb[41].mxu0 }
 0x9e3   :  { %v7499_v32 = vadd.f32 %v7498_v45, %v7497_v12  ;;  %v7500_v47 = vpop.f32.mrb[42].mxu0 }
 0x9e4   :  { %v7501_v59 = vpop.f32.mrb[43].mxu0 }
 0x9e5   :  { %v7502_v36 = vadd.f32 %v7501_v59, %v7500_v47  ;;  %v5491_v18 = vadd.f32 %v7499_v32, %v5450_v30 }
 0x9e7   :  { %v5494_v37 = vadd.f32 %v7502_v36, %v5453_v49 }
 0xa01   :  { %v5531_v43 = vpop.f32.mrb[44].mxu0 }
 0xa02   :  { %v5532_v54 = vadd.f32 %v5531_v43, %v5491_v18  ;;  %v7625_v8 = vpop.f32.mrb[45].mxu0 }
 0xa03   :  { %v5534_v46 = vpop.f32.mrb[46].mxu0 }
 0xa04   :  { %v5535_v7 = vadd.f32 %v5534_v46, %v5494_v37  ;;  %v7626_v58 = vpop.f32.mrb[47].mxu0  ;;  %v5582_v38 = vrot.slane %v5532_v54, 4 }
 0xa06   :  { %v5624_v26 = vrot.slane %v5535_v7, 4  ;;  %v5583_v52 = vadd.f32 %v5582_v38, %v5532_v54 }
 0xa08   :  { %v5625_v24 = vadd.f32 %v5624_v26, %v5535_v7  ;;  %v5584_v21 = vrot.slane %v5583_v52, 2 }
 0xa0a   :  { %v5626_v14 = vrot.slane %v5625_v24, 2  ;;  %v5585_v35 = vadd.f32 %v5584_v21, %v5583_v52 }
 0xa0c   :  { %v5627_v63 = vadd.f32 %v5626_v14, %v5625_v24  ;;  %v5586_v9 = vrot.slane %v5585_v35, 1 }
 0xa0e   :  { %v5628_v34 = vrot.slane %v5627_v63, 1  ;;  %v5587_v6 = vadd.f32 %v5586_v9, %v5585_v35 }
 0xa10   :  { %v5629_v48 = vadd.f32 %v5628_v34, %v5627_v63  ;;  %v5636_v19 = vmul.f32 0.125, %v5587_v6 }
 0xa12   :  { %v5643_v11 = vmul.f32 0.125, %v5629_v48  ;;  %v9245_v39 = vsub.f32 %v5532_v54, %v5636_v19 }
 0xa14   :  { %v9247_v62 = vsub.f32 %v5535_v7, %v5643_v11  ;;  %v5664_v3 = vmul.f32 %v9245_v39, %v9245_v39 }
 0xa16   :  { %v5671_v28 = vmul.f32 %v9247_v62, %v9247_v62  ;;  %v5708_v13 = vrot.slane %v5664_v3, 4 }
 0xa18   :  { %v5750_v33 = vrot.slane %v5671_v28, 4  ;;  %v5709_v59 = vadd.f32 %v5708_v13, %v5664_v3 }
 0xa1a   :  { %v5751_v37 = vadd.f32 %v5750_v33, %v5671_v28  ;;  %v5710_v38 = vrot.slane %v5709_v59, 2 }
 0xa1c   :  { %v5752_v24 = vrot.slane %v5751_v37, 2  ;;  %v5711_v6 = vadd.f32 %v5710_v38, %v5709_v59 }
 0xa1e   :  { %v5753_v11 = vadd.f32 %v5752_v24, %v5751_v37 }
 0xa61   :  { %v5365_v60 = vpop.f32.mrb[48].mxu1 }
 0xa62   :  { %v5570_v27 = vrot.slane %v5365_v60, 4  ;;  %v5367_v1 = vpop.f32.mrb[49].mxu1 }
 0xa63   :  { %v5576_v30 = vrot.slane %v5367_v1, 4  ;;  %v5369_v55 = vpop.f32.mrb[50].mxu1 }
 0xa64   :  { %v5571_v49 = vadd.f32 %v5570_v27, %v5365_v60  ;;  %v5612_v12 = vrot.slane %v5369_v55, 4  ;;  %v5371_v45 = vpop.f32.mrb[51].mxu1 }
 0xa65   :  { %v5577_v32 = vadd.f32 %v5576_v30, %v5367_v1  ;;  %v5618_v47 = vrot.slane %v5371_v45, 4 }
 0xa66   :  { %v5572_v36 = vrot.slane %v5571_v49, 2  ;;  %v5613_v18 = vadd.f32 %v5612_v12, %v5369_v55 }
 0xa67   :  { %v5578_v43 = vrot.slane %v5577_v32, 2  ;;  %v5619_v54 = vadd.f32 %v5618_v47, %v5371_v45  ;;  %v5754_v47 = vrot.slane %v5753_v11, 1 }
 0xa68   :  { %v5573_v8 = vadd.f32 %v5572_v36, %v5571_v49  ;;  %v5614_v46 = vrot.slane %v5613_v18, 2  ;;  %v5712_v49 = vrot.slane %v5711_v6, 1 }
 0xa69   :  { %v5579_v7 = vadd.f32 %v5578_v43, %v5577_v32  ;;  %v5620_v58 = vrot.slane %v5619_v54, 2 }
 0xa6a   :  { %v5574_v26 = vrot.slane %v5573_v8, 1  ;;  %v5615_v52 = vadd.f32 %v5614_v46, %v5613_v18  ;;  %v5713_v43 = vadd.f32 %v5712_v49, %v5711_v6  ;;  %v5755_v46 = vadd.f32 %v5754_v47, %v5753_v11 }
 0xa6b   :  { %v5580_v21 = vrot.slane %v5579_v7, 1  ;;  %v5621_v14 = vadd.f32 %v5620_v58, %v5619_v54 }
 0xa6c   :  { %v5575_v35 = vadd.f32 %v5574_v26, %v5573_v8  ;;  %v5616_v63 = vrot.slane %v5615_v52, 1 }
 0xa6d   :  { %v5581_v9 = vadd.f32 %v5580_v21, %v5579_v7  ;;  %v5622_v34 = vrot.slane %v5621_v14, 1 }
 0xa6e   :  { %v5634_v48 = vmul.f32 0.125, %v5575_v35  ;;  %v5617_v19 = vadd.f32 %v5616_v63, %v5615_v52 }
 0xa6f   :  { %v5635_v3 = vmul.f32 0.125, %v5581_v9  ;;  %v5623_v28 = vadd.f32 %v5622_v34, %v5621_v14  ;;  %v5769_v14 = vmul.f32 0.125, %v5755_v46 }
 0xa70   :  { %v9253_v13 = vsub.f32 %v5365_v60, %v5634_v48  ;;  %v5641_v27 = vmul.f32 0.125, %v5617_v19 }
 0xa71   :  { %v9255_v33 = vsub.f32 %v5367_v1, %v5635_v3  ;;  %v5642_v30 = vmul.f32 0.125, %v5623_v28  ;;  %v5783_v11 = vadd.f32 1e-05, %v5769_v14 }
 0xa72   :  { %v5662_v12 = vmul.f32 %v9253_v13, %v9253_v13  ;;  %v9259_v32 = vsub.f32 %v5369_v55, %v5641_v27 }
 0xa73   :  { %v5663_v59 = vmul.f32 %v9255_v33, %v9255_v33  ;;  %v9263_v36 = vsub.f32 %v5371_v45, %v5642_v30  ;;  %v5762_v45 = vmul.f32 0.125, %v5713_v43 }
 0xa74   :  { %v5696_v18 = vrot.slane %v5662_v12, 4  ;;  %v5669_v60 = vmul.f32 %v9259_v32, %v9259_v32 }
 0xa75   :  { %v5702_v37 = vrot.slane %v5663_v59, 4  ;;  %v5670_v1 = vmul.f32 %v9263_v36, %v9263_v36  ;;  %v5776_v6 = vadd.f32 1e-05, %v5762_v45  ;;  %v5543_v45 = vld [vmem:[#allocation12 + $0x42] ss:$8 sm:$0xf] }
 0xa76   :  { %v5697_v54 = vadd.f32 %v5696_v18, %v5662_v12  ;;  %v5738_v8 = vrot.slane %v5669_v60, 4 }
 0xa77   :  { %v5703_v55 = vadd.f32 %v5702_v37, %v5663_v59  ;;  %v5744_v7 = vrot.slane %v5670_v1, 4  ;;  %7963 = vrsqrt.f32 %v5776_v6  ;;  %v5851_v6 = vrot.slane %v5843_v16, %v8285_v10 }
 0xa78   :  { %v5698_v58 = vrot.slane %v5697_v54, 2  ;;  %v5739_v38 = vadd.f32 %v5738_v8, %v5669_v60  ;;  %7965 = vrsqrt.f32 %v5783_v11 }
 0xa79   :  { %v5704_v26 = vrot.slane %v5703_v55, 2  ;;  %v5745_v52 = vadd.f32 %v5744_v7, %v5670_v1 }
 0xa7a   :  { %v5699_v24 = vadd.f32 %v5698_v58, %v5697_v54  ;;  %v5740_v21 = vrot.slane %v5739_v38, 2 }
 0xa7b   :  { %v5705_v35 = vadd.f32 %v5704_v26, %v5703_v55  ;;  %v5746_v63 = vrot.slane %v5745_v52, 2 }
 0xa7c   :  { %v5700_v9 = vrot.slane %v5699_v24, 1  ;;  %v5741_v34 = vadd.f32 %v5740_v21, %v5739_v38 }
 0xa7d   :  { %v5706_v48 = vrot.slane %v5705_v35, 1  ;;  %v5747_v19 = vadd.f32 %v5746_v63, %v5745_v52  ;;  %v5540_v63 = vld [vmem:[#allocation12 + $0x41] ss:$8 sm:$0xf0] }
 0xa7e   :  { %v5701_v3 = vadd.f32 %v5700_v9, %v5699_v24  ;;  %v5742_v28 = vrot.slane %v5741_v34, 1  ;;  %v5544_v24 = vld [vmem:[#allocation12 + $0x42] ss:$8 sm:$0xf0] }
 0xa7f   :  { %v5707_v27 = vadd.f32 %v5706_v48, %v5705_v35  ;;  %v5748_v30 = vrot.slane %v5747_v19, 1  ;;  %v5539_v35 = vld [vmem:[#allocation12 + $0x41] ss:$8 sm:$0xf] }
 0xa80   :  { %v5760_v49 = vmul.f32 0.125, %v5701_v3  ;;  %v5743_v12 = vadd.f32 %v5742_v28, %v5741_v34  ;;  %v5541_v3 = vor.u32 %v5540_v63, %v5539_v35 }
 0xa81   :  { %v5761_v47 = vmul.f32 0.125, %v5707_v27  ;;  %v5749_v59 = vadd.f32 %v5748_v30, %v5747_v19  ;;  %v7964_v8 = vpop.eup %7963  ;;  %v5545_v19 = vor.u32 %v5544_v24, %v5543_v45  ;;  %v5899_v27 = vrot.slane %v5891_v25, %v8285_v10 }
 0xa82   :  { %v5774_v18 = vadd.f32 1e-05, %v5760_v49  ;;  %v5767_v60 = vmul.f32 0.125, %v5743_v12  ;;  %v7966_v46 = vpop.eup %7965  ;;  %v5842_v52 = vrot.slane %v7964_v8, %v8285_v10 }
 0xa83   :  { %v5775_v37 = vadd.f32 1e-05, %v5761_v47  ;;  %v5768_v1 = vmul.f32 0.125, %v5749_v59  ;;  %v5890_v9 = vrot.slane %v7966_v46, %v8285_v10  ;;  %v6002_v12 = vrot.slane %v5545_v19, %v8250_v41 }
 0xa84   :  { %7967 = vrsqrt.f32 %v5774_v18  ;;  %v5781_v43 = vadd.f32 1e-05, %v5767_v60  ;;  %v6006_v59 = vrot.slane %v5545_v19, %v8252_v42  ;;  %v6010_v15 = vrot.slane %v5545_v19, %v8256_v50 }
 0xa85   :  { %7969 = vrsqrt.f32 %v5775_v37  ;;  %v5782_v54 = vadd.f32 1e-05, %v5768_v1  ;;  %v6014_v16 = vrot.slane %v5545_v19, %v8258_v53  ;;  %v6018_v18 = vrot.slane %v5545_v19, %v8262_v57 }
 0xa86   :  { %7971 = vrsqrt.f32 %v5781_v43  ;;  %v6022_v60 = vrot.slane %v5545_v19, %v8266_v61  ;;  %v6026_v22 = vrot.slane %v5545_v19, %v8272_v2 }
 0xa87   :  { %7973 = vrsqrt.f32 %v5782_v54 }
 0xa8e   :  { %v7968_v55 = vpop.eup %7967 }
 0xa8f   :  { %v7970_v7 = vpop.eup %7969 }
 0xa90   :  { %v7972_v58 = vpop.eup %7971  ;;  %v5814_v38 = vcombine.low %v7968_v55, %v7970_v7 }
 0xa91   :  { %v7974_v26 = vpop.eup %7973 }
 0xa92   :  { %v5835_v21 = vrot.slane %v5814_v38, %v8285_v10  ;;  %v5862_v14 = vcombine.low %v7972_v58, %v7974_v26 }
 0xa94   :  { %v5844_v34 = vcombine.low %v5835_v21, %v5842_v52  ;;  %v5883_v48 = vrot.slane %v5862_v14, %v8285_v10 }
 0xa96   :  { %v5858_v28 = vrot.slane %v5844_v34, %v8285_v10  ;;  %v5892_v11 = vcombine.low %v5883_v48, %v5890_v9 }
 0xa98   :  { %v5859_v30 = vcombine.low %v5851_v6, %v5858_v28  ;;  %v5906_v49 = vrot.slane %v5892_v11, %v8285_v10 }
 0xa9a   :  { %v5910_v47 = vmul.f32 %v5859_v30, %v5541_v3  ;;  %v5907_v4 = vcombine.low %v5899_v27, %v5906_v49 }
 0xa9c   :  { %v5917_v17 = vrot.slane %v5910_v47, %v8250_v41  ;;  %v5921_v10 = vrot.slane %v5910_v47, %v8252_v42  ;;  %v5925_v25 = vrot.slane %v5910_v47, %v8256_v50  ;;  %v5929_v37 = vrot.slane %v5910_v47, %v8258_v53 }
 0xa9d   :  { %v5933_v1 = vrot.slane %v5910_v47, %v8262_v57  ;;  %v5937_v43 = vrot.slane %v5910_v47, %v8266_v61  ;;  %v5941_v54 = vrot.slane %v5910_v47, %v8272_v2  ;;  %v5911_v8 = vmul.f32 %v5907_v4, %v5541_v3 }
 0xa9e   :  { %v5984_v46 = vmul.f32 %v5917_v17, %v9190_v23  ;;  %v5985_v55 = vmul.f32 %v5921_v10, %v9196_v31  ;;  %v5986_v7 = vmul.f32 %v5925_v25, %v9193_v56  ;;  %v5987_v58 = vmul.f32 %v5929_v37, %v9199_v40 }
 0xa9f   :  { %v5988_v38 = vmul.f32 %v5933_v1, %v9253_v13  ;;  %v5989_v26 = vmul.f32 %v5937_v43, %v9255_v33  ;;  %v5990_v52 = vmul.f32 %v5941_v54, %v9245_v39  ;;  %v5945_v45 = vrot.slane %v5911_v8, %v8250_v41 }
 0xaa0   :  { %v9305_v24 = vadd.f32 %v6002_v12, %v5984_v46  ;;  %v6035_v21 = vadd.f32 %v6006_v59, %v5985_v55  ;;  %v9307_v14 = vadd.f32 %v6010_v15, %v5986_v7  ;;  %v9309_v23 = vadd.f32 %v6014_v16, %v5987_v58 }
 0xaa1   :  { %v9311_v31 = vadd.f32 %v6018_v18, %v5988_v38  ;;  %v9313_v56 = vadd.f32 %v6022_v60, %v5989_v26  ;;  %v9315_v40 = vadd.f32 %v6026_v22, %v5990_v52  ;;  %v5949_v13 = vrot.slane %v5911_v8, %v8252_v42 }
 0xaa2   :  { %v6048_v33 = vmax.f32 %v9305_v24, 0.0  ;;  %v6049_v39 = vmax.f32 %v6035_v21, 0.0  ;;  %v6050_v35 = vmax.f32 %v9307_v14, 0.0  ;;  %v6051_v63 = vmax.f32 %v9309_v23, 0.0 }
 0xaa3   :  { %v6052_v9 = vmax.f32 %v9311_v31, 0.0  ;;  %v6053_v34 = vmax.f32 %v9313_v56, 0.0  ;;  %v6054_v48 = vmax.f32 %v9315_v40, 0.0  ;;  %v5953_v19 = vrot.slane %v5911_v8, %v8256_v50 }
 0xaa4   :  { %v5957_v6 = vrot.slane %v5911_v8, %v8258_v53  ;;  %v5961_v3 = vrot.slane %v5911_v8, %v8262_v57  ;;  %v5965_v28 = vrot.slane %v5911_v8, %v8266_v61  ;;  %v5969_v11 = vrot.slane %v5911_v8, %v8272_v2 }
 0xaa5   :  { %v5991_v27 = vmul.f32 %v5945_v45, %v9206_v29  ;;  %v5992_v30 = vmul.f32 %v5949_v13, %v9216_v20  ;;  %v5993_v49 = vmul.f32 %v5953_v19, %v9209_v51 }
 0xaa6   :  { %v5994_v47 = vmul.f32 %v5957_v6, %v9219_v44  ;;  %v5995_v4 = vmul.f32 %v5961_v3, %v9259_v32  ;;  %v5996_v17 = vmul.f32 %v5965_v28, %v9263_v36  ;;  %v5997_v10 = vmul.f32 %v5969_v11, %v9247_v62 }
 0xaa7   :  { %v9336_v25 = vadd.f32 %v6002_v12, %v5991_v27  ;;  %v6042_v37 = vadd.f32 %v6006_v59, %v5992_v30  ;;  %v9338_v1 = vadd.f32 %v6010_v15, %v5993_v49 }
 0xaa8   :  { %v9340_v43 = vadd.f32 %v6014_v16, %v5994_v47  ;;  %v9342_v29 = vadd.f32 %v6018_v18, %v5995_v4  ;;  %v9344_v20 = vadd.f32 %v6022_v60, %v5996_v17  ;;  %v9346_v51 = vadd.f32 %v6026_v22, %v5997_v10 }
 0xaa9   :  { %v6055_v44 = vmax.f32 %v9336_v25, 0.0  ;;  %v6056_v32 = vmax.f32 %v6042_v37, 0.0  ;;  %v6057_v36 = vmax.f32 %v9338_v1, 0.0 }
 0xaaa   :  { %v6058_v62 = vmax.f32 %v9340_v43, 0.0  ;;  %v6059_v12 = vmax.f32 %v9342_v29, 0.0  ;;  %v6060_v59 = vmax.f32 %v9344_v20, 0.0  ;;  %v6061_v15 = vmax.f32 %v9346_v51, 0.0 }
 0xaab   :  { %8073 = dma.done.wait [#allocation6 + $0x3], 50176 }
 0xaac   :  { %8074 = vsyncadd [#allocation6 + $0x3], 4294917120  ;;  %v9354_v16 = vpack.c.bf16 %v6056_v32, %v6049_v39  ;;  %v6072_v18 = vld [vmem:[#allocation5 + $0x8] sm:$0xff]  ;;  %v6074_v60 = vld [vmem:[#allocation5 + $0x18] sm:$0xff]  ;;  %s8107_s6 = smov [#allocation13]  }
 0xaad   :  { %v6071_v22 = vld [vmem:[#allocation5] sm:$0xff]  ;;  %6503 = vmatprep.subr.bf16.mxu0 %v6072_v18  ;;  %6675 = vmatprep.subr.bf16.mxu1 %v6074_v60  ;;  %v6073_v54 = vld [vmem:[#allocation5 + $0x10] sm:$0xff]  ;;  %v6078_v55 = vld [vmem:[#allocation5 + $0x38] sm:$0xff]  ;;  %s7202_s1 = sshll.u32 %s8107_s6, 4  ;;  %s7203_s1 = int_to_ptr.vmem [resolvable:$true] %s7202_s1 }
 0xaae   :  { %6535 = vmatprep.mubr.bf16.mxu0 %v9354_v16  ;;  %6707 = vmatprep.mubr.bf16.mxu1 %v9354_v16  ;;  %v6079_v8 = vld [vmem:[#allocation5 + $0x40] sm:$0xff]  ;;  %v6081_v46 = vld [vmem:[#allocation5 + $0x50] sm:$0xff]  ;;  %v6080_v7 = vld [vmem:[#allocation5 + $0x48] sm:$0xff]  ;;  %s8041_s15 = scalar_lea.vmem %s7203_s1, 1792  ;;  %p8046_p11 = scmp.lt.s32.totalorder %s7203_s1, %s7203_s1 }
 0xaaf   :  { %6504 = vmatpush1.bf16.msra.mxu0 %v6071_v22  ;;  %6676 = vmatpush1.bf16.msra.mxu1 %v6073_v54  ;;  %v6086_v58 = vld [vmem:[#allocation5 + $0x78] sm:$0xff]  ;;  %v6088_v38 = vld [vmem:[#allocation5 + $0x88] sm:$0xff]  ;;  %v6085_v26 = vld [vmem:[#allocation5 + $0x70] sm:$0xff]  ;;  %p8042_p10 = scmp.ne.s32.totalorder %s7203_s1, %s8041_s15  ;;  %p8047_p12 = scmp.lt.s32.totalorder %s8041_s15, %s8041_s15 }
 0xab0   :  { %6505 = vmatprep.subr.bf16.mxu0 %v6079_v8  ;;  %6677 = vmatprep.subr.bf16.mxu1 %v6081_v46  ;;  %v6087_v52 = vld [vmem:[#allocation5 + $0x80] sm:$0xff]  ;;  %v6093_v45 = vld [vmem:[#allocation5 + $0xb0] sm:$0xff]  ;;  %v6092_v13 = vld [vmem:[#allocation5 + $0xa8] sm:$0xff] }
 0xab1   :  { %v6095_v21 = vld [vmem:[#allocation5 + $0xc0] sm:$0xff]  ;;  %v6094_v39 = vld [vmem:[#allocation5 + $0xb8] sm:$0xff]  ;;  %v6100_v19 = vld [vmem:[#allocation5 + $0xe8] sm:$0xff]  ;;  %p8048_p13 = por %p8047_p12, %p8046_p11 }
 0xab2   :  { %v6102_v6 = vld [vmem:[#allocation5 + $0xf8] sm:$0xff]  ;;  %v6099_v3 = vld [vmem:[#allocation5 + $0xe0] sm:$0xff]  ;;  %v6101_v28 = vld [vmem:[#allocation5 + $0xf0] sm:$0xff] }
 0xab3   :  { %6506 = vmatpush1.bf16.msra.mxu0 %v6078_v55  ;;  %6678 = vmatpush1.bf16.msra.mxu1 %v6080_v7  ;;  %v6107_v11 = vld [vmem:[#allocation5 + $0x120] sm:$0xff]  ;;  %v6109_v27 = vld [vmem:[#allocation5 + $0x130] sm:$0xff]  ;;  %v6106_v30 = vld [vmem:[#allocation5 + $0x118] sm:$0xff]  ;;  %p8049_p0 = pnand %p8048_p13, %p8042_p10 }
 0xab4   :  { %6507 = vmatprep.subr.bf16.mxu0 %v6086_v58  ;;  %6679 = vmatprep.subr.bf16.mxu1 %v6088_v38  ;;  %v6108_v49 = vld [vmem:[#allocation5 + $0x128] sm:$0xff]  ;;  %v6114_v47 = vld [vmem:[#allocation5 + $0x158] sm:$0xff]  ;;  %v6113_v17 = vld [vmem:[#allocation5 + $0x150] sm:$0xff] }
 0xab5   :  { %v6116_v4 = vld [vmem:[#allocation5 + $0x168] sm:$0xff]  ;;  %v6115_v10 = vld [vmem:[#allocation5 + $0x160] sm:$0xff]  ;;  %v6121_v37 = vld [vmem:[#allocation5 + $0x190] sm:$0xff] }
 0xab6   :  { %v6123_v32 = vld [vmem:[#allocation5 + $0x1a0] sm:$0xff]  ;;  %v6120_v18 = vld [vmem:[#allocation5 + $0x188] sm:$0xff]  ;;  %v6122_v60 = vld [vmem:[#allocation5 + $0x198] sm:$0xff] }
 0xab7   :  { %6508 = vmatpush1.bf16.msra.mxu0 %v6085_v26  ;;  %6680 = vmatpush1.bf16.msra.mxu1 %v6087_v52  ;;  %v6128_v22 = vld [vmem:[#allocation5 + $0x1c8] sm:$0xff]  ;;  %v6130_v54 = vld [vmem:[#allocation5 + $0x1d8] sm:$0xff]  ;;  %v6127_v8 = vld [vmem:[#allocation5 + $0x1c0] sm:$0xff] }
 0xab8   :  { %6509 = vmatprep.subr.bf16.mxu0 %v6093_v45  ;;  %6681 = vmatprep.subr.bf16.mxu1 %v6095_v21  ;;  %v6129_v46 = vld [vmem:[#allocation5 + $0x1d0] sm:$0xff]  ;;  %v6135_v55 = vld [vmem:[#allocation5 + $0x200] sm:$0xff]  ;;  %v6134_v58 = vld [vmem:[#allocation5 + $0x1f8] sm:$0xff] }
 0xab9   :  { %v6137_v7 = vld [vmem:[#allocation5 + $0x210] sm:$0xff]  ;;  %v6136_v38 = vld [vmem:[#allocation5 + $0x208] sm:$0xff]  ;;  %v6142_v26 = vld [vmem:[#allocation5 + $0x238] sm:$0xff] }
 0xaba   :  { %v6144_v52 = vld [vmem:[#allocation5 + $0x248] sm:$0xff]  ;;  %v6141_v45 = vld [vmem:[#allocation5 + $0x230] sm:$0xff]  ;;  %v6143_v21 = vld [vmem:[#allocation5 + $0x240] sm:$0xff] }
 0xabb   :  { %6510 = vmatpush1.bf16.msra.mxu0 %v6092_v13  ;;  %6682 = vmatpush1.bf16.msra.mxu1 %v6094_v39  ;;  %v6149_v13 = vld [vmem:[#allocation5 + $0x270] sm:$0xff]  ;;  %v6151_v39 = vld [vmem:[#allocation5 + $0x280] sm:$0xff]  ;;  %v6190_v24 = vld [vmem:[#allocation5 + $0x3b8] sm:$0xff] }
 0xabc   :  { %6511 = vmatprep.subr.bf16.mxu0 %v6100_v19  ;;  %6683 = vmatprep.subr.bf16.mxu1 %v6102_v6  ;;  %v6148_v19 = vld [vmem:[#allocation5 + $0x268] sm:$0xff]  ;;  %v6150_v6 = vld [vmem:[#allocation5 + $0x278] sm:$0xff]  ;;  %v6197_v23 = vld [vmem:[#allocation5 + $0x3f0] sm:$0xff] }
 0xabd   :  { %v6198_v25 = vld [vmem:[#allocation5 + $0x3f8] sm:$0xff]  ;;  %v6205_v43 = vld [vmem:[#allocation5 + $0x430] sm:$0xff]  ;;  %v6416_v29 = vld [vmem:[#allocation5 + $0xac8] sm:$0xff] }
 0xabe   :  { %v6302_v14 = vld [vmem:[#allocation5 + $0x738] sm:$0xff]  ;;  %v6309_v56 = vld [vmem:[#allocation5 + $0x770] sm:$0xff]  ;;  %v6084_v51 = vld [vmem:[#allocation5 + $0x68] sm:$0xff] }
 0xabf   :  { %6512 = vmatpush1.bf16.msra.mxu0 %v6099_v3  ;;  %6684 = vmatpush1.bf16.msra.mxu1 %v6101_v28  ;;  %v6156_v3 = vld [vmem:[#allocation5 + $0x2a8] sm:$0xff]  ;;  %v6158_v28 = vld [vmem:[#allocation5 + $0x2b8] sm:$0xff]  ;;  %v6317_v20 = vld [vmem:[#allocation5 + $0x7b0] sm:$0xff] }
 0xac0   :  { %6513 = vmatprep.subr.bf16.mxu0 %v6107_v11  ;;  %6685 = vmatprep.subr.bf16.mxu1 %v6109_v27  ;;  %v6155_v11 = vld [vmem:[#allocation5 + $0x2a0] sm:$0xff]  ;;  %v6157_v27 = vld [vmem:[#allocation5 + $0x2b0] sm:$0xff]  ;;  %v6310_v1 = vld [vmem:[#allocation5 + $0x778] sm:$0xff] }
 0xac1   :  { %v6414_v31 = vld [vmem:[#allocation5 + $0xab8] sm:$0xff] }
 0xac2   :  { %v6082_v40 = vld [vmem:[#allocation5 + $0x58] sm:$0xff] }
 0xac3   :  { %6514 = vmatpush1.bf16.msra.mxu0 %v6106_v30  ;;  %6686 = vmatpush1.bf16.msra.mxu1 %v6108_v49  ;;  %v6163_v30 = vld [vmem:[#allocation5 + $0x2e0] sm:$0xff]  ;;  %v6165_v49 = vld [vmem:[#allocation5 + $0x2f0] sm:$0xff] }
 0xac4   :  { %6515 = vmatprep.subr.bf16.mxu0 %v6114_v47  ;;  %6687 = vmatprep.subr.bf16.mxu1 %v6116_v4  ;;  %v6162_v47 = vld [vmem:[#allocation5 + $0x2d8] sm:$0xff]  ;;  %v6164_v4 = vld [vmem:[#allocation5 + $0x2e8] sm:$0xff] }
 0xac7   :  { %6516 = vmatpush1.bf16.msra.mxu0 %v6113_v17  ;;  %6688 = vmatpush1.bf16.msra.mxu1 %v6115_v10  ;;  %v6170_v17 = vld [vmem:[#allocation5 + $0x318] sm:$0xff]  ;;  %v6172_v10 = vld [vmem:[#allocation5 + $0x328] sm:$0xff] }
 0xac8   :  { %6517 = vmatprep.subr.bf16.mxu0 %v6121_v37  ;;  %6689 = vmatprep.subr.bf16.mxu1 %v6123_v32  ;;  %v6169_v37 = vld [vmem:[#allocation5 + $0x310] sm:$0xff]  ;;  %v6171_v32 = vld [vmem:[#allocation5 + $0x320] sm:$0xff] }
 0xacb   :  { %6518 = vmatpush1.bf16.msra.mxu0 %v6120_v18  ;;  %6690 = vmatpush1.bf16.msra.mxu1 %v6122_v60  ;;  %v6177_v18 = vld [vmem:[#allocation5 + $0x350] sm:$0xff]  ;;  %v6179_v60 = vld [vmem:[#allocation5 + $0x360] sm:$0xff] }
 0xacc   :  { %6519 = vmatprep.subr.bf16.mxu0 %v6128_v22  ;;  %6691 = vmatprep.subr.bf16.mxu1 %v6130_v54  ;;  %v6176_v22 = vld [vmem:[#allocation5 + $0x348] sm:$0xff]  ;;  %v6178_v54 = vld [vmem:[#allocation5 + $0x358] sm:$0xff] }
 0xacf   :  { %6520 = vmatpush1.bf16.msra.mxu0 %v6127_v8  ;;  %6692 = vmatpush1.bf16.msra.mxu1 %v6129_v46  ;;  %v6184_v8 = vld [vmem:[#allocation5 + $0x388] sm:$0xff]  ;;  %v6186_v46 = vld [vmem:[#allocation5 + $0x398] sm:$0xff] }
 0xad0   :  { %6521 = vmatprep.subr.bf16.mxu0 %v6135_v55  ;;  %6693 = vmatprep.subr.bf16.mxu1 %v6137_v7  ;;  %v9362_v55 = vpack.c.bf16 %v6055_v44, %v6048_v33  ;;  %v6183_v7 = vld [vmem:[#allocation5 + $0x380] sm:$0xff]  ;;  %v6192_v33 = vld [vmem:[#allocation5 + $0x3c8] sm:$0xff] }
 0xad1   :  { %v6200_v44 = vld [vmem:[#allocation5 + $0x408] sm:$0xff] }
 0xad3   :  { %6522 = vmatpush1.bf16.msra.mxu0 %v6134_v58  ;;  %6694 = vmatpush1.bf16.msra.mxu1 %v6136_v38  ;;  %v6185_v58 = vld [vmem:[#allocation5 + $0x390] sm:$0xff]  ;;  %v6191_v38 = vld [vmem:[#allocation5 + $0x3c0] sm:$0xff] }
 0xad4   :  { %6523 = vmatprep.subr.bf16.mxu0 %v6142_v26  ;;  %6695 = vmatprep.subr.bf16.mxu1 %v6144_v52  ;;  %v6193_v26 = vld [vmem:[#allocation5 + $0x3d0] sm:$0xff]  ;;  %v9368_v52 = vpack.c.bf16 %v6058_v62, %v6051_v63  ;;  %v6199_v63 = vld [vmem:[#allocation5 + $0x400] sm:$0xff] }
 0xad5   :  { %v6207_v62 = vld [vmem:[#allocation5 + $0x440] sm:$0xff] }
 0xad7   :  { %6524 = vmatpush1.bf16.msra.mxu0 %v6141_v45  ;;  %6696 = vmatpush1.bf16.msra.mxu1 %v6143_v21  ;;  %v6204_v45 = vld [vmem:[#allocation5 + $0x428] sm:$0xff]  ;;  %v6206_v21 = vld [vmem:[#allocation5 + $0x438] sm:$0xff] }
 0xad8   :  { %6525 = vmatprep.subr.bf16.mxu0 %v6149_v13  ;;  %6697 = vmatprep.subr.bf16.mxu1 %v6151_v39  ;;  %v6212_v13 = vld [vmem:[#allocation5 + $0x468] sm:$0xff]  ;;  %v6214_v39 = vld [vmem:[#allocation5 + $0x478] sm:$0xff] }
 0xadb   :  { %6526 = vmatpush1.bf16.msra.mxu0 %v6148_v19  ;;  %6698 = vmatpush1.bf16.msra.mxu1 %v6150_v6  ;;  %v6211_v19 = vld [vmem:[#allocation5 + $0x460] sm:$0xff]  ;;  %v6213_v6 = vld [vmem:[#allocation5 + $0x470] sm:$0xff] }
 0xadc   :  { %6527 = vmatprep.subr.bf16.mxu0 %v6156_v3  ;;  %6699 = vmatprep.subr.bf16.mxu1 %v6158_v28  ;;  %v6219_v3 = vld [vmem:[#allocation5 + $0x4a0] sm:$0xff]  ;;  %v6221_v28 = vld [vmem:[#allocation5 + $0x4b0] sm:$0xff] }
 0xadf   :  { %6528 = vmatpush1.bf16.msra.mxu0 %v6155_v11  ;;  %6700 = vmatpush1.bf16.msra.mxu1 %v6157_v27  ;;  %v6218_v11 = vld [vmem:[#allocation5 + $0x498] sm:$0xff]  ;;  %v6220_v27 = vld [vmem:[#allocation5 + $0x4a8] sm:$0xff] }
 0xae0   :  { %6529 = vmatprep.subr.bf16.mxu0 %v6163_v30  ;;  %6701 = vmatprep.subr.bf16.mxu1 %v6165_v49  ;;  %v6226_v30 = vld [vmem:[#allocation5 + $0x4d8] sm:$0xff]  ;;  %v6228_v49 = vld [vmem:[#allocation5 + $0x4e8] sm:$0xff] }
 0xae3   :  { %6530 = vmatpush1.bf16.msra.mxu0 %v6162_v47  ;;  %6702 = vmatpush1.bf16.msra.mxu1 %v6164_v4  ;;  %v6225_v47 = vld [vmem:[#allocation5 + $0x4d0] sm:$0xff]  ;;  %v6227_v4 = vld [vmem:[#allocation5 + $0x4e0] sm:$0xff] }
 0xae4   :  { %6531 = vmatprep.subr.bf16.mxu0 %v6170_v17  ;;  %6703 = vmatprep.subr.bf16.mxu1 %v6172_v10  ;;  %v6233_v17 = vld [vmem:[#allocation5 + $0x510] sm:$0xff]  ;;  %v6235_v10 = vld [vmem:[#allocation5 + $0x520] sm:$0xff] }
 0xae7   :  { %6532 = vmatpush1.bf16.msra.mxu0 %v6169_v37  ;;  %6704 = vmatpush1.bf16.msra.mxu1 %v6171_v32  ;;  %v6232_v37 = vld [vmem:[#allocation5 + $0x508] sm:$0xff]  ;;  %v6234_v32 = vld [vmem:[#allocation5 + $0x518] sm:$0xff] }
 0xae8   :  { %6533 = vmatprep.subr.bf16.mxu0 %v6177_v18  ;;  %6705 = vmatprep.subr.bf16.mxu1 %v6179_v60  ;;  %v6240_v18 = vld [vmem:[#allocation5 + $0x548] sm:$0xff]  ;;  %v6242_v60 = vld [vmem:[#allocation5 + $0x558] sm:$0xff] }
 0xaeb   :  { %6534 = vmatpush1.bf16.msra.mxu0 %v6176_v22  ;;  %6706 = vmatpush1.bf16.msra.mxu1 %v6178_v54  ;;  %v6239_v22 = vld [vmem:[#allocation5 + $0x540] sm:$0xff]  ;;  %v6241_v54 = vld [vmem:[#allocation5 + $0x550] sm:$0xff] }
 0xaec   :  { %6546 = vmatprep.subr.bf16.mxu0 %v6184_v8  ;;  %6718 = vmatprep.subr.bf16.mxu1 %v6186_v46  ;;  %v6247_v8 = vld [vmem:[#allocation5 + $0x580] sm:$0xff]  ;;  %v6249_v46 = vld [vmem:[#allocation5 + $0x590] sm:$0xff] }
 0xaee   :  { %6536 = vmatmul.mubr.bf16.vlgmr.msra.gmra.mrb[48].mxu0 %v9362_v55  ;;  %6708 = vmatmul.mubr.bf16.vlgmr.msra.gmra.mrb[52].mxu1 %v9362_v55 }
 0xaef   :  { %6547 = vmatpush1.bf16.msra.mxu0 %v6183_v7  ;;  %6719 = vmatpush1.bf16.msra.mxu1 %v6185_v58  ;;  %v6246_v7 = vld [vmem:[#allocation5 + $0x578] sm:$0xff]  ;;  %v6248_v58 = vld [vmem:[#allocation5 + $0x588] sm:$0xff] }
 0xaf0   :  { %6548 = vmatprep.subr.bf16.mxu0 %v6191_v38  ;;  %6720 = vmatprep.subr.bf16.mxu1 %v6193_v26  ;;  %v6254_v38 = vld [vmem:[#allocation5 + $0x5b8] sm:$0xff]  ;;  %v6256_v26 = vld [vmem:[#allocation5 + $0x5c8] sm:$0xff] }
 0xaf1   :  { %6578 = vmatprep.mubr.bf16.mxu0 %v9368_v52  ;;  %6750 = vmatprep.mubr.bf16.mxu1 %v9368_v52 }
 0xaf3   :  { %6549 = vmatpush1.bf16.msra.mxu0 %v6190_v24  ;;  %6721 = vmatpush1.bf16.msra.mxu1 %v6192_v33  ;;  %v6253_v24 = vld [vmem:[#allocation5 + $0x5b0] sm:$0xff]  ;;  %v6255_v33 = vld [vmem:[#allocation5 + $0x5c0] sm:$0xff] }
 0xaf4   :  { %6550 = vmatprep.subr.bf16.mxu0 %v6198_v25  ;;  %6722 = vmatprep.subr.bf16.mxu1 %v6200_v44  ;;  %v6261_v25 = vld [vmem:[#allocation5 + $0x5f0] sm:$0xff]  ;;  %v6263_v44 = vld [vmem:[#allocation5 + $0x600] sm:$0xff] }
 0xaf7   :  { %6551 = vmatpush1.bf16.msra.mxu0 %v6197_v23  ;;  %6723 = vmatpush1.bf16.msra.mxu1 %v6199_v63  ;;  %v6260_v23 = vld [vmem:[#allocation5 + $0x5e8] sm:$0xff]  ;;  %v6262_v63 = vld [vmem:[#allocation5 + $0x5f8] sm:$0xff] }
 0xaf8   :  { %6552 = vmatprep.subr.bf16.mxu0 %v6205_v43  ;;  %6724 = vmatprep.subr.bf16.mxu1 %v6207_v62  ;;  %v6268_v43 = vld [vmem:[#allocation5 + $0x628] sm:$0xff]  ;;  %v6270_v62 = vld [vmem:[#allocation5 + $0x638] sm:$0xff] }
 0xafb   :  { %6553 = vmatpush1.bf16.msra.mxu0 %v6204_v45  ;;  %6725 = vmatpush1.bf16.msra.mxu1 %v6206_v21  ;;  %v6267_v45 = vld [vmem:[#allocation5 + $0x620] sm:$0xff]  ;;  %v6269_v21 = vld [vmem:[#allocation5 + $0x630] sm:$0xff] }
 0xafc   :  { %6554 = vmatprep.subr.bf16.mxu0 %v6212_v13  ;;  %6726 = vmatprep.subr.bf16.mxu1 %v6214_v39  ;;  %v6275_v13 = vld [vmem:[#allocation5 + $0x660] sm:$0xff]  ;;  %v6277_v39 = vld [vmem:[#allocation5 + $0x670] sm:$0xff] }
 0xaff   :  { %6555 = vmatpush1.bf16.msra.mxu0 %v6211_v19  ;;  %6727 = vmatpush1.bf16.msra.mxu1 %v6213_v6  ;;  %v6274_v19 = vld [vmem:[#allocation5 + $0x658] sm:$0xff]  ;;  %v6276_v6 = vld [vmem:[#allocation5 + $0x668] sm:$0xff] }
 0xb00   :  { %6556 = vmatprep.subr.bf16.mxu0 %v6219_v3  ;;  %6728 = vmatprep.subr.bf16.mxu1 %v6221_v28  ;;  %v6282_v3 = vld [vmem:[#allocation5 + $0x698] sm:$0xff]  ;;  %v6284_v28 = vld [vmem:[#allocation5 + $0x6a8] sm:$0xff] }
 0xb03   :  { %6557 = vmatpush1.bf16.msra.mxu0 %v6218_v11  ;;  %6729 = vmatpush1.bf16.msra.mxu1 %v6220_v27  ;;  %v6281_v11 = vld [vmem:[#allocation5 + $0x690] sm:$0xff]  ;;  %v6283_v27 = vld [vmem:[#allocation5 + $0x6a0] sm:$0xff] }
 0xb04   :  { %6558 = vmatprep.subr.bf16.mxu0 %v6226_v30  ;;  %6730 = vmatprep.subr.bf16.mxu1 %v6228_v49  ;;  %v6289_v30 = vld [vmem:[#allocation5 + $0x6d0] sm:$0xff]  ;;  %v6291_v49 = vld [vmem:[#allocation5 + $0x6e0] sm:$0xff] }
 0xb07   :  { %6559 = vmatpush1.bf16.msra.mxu0 %v6225_v47  ;;  %6731 = vmatpush1.bf16.msra.mxu1 %v6227_v4  ;;  %v6288_v47 = vld [vmem:[#allocation5 + $0x6c8] sm:$0xff]  ;;  %v6290_v4 = vld [vmem:[#allocation5 + $0x6d8] sm:$0xff] }
 0xb08   :  { %6560 = vmatprep.subr.bf16.mxu0 %v6233_v17  ;;  %6732 = vmatprep.subr.bf16.mxu1 %v6235_v10  ;;  %v6296_v17 = vld [vmem:[#allocation5 + $0x708] sm:$0xff]  ;;  %v6298_v10 = vld [vmem:[#allocation5 + $0x718] sm:$0xff] }
 0xb0b   :  { %6561 = vmatpush1.bf16.msra.mxu0 %v6232_v37  ;;  %6733 = vmatpush1.bf16.msra.mxu1 %v6234_v32  ;;  %v9378_v37 = vpack.c.bf16 %v6057_v36, %v6050_v35  ;;  %v6295_v32 = vld [vmem:[#allocation5 + $0x700] sm:$0xff]  ;;  %v6304_v35 = vld [vmem:[#allocation5 + $0x748] sm:$0xff] }
 0xb0c   :  { %6562 = vmatprep.subr.bf16.mxu0 %v6240_v18  ;;  %6734 = vmatprep.subr.bf16.mxu1 %v6242_v60  ;;  %v6297_v18 = vld [vmem:[#allocation5 + $0x710] sm:$0xff]  ;;  %v6303_v60 = vld [vmem:[#allocation5 + $0x740] sm:$0xff]  ;;  %v6312_v36 = vld [vmem:[#allocation5 + $0x788] sm:$0xff] }
 0xb0f   :  { %6563 = vmatpush1.bf16.msra.mxu0 %v6239_v22  ;;  %6735 = vmatpush1.bf16.msra.mxu1 %v6241_v54  ;;  %v6305_v22 = vld [vmem:[#allocation5 + $0x750] sm:$0xff]  ;;  %v9384_v54 = vpack.c.bf16 %v6060_v59, %v6053_v34  ;;  %v6311_v34 = vld [vmem:[#allocation5 + $0x780] sm:$0xff] }
 0xb10   :  { %6564 = vmatprep.subr.bf16.mxu0 %v6247_v8  ;;  %6736 = vmatprep.subr.bf16.mxu1 %v6249_v46  ;;  %v6319_v59 = vld [vmem:[#allocation5 + $0x7c0] sm:$0xff]  ;;  %v6316_v8 = vld [vmem:[#allocation5 + $0x7a8] sm:$0xff]  ;;  %v6318_v46 = vld [vmem:[#allocation5 + $0x7b8] sm:$0xff] }
 0xb13   :  { %6565 = vmatpush1.bf16.msra.mxu0 %v6246_v7  ;;  %6737 = vmatpush1.bf16.msra.mxu1 %v6248_v58  ;;  %v6324_v7 = vld [vmem:[#allocation5 + $0x7e8] sm:$0xff]  ;;  %v6326_v58 = vld [vmem:[#allocation5 + $0x7f8] sm:$0xff] }
 0xb14   :  { %6566 = vmatprep.subr.bf16.mxu0 %v6254_v38  ;;  %6738 = vmatprep.subr.bf16.mxu1 %v6256_v26  ;;  %v6323_v38 = vld [vmem:[#allocation5 + $0x7e0] sm:$0xff]  ;;  %v6325_v26 = vld [vmem:[#allocation5 + $0x7f0] sm:$0xff] }
 0xb17   :  { %6567 = vmatpush1.bf16.msra.mxu0 %v6253_v24  ;;  %6739 = vmatpush1.bf16.msra.mxu1 %v6255_v33  ;;  %v6331_v24 = vld [vmem:[#allocation5 + $0x820] sm:$0xff]  ;;  %v6333_v33 = vld [vmem:[#allocation5 + $0x830] sm:$0xff] }
 0xb18   :  { %6568 = vmatprep.subr.bf16.mxu0 %v6261_v25  ;;  %6740 = vmatprep.subr.bf16.mxu1 %v6263_v44  ;;  %v6330_v25 = vld [vmem:[#allocation5 + $0x818] sm:$0xff]  ;;  %v6332_v44 = vld [vmem:[#allocation5 + $0x828] sm:$0xff] }
 0xb1b   :  { %6569 = vmatpush1.bf16.msra.mxu0 %v6260_v23  ;;  %6741 = vmatpush1.bf16.msra.mxu1 %v6262_v63  ;;  %v6338_v23 = vld [vmem:[#allocation5 + $0x858] sm:$0xff]  ;;  %v6340_v63 = vld [vmem:[#allocation5 + $0x868] sm:$0xff] }
 0xb1c   :  { %6570 = vmatprep.subr.bf16.mxu0 %v6268_v43  ;;  %6742 = vmatprep.subr.bf16.mxu1 %v6270_v62  ;;  %v6337_v43 = vld [vmem:[#allocation5 + $0x850] sm:$0xff]  ;;  %v6339_v62 = vld [vmem:[#allocation5 + $0x860] sm:$0xff] }
 0xb1f   :  { %6571 = vmatpush1.bf16.msra.mxu0 %v6267_v45  ;;  %6743 = vmatpush1.bf16.msra.mxu1 %v6269_v21  ;;  %v6345_v45 = vld [vmem:[#allocation5 + $0x890] sm:$0xff]  ;;  %v6347_v21 = vld [vmem:[#allocation5 + $0x8a0] sm:$0xff] }
 0xb20   :  { %6572 = vmatprep.subr.bf16.mxu0 %v6275_v13  ;;  %6744 = vmatprep.subr.bf16.mxu1 %v6277_v39  ;;  %v6344_v13 = vld [vmem:[#allocation5 + $0x888] sm:$0xff]  ;;  %v6346_v39 = vld [vmem:[#allocation5 + $0x898] sm:$0xff] }
 0xb23   :  { %6573 = vmatpush1.bf16.msra.mxu0 %v6274_v19  ;;  %6745 = vmatpush1.bf16.msra.mxu1 %v6276_v6  ;;  %v6352_v19 = vld [vmem:[#allocation5 + $0x8c8] sm:$0xff]  ;;  %v6354_v6 = vld [vmem:[#allocation5 + $0x8d8] sm:$0xff] }
 0xb24   :  { %6574 = vmatprep.subr.bf16.mxu0 %v6282_v3  ;;  %6746 = vmatprep.subr.bf16.mxu1 %v6284_v28  ;;  %v6351_v3 = vld [vmem:[#allocation5 + $0x8c0] sm:$0xff]  ;;  %v6353_v28 = vld [vmem:[#allocation5 + $0x8d0] sm:$0xff] }
 0xb27   :  { %6575 = vmatpush1.bf16.msra.mxu0 %v6281_v11  ;;  %6747 = vmatpush1.bf16.msra.mxu1 %v6283_v27  ;;  %v6359_v11 = vld [vmem:[#allocation5 + $0x900] sm:$0xff]  ;;  %v6361_v27 = vld [vmem:[#allocation5 + $0x910] sm:$0xff] }
 0xb28   :  { %6576 = vmatprep.subr.bf16.mxu0 %v6289_v30  ;;  %6748 = vmatprep.subr.bf16.mxu1 %v6291_v49  ;;  %v6358_v30 = vld [vmem:[#allocation5 + $0x8f8] sm:$0xff]  ;;  %v6360_v49 = vld [vmem:[#allocation5 + $0x908] sm:$0xff] }
 0xb2b   :  { %6577 = vmatpush1.bf16.msra.mxu0 %v6288_v47  ;;  %6749 = vmatpush1.bf16.msra.mxu1 %v6290_v4  ;;  %v6366_v47 = vld [vmem:[#allocation5 + $0x938] sm:$0xff]  ;;  %v6368_v4 = vld [vmem:[#allocation5 + $0x948] sm:$0xff] }
 0xb2c   :  { %6589 = vmatprep.subr.bf16.mxu0 %v6296_v17  ;;  %6761 = vmatprep.subr.bf16.mxu1 %v6298_v10  ;;  %v6365_v17 = vld [vmem:[#allocation5 + $0x930] sm:$0xff]  ;;  %v6367_v10 = vld [vmem:[#allocation5 + $0x940] sm:$0xff] }
 0xb2e   :  { %6579 = vmatmul.mubr.bf16.vlgmr.msra.gmra.mrb[48].mxu0 %v9378_v37  ;;  %6751 = vmatmul.mubr.bf16.vlgmr.msra.gmra.mrb[52].mxu1 %v9378_v37 }
 0xb2f   :  { %6590 = vmatpush1.bf16.msra.mxu0 %v6295_v32  ;;  %6762 = vmatpush1.bf16.msra.mxu1 %v6297_v18  ;;  %v6373_v32 = vld [vmem:[#allocation5 + $0x970] sm:$0xff]  ;;  %v6375_v18 = vld [vmem:[#allocation5 + $0x980] sm:$0xff] }
 0xb30   :  { %6591 = vmatprep.subr.bf16.mxu0 %v6303_v60  ;;  %6763 = vmatprep.subr.bf16.mxu1 %v6305_v22  ;;  %v6372_v60 = vld [vmem:[#allocation5 + $0x968] sm:$0xff]  ;;  %v6374_v22 = vld [vmem:[#allocation5 + $0x978] sm:$0xff] }
 0xb31   :  { %6621 = vmatprep.mubr.bf16.mxu0 %v9384_v54  ;;  %6793 = vmatprep.mubr.bf16.mxu1 %v9384_v54 }
 0xb33   :  { %6592 = vmatpush1.bf16.msra.mxu0 %v6302_v14  ;;  %6764 = vmatpush1.bf16.msra.mxu1 %v6304_v35  ;;  %v6380_v14 = vld [vmem:[#allocation5 + $0x9a8] sm:$0xff]  ;;  %v6382_v35 = vld [vmem:[#allocation5 + $0x9b8] sm:$0xff] }
 0xb34   :  { %6593 = vmatprep.subr.bf16.mxu0 %v6310_v1  ;;  %6765 = vmatprep.subr.bf16.mxu1 %v6312_v36  ;;  %v6379_v1 = vld [vmem:[#allocation5 + $0x9a0] sm:$0xff]  ;;  %v6381_v36 = vld [vmem:[#allocation5 + $0x9b0] sm:$0xff] }
 0xb37   :  { %6594 = vmatpush1.bf16.msra.mxu0 %v6309_v56  ;;  %6766 = vmatpush1.bf16.msra.mxu1 %v6311_v34  ;;  %v6387_v56 = vld [vmem:[#allocation5 + $0x9e0] sm:$0xff]  ;;  %v6389_v34 = vld [vmem:[#allocation5 + $0x9f0] sm:$0xff] }
 0xb38   :  { %6595 = vmatprep.subr.bf16.mxu0 %v6317_v20  ;;  %6767 = vmatprep.subr.bf16.mxu1 %v6319_v59  ;;  %v6386_v20 = vld [vmem:[#allocation5 + $0x9d8] sm:$0xff]  ;;  %v6388_v59 = vld [vmem:[#allocation5 + $0x9e8] sm:$0xff] }
 0xb3b   :  { %6596 = vmatpush1.bf16.msra.mxu0 %v6316_v8  ;;  %6768 = vmatpush1.bf16.msra.mxu1 %v6318_v46  ;;  %v6394_v8 = vld [vmem:[#allocation5 + $0xa18] sm:$0xff]  ;;  %v6396_v46 = vld [vmem:[#allocation5 + $0xa28] sm:$0xff] }
 0xb3c   :  { %6597 = vmatprep.subr.bf16.mxu0 %v6324_v7  ;;  %6769 = vmatprep.subr.bf16.mxu1 %v6326_v58  ;;  %v6393_v7 = vld [vmem:[#allocation5 + $0xa10] sm:$0xff]  ;;  %v6395_v58 = vld [vmem:[#allocation5 + $0xa20] sm:$0xff] }
 0xb3f   :  { %6598 = vmatpush1.bf16.msra.mxu0 %v6323_v38  ;;  %6770 = vmatpush1.bf16.msra.mxu1 %v6325_v26  ;;  %v6401_v38 = vld [vmem:[#allocation5 + $0xa50] sm:$0xff]  ;;  %v6403_v26 = vld [vmem:[#allocation5 + $0xa60] sm:$0xff] }
 0xb40   :  { %6599 = vmatprep.subr.bf16.mxu0 %v6331_v24  ;;  %6771 = vmatprep.subr.bf16.mxu1 %v6333_v33  ;;  %v6400_v24 = vld [vmem:[#allocation5 + $0xa48] sm:$0xff]  ;;  %v6402_v33 = vld [vmem:[#allocation5 + $0xa58] sm:$0xff] }
 0xb43   :  { %6600 = vmatpush1.bf16.msra.mxu0 %v6330_v25  ;;  %6772 = vmatpush1.bf16.msra.mxu1 %v6332_v44  ;;  %v6408_v25 = vld [vmem:[#allocation5 + $0xa88] sm:$0xff]  ;;  %v6410_v44 = vld [vmem:[#allocation5 + $0xa98] sm:$0xff] }
 0xb44   :  { %6601 = vmatprep.subr.bf16.mxu0 %v6338_v23  ;;  %6773 = vmatprep.subr.bf16.mxu1 %v6340_v63  ;;  %v9394_v23 = vpack.c.bf16 %v6059_v12, %v6052_v9  ;;  %v6407_v63 = vld [vmem:[#allocation5 + $0xa80] sm:$0xff]  ;;  %v6422_v9 = vld [vmem:[#allocation5 + $0xaf8] sm:$0xff]  ;;  %v6424_v12 = vld [vmem:[#allocation5 + $0xb08] sm:$0xff] }
 0xb47   :  { %6602 = vmatpush1.bf16.msra.mxu0 %v6337_v43  ;;  %6774 = vmatpush1.bf16.msra.mxu1 %v6339_v62  ;;  %v6409_v43 = vld [vmem:[#allocation5 + $0xa90] sm:$0xff]  ;;  %v6415_v62 = vld [vmem:[#allocation5 + $0xac0] sm:$0xff] }
 0xb48   :  { %6603 = vmatprep.subr.bf16.mxu0 %v6345_v45  ;;  %6775 = vmatprep.subr.bf16.mxu1 %v6347_v21  ;;  %v6417_v45 = vld [vmem:[#allocation5 + $0xad0] sm:$0xff] }
 0xb49   :  { %v6421_v21 = vld [vmem:[#allocation5 + $0xaf0] sm:$0xff] }
 0xb4b   :  { %6604 = vmatpush1.bf16.msra.mxu0 %v6344_v13  ;;  %6776 = vmatpush1.bf16.msra.mxu1 %v6346_v39  ;;  %v6423_v13 = vld [vmem:[#allocation5 + $0xb00] sm:$0xff]  ;;  %v6429_v39 = vld [vmem:[#allocation5 + $0xb30] sm:$0xff] }
 0xb4c   :  { %6605 = vmatprep.subr.bf16.mxu0 %v6352_v19  ;;  %6777 = vmatprep.subr.bf16.mxu1 %v6354_v6  ;;  %v6431_v19 = vld [vmem:[#allocation5 + $0xb40] sm:$0xff]  ;;  %v6428_v6 = vld [vmem:[#allocation5 + $0xb28] sm:$0xff] }
 0xb4f   :  { %6606 = vmatpush1.bf16.msra.mxu0 %v6351_v3  ;;  %6778 = vmatpush1.bf16.msra.mxu1 %v6353_v28  ;;  %v6430_v3 = vld [vmem:[#allocation5 + $0xb38] sm:$0xff]  ;;  %v6436_v28 = vld [vmem:[#allocation5 + $0xb68] sm:$0xff] }
 0xb50   :  { %6607 = vmatprep.subr.bf16.mxu0 %v6359_v11  ;;  %6779 = vmatprep.subr.bf16.mxu1 %v6361_v27  ;;  %v6438_v11 = vld [vmem:[#allocation5 + $0xb78] sm:$0xff]  ;;  %v6435_v27 = vld [vmem:[#allocation5 + $0xb60] sm:$0xff] }
 0xb53   :  { %6608 = vmatpush1.bf16.msra.mxu0 %v6358_v30  ;;  %6780 = vmatpush1.bf16.msra.mxu1 %v6360_v49  ;;  %v6437_v30 = vld [vmem:[#allocation5 + $0xb70] sm:$0xff]  ;;  %v6443_v49 = vld [vmem:[#allocation5 + $0xba0] sm:$0xff] }
 0xb54   :  { %6609 = vmatprep.subr.bf16.mxu0 %v6366_v47  ;;  %6781 = vmatprep.subr.bf16.mxu1 %v6368_v4  ;;  %v6445_v47 = vld [vmem:[#allocation5 + $0xbb0] sm:$0xff]  ;;  %v6442_v4 = vld [vmem:[#allocation5 + $0xb98] sm:$0xff] }
 0xb57   :  { %6610 = vmatpush1.bf16.msra.mxu0 %v6365_v17  ;;  %6782 = vmatpush1.bf16.msra.mxu1 %v6367_v10  ;;  %v6444_v17 = vld [vmem:[#allocation5 + $0xba8] sm:$0xff]  ;;  %v6450_v10 = vld [vmem:[#allocation5 + $0xbd8] sm:$0xff] }
 0xb58   :  { %6611 = vmatprep.subr.bf16.mxu0 %v6373_v32  ;;  %6783 = vmatprep.subr.bf16.mxu1 %v6375_v18  ;;  %v6452_v32 = vld [vmem:[#allocation5 + $0xbe8] sm:$0xff]  ;;  %v6449_v18 = vld [vmem:[#allocation5 + $0xbd0] sm:$0xff] }
 0xb5b   :  { %6612 = vmatpush1.bf16.msra.mxu0 %v6372_v60  ;;  %6784 = vmatpush1.bf16.msra.mxu1 %v6374_v22  ;;  %v6451_v60 = vld [vmem:[#allocation5 + $0xbe0] sm:$0xff]  ;;  %v6457_v22 = vld [vmem:[#allocation5 + $0xc10] sm:$0xff] }
 0xb5c   :  { %6613 = vmatprep.subr.bf16.mxu0 %v6380_v14  ;;  %6785 = vmatprep.subr.bf16.mxu1 %v6382_v35  ;;  %v6459_v14 = vld [vmem:[#allocation5 + $0xc20] sm:$0xff]  ;;  %v6456_v35 = vld [vmem:[#allocation5 + $0xc08] sm:$0xff] }
 0xb5f   :  { %6614 = vmatpush1.bf16.msra.mxu0 %v6379_v1  ;;  %6786 = vmatpush1.bf16.msra.mxu1 %v6381_v36  ;;  %v6458_v1 = vld [vmem:[#allocation5 + $0xc18] sm:$0xff]  ;;  %v6076_v36 = vld [vmem:[#allocation5 + $0x28] sm:$0xff] }
 0xb60   :  { %6615 = vmatprep.subr.bf16.mxu0 %v6387_v56  ;;  %6787 = vmatprep.subr.bf16.mxu1 %v6389_v34  ;;  %v6133_v56 = vld [vmem:[#allocation5 + $0x1f0] sm:$0xff]  ;;  %v9404_v34 = vpack.c.bf16 %v6061_v15, %v6054_v48  ;;  %v6090_v48 = vld [vmem:[#allocation5 + $0x98] sm:$0xff]  ;;  %v6147_v15 = vld [vmem:[#allocation5 + $0x260] sm:$0xff] }
 0xb63   :  { %6616 = vmatpush1.bf16.msra.mxu0 %v6386_v20  ;;  %6788 = vmatpush1.bf16.msra.mxu1 %v6388_v59  ;;  %v6075_v20 = vld [vmem:[#allocation5 + $0x20] sm:$0xff]  ;;  %v6077_v59 = vld [vmem:[#allocation5 + $0x30] sm:$0xff] }
 0xb64   :  { %6617 = vmatprep.subr.bf16.mxu0 %v6394_v8  ;;  %6789 = vmatprep.subr.bf16.mxu1 %v6396_v46  ;;  %v6083_v8 = vld [vmem:[#allocation5 + $0x60] sm:$0xff]  ;;  %v6140_v46 = vld [vmem:[#allocation5 + $0x228] sm:$0xff] }
 0xb67   :  { %6618 = vmatpush1.bf16.msra.mxu0 %v6393_v7  ;;  %6790 = vmatpush1.bf16.msra.mxu1 %v6395_v58  ;;  %v6089_v7 = vld [vmem:[#allocation5 + $0x90] sm:$0xff]  ;;  %v6091_v58 = vld [vmem:[#allocation5 + $0xa0] sm:$0xff] }
 0xb68   :  { %6619 = vmatprep.subr.bf16.mxu0 %v6401_v38  ;;  %6791 = vmatprep.subr.bf16.mxu1 %v6403_v26  ;;  %v6097_v38 = vld [vmem:[#allocation5 + $0xd0] sm:$0xff]  ;;  %v6154_v26 = vld [vmem:[#allocation5 + $0x298] sm:$0xff] }
 0xb6b   :  { %6620 = vmatpush1.bf16.msra.mxu0 %v6400_v24  ;;  %6792 = vmatpush1.bf16.msra.mxu1 %v6402_v33  ;;  %v6096_v24 = vld [vmem:[#allocation5 + $0xc8] sm:$0xff]  ;;  %v6098_v33 = vld [vmem:[#allocation5 + $0xd8] sm:$0xff] }
 0xb6c   :  { %6632 = vmatprep.subr.bf16.mxu0 %v6408_v25  ;;  %6804 = vmatprep.subr.bf16.mxu1 %v6410_v44  ;;  %v6104_v25 = vld [vmem:[#allocation5 + $0x108] sm:$0xff]  ;;  %v6161_v44 = vld [vmem:[#allocation5 + $0x2d0] sm:$0xff] }
 0xb6e   :  { %6622 = vmatmul.mubr.bf16.vlgmr.msra.gmra.mrb[48].mxu0 %v9394_v23  ;;  %6794 = vmatmul.mubr.bf16.vlgmr.msra.gmra.mrb[52].mxu1 %v9394_v23 }
 0xb6f   :  { %6633 = vmatpush1.bf16.msra.mxu0 %v6407_v63  ;;  %6805 = vmatpush1.bf16.msra.mxu1 %v6409_v43  ;;  %v6105_v63 = vld [vmem:[#allocation5 + $0x110] sm:$0xff]  ;;  %v6111_v43 = vld [vmem:[#allocation5 + $0x140] sm:$0xff] }
 0xb70   :  { %6634 = vmatprep.subr.bf16.mxu0 %v6415_v62  ;;  %6806 = vmatprep.subr.bf16.mxu1 %v6417_v45  ;;  %v6168_v62 = vld [vmem:[#allocation5 + $0x308] sm:$0xff]  ;;  %v6110_v45 = vld [vmem:[#allocation5 + $0x138] sm:$0xff] }
 0xb71   :  { %6664 = vmatprep.mubr.bf16.mxu0 %v8087_v0  ;;  %6836 = vmatprep.mubr.bf16.mxu1 %v8087_v0 }
 0xb73   :  { %6635 = vmatpush1.bf16.msra.mxu0 %v6414_v31  ;;  %6807 = vmatpush1.bf16.msra.mxu1 %v6416_v29  ;;  %v6112_v31 = vld [vmem:[#allocation5 + $0x148] sm:$0xff]  ;;  %v6118_v29 = vld [vmem:[#allocation5 + $0x178] sm:$0xff] }
 0xb74   :  { %6636 = vmatprep.subr.bf16.mxu0 %v6422_v9  ;;  %6808 = vmatprep.subr.bf16.mxu1 %v6424_v12  ;;  %v6175_v9 = vld [vmem:[#allocation5 + $0x340] sm:$0xff]  ;;  %v6117_v12 = vld [vmem:[#allocation5 + $0x170] sm:$0xff] }
 0xb77   :  { %6637 = vmatpush1.bf16.msra.mxu0 %v6421_v21  ;;  %6809 = vmatpush1.bf16.msra.mxu1 %v6423_v13  ;;  %v6119_v21 = vld [vmem:[#allocation5 + $0x180] sm:$0xff]  ;;  %v6125_v13 = vld [vmem:[#allocation5 + $0x1b0] sm:$0xff] }
 0xb78   :  { %6638 = vmatprep.subr.bf16.mxu0 %v6429_v39  ;;  %6810 = vmatprep.subr.bf16.mxu1 %v6431_v19  ;;  %v6182_v39 = vld [vmem:[#allocation5 + $0x378] sm:$0xff]  ;;  %v6124_v19 = vld [vmem:[#allocation5 + $0x1a8] sm:$0xff] }
 0xb7b   :  { %6639 = vmatpush1.bf16.msra.mxu0 %v6428_v6  ;;  %6811 = vmatpush1.bf16.msra.mxu1 %v6430_v3  ;;  %v6126_v6 = vld [vmem:[#allocation5 + $0x1b8] sm:$0xff]  ;;  %v6132_v3 = vld [vmem:[#allocation5 + $0x1e8] sm:$0xff] }
 0xb7c   :  { %6640 = vmatprep.subr.bf16.mxu0 %v6436_v28  ;;  %6812 = vmatprep.subr.bf16.mxu1 %v6438_v11  ;;  %v6245_v28 = vld [vmem:[#allocation5 + $0x570] sm:$0xff]  ;;  %v6131_v11 = vld [vmem:[#allocation5 + $0x1e0] sm:$0xff] }
 0xb7f   :  { %6641 = vmatpush1.bf16.msra.mxu0 %v6435_v27  ;;  %6813 = vmatpush1.bf16.msra.mxu1 %v6437_v30  ;;  %v6189_v27 = vld [vmem:[#allocation5 + $0x3b0] sm:$0xff]  ;;  %v6139_v30 = vld [vmem:[#allocation5 + $0x220] sm:$0xff] }
 0xb80   :  { %6642 = vmatprep.subr.bf16.mxu0 %v6443_v49  ;;  %6814 = vmatprep.subr.bf16.mxu1 %v6445_v47  ;;  %v6252_v49 = vld [vmem:[#allocation5 + $0x5a8] sm:$0xff]  ;;  %v6138_v47 = vld [vmem:[#allocation5 + $0x218] sm:$0xff] }
 0xb83   :  { %6643 = vmatpush1.bf16.msra.mxu0 %v6442_v4  ;;  %6815 = vmatpush1.bf16.msra.mxu1 %v6444_v17  ;;  %v6196_v4 = vld [vmem:[#allocation5 + $0x3e8] sm:$0xff]  ;;  %v6146_v17 = vld [vmem:[#allocation5 + $0x258] sm:$0xff] }
 0xb84   :  { %6644 = vmatprep.subr.bf16.mxu0 %v6450_v10  ;;  %6816 = vmatprep.subr.bf16.mxu1 %v6452_v32  ;;  %v6259_v10 = vld [vmem:[#allocation5 + $0x5e0] sm:$0xff]  ;;  %v6145_v32 = vld [vmem:[#allocation5 + $0x250] sm:$0xff] }
 0xb87   :  { %6645 = vmatpush1.bf16.msra.mxu0 %v6449_v18  ;;  %6817 = vmatpush1.bf16.msra.mxu1 %v6451_v60  ;;  %v6203_v18 = vld [vmem:[#allocation5 + $0x420] sm:$0xff]  ;;  %v6153_v60 = vld [vmem:[#allocation5 + $0x290] sm:$0xff] }
 0xb88   :  { %6646 = vmatprep.subr.bf16.mxu0 %v6457_v22  ;;  %6818 = vmatprep.subr.bf16.mxu1 %v6459_v14  ;;  %v6266_v22 = vld [vmem:[#allocation5 + $0x618] sm:$0xff]  ;;  %v6152_v14 = vld [vmem:[#allocation5 + $0x288] sm:$0xff] }
 0xb8b   :  { %6647 = vmatpush1.bf16.msra.mxu0 %v6456_v35  ;;  %6819 = vmatpush1.bf16.msra.mxu1 %v6458_v1  ;;  %v6210_v35 = vld [vmem:[#allocation5 + $0x458] sm:$0xff]  ;;  %v6160_v1 = vld [vmem:[#allocation5 + $0x2c8] sm:$0xff] }
 0xb8c   :  { %6847 = vmatprep.subr.bf16.mxu0 %v6076_v36  ;;  %7512 = vmatprep.subr.bf16.mxu1 %v6133_v56  ;;  %v6273_v36 = vld [vmem:[#allocation5 + $0x650] sm:$0xff]  ;;  %v6159_v56 = vld [vmem:[#allocation5 + $0x2c0] sm:$0xff] }
 0xb8e   :  { %6665 = vmatmul.mubr.bf16.vlgmr.msra.gmra.mrb[48].mxu0 %v9404_v34  ;;  %6837 = vmatmul.mubr.bf16.vlgmr.msra.gmra.mrb[52].mxu1 %v9404_v34 }
 0xb8f   :  { %6848 = vmatpush1.bf16.msra.mxu0 %v6075_v20  ;;  %7513 = vmatpush3.bf16.msra.mxu1 %v6077_v59  ;;  %v6217_v20 = vld [vmem:[#allocation5 + $0x490] sm:$0xff]  ;;  %v6167_v59 = vld [vmem:[#allocation5 + $0x300] sm:$0xff] }
 0xb90   :  { %6849 = vmatprep.subr.bf16.mxu0 %v6083_v8  ;;  %7514 = vmatprep.subr.bf16.mxu1 %v6140_v46  ;;  %v6280_v8 = vld [vmem:[#allocation5 + $0x688] sm:$0xff]  ;;  %v6166_v46 = vld [vmem:[#allocation5 + $0x2f8] sm:$0xff] }
 0xb91   :  { %7051 = vmatprep.mubr.bf16.mxu1 %v9354_v16  ;;  %6879 = vmatprep.mubr.bf16.mxu0 %v9354_v16  ;;  %v6103_v16 = vld [vmem:[#allocation5 + $0x100] sm:$0xff] }
 0xb93   :  { %6850 = vmatpush1.bf16.msra.mxu0 %v6082_v40  ;;  %7515 = vmatpush3.bf16.msra.mxu1 %v6084_v51  ;;  %v6224_v40 = vld [vmem:[#allocation5 + $0x4c8] sm:$0xff]  ;;  %v6174_v51 = vld [vmem:[#allocation5 + $0x338] sm:$0xff] }
 0xb94   :  { %6851 = vmatprep.subr.bf16.mxu0 %v6090_v48  ;;  %7516 = vmatprep.subr.bf16.mxu1 %v6147_v15  ;;  %v6287_v48 = vld [vmem:[#allocation5 + $0x6c0] sm:$0xff]  ;;  %v6173_v15 = vld [vmem:[#allocation5 + $0x330] sm:$0xff] }
 0xb97   :  { %6852 = vmatpush1.bf16.msra.mxu0 %v6089_v7  ;;  %7517 = vmatpush3.bf16.msra.mxu1 %v6091_v58  ;;  %v6231_v7 = vld [vmem:[#allocation5 + $0x500] sm:$0xff]  ;;  %v6181_v58 = vld [vmem:[#allocation5 + $0x370] sm:$0xff] }
 0xb98   :  { %6853 = vmatprep.subr.bf16.mxu0 %v6097_v38  ;;  %7518 = vmatprep.subr.bf16.mxu1 %v6154_v26  ;;  %v6294_v38 = vld [vmem:[#allocation5 + $0x6f8] sm:$0xff]  ;;  %v6180_v26 = vld [vmem:[#allocation5 + $0x368] sm:$0xff] }
 0xb9b   :  { %6854 = vmatpush1.bf16.msra.mxu0 %v6096_v24  ;;  %7519 = vmatpush3.bf16.msra.mxu1 %v6098_v33  ;;  %v6238_v24 = vld [vmem:[#allocation5 + $0x538] sm:$0xff]  ;;  %v6188_v33 = vld [vmem:[#allocation5 + $0x3a8] sm:$0xff] }
 0xb9c   :  { %6855 = vmatprep.subr.bf16.mxu0 %v6104_v25  ;;  %7520 = vmatprep.subr.bf16.mxu1 %v6161_v44  ;;  %v6357_v25 = vld [vmem:[#allocation5 + $0x8f0] sm:$0xff]  ;;  %v6187_v44 = vld [vmem:[#allocation5 + $0x3a0] sm:$0xff] }
 0xb9f   :  { %6856 = vmatpush1.bf16.msra.mxu0 %v6103_v16  ;;  %7521 = vmatpush3.bf16.msra.mxu1 %v6105_v63  ;;  %v6301_v16 = vld [vmem:[#allocation5 + $0x730] sm:$0xff]  ;;  %v6195_v63 = vld [vmem:[#allocation5 + $0x3e0] sm:$0xff] }
 0xba0   :  { %6857 = vmatprep.subr.bf16.mxu0 %v6111_v43  ;;  %7522 = vmatprep.subr.bf16.mxu1 %v6168_v62  ;;  %v6364_v43 = vld [vmem:[#allocation5 + $0x928] sm:$0xff]  ;;  %v6194_v62 = vld [vmem:[#allocation5 + $0x3d8] sm:$0xff] }
 0xba3   :  { %6858 = vmatpush1.bf16.msra.mxu0 %v6110_v45  ;;  %7523 = vmatpush3.bf16.msra.mxu1 %v6112_v31  ;;  %v6308_v45 = vld [vmem:[#allocation5 + $0x768] sm:$0xff]  ;;  %v6202_v31 = vld [vmem:[#allocation5 + $0x418] sm:$0xff] }
 0xba4   :  { %6859 = vmatprep.subr.bf16.mxu0 %v6118_v29  ;;  %7524 = vmatprep.subr.bf16.mxu1 %v6175_v9  ;;  %v6371_v29 = vld [vmem:[#allocation5 + $0x960] sm:$0xff]  ;;  %v6201_v9 = vld [vmem:[#allocation5 + $0x410] sm:$0xff] }
 0xba7   :  { %6860 = vmatpush1.bf16.msra.mxu0 %v6117_v12  ;;  %7525 = vmatpush3.bf16.msra.mxu1 %v6119_v21  ;;  %v6209_v12 = vld [vmem:[#allocation5 + $0x450] sm:$0xff]  ;;  %v6378_v21 = vld [vmem:[#allocation5 + $0x998] sm:$0xff] }
 0xba8   :  { %6861 = vmatprep.subr.bf16.mxu0 %v6125_v13  ;;  %7526 = vmatprep.subr.bf16.mxu1 %v6182_v39  ;;  %v6208_v13 = vld [vmem:[#allocation5 + $0x448] sm:$0xff]  ;;  %v6322_v39 = vld [vmem:[#allocation5 + $0x7d8] sm:$0xff] }
 0xbab   :  { %6862 = vmatpush1.bf16.msra.mxu0 %v6124_v19  ;;  %7527 = vmatpush3.bf16.msra.mxu1 %v6126_v6  ;;  %v6216_v19 = vld [vmem:[#allocation5 + $0x488] sm:$0xff]  ;;  %v6385_v6 = vld [vmem:[#allocation5 + $0x9d0] sm:$0xff] }
 0xbac   :  { %6863 = vmatprep.subr.bf16.mxu0 %v6132_v3  ;;  %7534 = vmatprep.subr.bf16.mxu1 %v6245_v28  ;;  %v6329_v3 = vld [vmem:[#allocation5 + $0x810] sm:$0xff]  ;;  %v6223_v28 = vld [vmem:[#allocation5 + $0x4c0] sm:$0xff] }
 0xbae   :  { %7052 = vmatmul.mubr.bf16.vlgmr.msra.gmra.mrb[56].mxu1 %v9362_v55 }
 0xbaf   :  { %6864 = vmatpush1.bf16.msra.mxu0 %v6131_v11  ;;  %7535 = vmatpush3.bf16.msra.mxu1 %v6189_v27  ;;  %v6392_v11 = vld [vmem:[#allocation5 + $0xa08] sm:$0xff]  ;;  %v6222_v27 = vld [vmem:[#allocation5 + $0x4b8] sm:$0xff] }
 0xbb0   :  { %6865 = vmatprep.subr.bf16.mxu0 %v6139_v30  ;;  %7536 = vmatprep.subr.bf16.mxu1 %v6252_v49  ;;  %v6336_v30 = vld [vmem:[#allocation5 + $0x848] sm:$0xff]  ;;  %v6230_v49 = vld [vmem:[#allocation5 + $0x4f8] sm:$0xff] }
 0xbb1   :  { %7092 = vmatprep.mubr.bf16.mxu1 %v9368_v52 }
 0xbb3   :  { %6866 = vmatpush1.bf16.msra.mxu0 %v6138_v47  ;;  %7537 = vmatpush3.bf16.msra.mxu1 %v6196_v4  ;;  %v6399_v47 = vld [vmem:[#allocation5 + $0xa40] sm:$0xff]  ;;  %v6229_v4 = vld [vmem:[#allocation5 + $0x4f0] sm:$0xff] }
 0xbb4   :  { %6867 = vmatprep.subr.bf16.mxu0 %v6146_v17  ;;  %7538 = vmatprep.subr.bf16.mxu1 %v6259_v10  ;;  %v6343_v17 = vld [vmem:[#allocation5 + $0x880] sm:$0xff]  ;;  %v6237_v10 = vld [vmem:[#allocation5 + $0x530] sm:$0xff] }
 0xbb7   :  { %6868 = vmatpush1.bf16.msra.mxu0 %v6145_v32  ;;  %7539 = vmatpush3.bf16.msra.mxu1 %v6203_v18  ;;  %v6406_v32 = vld [vmem:[#allocation5 + $0xa78] sm:$0xff]  ;;  %v6236_v18 = vld [vmem:[#allocation5 + $0x528] sm:$0xff] }
 0xbb8   :  { %6869 = vmatprep.subr.bf16.mxu0 %v6153_v60  ;;  %7540 = vmatprep.subr.bf16.mxu1 %v6266_v22  ;;  %v6350_v60 = vld [vmem:[#allocation5 + $0x8b8] sm:$0xff]  ;;  %v6244_v22 = vld [vmem:[#allocation5 + $0x568] sm:$0xff] }
 0xbbb   :  { %6870 = vmatpush1.bf16.msra.mxu0 %v6152_v14  ;;  %7541 = vmatpush3.bf16.msra.mxu1 %v6210_v35  ;;  %v6243_v14 = vld [vmem:[#allocation5 + $0x560] sm:$0xff]  ;;  %v6413_v35 = vld [vmem:[#allocation5 + $0xab0] sm:$0xff] }
 0xbbc   :  { %6871 = vmatprep.subr.bf16.mxu0 %v6160_v1  ;;  %7542 = vmatprep.subr.bf16.mxu1 %v6273_v36  ;;  %v6251_v1 = vld [vmem:[#allocation5 + $0x5a0] sm:$0xff]  ;;  %v6250_v36 = vld [vmem:[#allocation5 + $0x598] sm:$0xff] }
 0xbbf   :  { %6872 = vmatpush1.bf16.msra.mxu0 %v6159_v56  ;;  %7543 = vmatpush3.bf16.msra.mxu1 %v6217_v20  ;;  %v6420_v56 = vld [vmem:[#allocation5 + $0xae8] sm:$0xff]  ;;  %v6258_v20 = vld [vmem:[#allocation5 + $0x5d8] sm:$0xff] }
 0xbc0   :  { %6873 = vmatprep.subr.bf16.mxu0 %v6167_v59  ;;  %7544 = vmatprep.subr.bf16.mxu1 %v6280_v8  ;;  %v6257_v59 = vld [vmem:[#allocation5 + $0x5d0] sm:$0xff]  ;;  %v6427_v8 = vld [vmem:[#allocation5 + $0xb20] sm:$0xff] }
 0xbc3   :  { %6874 = vmatpush1.bf16.msra.mxu0 %v6166_v46  ;;  %7545 = vmatpush3.bf16.msra.mxu1 %v6224_v40  ;;  %v6265_v46 = vld [vmem:[#allocation5 + $0x610] sm:$0xff]  ;;  %v6264_v40 = vld [vmem:[#allocation5 + $0x608] sm:$0xff] }
 0xbc4   :  { %6875 = vmatprep.subr.bf16.mxu0 %v6174_v51  ;;  %7546 = vmatprep.subr.bf16.mxu1 %v6287_v48  ;;  %v6434_v51 = vld [vmem:[#allocation5 + $0xb58] sm:$0xff]  ;;  %v6272_v48 = vld [vmem:[#allocation5 + $0x648] sm:$0xff] }
 0xbc7   :  { %6876 = vmatpush1.bf16.msra.mxu0 %v6173_v15  ;;  %7547 = vmatpush3.bf16.msra.mxu1 %v6231_v7  ;;  %v6271_v15 = vld [vmem:[#allocation5 + $0x640] sm:$0xff]  ;;  %v6441_v7 = vld [vmem:[#allocation5 + $0xb90] sm:$0xff] }
 0xbc8   :  { %6877 = vmatprep.subr.bf16.mxu0 %v6181_v58  ;;  %7548 = vmatprep.subr.bf16.mxu1 %v6294_v38  ;;  %v6279_v58 = vld [vmem:[#allocation5 + $0x680] sm:$0xff]  ;;  %v6278_v38 = vld [vmem:[#allocation5 + $0x678] sm:$0xff] }
 0xbcb   :  { %6878 = vmatpush1.bf16.msra.mxu0 %v6180_v26  ;;  %7549 = vmatpush3.bf16.msra.mxu1 %v6238_v24  ;;  %v6448_v26 = vld [vmem:[#allocation5 + $0xbc8] sm:$0xff]  ;;  %v6286_v24 = vld [vmem:[#allocation5 + $0x6b8] sm:$0xff] }
 0xbcc   :  { %6890 = vmatprep.subr.bf16.mxu0 %v6188_v33  ;;  %7556 = vmatprep.subr.bf16.mxu1 %v6357_v25  ;;  %v6285_v33 = vld [vmem:[#allocation5 + $0x6b0] sm:$0xff]  ;;  %v6455_v25 = vld [vmem:[#allocation5 + $0xc00] sm:$0xff] }
 0xbce   :  { %6880 = vmatmul.mubr.bf16.vlgmr.msra.gmra.mrb[52].mxu0 %v9362_v55  ;;  %7093 = vmatmul.mubr.bf16.vlgmr.msra.gmra.mrb[60].mxu1 %v9378_v37  ;;  %v6315_v55 = vld [vmem:[#allocation5 + $0x7a0] sm:$0xff] }
 0xbcf   :  { %6891 = vmatpush1.bf16.msra.mxu0 %v6187_v44  ;;  %7557 = vmatpush3.bf16.msra.mxu1 %v6301_v16  ;;  %v6293_v44 = vld [vmem:[#allocation5 + $0x6f0] sm:$0xff]  ;;  %v6292_v16 = vld [vmem:[#allocation5 + $0x6e8] sm:$0xff] }
 0xbd0   :  { %6892 = vmatprep.subr.bf16.mxu0 %v6195_v63  ;;  %7558 = vmatprep.subr.bf16.mxu1 %v6364_v43  ;;  %v6462_v63 = vld [vmem:[#allocation5 + $0xc38] sm:$0xff]  ;;  %v6300_v43 = vld [vmem:[#allocation5 + $0x728] sm:$0xff] }
 0xbd1   :  { %7133 = vmatprep.mubr.bf16.mxu1 %v9384_v54  ;;  %6922 = vmatprep.mubr.bf16.mxu0 %v9368_v52  ;;  %v6215_v52 = vld [vmem:[#allocation5 + $0x480] sm:$0xff] }
 0xbd3   :  { %6893 = vmatpush1.bf16.msra.mxu0 %v6194_v62  ;;  %7559 = vmatpush3.bf16.msra.mxu1 %v6308_v45  ;;  %v6299_v62 = vld [vmem:[#allocation5 + $0x720] sm:$0xff] }
 0xbd4   :  { %6894 = vmatprep.subr.bf16.mxu0 %v6202_v31  ;;  %7560 = vmatprep.subr.bf16.mxu1 %v6371_v29  ;;  %v6307_v45 = vld [vmem:[#allocation5 + $0x760] sm:$0xff]  ;;  %v6306_v31 = vld [vmem:[#allocation5 + $0x758] sm:$0xff] }
 0xbd5   :  { %v6314_v29 = vld [vmem:[#allocation5 + $0x798] sm:$0xff] }
 0xbd7   :  { %6895 = vmatpush1.bf16.msra.mxu0 %v6201_v9  ;;  %7561 = vmatpush3.bf16.msra.mxu1 %v6315_v55  ;;  %v6321_v9 = vld [vmem:[#allocation5 + $0x7d0] sm:$0xff]  ;;  %v6320_v55 = vld [vmem:[#allocation5 + $0x7c8] sm:$0xff] }
 0xbd8   :  { %6896 = vmatprep.subr.bf16.mxu0 %v6209_v12  ;;  %7562 = vmatprep.subr.bf16.mxu1 %v6378_v21  ;;  %v6328_v12 = vld [vmem:[#allocation5 + $0x808] sm:$0xff]  ;;  %v6327_v21 = vld [vmem:[#allocation5 + $0x800] sm:$0xff] }
 0xbdb   :  { %6897 = vmatpush1.bf16.msra.mxu0 %v6208_v13  ;;  %7563 = vmatpush3.bf16.msra.mxu1 %v6322_v39  ;;  %v6334_v13 = vld [vmem:[#allocation5 + $0x838] sm:$0xff] }
 0xbdc   :  { %6898 = vmatprep.subr.bf16.mxu0 %v6216_v19  ;;  %7564 = vmatprep.subr.bf16.mxu1 %v6385_v6  ;;  %v6342_v39 = vld [vmem:[#allocation5 + $0x878] sm:$0xff]  ;;  %v6349_v19 = vld [vmem:[#allocation5 + $0x8b0] sm:$0xff]  ;;  %v6348_v6 = vld [vmem:[#allocation5 + $0x8a8] sm:$0xff] }
 0xbdf   :  { %6899 = vmatpush1.bf16.msra.mxu0 %v6215_v52  ;;  %7565 = vmatpush3.bf16.msra.mxu1 %v6329_v3  ;;  %v6356_v52 = vld [vmem:[#allocation5 + $0x8e8] sm:$0xff]  ;;  %v6355_v3 = vld [vmem:[#allocation5 + $0x8e0] sm:$0xff] }
 0xbe0   :  { %6900 = vmatprep.subr.bf16.mxu0 %v6223_v28  ;;  %7566 = vmatprep.subr.bf16.mxu1 %v6392_v11  ;;  %v6363_v28 = vld [vmem:[#allocation5 + $0x920] sm:$0xff]  ;;  %v6362_v11 = vld [vmem:[#allocation5 + $0x918] sm:$0xff] }
 0xbe3   :  { %6901 = vmatpush1.bf16.msra.mxu0 %v6222_v27  ;;  %7567 = vmatpush3.bf16.msra.mxu1 %v6336_v30  ;;  %v6370_v27 = vld [vmem:[#allocation5 + $0x958] sm:$0xff]  ;;  %v6369_v30 = vld [vmem:[#allocation5 + $0x950] sm:$0xff] }
 0xbe4   :  { %6902 = vmatprep.subr.bf16.mxu0 %v6230_v49  ;;  %7568 = vmatprep.subr.bf16.mxu1 %v6399_v47  ;;  %v6377_v49 = vld [vmem:[#allocation5 + $0x990] sm:$0xff]  ;;  %v6376_v47 = vld [vmem:[#allocation5 + $0x988] sm:$0xff] }
 0xbe7   :  { %6903 = vmatpush1.bf16.msra.mxu0 %v6229_v4  ;;  %7569 = vmatpush3.bf16.msra.mxu1 %v6343_v17  ;;  %v6384_v4 = vld [vmem:[#allocation5 + $0x9c8] sm:$0xff]  ;;  %v6383_v17 = vld [vmem:[#allocation5 + $0x9c0] sm:$0xff] }
 0xbe8   :  { %6904 = vmatprep.subr.bf16.mxu0 %v6237_v10  ;;  %7570 = vmatprep.subr.bf16.mxu1 %v6406_v32  ;;  %v6391_v10 = vld [vmem:[#allocation5 + $0xa00] sm:$0xff]  ;;  %v6390_v32 = vld [vmem:[#allocation5 + $0x9f8] sm:$0xff] }
 0xbeb   :  { %6905 = vmatpush1.bf16.msra.mxu0 %v6236_v18  ;;  %7571 = vmatpush3.bf16.msra.mxu1 %v6350_v60  ;;  %v6398_v18 = vld [vmem:[#allocation5 + $0xa38] sm:$0xff]  ;;  %v6397_v60 = vld [vmem:[#allocation5 + $0xa30] sm:$0xff] }
 0xbec   :  { %6906 = vmatprep.subr.bf16.mxu0 %v6244_v22  ;;  %7627 = vmatprep.subr.bf16.mxu1 %v8105_v5  ;;  %v6405_v22 = vld [vmem:[#allocation5 + $0xa70] sm:$0xff] }
 0xbee   :  { %7134 = vmatmul.mubr.bf16.vlgmr.msra.gmra.mrb[64].mxu1 %v9394_v23 }
 0xbef   :  { %6907 = vmatpush1.bf16.msra.mxu0 %v6243_v14  ;;  %7628 = vmatpush3.bf16.msra.mxu1 %v6413_v35  ;;  %v6404_v14 = vld [vmem:[#allocation5 + $0xa68] sm:$0xff] }
 0xbf0   :  { %6908 = vmatprep.subr.bf16.mxu0 %v6251_v1  ;;  %7629 = vmatprep.subr.bf16.mxu1 %v8105_v5  ;;  %v6412_v35 = vld [vmem:[#allocation5 + $0xaa8] sm:$0xff]  ;;  %v6411_v1 = vld [vmem:[#allocation5 + $0xaa0] sm:$0xff] }
 0xbf1   :  { %7643 = vmatprep.mubr.msk.bf16.mxu1 %vm8106_vm1, %v8105_v5 }
 0xbf3   :  { %6909 = vmatpush1.bf16.msra.mxu0 %v6250_v36  ;;  %7630 = vmatpush3.bf16.msra.mxu1 %v6420_v56  ;;  %v6419_v36 = vld [vmem:[#allocation5 + $0xae0] sm:$0xff]  ;;  %v6418_v56 = vld [vmem:[#allocation5 + $0xad8] sm:$0xff] }
 0xbf4   :  { %6910 = vmatprep.subr.bf16.mxu0 %v6258_v20  ;;  %7631 = vmatprep.subr.bf16.mxu1 %v8105_v5  ;;  %v6426_v20 = vld [vmem:[#allocation5 + $0xb18] sm:$0xff] }
 0xbf7   :  { %6911 = vmatpush1.bf16.msra.mxu0 %v6257_v59  ;;  %7632 = vmatpush3.bf16.msra.mxu1 %v6427_v8  ;;  %v6425_v59 = vld [vmem:[#allocation5 + $0xb10] sm:$0xff] }
 0xbf8   :  { %6912 = vmatprep.subr.bf16.mxu0 %v6265_v46  ;;  %7633 = vmatprep.subr.bf16.mxu1 %v8105_v5  ;;  %v6433_v8 = vld [vmem:[#allocation5 + $0xb50] sm:$0xff] }
 0xbf9   :  { %v6464_v46 = vld [vmem:[#allocation12 + $0x43] ss:$8 sm:$0xf] }
 0xbfb   :  { %6913 = vmatpush1.bf16.msra.mxu0 %v6264_v40  ;;  %7634 = vmatpush3.bf16.msra.mxu1 %v6434_v51  ;;  %v6465_v40 = vld [vmem:[#allocation12 + $0x43] ss:$8 sm:$0xf0] }
 0xbfc   :  { %6914 = vmatprep.subr.bf16.mxu0 %v6272_v48  ;;  %7635 = vmatprep.subr.bf16.mxu1 %v8105_v5  ;;  %v6432_v51 = vld [vmem:[#allocation5 + $0xb48] sm:$0xff] }
 0xbfd   :  { %v6440_v48 = vld [vmem:[#allocation5 + $0xb88] sm:$0xff] }
 0xbff   :  { %6915 = vmatpush1.bf16.msra.mxu0 %v6271_v15  ;;  %7636 = vmatpush3.bf16.msra.mxu1 %v6441_v7  ;;  %v9432_v15 = vor.u32 %v6465_v40, %v6464_v46  ;;  %v6447_v7 = vld [vmem:[#allocation5 + $0xbc0] sm:$0xff] }
 0xc00   :  { %6916 = vmatprep.subr.bf16.mxu0 %v6279_v58  ;;  %7637 = vmatprep.subr.bf16.mxu1 %v8105_v5 }
 0xc01   :  { %v6479_v58 = vrot.slane %v9432_v15, %v8256_v50  ;;  %v6487_v40 = vrot.slane %v9432_v15, %v8262_v57 }
 0xc03   :  { %6917 = vmatpush1.bf16.msra.mxu0 %v6278_v38  ;;  %7638 = vmatpush3.bf16.msra.mxu1 %v6448_v26  ;;  %v6475_v38 = vrot.slane %v9432_v15, %v8252_v42  ;;  %v6483_v26 = vrot.slane %v9432_v15, %v8258_v53 }
 0xc04   :  { %6918 = vmatprep.subr.bf16.mxu0 %v6286_v24  ;;  %7639 = vmatprep.subr.bf16.mxu1 %v8105_v5  ;;  %v6446_v24 = vld [vmem:[#allocation5 + $0xbb8] sm:$0xff] }
 0xc07   :  { %6919 = vmatpush1.bf16.msra.mxu0 %v6285_v33  ;;  %7640 = vmatpush3.bf16.msra.mxu1 %v6455_v25 }
 0xc08   :  { %6920 = vmatprep.subr.bf16.mxu0 %v6293_v44  ;;  %7641 = vmatprep.subr.bf16.mxu1 %v8105_v5  ;;  %v6313_v5 = vld [vmem:[#allocation5 + $0x790] sm:$0xff]  ;;  %v6454_v44 = vld [vmem:[#allocation5 + $0xbf8] sm:$0xff] }
 0xc0b   :  { %6921 = vmatpush1.bf16.msra.mxu0 %v6292_v16  ;;  %7642 = vmatpush3.bf16.msra.mxu1 %v6462_v63 }
 0xc0c   :  { %6933 = vmatprep.subr.bf16.mxu0 %v6300_v43 }
 0xc0e   :  { %6923 = vmatmul.mubr.bf16.vlgmr.msra.gmra.mrb[52].mxu0 %v9378_v37  ;;  %7644 = vmatmul.mubr.bf16.vlgmr.msra.gmra.mrb[68].mxu1 %v9404_v34  ;;  %v6335_v37 = vld [vmem:[#allocation5 + $0x840] sm:$0xff] }
 0xc0f   :  { %6934 = vmatpush1.bf16.msra.mxu0 %v6299_v62  ;;  %6965 = vmatprep.mubr.bf16.mxu0 %v9384_v54  ;;  %v6341_v54 = vld [vmem:[#allocation5 + $0x870] sm:$0xff] }
 0xc10   :  { %6935 = vmatprep.subr.bf16.mxu0 %v6307_v45 }
 0xc13   :  { %6936 = vmatpush1.bf16.msra.mxu0 %v6306_v31 }
 0xc14   :  { %6937 = vmatprep.subr.bf16.mxu0 %v6314_v29 }
 0xc17   :  { %6938 = vmatpush1.bf16.msra.mxu0 %v6313_v5 }
 0xc18   :  { %6939 = vmatprep.subr.bf16.mxu0 %v6321_v9  ;;  %v6453_v9 = vld [vmem:[#allocation5 + $0xbf0] sm:$0xff] }
 0xc1b   :  { %6940 = vmatpush1.bf16.msra.mxu0 %v6320_v55 }
 0xc1c   :  { %6941 = vmatprep.subr.bf16.mxu0 %v6328_v12 }
 0xc1f   :  { %6942 = vmatpush1.bf16.msra.mxu0 %v6327_v21  ;;  %v6461_v21 = vld [vmem:[#allocation5 + $0xc30] sm:$0xff] }
 0xc20   :  { %6943 = vmatprep.subr.bf16.mxu0 %v6335_v37  ;;  %v6460_v37 = vld [vmem:[#allocation5 + $0xc28] sm:$0xff] }
 0xc23   :  { %6944 = vmatpush1.bf16.msra.mxu0 %v6334_v13 }
 0xc24   :  { %6945 = vmatprep.subr.bf16.mxu0 %v6342_v39 }
 0xc27   :  { %6946 = vmatpush1.bf16.msra.mxu0 %v6341_v54 }
 0xc28   :  { %6947 = vmatprep.subr.bf16.mxu0 %v6349_v19 }
 0xc2b   :  { %6948 = vmatpush1.bf16.msra.mxu0 %v6348_v6 }
 0xc2c   :  { %6949 = vmatprep.subr.bf16.mxu0 %v6356_v52 }
 0xc2f   :  { %6950 = vmatpush1.bf16.msra.mxu0 %v6355_v3  ;;  %v6495_v3 = vrot.slane %v9432_v15, %v8272_v2 }
 0xc30   :  { %6951 = vmatprep.subr.bf16.mxu0 %v6363_v28 }
 0xc33   :  { %6952 = vmatpush1.bf16.msra.mxu0 %v6362_v11 }
 0xc34   :  { %6953 = vmatprep.subr.bf16.mxu0 %v6370_v27 }
 0xc37   :  { %6954 = vmatpush1.bf16.msra.mxu0 %v6369_v30 }
 0xc38   :  { %6955 = vmatprep.subr.bf16.mxu0 %v6377_v49 }
 0xc3b   :  { %6956 = vmatpush1.bf16.msra.mxu0 %v6376_v47 }
 0xc3c   :  { %6957 = vmatprep.subr.bf16.mxu0 %v6384_v4 }
 0xc3f   :  { %6958 = vmatpush1.bf16.msra.mxu0 %v6383_v17 }
 0xc40   :  { %6959 = vmatprep.subr.bf16.mxu0 %v6391_v10 }
 0xc43   :  { %6960 = vmatpush1.bf16.msra.mxu0 %v6390_v32 }
 0xc44   :  { %6961 = vmatprep.subr.bf16.mxu0 %v6398_v18 }
 0xc47   :  { %6962 = vmatpush1.bf16.msra.mxu0 %v6397_v60 }
 0xc48   :  { %6963 = vmatprep.subr.bf16.mxu0 %v6405_v22 }
 0xc4b   :  { %6964 = vmatpush1.bf16.msra.mxu0 %v6404_v14 }
 0xc4c   :  { %6976 = vmatprep.subr.bf16.mxu0 %v6412_v35 }
 0xc4e   :  { %6966 = vmatmul.mubr.bf16.vlgmr.msra.gmra.mrb[52].mxu0 %v9394_v23  ;;  %v6439_v23 = vld [vmem:[#allocation5 + $0xb80] sm:$0xff] }
 0xc4f   :  { %6977 = vmatpush1.bf16.msra.mxu0 %v6411_v1  ;;  %7008 = vmatprep.mubr.bf16.mxu0 %v8087_v0  ;;  %v6471_v0 = vrot.slane %v9432_v15, %v8250_v41 }
 0xc50   :  { %6978 = vmatprep.subr.bf16.mxu0 %v6419_v36 }
 0xc53   :  { %6979 = vmatpush1.bf16.msra.mxu0 %v6418_v56 }
 0xc54   :  { %6980 = vmatprep.subr.bf16.mxu0 %v6426_v20 }
 0xc57   :  { %6981 = vmatpush1.bf16.msra.mxu0 %v6425_v59 }
 0xc58   :  { %6982 = vmatprep.subr.bf16.mxu0 %v6433_v8 }
 0xc5b   :  { %6983 = vmatpush1.bf16.msra.mxu0 %v6432_v51  ;;  %v6491_v51 = vrot.slane %v9432_v15, %v8266_v61 }
 0xc5c   :  { %6984 = vmatprep.subr.bf16.mxu0 %v6440_v48 }
 0xc5f   :  { %6985 = vmatpush1.bf16.msra.mxu0 %v6439_v23 }
 0xc60   :  { %6986 = vmatprep.subr.bf16.mxu0 %v6447_v7 }
 0xc61   :  { %v6666_v33 = vpop.f32.mrb[48].mxu0  ;;  %v6838_v25 = vpop.f32.mrb[52].mxu1 }
 0xc62   :  { %v7671_v16 = vadd.f32 %v6666_v33, %v6471_v0  ;;  %v7675_v63 = vadd.f32 %v6838_v25, %v6479_v58  ;;  %v6668_v43 = vpop.f32.mrb[49].mxu0  ;;  %v6840_v62 = vpop.f32.mrb[53].mxu1 }
 0xc63   :  { %v7672_v41 = vadd.f32 %v6668_v43, %v6475_v38  ;;  %v7676_v45 = vadd.f32 %v6840_v62, %v6483_v26  ;;  %v6670_v31 = vpop.f32.mrb[50].mxu0  ;;  %v6842_v50 = vpop.f32.mrb[54].mxu1  ;;  %6987 = vmatpush1.bf16.msra.mxu0 %v6446_v24 }
 0xc64   :  { %7183 = vst [vmem:[#allocation13] sm:$0xff] %v7671_v16  ;;  %7185 = vst [vmem:[#allocation13 + $0x10] sm:$0xff] %v7675_v63  ;;  %v7673_v42 = vadd.f32 %v6670_v31, %v6471_v0  ;;  %v7677_v29 = vadd.f32 %v6842_v50, %v6479_v58  ;;  %v6672_v5 = vpop.f32.mrb[51].mxu0  ;;  %v6844_v53 = vpop.f32.mrb[55].mxu1  ;;  %6988 = vmatprep.subr.bf16.mxu0 %v6454_v44 }
 0xc65   :  { %7184 = vst [vmem:[#allocation13 + $0x8] sm:$0xff] %v7672_v41  ;;  %7186 = vst [vmem:[#allocation13 + $0x18] sm:$0xff] %v7676_v45  ;;  %v7674_v55 = vadd.f32 %v6672_v5, %v6475_v38  ;;  %v7678_v12 = vadd.f32 %v6844_v53, %v6483_v26 }
 0xc66   :  { %7190 = vst [vmem:[#allocation13 + $0x38] sm:$0xff] %v7673_v42  ;;  %7192 = vst [vmem:[#allocation13 + $0x48] sm:$0xff] %v7677_v29 }
 0xc67   :  { %7191 = vst [vmem:[#allocation13 + $0x40] sm:$0xff] %v7674_v55  ;;  %7193 = vst [vmem:[#allocation13 + $0x50] sm:$0xff] %v7678_v12  ;;  %6989 = vmatpush1.bf16.msra.mxu0 %v6453_v9 }
 0xc68   :  { %6990 = vmatprep.subr.bf16.mxu0 %v6461_v21 }
 0xc6b   :  { %6991 = vmatpush1.bf16.msra.mxu0 %v6460_v37 }
 0xc6e   :  { %7009 = vmatmul.mubr.bf16.vlgmr.msra.gmra.mrb[52].mxu0 %v9404_v34 }
 0xc81   :  { %v7528_v13 = vpop.f32.mrb[56].mxu1 }
 0xc82   :  { %v7529_v39 = vpop.f32.mrb[57].mxu1 }
 0xc83   :  { %v7530_v54 = vadd.f32 %v7529_v39, %v7528_v13  ;;  %v7531_v19 = vpop.f32.mrb[58].mxu1 }
 0xc84   :  { %v7532_v6 = vpop.f32.mrb[59].mxu1 }
 0xc85   :  { %v7533_v52 = vadd.f32 %v7532_v6, %v7531_v19  ;;  %v7054_v28 = vadd.f32 %v7530_v54, %v6495_v3 }
 0xc87   :  { %v7057_v30 = vadd.f32 %v7533_v52, %v6495_v3 }
 0xca1   :  { %v7550_v11 = vpop.f32.mrb[60].mxu1 }
 0xca2   :  { %v7551_v27 = vpop.f32.mrb[61].mxu1 }
 0xca3   :  { %v7552_v49 = vadd.f32 %v7551_v27, %v7550_v11  ;;  %v7553_v47 = vpop.f32.mrb[62].mxu1 }
 0xca4   :  { %v7554_v4 = vpop.f32.mrb[63].mxu1 }
 0xca5   :  { %v7095_v17 = vadd.f32 %v7552_v49, %v7054_v28  ;;  %v7555_v10 = vadd.f32 %v7554_v4, %v7553_v47 }
 0xca7   :  { %v7098_v32 = vadd.f32 %v7555_v10, %v7057_v30 }
 0xcc1   :  { %v7572_v34 = vpop.f32.mrb[64].mxu1 }
 0xcc2   :  { %v7573_v18 = vpop.f32.mrb[65].mxu1 }
 0xcc3   :  { %v7574_v60 = vadd.f32 %v7573_v18, %v7572_v34  ;;  %v7575_v22 = vpop.f32.mrb[66].mxu1 }
 0xcc4   :  { %v7576_v14 = vpop.f32.mrb[67].mxu1 }
 0xcc5   :  { %v7577_v35 = vadd.f32 %v7576_v14, %v7575_v22  ;;  %v7136_v1 = vadd.f32 %v7574_v60, %v7095_v17 }
 0xcc7   :  { %v7139_v36 = vadd.f32 %v7577_v35, %v7098_v32 }
 0xce1   :  { %v7176_v56 = vpop.f32.mrb[68].mxu1 }
 0xce2   :  { %v7177_v2 = vadd.f32 %v7176_v56, %v7136_v1  ;;  %v7645_v20 = vpop.f32.mrb[69].mxu1 }
 0xce3   :  { %v7179_v59 = vpop.f32.mrb[70].mxu1 }
 0xce4   :  { %7189 = vst [vmem:[#allocation13 + $0x30] sm:$0xff] %v7177_v2  ;;  %v7180_v8 = vadd.f32 %v7179_v59, %v7139_v36  ;;  %v7646_v46 = vpop.f32.mrb[71].mxu1 }
 0xce6   :  { %7196 = vst [vmem:[#allocation13 + $0x68] sm:$0xff] %v7180_v8 }
 0xd41   :  { %v7010_v48 = vpop.f32.mrb[52].mxu0 }
 0xd42   :  { %v7679_v23 = vadd.f32 %v7010_v48, %v6487_v40  ;;  %v7012_v7 = vpop.f32.mrb[53].mxu0 }
 0xd43   :  { %v7680_v0 = vadd.f32 %v7012_v7, %v6491_v51  ;;  %v7014_v58 = vpop.f32.mrb[54].mxu0 }
 0xd44   :  { %7187 = vst [vmem:[#allocation13 + $0x20] sm:$0xff] %v7679_v23  ;;  %v7681_v38 = vadd.f32 %v7014_v58, %v6487_v40  ;;  %v7016_v26 = vpop.f32.mrb[55].mxu0 }
 0xd45   :  { %7188 = vst [vmem:[#allocation13 + $0x28] sm:$0xff] %v7680_v0  ;;  %v7682_v24 = vadd.f32 %v7016_v26, %v6491_v51 }
 0xd46   :  { %7194 = vst [vmem:[#allocation13 + $0x58] sm:$0xff] %v7681_v38 }
 0xd47   :  { %7195 = vst [vmem:[#allocation13 + $0x60] sm:$0xff] %v7682_v24 }
 0xd48   :  { %8052 = shalt.err (!%p8049_p0)
}
 0xd49   :  { %s8053_s24 = scalar_lea.hbm %s9470_s7, 1792 }
 0xd4a   :  { %p8054_p1 = scmp.ne.s32.totalorder %s9470_s7, %s8053_s24  ;;  %p8057_p2 = scmp.lt.u32.totalorder %s8053_s24, %s9470_s7 }
 0xd4c   :  { %p8059_p3 = pnand %p8057_p2, %p8054_p1 }
 0xd4e   :  { %8062 = shalt.err (!%p8059_p3)
}
 0xd4f   :  { %s8108_s30 = smov 56  }
 0xd50   :  { %7208 = dma.vmem_to_hbm [thread:$0]  %s7203_s1, 1792, %s9470_s7, [#allocation9], %s8086_s19, %s8086_s19, %s8108_s30  }
 0xd51   :  { %8075 = dma.done.wait [#allocation9], 1792  }
 0xd52   :  { %8076 = vsyncadd [#allocation9], 4294965504 }
 0xd53   :  { %7212 = vsyncpa [#allocation8], 1 }
 0xd54   :  { %7213 = vsyncpa [#allocation11], 1 }
 0xd55   :  { %7214 = vsyncpa [#allocation9], 1 }
 0xd56   :  { %7215 = vsyncmov [#allocation6] }
 0xd59   :  { %s7216_s3 = vpop.sfrf %7215 }
 0xd5a   :  { %p7270_p4 = scmp.ne.s32.totalorder %s7216_s3, 0 }
 0xd5c   :  { %7220 = shalt.err (%p7270_p4)  }
 0xd5d   :  { %7222 = vsyncmov [#allocation6 + $0x1] }
 0xd60   :  { %s7223_s10 = vpop.sfrf %7222 }
 0xd61   :  { %p7271_p5 = scmp.ne.s32.totalorder %s7223_s10, 0 }
 0xd63   :  { %7227 = shalt.err (%p7271_p5)  }
 0xd64   :  { %7229 = vsyncmov [#allocation6 + $0x2] }
 0xd67   :  { %s7230_s11 = vpop.sfrf %7229 }
 0xd68   :  { %p7272_p6 = scmp.ne.s32.totalorder %s7230_s11, 0 }
 0xd6a   :  { %7234 = shalt.err (%p7272_p6)  }
 0xd6b   :  { %7236 = vsyncmov [#allocation6 + $0x3] }
 0xd6e   :  { %s7237_s12 = vpop.sfrf %7236 }
 0xd6f   :  { %p7273_p7 = scmp.ne.s32.totalorder %s7237_s12, 0 }
 0xd71   :  { %7241 = shalt.err (%p7273_p7)  }

</bundles_post_ra>
